<compile_context>
chip_gen: v5e
topology: v5e:2x2
jax: 0.10.0
libtpu: 0.0.40
codegen_flags: <defaults>
</compile_context>

<pallas_src>
import functools
import math

import jax
import jax.numpy as jnp
from jax.experimental import pallas as pl
from jax.experimental.pallas import tpu as pltpu

FRAME_SKIP = 4
N_ACTION = 6
EPS = 1e-5
VMEM_LIMIT = 32 * 1024 * 1024      # safe on v5e/v6e/v7x
MAX_TILE_M = 1024                  # row tile upper bound (multiple of 16)


# ---------------------------------------------------------------------------
# Row tiling plan
# ---------------------------------------------------------------------------
def _round_up(x, m):
    return (x + m - 1) // m * m


def _row_plan(m, max_tile=MAX_TILE_M):
    """Return (tile_m, grid_m); tile_m is a multiple of 16 (bf16 packing)."""
    if m <= max_tile:
        return _round_up(m, 16), 1
    for t in range(max_tile, 127, -16):      # prefer an exact tiling
        if m % t == 0:
            return t, m // t
    return max_tile, pl.cdiv(m, max_tile)


def _pad_rows(x, mp):
    return x if x.shape[0] == mp else jnp.pad(x, ((0, mp - x.shape[0]), (0, 0)))


# ---------------------------------------------------------------------------
# Pallas kernels
# ---------------------------------------------------------------------------
def fused_matmul_bn_relu_kernel(x_ref, w_ref, o_ref, *, inv_m):
    """Single-tile layer: o = relu(batchnorm_train(x @ w)), bf16 out.

    Padded zero rows contribute nothing to the sums; inv_m = 1 / true_M.
    """
    y = jnp.dot(x_ref[...], w_ref[...], preferred_element_type=jnp.float32)
    s1 = jnp.sum(y, axis=0, keepdims=True)
    s2 = jnp.sum(y * y, axis=0, keepdims=True)
    mean = s1 * inv_m
    var = jnp.maximum(s2 * inv_m - mean * mean, 0.0)   # biased (train-mode BN)
    rstd = jax.lax.rsqrt(var + EPS)
    o_ref[...] = jnp.maximum((y - mean) * rstd, 0.0).astype(o_ref.dtype)


def fused_fc_head_kernel(x_ref, w1_ref, w2_ref, b2_ref, o_ref, *, inv_m):
    """Single-tile fc tail: softmax(relu(bn4(x @ w1)) @ w2 + b2, axis=1).

    w2/b2 are padded to 128 output lanes with -1e30 bias on the padding, so
    the softmax over 128 lanes equals the softmax over the real actions.
    """
    y = jnp.dot(x_ref[...], w1_ref[...], preferred_element_type=jnp.float32)
    s1 = jnp.sum(y, axis=0, keepdims=True)
    s2 = jnp.sum(y * y, axis=0, keepdims=True)
    mean = s1 * inv_m
    var = jnp.maximum(s2 * inv_m - mean * mean, 0.0)
    rstd = jax.lax.rsqrt(var + EPS)
    h = jnp.maximum((y - mean) * rstd, 0.0).astype(jnp.bfloat16)
    logits = jnp.dot(h, w2_ref[...], preferred_element_type=jnp.float32) + b2_ref[...]
    m = jnp.max(logits, axis=1, keepdims=True)
    e = jnp.exp(logits - m)
    o_ref[...] = e / jnp.sum(e, axis=1, keepdims=True)


def matmul_partial_stats_kernel(x_ref, w_ref, y_ref, ps_ref):
    """Two-pass fallback, pass 1: y = x @ w (bf16 out) + per-tile partial
    (sum, sumsq) written as ONE full (2, O) block.  No cross-tile dependency,
    so the grid axis is 'parallel' (shards across v7x TensorCores)."""
    y = jnp.dot(x_ref[...], w_ref[...], preferred_element_type=jnp.float32)
    y_ref[...] = y.astype(y_ref.dtype)
    s1 = jnp.sum(y, axis=0, keepdims=True)
    s2 = jnp.sum(y * y, axis=0, keepdims=True)
    ps_ref[...] = jnp.concatenate([s1, s2], axis=0)


def bn_relu_kernel(y_ref, st_ref, o_ref):
    """Two-pass fallback, pass 2: o = relu((y - mean) * rstd), lane-dense view.

    st_ref is (2, width): row 0 = mean, row 1 = rstd, pre-tiled to the block's
    lane width so the whole pass is full-width loads/stores."""
    yv = y_ref[...].astype(jnp.float32)
    o_ref[...] = jnp.maximum((yv - st_ref[0:1, :]) * st_ref[1:2, :], 0.0).astype(o_ref.dtype)


def mm_bias_softmax_kernel(x_ref, w_ref, b_ref, o_ref):
    """Row-tiled softmax(x @ w + b, axis=1); w/b padded to 128 lanes."""
    logits = jnp.dot(x_ref[...], w_ref[...], preferred_element_type=jnp.float32)
    logits = logits + b_ref[...]
    m = jnp.max(logits, axis=1, keepdims=True)
    e = jnp.exp(logits - m)
    o_ref[...] = e / jnp.sum(e, axis=1, keepdims=True)


# ---------------------------------------------------------------------------
# Pallas wrappers
# ---------------------------------------------------------------------------
def matmul_bn_relu(x, w):
    """relu(batchnorm_train(x @ w)).  x:(M,K) bf16, w:(K,O) bf16 -> (M,O) bf16."""
    M, K = x.shape
    O = w.shape[1]
    tm, gm = _row_plan(M)
    Mp = tm * gm
    xp = _pad_rows(x, Mp)            # zero rows: no effect on the BN stats

    if gm == 1:
        # Whole layer fits one row tile: fully fused, no HBM intermediate.
        out = pl.pallas_call(
            functools.partial(fused_matmul_bn_relu_kernel, inv_m=1.0 / M),
            out_shape=jax.ShapeDtypeStruct((Mp, O), jnp.bfloat16),
            grid=(1,),
            in_specs=[pl.BlockSpec((Mp, K), lambda i: (0, 0)),
                      pl.BlockSpec((K, O), lambda i: (0, 0))],
            out_specs=pl.BlockSpec((Mp, O), lambda i: (0, 0)),
            compiler_params=pltpu.CompilerParams(
                dimension_semantics=("arbitrary",),
                vmem_limit_bytes=VMEM_LIMIT),
        )(xp, w)
        return out[:M]

    # ---- two-pass fallback: parallel partial stats + lane-dense BN/ReLU ----
    y, pstats = pl.pallas_call(
        matmul_partial_stats_kernel,
        out_shape=(jax.ShapeDtypeStruct((Mp, O), jnp.bfloat16),
                   jax.ShapeDtypeStruct((gm, 2, O), jnp.float32)),
        grid=(gm,),
        in_specs=[pl.BlockSpec((tm, K), lambda i: (i, 0)),
                  pl.BlockSpec((K, O), lambda i: (0, 0))],
        out_specs=(pl.BlockSpec((tm, O), lambda i: (i, 0)),
                   pl.BlockSpec((None, 2, O), lambda i: (i, 0, 0))),
        compiler_params=pltpu.CompilerParams(
            dimension_semantics=("parallel",),
            vmem_limit_bytes=VMEM_LIMIT),
    )(xp, w)

    # Tiny finalize (<= 2*512 floats) outside the kernel.
    psum = jnp.sum(pstats, axis=0)                       # (2, O)
    mean = psum[0] * (1.0 / M)
    var = jnp.maximum(psum[1] * (1.0 / M) - mean * mean, 0.0)
    rstd = jax.lax.rsqrt(var + EPS)

    if O < 128 and 128 % O == 0 and (Mp * O) % 128 == 0:
        # Lane-dense view: each 128-wide row holds 128/O logical rows.
        reps = 128 // O
        stats = jnp.stack([jnp.tile(mean, reps), jnp.tile(rstd, reps)], axis=0)
        y2 = y.reshape(Mp * O // 128, 128)
    else:
        stats = jnp.stack([mean, rstd], axis=0)
        y2 = y
    R, L = y2.shape
    tr, gr = _row_plan(R)
    Rp = tr * gr
    y2 = _pad_rows(y2, Rp)

    o2 = pl.pallas_call(
        bn_relu_kernel,
        out_shape=jax.ShapeDtypeStruct((Rp, L), jnp.bfloat16),
        grid=(gr,),
        in_specs=[pl.BlockSpec((tr, L), lambda i: (i, 0)),
                  pl.BlockSpec((2, L), lambda i: (0, 0))],
        out_specs=pl.BlockSpec((tr, L), lambda i: (i, 0)),
        compiler_params=pltpu.CompilerParams(
            dimension_semantics=("parallel",),
            vmem_limit_bytes=VMEM_LIMIT),
    )(y2, stats)
    return o2[:R].reshape(Mp, O)[:M]


def matmul_bias_softmax(x, w, b):
    """softmax(x @ w + b, axis=1), row-tiled.  w/b padded to 128 lanes."""
    M, K = x.shape
    A = w.shape[1]
    tm, gm = _row_plan(M)
    Mp = tm * gm
    xp = _pad_rows(x, Mp)
    out = pl.pallas_call(
        mm_bias_softmax_kernel,
        out_shape=jax.ShapeDtypeStruct((Mp, A), jnp.float32),
        grid=(gm,),
        in_specs=[pl.BlockSpec((tm, K), lambda i: (i, 0)),
                  pl.BlockSpec((K, A), lambda i: (0, 0)),
                  pl.BlockSpec((1, A), lambda i: (0, 0))],
        out_specs=pl.BlockSpec((tm, A), lambda i: (i, 0)),
        compiler_params=pltpu.CompilerParams(
            dimension_semantics=("parallel",),
            vmem_limit_bytes=VMEM_LIMIT),
    )(xp, w, b)
    return out[:M]


def fc_head(x, w1, w2, b2, n_action):
    """softmax(fc2(relu(bn4(fc1(x)))), dim=1), sliced to n_action columns."""
    M, K = x.shape
    A = w2.shape[1]
    tm, gm = _row_plan(M)
    Mp = tm * gm
    if gm == 1:
        xp = _pad_rows(x, Mp)
        out = pl.pallas_call(
            functools.partial(fused_fc_head_kernel, inv_m=1.0 / M),
            out_shape=jax.ShapeDtypeStruct((Mp, A), jnp.float32),
            grid=(1,),
            in_specs=[pl.BlockSpec((Mp, K), lambda i: (0, 0)),
                      pl.BlockSpec((K, w1.shape[1]), lambda i: (0, 0)),
                      pl.BlockSpec((w1.shape[1], A), lambda i: (0, 0)),
                      pl.BlockSpec((1, A), lambda i: (0, 0))],
            out_specs=pl.BlockSpec((Mp, A), lambda i: (0, 0)),
            compiler_params=pltpu.CompilerParams(
                dimension_semantics=("arbitrary",),
                vmem_limit_bytes=VMEM_LIMIT),
        )(xp, w1, w2, b2)
        return out[:M, :n_action]
    # Very large batch: fc1+bn4+relu (two-pass) then fc2+softmax, row-tiled.
    h = matmul_bn_relu(x, w1)
    return matmul_bias_softmax(h, w2, b2)[:, :n_action]


# ---------------------------------------------------------------------------
# Glue: NHWC im2col (plain slicing/stack; see TODO at top re: in-kernel fusion)
# ---------------------------------------------------------------------------
def conv_bn_relu(x, w_mat, k, s):
    """x: (N, H, W, C) bf16 -> (N, Ho, Wo, O) bf16.

    VALID conv (via im2col) + BatchNorm2d(train, affine=False) + ReLU.
    w_mat: (k*k*C, O) bf16 with rows ordered (kh, kw, c).
    """
    N, H, W, C = x.shape
    Ho = (H - k) // s + 1
    Wo = (W - k) // s + 1
    cols = [x[:, i:i + s * Ho:s, j:j + s * Wo:s, :]
            for i in range(k) for j in range(k)]          # each (N, Ho, Wo, C)
    p = jnp.stack(cols, axis=3)                           # (N, Ho, Wo, k*k, C)
    patches = p.reshape(N * Ho * Wo, k * k * C)           # bf16
    y = matmul_bn_relu(patches, w_mat)                    # (N*Ho*Wo, O) bf16
    return y.reshape(N, Ho, Wo, w_mat.shape[1])           # stays NHWC


# ---------------------------------------------------------------------------
# Parameters: PyTorch-layout init + one-time matmul-ready preparation
# ---------------------------------------------------------------------------
def init_params(key, n_action=N_ACTION):
    """Matches _initialize_weights semantics (PyTorch layouts)."""
    ks = jax.random.split(key, 5)

    def conv_w(k_, out_c, in_c, ksz):
        n = ksz * ksz * out_c
        return jax.random.normal(k_, (out_c, in_c, ksz, ksz), jnp.float32) * math.sqrt(2.0 / n)

    return {
        "conv1_w": conv_w(ks[0], 32, FRAME_SKIP, 8),
        "conv1_b": jnp.zeros((32,), jnp.float32),
        "conv2_w": conv_w(ks[1], 64, 32, 4),
        "conv2_b": jnp.zeros((64,), jnp.float32),
        "conv3_w": conv_w(ks[2], 64, 64, 3),
        "conv3_b": jnp.zeros((64,), jnp.float32),
        "fc1_w": jax.random.normal(ks[3], (512, 7 * 7 * 64), jnp.float32) * 0.01,
        "fc1_b": jnp.zeros((512,), jnp.float32),
        "fc2_w": jax.random.normal(ks[4], (n_action, 512), jnp.float32) * 0.01,
        "fc2_b": jnp.zeros((n_action,), jnp.float32),
    }


def prepare_params(params, n_action=N_ACTION):
    """One-time layout prep (outside the forward path):
      * conv weights (O,C,kh,kw) -> (kh*kw*C, O) bf16 (matches NHWC patches)
      * fc1 weight column-permuted from torch's (C,H,W) flatten to our (H,W,C)
        flatten, then transposed to (3136, 512) bf16
      * fc2 padded to 128 output lanes: zero weight columns, -1e30 bias on the
        padding (softmax of the real actions is unchanged); bias kept f32
      * conv/fc1 biases dropped: a per-channel bias before affine-free,
        train-mode BatchNorm is exactly cancelled by the mean subtraction.
    """
    def conv_mat(w):
        o, c, k, _ = w.shape
        return w.transpose(2, 3, 1, 0).reshape(k * k * c, o).astype(jnp.bfloat16)

    fc1 = params["fc1_w"].reshape(512, 64, 7, 7).transpose(0, 2, 3, 1)
    fc1 = fc1.reshape(512, 7 * 7 * 64).T.astype(jnp.bfloat16)       # (3136, 512)

    a_pad = _round_up(n_action, 128)
    w2 = jnp.zeros((512, a_pad), jnp.float32).at[:, :n_action].set(params["fc2_w"].T)
    b2 = jnp.full((1, a_pad), -1e30, jnp.float32).at[0, :n_action].set(params["fc2_b"])

    return {
        "conv1_w": conv_mat(params["conv1_w"]),
        "conv2_w": conv_mat(params["conv2_w"]),
        "conv3_w": conv_mat(params["conv3_w"]),
        "fc1_w": fc1,
        "fc2_w": w2.astype(jnp.bfloat16),                           # (512, 128)
        "fc2_b": b2,                                                # (1, 128) f32
    }


# ---------------------------------------------------------------------------
# ESNet.forward (status == 'bn')
# ---------------------------------------------------------------------------
def esnet_forward(prep, x, n_action=N_ACTION):
    # x: (N, 4, 84, 84) f32 (PyTorch NCHW input); go NHWC + bf16 once.
    x = jnp.transpose(x, (0, 2, 3, 1)).astype(jnp.bfloat16)         # (N,84,84,4)
    x = conv_bn_relu(x, prep["conv1_w"], k=8, s=4)                  # (N,20,20,32)
    x = conv_bn_relu(x, prep["conv2_w"], k=4, s=2)                  # (N, 9, 9,64)
    x = conv_bn_relu(x, prep["conv3_w"], k=3, s=1)                  # (N, 7, 7,64)
    n = x.shape[0]
    x = x.reshape(n, 7 * 7 * 64)                                    # (H,W,C) flatten
    return fc_head(x, prep["fc1_w"], prep["fc2_w"], prep["fc2_b"], n_action)


if __name__ == "__main__":
    key = jax.random.PRNGKey(0)
    k_param, k_x, k_a, k_b = jax.random.split(key, 4)

    params = init_params(k_param)
    prep = prepare_params(params)

    # Spatial dims must be 84x84 (conv arithmetic implies the 7*7*64 flatten).
    x = jax.random.normal(k_x, (2, FRAME_SKIP, 84, 84), jnp.float32)

    fwd = jax.jit(esnet_forward)
    out = jax.block_until_ready(fwd(prep, x))
    assert out.shape == (2, N_ACTION)
    assert bool(jnp.all(jnp.isfinite(out)))
    assert bool(jnp.allclose(jnp.sum(out, axis=1), 1.0, atol=1e-4))

    # Also exercise + verify the large-batch two-pass fallback (parallel
    # partial stats + lane-dense BN/ReLU) against a pure-jnp reference.
    xs = jax.random.normal(k_a, (2048, 256), jnp.float32).astype(jnp.bfloat16)
    ws = (0.05 * jax.random.normal(k_b, (256, 64), jnp.float32)).astype(jnp.bfloat16)
    got = jax.block_until_ready(jax.jit(matmul_bn_relu)(xs, ws)).astype(jnp.float32)
    yr = jnp.dot(xs.astype(jnp.float32), ws.astype(jnp.float32))
    mu = jnp.mean(yr, axis=0)
    vr = jnp.mean((yr - mu) ** 2, axis=0)
    ref = jnp.maximum((yr - mu) * jax.lax.rsqrt(vr + EPS), 0.0)
    assert got.shape == ref.shape
    assert bool(jnp.max(jnp.abs(got - ref)) < 1e-1)

    print("KERNEL_OK")
</pallas_src>

<mosaic_0001>
module attributes {stable_mosaic.version = 11 : i64} {
  func.func @fused_matmul_bn_relu_kernel(%arg0: i32, %arg1: memref<800x256xbf16, #tpu.memory_space<vmem>>, %arg2: memref<256x32xbf16, #tpu.memory_space<vmem>>, %arg3: memref<800x32xbf16, #tpu.memory_space<vmem>>) attributes {dimension_semantics = [#tpu.dimension_semantics<arbitrary>], iteration_bounds = array<i64: 1>, scalar_prefetch = 0 : i64, scratch_operands = 0 : i64, tpu.core_type = #tpu.core_type<tc>, window_params = [{pipeline_mode = #tpu.pipeline_mode<synchronous>, transform_indices = @transform_0, window_bounds = array<i64: 800, 256>}, {pipeline_mode = #tpu.pipeline_mode<synchronous>, transform_indices = @transform_1, window_bounds = array<i64: 256, 32>}, {pipeline_mode = #tpu.pipeline_mode<synchronous>, transform_indices = @transform_2, window_bounds = array<i64: 800, 32>}]} {
    %c0 = arith.constant 0 : index
    %c0_0 = arith.constant 0 : index
    %0 = vector.load %arg1[%c0, %c0_0] : memref<800x256xbf16, #tpu.memory_space<vmem>>, vector<800x256xbf16>
    %c0_1 = arith.constant 0 : index
    %c0_2 = arith.constant 0 : index
    %1 = vector.load %arg2[%c0_1, %c0_2] : memref<256x32xbf16, #tpu.memory_space<vmem>>, vector<256x32xbf16>
    %cst = arith.constant dense<0.000000e+00> : vector<800x32xf32>
    %2 = tpu.matmul %0, %1, %cst {dimension_numbers = #tpu.dot_dimension_numbers<[1], [0], [0], [1], [0, 0, 1, 1], [], []>} : vector<800x256xbf16>, vector<256x32xbf16>, vector<800x32xf32> -> vector<800x32xf32>
    %cst_3 = arith.constant dense<0.000000e+00> : vector<32xf32>
    %3 = vector.multi_reduction <add>, %2, %cst_3 [0] : vector<800x32xf32> to vector<32xf32>
    %4 = vector.shape_cast %3 : vector<32xf32> to vector<1x32xf32>
    %5 = arith.mulf %2, %2 : vector<800x32xf32>
    %cst_4 = arith.constant dense<0.000000e+00> : vector<32xf32>
    %6 = vector.multi_reduction <add>, %5, %cst_4 [0] : vector<800x32xf32> to vector<32xf32>
    %7 = vector.shape_cast %6 : vector<32xf32> to vector<1x32xf32>
    %cst_5 = arith.constant 1.250000e-03 : f32
    %8 = vector.broadcast %cst_5 : f32 to vector<1x32xf32>
    %9 = arith.mulf %4, %8 : vector<1x32xf32>
    %cst_6 = arith.constant 1.250000e-03 : f32
    %10 = vector.broadcast %cst_6 : f32 to vector<1x32xf32>
    %11 = arith.mulf %7, %10 : vector<1x32xf32>
    %12 = arith.mulf %9, %9 : vector<1x32xf32>
    %13 = arith.subf %11, %12 : vector<1x32xf32>
    %cst_7 = arith.constant 0.000000e+00 : f32
    %14 = vector.broadcast %cst_7 : f32 to vector<1x32xf32>
    %15 = arith.maximumf %13, %14 : vector<1x32xf32>
    %cst_8 = arith.constant 9.99999974E-6 : f32
    %16 = vector.broadcast %cst_8 : f32 to vector<1x32xf32>
    %17 = arith.addf %15, %16 : vector<1x32xf32>
    %18 = math.rsqrt %17 : vector<1x32xf32>
    %19 = vector.broadcast %9 : vector<1x32xf32> to vector<800x32xf32>
    %20 = arith.subf %2, %19 : vector<800x32xf32>
    %21 = vector.broadcast %18 : vector<1x32xf32> to vector<800x32xf32>
    %22 = arith.mulf %20, %21 : vector<800x32xf32>
    %cst_9 = arith.constant 0.000000e+00 : f32
    %23 = vector.broadcast %cst_9 : f32 to vector<800x32xf32>
    %24 = arith.maximumf %22, %23 : vector<800x32xf32>
    %25 = arith.truncf %24 : vector<800x32xf32> to vector<800x32xbf16>
    %c0_10 = arith.constant 0 : index
    %c0_11 = arith.constant 0 : index
    %26 = vector.load %arg3[%c0_10, %c0_11] : memref<800x32xbf16, #tpu.memory_space<vmem>>, vector<800x32xbf16>
    tpu.vector_store %arg3[%c0_10, %c0_11], %25 {strides = array<i32>} : memref<800x32xbf16, #tpu.memory_space<vmem>>, vector<800x32xbf16>,
    return
  }
  func.func @transform_0(%arg0: i32) -> (i32, i32) {
    %c0_i32 = arith.constant 0 : i32
    %c0_i32_0 = arith.constant 0 : i32
    %c0_i32_1 = arith.constant 0 : i32
    return %c0_i32, %c0_i32_0 : i32, i32
  }
  func.func @transform_1(%arg0: i32) -> (i32, i32) {
    %c0_i32 = arith.constant 0 : i32
    %c0_i32_0 = arith.constant 0 : i32
    %c0_i32_1 = arith.constant 0 : i32
    return %c0_i32, %c0_i32_0 : i32, i32
  }
  func.func @transform_2(%arg0: i32) -> (i32, i32) {
    %c0_i32 = arith.constant 0 : i32
    %c0_i32_0 = arith.constant 0 : i32
    %c0_i32_1 = arith.constant 0 : i32
    return %c0_i32, %c0_i32_0 : i32, i32
  }
}

module attributes {stable_mosaic.version = 11 : i64} {
  func.func @fused_matmul_bn_relu_kernel(%arg0: i32, %arg1: memref<176x512xbf16, #tpu.memory_space<vmem>>, %arg2: memref<512x64xbf16, #tpu.memory_space<vmem>>, %arg3: memref<176x64xbf16, #tpu.memory_space<vmem>>) attributes {dimension_semantics = [#tpu.dimension_semantics<arbitrary>], iteration_bounds = array<i64: 1>, scalar_prefetch = 0 : i64, scratch_operands = 0 : i64, tpu.core_type = #tpu.core_type<tc>, window_params = [{pipeline_mode = #tpu.pipeline_mode<synchronous>, transform_indices = @transform_0, window_bounds = array<i64: 176, 512>}, {pipeline_mode = #tpu.pipeline_mode<synchronous>, transform_indices = @transform_1, window_bounds = array<i64: 512, 64>}, {pipeline_mode = #tpu.pipeline_mode<synchronous>, transform_indices = @transform_2, window_bounds = array<i64: 176, 64>}]} {
    %c0 = arith.constant 0 : index
    %c0_0 = arith.constant 0 : index
    %0 = vector.load %arg1[%c0, %c0_0] : memref<176x512xbf16, #tpu.memory_space<vmem>>, vector<176x512xbf16>
    %c0_1 = arith.constant 0 : index
    %c0_2 = arith.constant 0 : index
    %1 = vector.load %arg2[%c0_1, %c0_2] : memref<512x64xbf16, #tpu.memory_space<vmem>>, vector<512x64xbf16>
    %cst = arith.constant dense<0.000000e+00> : vector<176x64xf32>
    %2 = tpu.matmul %0, %1, %cst {dimension_numbers = #tpu.dot_dimension_numbers<[1], [0], [0], [1], [0, 0, 1, 1], [], []>} : vector<176x512xbf16>, vector<512x64xbf16>, vector<176x64xf32> -> vector<176x64xf32>
    %cst_3 = arith.constant dense<0.000000e+00> : vector<64xf32>
    %3 = vector.multi_reduction <add>, %2, %cst_3 [0] : vector<176x64xf32> to vector<64xf32>
    %4 = vector.shape_cast %3 : vector<64xf32> to vector<1x64xf32>
    %5 = arith.mulf %2, %2 : vector<176x64xf32>
    %cst_4 = arith.constant dense<0.000000e+00> : vector<64xf32>
    %6 = vector.multi_reduction <add>, %5, %cst_4 [0] : vector<176x64xf32> to vector<64xf32>
    %7 = vector.shape_cast %6 : vector<64xf32> to vector<1x64xf32>
    %cst_5 = arith.constant 0.00617283955 : f32
    %8 = vector.broadcast %cst_5 : f32 to vector<1x64xf32>
    %9 = arith.mulf %4, %8 : vector<1x64xf32>
    %cst_6 = arith.constant 0.00617283955 : f32
    %10 = vector.broadcast %cst_6 : f32 to vector<1x64xf32>
    %11 = arith.mulf %7, %10 : vector<1x64xf32>
    %12 = arith.mulf %9, %9 : vector<1x64xf32>
    %13 = arith.subf %11, %12 : vector<1x64xf32>
    %cst_7 = arith.constant 0.000000e+00 : f32
    %14 = vector.broadcast %cst_7 : f32 to vector<1x64xf32>
    %15 = arith.maximumf %13, %14 : vector<1x64xf32>
    %cst_8 = arith.constant 9.99999974E-6 : f32
    %16 = vector.broadcast %cst_8 : f32 to vector<1x64xf32>
    %17 = arith.addf %15, %16 : vector<1x64xf32>
    %18 = math.rsqrt %17 : vector<1x64xf32>
    %19 = vector.broadcast %9 : vector<1x64xf32> to vector<176x64xf32>
    %20 = arith.subf %2, %19 : vector<176x64xf32>
    %21 = vector.broadcast %18 : vector<1x64xf32> to vector<176x64xf32>
    %22 = arith.mulf %20, %21 : vector<176x64xf32>
    %cst_9 = arith.constant 0.000000e+00 : f32
    %23 = vector.broadcast %cst_9 : f32 to vector<176x64xf32>
    %24 = arith.maximumf %22, %23 : vector<176x64xf32>
    %25 = arith.truncf %24 : vector<176x64xf32> to vector<176x64xbf16>
    %c0_10 = arith.constant 0 : index
    %c0_11 = arith.constant 0 : index
    %26 = vector.load %arg3[%c0_10, %c0_11] : memref<176x64xbf16, #tpu.memory_space<vmem>>, vector<176x64xbf16>
    tpu.vector_store %arg3[%c0_10, %c0_11], %25 {strides = array<i32>} : memref<176x64xbf16, #tpu.memory_space<vmem>>, vector<176x64xbf16>,
    return
  }
  func.func @transform_0(%arg0: i32) -> (i32, i32) {
    %c0_i32 = arith.constant 0 : i32
    %c0_i32_0 = arith.constant 0 : i32
    %c0_i32_1 = arith.constant 0 : i32
    return %c0_i32, %c0_i32_0 : i32, i32
  }
  func.func @transform_1(%arg0: i32) -> (i32, i32) {
    %c0_i32 = arith.constant 0 : i32
    %c0_i32_0 = arith.constant 0 : i32
    %c0_i32_1 = arith.constant 0 : i32
    return %c0_i32, %c0_i32_0 : i32, i32
  }
  func.func @transform_2(%arg0: i32) -> (i32, i32) {
    %c0_i32 = arith.constant 0 : i32
    %c0_i32_0 = arith.constant 0 : i32
    %c0_i32_1 = arith.constant 0 : i32
    return %c0_i32, %c0_i32_0 : i32, i32
  }
}

module attributes {stable_mosaic.version = 11 : i64} {
  func.func @fused_matmul_bn_relu_kernel(%arg0: i32, %arg1: memref<112x576xbf16, #tpu.memory_space<vmem>>, %arg2: memref<576x64xbf16, #tpu.memory_space<vmem>>, %arg3: memref<112x64xbf16, #tpu.memory_space<vmem>>) attributes {dimension_semantics = [#tpu.dimension_semantics<arbitrary>], iteration_bounds = array<i64: 1>, scalar_prefetch = 0 : i64, scratch_operands = 0 : i64, tpu.core_type = #tpu.core_type<tc>, window_params = [{pipeline_mode = #tpu.pipeline_mode<synchronous>, transform_indices = @transform_0, window_bounds = array<i64: 112, 576>}, {pipeline_mode = #tpu.pipeline_mode<synchronous>, transform_indices = @transform_1, window_bounds = array<i64: 576, 64>}, {pipeline_mode = #tpu.pipeline_mode<synchronous>, transform_indices = @transform_2, window_bounds = array<i64: 112, 64>}]} {
    %c0 = arith.constant 0 : index
    %c0_0 = arith.constant 0 : index
    %0 = vector.load %arg1[%c0, %c0_0] : memref<112x576xbf16, #tpu.memory_space<vmem>>, vector<112x576xbf16>
    %c0_1 = arith.constant 0 : index
    %c0_2 = arith.constant 0 : index
    %1 = vector.load %arg2[%c0_1, %c0_2] : memref<576x64xbf16, #tpu.memory_space<vmem>>, vector<576x64xbf16>
    %cst = arith.constant dense<0.000000e+00> : vector<112x64xf32>
    %2 = tpu.matmul %0, %1, %cst {dimension_numbers = #tpu.dot_dimension_numbers<[1], [0], [0], [1], [0, 0, 1, 1], [], []>} : vector<112x576xbf16>, vector<576x64xbf16>, vector<112x64xf32> -> vector<112x64xf32>
    %cst_3 = arith.constant dense<0.000000e+00> : vector<64xf32>
    %3 = vector.multi_reduction <add>, %2, %cst_3 [0] : vector<112x64xf32> to vector<64xf32>
    %4 = vector.shape_cast %3 : vector<64xf32> to vector<1x64xf32>
    %5 = arith.mulf %2, %2 : vector<112x64xf32>
    %cst_4 = arith.constant dense<0.000000e+00> : vector<64xf32>
    %6 = vector.multi_reduction <add>, %5, %cst_4 [0] : vector<112x64xf32> to vector<64xf32>
    %7 = vector.shape_cast %6 : vector<64xf32> to vector<1x64xf32>
    %cst_5 = arith.constant 0.0102040814 : f32
    %8 = vector.broadcast %cst_5 : f32 to vector<1x64xf32>
    %9 = arith.mulf %4, %8 : vector<1x64xf32>
    %cst_6 = arith.constant 0.0102040814 : f32
    %10 = vector.broadcast %cst_6 : f32 to vector<1x64xf32>
    %11 = arith.mulf %7, %10 : vector<1x64xf32>
    %12 = arith.mulf %9, %9 : vector<1x64xf32>
    %13 = arith.subf %11, %12 : vector<1x64xf32>
    %cst_7 = arith.constant 0.000000e+00 : f32
    %14 = vector.broadcast %cst_7 : f32 to vector<1x64xf32>
    %15 = arith.maximumf %13, %14 : vector<1x64xf32>
    %cst_8 = arith.constant 9.99999974E-6 : f32
    %16 = vector.broadcast %cst_8 : f32 to vector<1x64xf32>
    %17 = arith.addf %15, %16 : vector<1x64xf32>
    %18 = math.rsqrt %17 : vector<1x64xf32>
    %19 = vector.broadcast %9 : vector<1x64xf32> to vector<112x64xf32>
    %20 = arith.subf %2, %19 : vector<112x64xf32>
    %21 = vector.broadcast %18 : vector<1x64xf32> to vector<112x64xf32>
    %22 = arith.mulf %20, %21 : vector<112x64xf32>
    %cst_9 = arith.constant 0.000000e+00 : f32
    %23 = vector.broadcast %cst_9 : f32 to vector<112x64xf32>
    %24 = arith.maximumf %22, %23 : vector<112x64xf32>
    %25 = arith.truncf %24 : vector<112x64xf32> to vector<112x64xbf16>
    %c0_10 = arith.constant 0 : index
    %c0_11 = arith.constant 0 : index
    %26 = vector.load %arg3[%c0_10, %c0_11] : memref<112x64xbf16, #tpu.memory_space<vmem>>, vector<112x64xbf16>
    tpu.vector_store %arg3[%c0_10, %c0_11], %25 {strides = array<i32>} : memref<112x64xbf16, #tpu.memory_space<vmem>>, vector<112x64xbf16>,
    return
  }
  func.func @transform_0(%arg0: i32) -> (i32, i32) {
    %c0_i32 = arith.constant 0 : i32
    %c0_i32_0 = arith.constant 0 : i32
    %c0_i32_1 = arith.constant 0 : i32
    return %c0_i32, %c0_i32_0 : i32, i32
  }
  func.func @transform_1(%arg0: i32) -> (i32, i32) {
    %c0_i32 = arith.constant 0 : i32
    %c0_i32_0 = arith.constant 0 : i32
    %c0_i32_1 = arith.constant 0 : i32
    return %c0_i32, %c0_i32_0 : i32, i32
  }
  func.func @transform_2(%arg0: i32) -> (i32, i32) {
    %c0_i32 = arith.constant 0 : i32
    %c0_i32_0 = arith.constant 0 : i32
    %c0_i32_1 = arith.constant 0 : i32
    return %c0_i32, %c0_i32_0 : i32, i32
  }
}

module attributes {stable_mosaic.version = 11 : i64} {
  func.func @fused_fc_head_kernel(%arg0: i32, %arg1: memref<16x3136xbf16, #tpu.memory_space<vmem>>, %arg2: memref<3136x512xbf16, #tpu.memory_space<vmem>>, %arg3: memref<512x128xbf16, #tpu.memory_space<vmem>>, %arg4: memref<1x128xf32, #tpu.memory_space<vmem>>, %arg5: memref<16x128xf32, #tpu.memory_space<vmem>>) attributes {dimension_semantics = [#tpu.dimension_semantics<arbitrary>], iteration_bounds = array<i64: 1>, scalar_prefetch = 0 : i64, scratch_operands = 0 : i64, tpu.core_type = #tpu.core_type<tc>, window_params = [{pipeline_mode = #tpu.pipeline_mode<synchronous>, transform_indices = @transform_0, window_bounds = array<i64: 16, 3136>}, {pipeline_mode = #tpu.pipeline_mode<synchronous>, transform_indices = @transform_1, window_bounds = array<i64: 3136, 512>}, {pipeline_mode = #tpu.pipeline_mode<synchronous>, transform_indices = @transform_2, window_bounds = array<i64: 512, 128>}, {pipeline_mode = #tpu.pipeline_mode<synchronous>, transform_indices = @transform_3, window_bounds = array<i64: 1, 128>}, {pipeline_mode = #tpu.pipeline_mode<synchronous>, transform_indices = @transform_4, window_bounds = array<i64: 16, 128>}]} {
    %c0 = arith.constant 0 : index
    %c0_0 = arith.constant 0 : index
    %0 = vector.load %arg1[%c0, %c0_0] : memref<16x3136xbf16, #tpu.memory_space<vmem>>, vector<16x3136xbf16>
    %c0_1 = arith.constant 0 : index
    %c0_2 = arith.constant 0 : index
    %1 = vector.load %arg2[%c0_1, %c0_2] : memref<3136x512xbf16, #tpu.memory_space<vmem>>, vector<3136x512xbf16>
    %cst = arith.constant dense<0.000000e+00> : vector<16x512xf32>
    %2 = tpu.matmul %0, %1, %cst {dimension_numbers = #tpu.dot_dimension_numbers<[1], [0], [0], [1], [0, 0, 1, 1], [], []>} : vector<16x3136xbf16>, vector<3136x512xbf16>, vector<16x512xf32> -> vector<16x512xf32>
    %cst_3 = arith.constant dense<0.000000e+00> : vector<512xf32>
    %3 = vector.multi_reduction <add>, %2, %cst_3 [0] : vector<16x512xf32> to vector<512xf32>
    %4 = vector.shape_cast %3 : vector<512xf32> to vector<1x512xf32>
    %5 = arith.mulf %2, %2 : vector<16x512xf32>
    %cst_4 = arith.constant dense<0.000000e+00> : vector<512xf32>
    %6 = vector.multi_reduction <add>, %5, %cst_4 [0] : vector<16x512xf32> to vector<512xf32>
    %7 = vector.shape_cast %6 : vector<512xf32> to vector<1x512xf32>
    %cst_5 = arith.constant 5.000000e-01 : f32
    %8 = vector.broadcast %cst_5 : f32 to vector<1x512xf32>
    %9 = arith.mulf %4, %8 : vector<1x512xf32>
    %cst_6 = arith.constant 5.000000e-01 : f32
    %10 = vector.broadcast %cst_6 : f32 to vector<1x512xf32>
    %11 = arith.mulf %7, %10 : vector<1x512xf32>
    %12 = arith.mulf %9, %9 : vector<1x512xf32>
    %13 = arith.subf %11, %12 : vector<1x512xf32>
    %cst_7 = arith.constant 0.000000e+00 : f32
    %14 = vector.broadcast %cst_7 : f32 to vector<1x512xf32>
    %15 = arith.maximumf %13, %14 : vector<1x512xf32>
    %cst_8 = arith.constant 9.99999974E-6 : f32
    %16 = vector.broadcast %cst_8 : f32 to vector<1x512xf32>
    %17 = arith.addf %15, %16 : vector<1x512xf32>
    %18 = math.rsqrt %17 : vector<1x512xf32>
    %19 = vector.broadcast %9 : vector<1x512xf32> to vector<16x512xf32>
    %20 = arith.subf %2, %19 : vector<16x512xf32>
    %21 = vector.broadcast %18 : vector<1x512xf32> to vector<16x512xf32>
    %22 = arith.mulf %20, %21 : vector<16x512xf32>
    %cst_9 = arith.constant 0.000000e+00 : f32
    %23 = vector.broadcast %cst_9 : f32 to vector<16x512xf32>
    %24 = arith.maximumf %22, %23 : vector<16x512xf32>
    %25 = arith.truncf %24 : vector<16x512xf32> to vector<16x512xbf16>
    %c0_10 = arith.constant 0 : index
    %c0_11 = arith.constant 0 : index
    %26 = vector.load %arg3[%c0_10, %c0_11] : memref<512x128xbf16, #tpu.memory_space<vmem>>, vector<512x128xbf16>
    %cst_12 = arith.constant dense<0.000000e+00> : vector<16x128xf32>
    %27 = tpu.matmul %25, %26, %cst_12 {dimension_numbers = #tpu.dot_dimension_numbers<[1], [0], [0], [1], [0, 0, 1, 1], [], []>} : vector<16x512xbf16>, vector<512x128xbf16>, vector<16x128xf32> -> vector<16x128xf32>
    %c0_13 = arith.constant 0 : index
    %c0_14 = arith.constant 0 : index
    %28 = vector.load %arg4[%c0_13, %c0_14] : memref<1x128xf32, #tpu.memory_space<vmem>>, vector<1x128xf32>
    %29 = vector.broadcast %28 : vector<1x128xf32> to vector<16x128xf32>
    %30 = arith.addf %27, %29 : vector<16x128xf32>
    %cst_15 = arith.constant dense<0xFF800000> : vector<16xf32>
    %31 = vector.multi_reduction <maximumf>, %30, %cst_15 [1] : vector<16x128xf32> to vector<16xf32>
    %32 = vector.shape_cast %31 : vector<16xf32> to vector<16x1xf32>
    %33 = vector.broadcast %32 : vector<16x1xf32> to vector<16x128xf32>
    %34 = arith.subf %30, %33 : vector<16x128xf32>
    %35 = math.exp %34 : vector<16x128xf32>
    %cst_16 = arith.constant dense<0.000000e+00> : vector<16xf32>
    %36 = vector.multi_reduction <add>, %35, %cst_16 [1] : vector<16x128xf32> to vector<16xf32>
    %37 = vector.shape_cast %36 : vector<16xf32> to vector<16x1xf32>
    %38 = vector.broadcast %37 : vector<16x1xf32> to vector<16x128xf32>
    %39 = arith.divf %35, %38 : vector<16x128xf32>
    %c0_17 = arith.constant 0 : index
    %c0_18 = arith.constant 0 : index
    %40 = vector.load %arg5[%c0_17, %c0_18] : memref<16x128xf32, #tpu.memory_space<vmem>>, vector<16x128xf32>
    tpu.vector_store %arg5[%c0_17, %c0_18], %39 {strides = array<i32>} : memref<16x128xf32, #tpu.memory_space<vmem>>, vector<16x128xf32>,
    return
  }
  func.func @transform_0(%arg0: i32) -> (i32, i32) {
    %c0_i32 = arith.constant 0 : i32
    %c0_i32_0 = arith.constant 0 : i32
    %c0_i32_1 = arith.constant 0 : i32
    return %c0_i32, %c0_i32_0 : i32, i32
  }
  func.func @transform_1(%arg0: i32) -> (i32, i32) {
    %c0_i32 = arith.constant 0 : i32
    %c0_i32_0 = arith.constant 0 : i32
    %c0_i32_1 = arith.constant 0 : i32
    return %c0_i32, %c0_i32_0 : i32, i32
  }
  func.func @transform_2(%arg0: i32) -> (i32, i32) {
    %c0_i32 = arith.constant 0 : i32
    %c0_i32_0 = arith.constant 0 : i32
    %c0_i32_1 = arith.constant 0 : i32
    return %c0_i32, %c0_i32_0 : i32, i32
  }
  func.func @transform_3(%arg0: i32) -> (i32, i32) {
    %c0_i32 = arith.constant 0 : i32
    %c0_i32_0 = arith.constant 0 : i32
    %c0_i32_1 = arith.constant 0 : i32
    return %c0_i32, %c0_i32_0 : i32, i32
  }
  func.func @transform_4(%arg0: i32) -> (i32, i32) {
    %c0_i32 = arith.constant 0 : i32
    %c0_i32_0 = arith.constant 0 : i32
    %c0_i32_1 = arith.constant 0 : i32
    return %c0_i32, %c0_i32_0 : i32, i32
  }
}

</mosaic_0001>

<bundles_post_ra>
// kernel: esnet_forward.4
= control target key start
LH: loop header
LB: loop body
LE: loop exit
PB: predicated region body
PF: predicated region fallthrough
CT: control target
= control target key end

     0   :  { %vm1257_vm0 = vcmask 261120   ;;  %vm2184_vm4 = vcmask 257024   ;;  %s5153_s1 = inlined_call_operand.vmem [shape: bf16[256,32], index: 1, kind: input, shape index: {}]   ;;  %s5154_s0 = inlined_call_operand.vmem [shape: bf16[800,256], index: 0, kind: input, shape index: {}]   ;;  %s5155_s2 = inlined_call_operand.vmem [shape: bf16[800,32], index: 2, kind: output, shape index: {}]  }
   0x1   :  { %v2860_v0 = vld [vmem:[%s5153_s1 + $0x38] sm:$0xff]  ;;  %v2859_v2 = vld [vmem:[%s5153_s1 + $0x30] sm:$0xff]  ;;  %v2858_v4 = vld [vmem:[%s5153_s1 + $0x28] sm:$0xff] }
   0x2   :  { %v2868_v1 = vld [vmem:[%s5153_s1 + $0x78] sm:$0xff]  ;;  %739 = vmatpush.bf16.msra.mxu0 %v2860_v0  ;;  %v2867_v3 = vld [vmem:[%s5153_s1 + $0x70] sm:$0xff]  ;;  %2869 = vmatpush.bf16.msra.mxu2 %v2860_v0  ;;  %v2866_v5 = vld [vmem:[%s5153_s1 + $0x68] sm:$0xff] }
   0x3   :  { %998 = vmatpush.bf16.msra.mxu1 %v2868_v1  ;;  %2877 = vmatpush.bf16.msra.mxu3 %v2868_v1  ;;  %v2857_v6 = vld [vmem:[%s5153_s1 + $0x20] sm:$0xff]  ;;  %v2856_v8 = vld [vmem:[%s5153_s1 + $0x18] sm:$0xff]  ;;  %v2855_v10 = vld [vmem:[%s5153_s1 + $0x10] sm:$0xff] }
   0x4   :  { %v2865_v7 = vld [vmem:[%s5153_s1 + $0x60] sm:$0xff]  ;;  %v2864_v9 = vld [vmem:[%s5153_s1 + $0x58] sm:$0xff]  ;;  %v2863_v11 = vld [vmem:[%s5153_s1 + $0x50] sm:$0xff] }
   0x5   :  { %v2854_v12 = vld [vmem:[%s5153_s1 + $0x8] sm:$0xff]  ;;  %v2853_v14 = vld [vmem:[%s5153_s1] sm:$0xff]  ;;  %v2299_v22 = vld [vmem:[%s5154_s0 + $0x10] sm:$0xf] }
   0x6   :  { %740 = vmatpush.bf16.msra.mxu0 %v2859_v2  ;;  %2870 = vmatpush.bf16.msra.mxu2 %v2859_v2  ;;  %v2862_v13 = vld [vmem:[%s5153_s1 + $0x48] sm:$0xff]  ;;  %v2861_v15 = vld [vmem:[%s5153_s1 + $0x40] sm:$0xff]  ;;  %v2756_v23 = vld [vmem:[%s5154_s0 + $0x14] sm:$0xf0] }
   0x7   :  { %999 = vmatpush.bf16.msra.mxu1 %v2867_v3  ;;  %2878 = vmatpush.bf16.msra.mxu3 %v2867_v3  ;;  %v2291_v16 = vld [vmem:[%s5154_s0] sm:$0xf]  ;;  %v2754_v17 = vld [vmem:[%s5154_s0 + $0x4] sm:$0xf0]  ;;  %v2753_v18 = vld [vmem:[%s5154_s0 + $0x4] sm:$0xf]  ;;  %v2300_v26 = vor.u32 %v2756_v23, %v2299_v22 }
   0x8   :  { %v2293_v19 = vld [vmem:[%s5154_s0 + $0x8] sm:$0xf0]  ;;  %v2292_v20 = vor.u32 %v2754_v17, %v2291_v16  ;;  %v2755_v24 = vld [vmem:[%s5154_s0 + $0x14] sm:$0xf]  ;;  %v2301_v25 = vld [vmem:[%s5154_s0 + $0x18] sm:$0xf0] }
   0x9   :  { %v2296_v21 = vor.u32 %v2753_v18, %v2293_v19  ;;  %v2304_v27 = vor.u32 %v2755_v24, %v2301_v25  ;;  %v2307_v28 = vld [vmem:[%s5154_s0 + $0x20] sm:$0xf]  ;;  %v2758_v29 = vld [vmem:[%s5154_s0 + $0x24] sm:$0xf0]  ;;  %v2757_v30 = vld [vmem:[%s5154_s0 + $0x24] sm:$0xf] }
   0xa   :  { %741 = vmatpush.bf16.msra.mxu0 %v2858_v4  ;;  %2871 = vmatpush.bf16.msra.mxu2 %v2858_v4  ;;  %v2309_v31 = vld [vmem:[%s5154_s0 + $0x28] sm:$0xf0]  ;;  %v2308_v32 = vor.u32 %v2758_v29, %v2307_v28  ;;  %v2315_v34 = vld [vmem:[%s5154_s0 + $0x30] sm:$0xf]  ;;  %v2760_v35 = vld [vmem:[%s5154_s0 + $0x34] sm:$0xf0] }
   0xb   :  { %1000 = vmatpush.bf16.msra.mxu1 %v2866_v5  ;;  %2879 = vmatpush.bf16.msra.mxu3 %v2866_v5  ;;  %v2312_v33 = vor.u32 %v2757_v30, %v2309_v31  ;;  %v2759_v36 = vld [vmem:[%s5154_s0 + $0x34] sm:$0xf]  ;;  %v2317_v37 = vld [vmem:[%s5154_s0 + $0x38] sm:$0xf0]  ;;  %v2316_v38 = vor.u32 %v2760_v35, %v2315_v34  ;;  %v2491_v40 = vld [vmem:[%s5154_s0 + $0x190] sm:$0xf] }
   0xc   :  { %v2320_v39 = vor.u32 %v2759_v36, %v2317_v37  ;;  %v2804_v41 = vld [vmem:[%s5154_s0 + $0x194] sm:$0xf0]  ;;  %v2803_v42 = vld [vmem:[%s5154_s0 + $0x194] sm:$0xf]  ;;  %v2493_v44 = vld [vmem:[%s5154_s0 + $0x198] sm:$0xf0] }
   0xd   :  { %v2492_v43 = vor.u32 %v2804_v41, %v2491_v40  ;;  %v2496_v45 = vor.u32 %v2803_v42, %v2493_v44  ;;  %v2323_v46 = vld [vmem:[%s5154_s0 + $0x40] sm:$0xf]  ;;  %v2762_v47 = vld [vmem:[%s5154_s0 + $0x44] sm:$0xf0]  ;;  %v2761_v48 = vld [vmem:[%s5154_s0 + $0x44] sm:$0xf] }
   0xe   :  { %742 = vmatpush.bf16.msra.mxu0 %v2857_v6  ;;  %2872 = vmatpush.bf16.msra.mxu2 %v2857_v6  ;;  %v2325_v49 = vld [vmem:[%s5154_s0 + $0x48] sm:$0xf0]  ;;  %v2324_v50 = vor.u32 %v2762_v47, %v2323_v46  ;;  %v2499_v52 = vld [vmem:[%s5154_s0 + $0x1a0] sm:$0xf]  ;;  %v2806_v53 = vld [vmem:[%s5154_s0 + $0x1a4] sm:$0xf0] }
   0xf   :  { %1001 = vmatpush.bf16.msra.mxu1 %v2865_v7  ;;  %2880 = vmatpush.bf16.msra.mxu3 %v2865_v7  ;;  %v2328_v51 = vor.u32 %v2761_v48, %v2325_v49  ;;  %v2805_v54 = vld [vmem:[%s5154_s0 + $0x1a4] sm:$0xf]  ;;  %v2500_v55 = vor.u32 %v2806_v53, %v2499_v52  ;;  %v2501_v56 = vld [vmem:[%s5154_s0 + $0x1a8] sm:$0xf0]  ;;  %v2331_v58 = vld [vmem:[%s5154_s0 + $0x50] sm:$0xf] }
  0x10   :  { %v2504_v57 = vor.u32 %v2805_v54, %v2501_v56  ;;  %v2764_v59 = vld [vmem:[%s5154_s0 + $0x54] sm:$0xf0]  ;;  %v2763_v60 = vld [vmem:[%s5154_s0 + $0x54] sm:$0xf]  ;;  %v2333_v61 = vld [vmem:[%s5154_s0 + $0x58] sm:$0xf0] }
  0x11   :  { %v2332_v62 = vor.u32 %v2764_v59, %v2331_v58  ;;  %v2336_v63 = vor.u32 %v2763_v60, %v2333_v61  ;;  %v2507_v0 = vld [vmem:[%s5154_s0 + $0x1b0] sm:$0xf]  ;;  %v2808_v1 = vld [vmem:[%s5154_s0 + $0x1b4] sm:$0xf0]  ;;  %v2807_v2 = vld [vmem:[%s5154_s0 + $0x1b4] sm:$0xf] }
  0x12   :  { %743 = vmatpush.bf16.msra.mxu0 %v2856_v8  ;;  %2873 = vmatpush.bf16.msra.mxu2 %v2856_v8  ;;  %v2508_v3 = vor.u32 %v2808_v1, %v2507_v0  ;;  %v2509_v4 = vld [vmem:[%s5154_s0 + $0x1b8] sm:$0xf0]  ;;  %v2339_v6 = vld [vmem:[%s5154_s0 + $0x60] sm:$0xf]  ;;  %v2766_v7 = vld [vmem:[%s5154_s0 + $0x64] sm:$0xf0] }
  0x13   :  { %1002 = vmatpush.bf16.msra.mxu1 %v2864_v9  ;;  %2881 = vmatpush.bf16.msra.mxu3 %v2864_v9  ;;  %v2512_v5 = vor.u32 %v2807_v2, %v2509_v4  ;;  %v2765_v8 = vld [vmem:[%s5154_s0 + $0x64] sm:$0xf]  ;;  %v2341_v9 = vld [vmem:[%s5154_s0 + $0x68] sm:$0xf0]  ;;  %v2347_v18 = vld [vmem:[%s5154_s0 + $0x70] sm:$0xf] }
  0x14   :  { %v2517_v16 = vld [vmem:[%s5154_s0 + $0x1c8] sm:$0xf0]  ;;  %v2768_v19 = vld [vmem:[%s5154_s0 + $0x74] sm:$0xf0]  ;;  %v2523_v24 = vld [vmem:[%s5154_s0 + $0x1d0] sm:$0xf] }
  0x15   :  { %v2348_v22 = vor.u32 %v2768_v19, %v2347_v18  ;;  %v2812_v25 = vld [vmem:[%s5154_s0 + $0x1d4] sm:$0xf0]  ;;  %v2525_v28 = vld [vmem:[%s5154_s0 + $0x1d8] sm:$0xf0]  ;;  %v2355_v30 = vld [vmem:[%s5154_s0 + $0x80] sm:$0xf] }
  0x16   :  { %744 = vmatpush.bf16.msra.mxu0 %v2855_v10  ;;  %2874 = vmatpush.bf16.msra.mxu2 %v2855_v10  ;;  %v2340_v10 = vor.u32 %v2766_v7, %v2339_v6  ;;  %v2770_v31 = vld [vmem:[%s5154_s0 + $0x84] sm:$0xf0]  ;;  %v2813_v41 = vld [vmem:[%s5154_s0 + $0x1e4] sm:$0xf]  ;;  %v2363_v48 = vld [vmem:[%s5154_s0 + $0x90] sm:$0xf] }
  0x17   :  { %1003 = vmatpush.bf16.msra.mxu1 %v2863_v11  ;;  %2882 = vmatpush.bf16.msra.mxu3 %v2863_v11  ;;  %v2344_v11 = vor.u32 %v2765_v8, %v2341_v9  ;;  %v2356_v34 = vor.u32 %v2770_v31, %v2355_v30  ;;  %v2814_v40 = vld [vmem:[%s5154_s0 + $0x1e4] sm:$0xf0]  ;;  %v2772_v49 = vld [vmem:[%s5154_s0 + $0x94] sm:$0xf0]  ;;  %v2815_v59 = vld [vmem:[%s5154_s0 + $0x1f4] sm:$0xf] }
  0x18   :  { %v2364_v52 = vor.u32 %v2772_v49, %v2363_v48  ;;  %v2816_v58 = vld [vmem:[%s5154_s0 + $0x1f4] sm:$0xf0]  ;;  %v2541_v61 = vld [vmem:[%s5154_s0 + $0x1f8] sm:$0xf0]  ;;  %v2371_v2 = vld [vmem:[%s5154_s0 + $0xa0] sm:$0xf] }
  0x19   :  { %v2544_v0 = vor.u32 %v2815_v59, %v2541_v61  ;;  %v2773_v4 = vld [vmem:[%s5154_s0 + $0xa4] sm:$0xf]  ;;  %v2820_v30 = vld [vmem:[%s5154_s0 + $0x214] sm:$0xf0]  ;;  %v2819_v31 = vld [vmem:[%s5154_s0 + $0x214] sm:$0xf] }
  0x1a   :  { %745 = vmatpush.bf16.msra.mxu0 %v2854_v12  ;;  %2875 = vmatpush.bf16.msra.mxu2 %v2854_v12  ;;  %v2515_v12 = vld [vmem:[%s5154_s0 + $0x1c0] sm:$0xf] }
  0x1b   :  { %1004 = vmatpush.bf16.msra.mxu1 %v2862_v13  ;;  %2883 = vmatpush.bf16.msra.mxu3 %v2862_v13  ;;  %v2810_v13 = vld [vmem:[%s5154_s0 + $0x1c4] sm:$0xf0] }
  0x1e   :  { %746 = vmatpush.bf16.msra.mxu0 %v2853_v14  ;;  %2876 = vmatpush.bf16.msra.mxu2 %v2853_v14  ;;  %v2809_v14 = vld [vmem:[%s5154_s0 + $0x1c4] sm:$0xf] }
  0x1f   :  { %1005 = vmatpush.bf16.msra.mxu1 %v2861_v15  ;;  %2884 = vmatpush.bf16.msra.mxu3 %v2861_v15  ;;  %v2516_v15 = vor.u32 %v2810_v13, %v2515_v12  ;;  %v2520_v17 = vor.u32 %v2809_v14, %v2517_v16  ;;  %v2818_v12 = vld [vmem:[%s5154_s0 + $0x204] sm:$0xf0]  ;;  %v2817_v13 = vld [vmem:[%s5154_s0 + $0x204] sm:$0xf] }
  0x21   :  { %747 = vmatmul.bf16.vlgmr.msra.gmra.mxu0 %v2292_v20  ;;  %872 = vmatmul.bf16.vlgmr.msra.gmra.mxu2 %v2492_v43  ;;  %v2767_v20 = vld [vmem:[%s5154_s0 + $0x74] sm:$0xf]  ;;  %v2533_v43 = vld [vmem:[%s5154_s0 + $0x1e8] sm:$0xf0] }
  0x22   :  { %1006 = vmatmul.bf16.vlgmr.msra.gmra.mxu1 %v2296_v21  ;;  %1131 = vmatmul.bf16.vlgmr.msra.gmra.mxu3 %v2496_v45  ;;  %v2349_v21 = vld [vmem:[%s5154_s0 + $0x78] sm:$0xf0]  ;;  %v2536_v46 = vor.u32 %v2813_v41, %v2533_v43  ;;  %v2777_v41 = vld [vmem:[%s5154_s0 + $0xc4] sm:$0xf] }
  0x23   :  { %v2352_v23 = vor.u32 %v2767_v20, %v2349_v21  ;;  %v2379_v20 = vld [vmem:[%s5154_s0 + $0xb0] sm:$0xf]  ;;  %v2776_v21 = vld [vmem:[%s5154_s0 + $0xb4] sm:$0xf0] }
  0x31   :  { %752 = vmatmul.bf16.gmra.mxu0 %v2300_v26  ;;  %877 = vmatmul.bf16.gmra.mxu2 %v2500_v55  ;;  %v2811_v26 = vld [vmem:[%s5154_s0 + $0x1d4] sm:$0xf] }
  0x32   :  { %1011 = vmatmul.bf16.gmra.mxu1 %v2304_v27  ;;  %1136 = vmatmul.bf16.gmra.mxu3 %v2504_v57  ;;  %v2524_v27 = vor.u32 %v2812_v25, %v2523_v24  ;;  %v2528_v29 = vor.u32 %v2811_v26, %v2525_v28  ;;  %v2539_v57 = vld [vmem:[%s5154_s0 + $0x1f0] sm:$0xf]  ;;  %v2380_v24 = vor.u32 %v2776_v21, %v2379_v20  ;;  %v2824_v20 = vld [vmem:[%s5154_s0 + $0x234] sm:$0xf0]  ;;  %v2823_v21 = vld [vmem:[%s5154_s0 + $0x234] sm:$0xf] }
  0x33   :  { %v2540_v60 = vor.u32 %v2816_v58, %v2539_v57  ;;  %v2822_v57 = vld [vmem:[%s5154_s0 + $0x224] sm:$0xf0]  ;;  %v2821_v58 = vld [vmem:[%s5154_s0 + $0x224] sm:$0xf] }
  0x41   :  { %757 = vmatmul.bf16.gmra.mxu0 %v2308_v32  ;;  %882 = vmatmul.bf16.gmra.mxu2 %v2508_v3  ;;  %v2769_v32 = vld [vmem:[%s5154_s0 + $0x84] sm:$0xf]  ;;  %v2774_v3 = vld [vmem:[%s5154_s0 + $0xa4] sm:$0xf0] }
  0x42   :  { %1016 = vmatmul.bf16.gmra.mxu1 %v2312_v33  ;;  %1141 = vmatmul.bf16.gmra.mxu3 %v2512_v5  ;;  %v2357_v33 = vld [vmem:[%s5154_s0 + $0x88] sm:$0xf0]  ;;  %v2372_v6 = vor.u32 %v2774_v3, %v2371_v2  ;;  %v2395_v2 = vld [vmem:[%s5154_s0 + $0xd0] sm:$0xf]  ;;  %v2780_v3 = vld [vmem:[%s5154_s0 + $0xd4] sm:$0xf0] }
  0x43   :  { %v2360_v35 = vor.u32 %v2769_v32, %v2357_v33  ;;  %v2373_v5 = vld [vmem:[%s5154_s0 + $0xa8] sm:$0xf0]  ;;  %v2557_v33 = vld [vmem:[%s5154_s0 + $0x218] sm:$0xf0] }
  0x44   :  { %v2376_v7 = vor.u32 %v2773_v4, %v2373_v5  ;;  %v2779_v4 = vld [vmem:[%s5154_s0 + $0xd4] sm:$0xf]  ;;  %v2397_v5 = vld [vmem:[%s5154_s0 + $0xd8] sm:$0xf0] }
  0x51   :  { %762 = vmatmul.bf16.gmra.mxu0 %v2316_v38  ;;  %887 = vmatmul.bf16.gmra.mxu2 %v2516_v15  ;;  %v2549_v15 = vld [vmem:[%s5154_s0 + $0x208] sm:$0xf0] }
  0x52   :  { %1021 = vmatmul.bf16.gmra.mxu1 %v2320_v39  ;;  %1146 = vmatmul.bf16.gmra.mxu3 %v2520_v17  ;;  %v2531_v39 = vld [vmem:[%s5154_s0 + $0x1e0] sm:$0xf]  ;;  %v2552_v18 = vor.u32 %v2817_v13, %v2549_v15 }
  0x53   :  { %v2532_v42 = vor.u32 %v2814_v40, %v2531_v39  ;;  %v2387_v39 = vld [vmem:[%s5154_s0 + $0xc0] sm:$0xf]  ;;  %v2778_v40 = vld [vmem:[%s5154_s0 + $0xc4] sm:$0xf0] }
  0x61   :  { %767 = vmatmul.bf16.gmra.mxu0 %v2324_v50  ;;  %892 = vmatmul.bf16.gmra.mxu2 %v2524_v27  ;;  %v2771_v50 = vld [vmem:[%s5154_s0 + $0x94] sm:$0xf] }
  0x62   :  { %1026 = vmatmul.bf16.gmra.mxu1 %v2328_v51  ;;  %1151 = vmatmul.bf16.gmra.mxu3 %v2528_v29  ;;  %v2365_v51 = vld [vmem:[%s5154_s0 + $0x98] sm:$0xf0]  ;;  %v2555_v29 = vld [vmem:[%s5154_s0 + $0x210] sm:$0xf] }
  0x63   :  { %v2368_v53 = vor.u32 %v2771_v50, %v2365_v51  ;;  %v2556_v32 = vor.u32 %v2820_v30, %v2555_v29  ;;  %v2403_v29 = vld [vmem:[%s5154_s0 + $0xe0] sm:$0xf]  ;;  %v2782_v30 = vld [vmem:[%s5154_s0 + $0xe4] sm:$0xf0] }
  0x71   :  { %772 = vmatmul.bf16.gmra.mxu0 %v2332_v62  ;;  %897 = vmatmul.bf16.gmra.mxu2 %v2532_v42  ;;  %v2389_v42 = vld [vmem:[%s5154_s0 + $0xc8] sm:$0xf0] }
  0x72   :  { %1031 = vmatmul.bf16.gmra.mxu1 %v2336_v63  ;;  %1156 = vmatmul.bf16.gmra.mxu3 %v2536_v46  ;;  %v2388_v46 = vor.u32 %v2778_v40, %v2387_v39  ;;  %v2392_v48 = vor.u32 %v2777_v41, %v2389_v42 }
  0x81   :  { %777 = vmatmul.bf16.gmra.mxu0 %v2340_v10  ;;  %902 = vmatmul.bf16.gmra.mxu2 %v2540_v60  ;;  %v2565_v60 = vld [vmem:[%s5154_s0 + $0x228] sm:$0xf0] }
  0x82   :  { %1036 = vmatmul.bf16.gmra.mxu1 %v2344_v11  ;;  %1161 = vmatmul.bf16.gmra.mxu3 %v2544_v0  ;;  %v2547_v11 = vld [vmem:[%s5154_s0 + $0x200] sm:$0xf] }
  0x83   :  { %v2548_v14 = vor.u32 %v2818_v12, %v2547_v11  ;;  %v2400_v11 = vor.u32 %v2779_v4, %v2397_v5 }
  0x91   :  { %782 = vmatmul.bf16.gmra.mxu0 %v2348_v22  ;;  %907 = vmatmul.bf16.gmra.mxu2 %v2548_v14  ;;  %v2775_v22 = vld [vmem:[%s5154_s0 + $0xb4] sm:$0xf] }
  0x92   :  { %1041 = vmatmul.bf16.gmra.mxu1 %v2352_v23  ;;  %1166 = vmatmul.bf16.gmra.mxu3 %v2552_v18  ;;  %v2381_v23 = vld [vmem:[%s5154_s0 + $0xb8] sm:$0xf0]  ;;  %v2571_v18 = vld [vmem:[%s5154_s0 + $0x230] sm:$0xf] }
  0x93   :  { %v2384_v25 = vor.u32 %v2775_v22, %v2381_v23  ;;  %v2572_v22 = vor.u32 %v2824_v20, %v2571_v18  ;;  %v2573_v23 = vld [vmem:[%s5154_s0 + $0x238] sm:$0xf0]  ;;  %v2828_v18 = vld [vmem:[%s5154_s0 + $0x254] sm:$0xf0]  ;;  %v2827_v20 = vld [vmem:[%s5154_s0 + $0x254] sm:$0xf] }
  0x9e   :  { %v748_v36 = vpop.f32.mrf.mxu0 }
  0x9f   :  { %v1007_v37 = vpop.f32.mrf.mxu1 }
  0xa0   :  { %v3118_v38 = vadd.f32 %v1007_v37, %v748_v36  ;;  %v2560_v36 = vor.u32 %v2819_v31, %v2557_v33  ;;  %v2781_v31 = vld [vmem:[%s5154_s0 + $0xe4] sm:$0xf] }
  0xa1   :  { %787 = vmatmul.bf16.gmra.mxu0 %v2356_v34  ;;  %912 = vmatmul.bf16.gmra.mxu2 %v2556_v32  ;;  %v2405_v32 = vld [vmem:[%s5154_s0 + $0xe8] sm:$0xf0] }
  0xa2   :  { %5236 = vst [vmem:[#allocation2_spill] sm:$0xff] %v3118_v38  ;;  %1046 = vmatmul.bf16.gmra.mxu1 %v2360_v35  ;;  %1171 = vmatmul.bf16.gmra.mxu3 %v2560_v36  ;;  %v2404_v36 = vor.u32 %v2782_v30, %v2403_v29  ;;  %v2408_v39 = vor.u32 %v2781_v31, %v2405_v32  ;;  %v2419_v29 = vld [vmem:[%s5154_s0 + $0x100] sm:$0xf]  ;;  %v2786_v30 = vld [vmem:[%s5154_s0 + $0x104] sm:$0xf0] }
  0xa3   :  { %v2785_v31 = vld [vmem:[%s5154_s0 + $0x104] sm:$0xf]  ;;  %v2421_v32 = vld [vmem:[%s5154_s0 + $0x108] sm:$0xf0] }
  0xa4   :  { %v873_v43 = vpop.f32.mrf.mxu2 }
  0xa6   :  { %v750_v44 = vpop.f32.mrf.mxu0 }
  0xa7   :  { %v1009_v45 = vpop.f32.mrf.mxu1 }
  0xa8   :  { %v3132_v47 = vadd.f32 %v1009_v45, %v750_v44  ;;  %v1132_v44 = vpop.f32.mrf.mxu3 }
  0xa9   :  { %v3230_v45 = vadd.f32 %v1132_v44, %v873_v43 }
  0xaa   :  { %5237 = vst [vmem:[#allocation3_spill] sm:$0xff] %v3132_v47 }
  0xab   :  { %5242 = vst [vmem:[#allocation8_spill] sm:$0xff] %v3230_v45 }
  0xae   :  { %v753_v54 = vpop.f32.mrf.mxu0 }
  0xaf   :  { %v1012_v55 = vpop.f32.mrf.mxu1 }
  0xb0   :  { %v3146_v56 = vadd.f32 %v1012_v55, %v753_v54  ;;  %v2563_v55 = vld [vmem:[%s5154_s0 + $0x220] sm:$0xf] }
  0xb1   :  { %792 = vmatmul.bf16.gmra.mxu0 %v2364_v52  ;;  %v875_v52 = vpop.f32.mrf.mxu2  ;;  %v2564_v59 = vor.u32 %v2822_v57, %v2563_v55 }
  0xb2   :  { %5238 = vst [vmem:[#allocation4_spill] sm:$0xff] %v3146_v56  ;;  %1051 = vmatmul.bf16.gmra.mxu1 %v2368_v53  ;;  %v1134_v53 = vpop.f32.mrf.mxu3 }
  0xb3   :  { %v3234_v54 = vadd.f32 %v1134_v53, %v875_v52  ;;  %917 = vmatmul.bf16.gmra.mxu2 %v2564_v59  ;;  %v2581_v53 = vld [vmem:[%s5154_s0 + $0x248] sm:$0xf0] }
  0xb5   :  { %5244 = vst [vmem:[#allocation10_spill] sm:$0xff] %v3234_v54 }
  0xb6   :  { %v755_v62 = vpop.f32.mrf.mxu0 }
  0xb7   :  { %v1014_v63 = vpop.f32.mrf.mxu1 }
  0xb8   :  { %v3160_v1 = vadd.f32 %v1014_v63, %v755_v62  ;;  %v2568_v63 = vor.u32 %v2821_v58, %v2565_v60  ;;  %v2411_v60 = vld [vmem:[%s5154_s0 + $0xf0] sm:$0xf] }
  0xba   :  { %5239 = vst [vmem:[#allocation5_spill] sm:$0xff] %v3160_v1  ;;  %1176 = vmatmul.bf16.gmra.mxu3 %v2568_v63  ;;  %v2413_v63 = vld [vmem:[%s5154_s0 + $0xf8] sm:$0xf0] }
  0xbe   :  { %v758_v8 = vpop.f32.mrf.mxu0 }
  0xbf   :  { %v1017_v9 = vpop.f32.mrf.mxu1 }
  0xc0   :  { %v3174_v10 = vadd.f32 %v1017_v9, %v758_v8  ;;  %v2396_v9 = vor.u32 %v2780_v3, %v2395_v2 }
  0xc1   :  { %797 = vmatmul.bf16.gmra.mxu0 %v2372_v6  ;;  %v878_v6 = vpop.f32.mrf.mxu2 }
  0xc2   :  { %1056 = vmatmul.bf16.gmra.mxu1 %v2376_v7  ;;  %v1137_v7 = vpop.f32.mrf.mxu3 }
  0xc3   :  { %v3262_v8 = vadd.f32 %v1137_v7, %v878_v6  ;;  %922 = vmatmul.bf16.gmra.mxu2 %v2572_v22  ;;  %v2589_v22 = vld [vmem:[%s5154_s0 + $0x258] sm:$0xf0] }
  0xc5   :  { %5246 = vst [vmem:[#allocation12_spill] sm:$0xff] %v3262_v8 }
  0xc6   :  { %v760_v16 = vpop.f32.mrf.mxu0 }
  0xc7   :  { %v1019_v17 = vpop.f32.mrf.mxu1 }
  0xc8   :  { %v3188_v19 = vadd.f32 %v1019_v17, %v760_v16 }
  0xc9   :  { %v880_v15 = vpop.f32.mrf.mxu2 }
  0xca   :  { %5240 = vst [vmem:[#allocation6_spill] sm:$0xff] %v3188_v19  ;;  %v1139_v16 = vpop.f32.mrf.mxu3 }
  0xcb   :  { %v3266_v17 = vadd.f32 %v1139_v16, %v880_v15  ;;  %v2587_v16 = vld [vmem:[%s5154_s0 + $0x250] sm:$0xf] }
  0xcd   :  { %5247 = vst [vmem:[#allocation13_spill] sm:$0xff] %v3266_v17 }
  0xce   :  { %v763_v26 = vpop.f32.mrf.mxu0 }
  0xcf   :  { %v1022_v27 = vpop.f32.mrf.mxu1 }
  0xd0   :  { %v3202_v28 = vadd.f32 %v1022_v27, %v763_v26  ;;  %v2576_v26 = vor.u32 %v2823_v21, %v2573_v23  ;;  %v2588_v21 = vor.u32 %v2828_v18, %v2587_v16 }
  0xd1   :  { %802 = vmatmul.bf16.gmra.mxu0 %v2380_v24  ;;  %v883_v33 = vpop.f32.mrf.mxu2 }
  0xd2   :  { %1061 = vmatmul.bf16.gmra.mxu1 %v2384_v25  ;;  %1181 = vmatmul.bf16.gmra.mxu3 %v2576_v26 }
  0xd6   :  { %v765_v34 = vpop.f32.mrf.mxu0 }
  0xd7   :  { %v1024_v35 = vpop.f32.mrf.mxu1 }
  0xd8   :  { %v3216_v37 = vadd.f32 %v1024_v35, %v765_v34  ;;  %v1142_v34 = vpop.f32.mrf.mxu3 }
  0xd9   :  { %v3294_v35 = vadd.f32 %v1142_v34, %v883_v33  ;;  %v885_v43 = vpop.f32.mrf.mxu2 }
  0xda   :  { %5241 = vst [vmem:[#allocation7_spill] sm:$0xff] %v3216_v37 }
  0xdb   :  { %5249 = vst [vmem:[#allocation15_spill] sm:$0xff] %v3294_v35 }
  0xde   :  { %v768_v49 = vpop.f32.mrf.mxu0 }
  0xdf   :  { %v1027_v50 = vpop.f32.mrf.mxu1 }
  0xe0   :  { %v3232_v51 = vadd.f32 %v1027_v50, %v768_v49  ;;  %v1144_v44 = vpop.f32.mrf.mxu3  ;;  %v2826_v49 = vld [vmem:[%s5154_s0 + $0x244] sm:$0xf0]  ;;  %v2825_v50 = vld [vmem:[%s5154_s0 + $0x244] sm:$0xf] }
  0xe1   :  { %807 = vmatmul.bf16.gmra.mxu0 %v2388_v46  ;;  %v3298_v46 = vadd.f32 %v1144_v44, %v885_v43  ;;  %v2584_v58 = vor.u32 %v2825_v50, %v2581_v53  ;;  %v888_v2 = vpop.f32.mrf.mxu2  ;;  %v2830_v53 = vld [vmem:[%s5154_s0 + $0x264] sm:$0xf0] }
  0xe2   :  { %5243 = vst [vmem:[#allocation9_spill] sm:$0xff] %v3232_v51  ;;  %1066 = vmatmul.bf16.gmra.mxu1 %v2392_v48  ;;  %v2579_v48 = vld [vmem:[%s5154_s0 + $0x240] sm:$0xf] }
  0xe3   :  { %5250 = vst [vmem:[#allocation16_spill] sm:$0xff] %v3298_v46  ;;  %v2580_v52 = vor.u32 %v2826_v49, %v2579_v48  ;;  %1186 = vmatmul.bf16.gmra.mxu3 %v2584_v58  ;;  %v2597_v58 = vld [vmem:[%s5154_s0 + $0x268] sm:$0xf0] }
  0xe5   :  { %927 = vmatmul.bf16.gmra.mxu2 %v2580_v52  ;;  %v2595_v52 = vld [vmem:[%s5154_s0 + $0x260] sm:$0xf] }
  0xe6   :  { %v770_v61 = vpop.f32.mrf.mxu0 }
  0xe7   :  { %v1029_v62 = vpop.f32.mrf.mxu1 }
  0xe8   :  { %v3248_v0 = vadd.f32 %v1029_v62, %v770_v61  ;;  %v2784_v61 = vld [vmem:[%s5154_s0 + $0xf4] sm:$0xf0]  ;;  %v2783_v62 = vld [vmem:[%s5154_s0 + $0xf4] sm:$0xf]  ;;  %v1147_v3 = vpop.f32.mrf.mxu3 }
  0xe9   :  { %v3326_v4 = vadd.f32 %v1147_v3, %v888_v2  ;;  %v2412_v5 = vor.u32 %v2784_v61, %v2411_v60  ;;  %v2416_v6 = vor.u32 %v2783_v62, %v2413_v63  ;;  %v2427_v2 = vld [vmem:[%s5154_s0 + $0x110] sm:$0xf]  ;;  %v2788_v3 = vld [vmem:[%s5154_s0 + $0x114] sm:$0xf0] }
  0xea   :  { %5245 = vst [vmem:[#allocation11_spill] sm:$0xff] %v3248_v0 }
  0xeb   :  { %5252 = vst [vmem:[#allocation18_spill] sm:$0xff] %v3326_v4 }
  0xee   :  { %v773_v12 = vpop.f32.mrf.mxu0 }
  0xef   :  { %v1032_v13 = vpop.f32.mrf.mxu1 }
  0xf0   :  { %v3264_v14 = vadd.f32 %v1032_v13, %v773_v12  ;;  %v890_v12 = vpop.f32.mrf.mxu2  ;;  %v1149_v13 = vpop.f32.mrf.mxu3 }
  0xf1   :  { %812 = vmatmul.bf16.gmra.mxu0 %v2396_v9  ;;  %v3330_v15 = vadd.f32 %v1149_v13, %v890_v12  ;;  %v2428_v13 = vor.u32 %v2788_v3, %v2427_v2 }
  0xf2   :  { %1071 = vmatmul.bf16.gmra.mxu1 %v2400_v11 }
  0xf3   :  { %5254 = vst [vmem:[#allocation20_spill] sm:$0xff] %v3330_v15 }
  0xf5   :  { %932 = vmatmul.bf16.gmra.mxu2 %v2588_v21 }
  0xf6   :  { %v775_v24 = vpop.f32.mrf.mxu0 }
  0xf7   :  { %v1034_v25 = vpop.f32.mrf.mxu1 }
  0xf8   :  { %v3280_v27 = vadd.f32 %v1034_v25, %v775_v24  ;;  %v2592_v25 = vor.u32 %v2827_v20, %v2589_v22  ;;  %v893_v33 = vpop.f32.mrf.mxu2  ;;  %v1152_v34 = vpop.f32.mrf.mxu3 }
  0xfa   :  { %5248 = vst [vmem:[#allocation14_spill] sm:$0xff] %v3280_v27  ;;  %1191 = vmatmul.bf16.gmra.mxu3 %v2592_v25  ;;  %v2603_v25 = vld [vmem:[%s5154_s0 + $0x270] sm:$0xf] }
  0xfe   :  { %v778_v40 = vpop.f32.mrf.mxu0 }
  0xff   :  { %v1037_v41 = vpop.f32.mrf.mxu1 }
 0x100   :  { %v3296_v42 = vadd.f32 %v1037_v41, %v778_v40  ;;  %v2424_v40 = vor.u32 %v2785_v31, %v2421_v32  ;;  %v895_v48 = vpop.f32.mrf.mxu2  ;;  %v1154_v49 = vpop.f32.mrf.mxu3  ;;  %v2605_v32 = vld [vmem:[%s5154_s0 + $0x278] sm:$0xf0] }
 0x101   :  { %817 = vmatmul.bf16.gmra.mxu0 %v2404_v36  ;;  %v3358_v36 = vadd.f32 %v1152_v34, %v893_v33  ;;  %v3362_v50 = vadd.f32 %v1154_v49, %v895_v48  ;;  %v2789_v48 = vld [vmem:[%s5154_s0 + $0x124] sm:$0xf]  ;;  %v2437_v49 = vld [vmem:[%s5154_s0 + $0x128] sm:$0xf0] }
 0x102   :  { %1076 = vmatmul.bf16.gmra.mxu1 %v2408_v39  ;;  %v2420_v39 = vor.u32 %v2786_v30, %v2419_v29  ;;  %v2832_v29 = vld [vmem:[%s5154_s0 + $0x274] sm:$0xf0]  ;;  %v2831_v30 = vld [vmem:[%s5154_s0 + $0x274] sm:$0xf] }
 0x103   :  { %5256 = vst [vmem:[#allocation22_spill] sm:$0xff] %v3358_v36  ;;  %v2604_v31 = vor.u32 %v2832_v29, %v2603_v25  ;;  %v2443_v25 = vld [vmem:[%s5154_s0 + $0x130] sm:$0xf]  ;;  %v2792_v29 = vld [vmem:[%s5154_s0 + $0x134] sm:$0xf0] }
 0x104   :  { %5257 = vst [vmem:[#allocation23_spill] sm:$0xff] %v3362_v50 }
 0x106   :  { %v780_v55 = vpop.f32.mrf.mxu0 }
 0x107   :  { %v1039_v57 = vpop.f32.mrf.mxu1 }
 0x108   :  { %v3312_v59 = vadd.f32 %v1039_v57, %v780_v55  ;;  %v2829_v55 = vld [vmem:[%s5154_s0 + $0x264] sm:$0xf]  ;;  %v2596_v57 = vor.u32 %v2830_v53, %v2595_v52 }
 0x109   :  { %v2600_v62 = vor.u32 %v2829_v55, %v2597_v58  ;;  %v2440_v58 = vor.u32 %v2789_v48, %v2437_v49 }
 0x10a   :  { %5251 = vst [vmem:[#allocation17_spill] sm:$0xff] %v3312_v59  ;;  %937 = vmatmul.bf16.gmra.mxu2 %v2596_v57 }
 0x10b   :  { %1196 = vmatmul.bf16.gmra.mxu3 %v2600_v62 }
 0x10e   :  { %v783_v7 = vpop.f32.mrf.mxu0 }
 0x10f   :  { %v1042_v9 = vpop.f32.mrf.mxu1 }
 0x110   :  { %v3328_v11 = vadd.f32 %v1042_v9, %v783_v7  ;;  %v898_v7 = vpop.f32.mrf.mxu2  ;;  %v1157_v9 = vpop.f32.mrf.mxu3 }
 0x111   :  { %822 = vmatmul.bf16.gmra.mxu0 %v2412_v5  ;;  %v2787_v5 = vld [vmem:[%s5154_s0 + $0x114] sm:$0xf]  ;;  %v3390_v12 = vadd.f32 %v1157_v9, %v898_v7  ;;  %v2834_v7 = vld [vmem:[%s5154_s0 + $0x284] sm:$0xf0]  ;;  %v2833_v9 = vld [vmem:[%s5154_s0 + $0x284] sm:$0xf] }
 0x112   :  { %5253 = vst [vmem:[#allocation19_spill] sm:$0xff] %v3328_v11  ;;  %1081 = vmatmul.bf16.gmra.mxu1 %v2416_v6  ;;  %v2429_v6 = vld [vmem:[%s5154_s0 + $0x118] sm:$0xf0] }
 0x113   :  { %5259 = vst [vmem:[#allocation25_spill] sm:$0xff] %v3390_v12  ;;  %v2432_v16 = vor.u32 %v2787_v5, %v2429_v6  ;;  %v2611_v6 = vld [vmem:[%s5154_s0 + $0x280] sm:$0xf] }
 0x116   :  { %v785_v23 = vpop.f32.mrf.mxu0 }
 0x117   :  { %v1044_v24 = vpop.f32.mrf.mxu1 }
 0x118   :  { %v3344_v26 = vadd.f32 %v1044_v24, %v785_v23  ;;  %v900_v22 = vpop.f32.mrf.mxu2  ;;  %v1159_v23 = vpop.f32.mrf.mxu3 }
 0x119   :  { %v3394_v24 = vadd.f32 %v1159_v23, %v900_v22 }
 0x11a   :  { %5255 = vst [vmem:[#allocation21_spill] sm:$0xff] %v3344_v26  ;;  %942 = vmatmul.bf16.gmra.mxu2 %v2604_v31  ;;  %v2445_v31 = vld [vmem:[%s5154_s0 + $0x138] sm:$0xf0] }
 0x11b   :  { %5261 = vst [vmem:[#allocation27_spill] sm:$0xff] %v3394_v24 }
 0x11e   :  { %v788_v41 = vpop.f32.mrf.mxu0 }
 0x11f   :  { %v1047_v43 = vpop.f32.mrf.mxu1 }
 0x120   :  { %v3360_v44 = vadd.f32 %v1047_v43, %v788_v41  ;;  %v2435_v41 = vld [vmem:[%s5154_s0 + $0x120] sm:$0xf]  ;;  %v2790_v43 = vld [vmem:[%s5154_s0 + $0x124] sm:$0xf0]  ;;  %v903_v52 = vpop.f32.mrf.mxu2  ;;  %v1162_v53 = vpop.f32.mrf.mxu3 }
 0x121   :  { %827 = vmatmul.bf16.gmra.mxu0 %v2420_v39  ;;  %v2608_v39 = vor.u32 %v2831_v30, %v2605_v32  ;;  %v3422_v55 = vadd.f32 %v1162_v53, %v903_v52  ;;  %v2436_v57 = vor.u32 %v2790_v43, %v2435_v41  ;;  %v2791_v30 = vld [vmem:[%s5154_s0 + $0x134] sm:$0xf] }
 0x122   :  { %1086 = vmatmul.bf16.gmra.mxu1 %v2424_v40  ;;  %v2448_v41 = vor.u32 %v2791_v30, %v2445_v31 }
 0x123   :  { %1201 = vmatmul.bf16.gmra.mxu3 %v2608_v39  ;;  %5263 = vst [vmem:[#allocation29_spill] sm:$0xff] %v3422_v55  ;;  %v2444_v39 = vor.u32 %v2792_v29, %v2443_v25 }
 0x126   :  { %v790_v60 = vpop.f32.mrf.mxu0 }
 0x127   :  { %v1049_v61 = vpop.f32.mrf.mxu1 }
 0x128   :  { %v3376_v63 = vadd.f32 %v1049_v61, %v790_v60  ;;  %v905_v2 = vpop.f32.mrf.mxu2  ;;  %v1164_v3 = vpop.f32.mrf.mxu3 }
 0x129   :  { %v3426_v5 = vadd.f32 %v1164_v3, %v905_v2  ;;  %v2621_v3 = vld [vmem:[%s5154_s0 + $0x298] sm:$0xf0] }
 0x12a   :  { %5258 = vst [vmem:[#allocation24_spill] sm:$0xff] %v3376_v63 }
 0x12b   :  { %5265 = vst [vmem:[#allocation31_spill] sm:$0xff] %v3426_v5 }
 0x12e   :  { %v793_v18 = vpop.f32.mrf.mxu0 }
 0x12f   :  { %v1052_v20 = vpop.f32.mrf.mxu1 }
 0x130   :  { %v3392_v21 = vadd.f32 %v1052_v20, %v793_v18  ;;  %v908_v32 = vpop.f32.mrf.mxu2 }
 0x131   :  { %832 = vmatmul.bf16.gmra.mxu0 %v2428_v13  ;;  %v2612_v13 = vor.u32 %v2834_v7, %v2611_v6 }
 0x132   :  { %5260 = vst [vmem:[#allocation26_spill] sm:$0xff] %v3392_v21  ;;  %1091 = vmatmul.bf16.gmra.mxu1 %v2432_v16  ;;  %v2613_v16 = vld [vmem:[%s5154_s0 + $0x288] sm:$0xf0] }
 0x133   :  { %v2616_v22 = vor.u32 %v2833_v9, %v2613_v16  ;;  %947 = vmatmul.bf16.gmra.mxu2 %v2612_v13  ;;  %v2451_v16 = vld [vmem:[%s5154_s0 + $0x140] sm:$0xf] }
 0x135   :  { %1206 = vmatmul.bf16.gmra.mxu3 %v2616_v22  ;;  %v2453_v22 = vld [vmem:[%s5154_s0 + $0x148] sm:$0xf0] }
 0x136   :  { %v795_v33 = vpop.f32.mrf.mxu0 }
 0x137   :  { %v1054_v34 = vpop.f32.mrf.mxu1 }
 0x138   :  { %v3408_v40 = vadd.f32 %v1054_v34, %v795_v33  ;;  %v1167_v33 = vpop.f32.mrf.mxu3  ;;  %v910_v52 = vpop.f32.mrf.mxu2 }
 0x139   :  { %v3454_v34 = vadd.f32 %v1167_v33, %v908_v32 }
 0x13a   :  { %5262 = vst [vmem:[#allocation28_spill] sm:$0xff] %v3408_v40 }
 0x13b   :  { %5267 = vst [vmem:[#allocation33_spill] sm:$0xff] %v3454_v34 }
 0x13e   :  { %v798_v60 = vpop.f32.mrf.mxu0 }
 0x13f   :  { %v1057_v61 = vpop.f32.mrf.mxu1 }
 0x140   :  { %v3424_v62 = vadd.f32 %v1057_v61, %v798_v60  ;;  %v1169_v53 = vpop.f32.mrf.mxu3  ;;  %v2836_v60 = vld [vmem:[%s5154_s0 + $0x294] sm:$0xf0]  ;;  %v2835_v61 = vld [vmem:[%s5154_s0 + $0x294] sm:$0xf]  ;;  %v913_v25 = vpop.f32.mrf.mxu2 }
 0x141   :  { %837 = vmatmul.bf16.gmra.mxu0 %v2436_v57  ;;  %v3458_v57 = vadd.f32 %v1169_v53, %v910_v52  ;;  %v2624_v9 = vor.u32 %v2835_v61, %v2621_v3  ;;  %v2627_v53 = vld [vmem:[%s5154_s0 + $0x2a0] sm:$0xf] }
 0x142   :  { %5264 = vst [vmem:[#allocation30_spill] sm:$0xff] %v3424_v62  ;;  %1096 = vmatmul.bf16.gmra.mxu1 %v2440_v58  ;;  %v2619_v58 = vld [vmem:[%s5154_s0 + $0x290] sm:$0xf] }
 0x143   :  { %5269 = vst [vmem:[#allocation35_spill] sm:$0xff] %v3458_v57  ;;  %v2620_v2 = vor.u32 %v2836_v60, %v2619_v58  ;;  %v2838_v58 = vld [vmem:[%s5154_s0 + $0x2a4] sm:$0xf0]  ;;  %v2837_v60 = vld [vmem:[%s5154_s0 + $0x2a4] sm:$0xf] }
 0x144   :  { %v2628_v61 = vor.u32 %v2838_v58, %v2627_v53 }
 0x145   :  { %952 = vmatmul.bf16.gmra.mxu2 %v2620_v2  ;;  %1211 = vmatmul.bf16.gmra.mxu3 %v2624_v9  ;;  %v2629_v2 = vld [vmem:[%s5154_s0 + $0x2a8] sm:$0xf0] }
 0x146   :  { %v800_v18 = vpop.f32.mrf.mxu0 }
 0x147   :  { %v1059_v20 = vpop.f32.mrf.mxu1 }
 0x148   :  { %v3440_v23 = vadd.f32 %v1059_v20, %v800_v18  ;;  %v2794_v18 = vld [vmem:[%s5154_s0 + $0x144] sm:$0xf0]  ;;  %v2793_v20 = vld [vmem:[%s5154_s0 + $0x144] sm:$0xf]  ;;  %v1172_v29 = vpop.f32.mrf.mxu3 }
 0x149   :  { %v3486_v30 = vadd.f32 %v1172_v29, %v913_v25  ;;  %v2452_v31 = vor.u32 %v2794_v18, %v2451_v16  ;;  %v2456_v32 = vor.u32 %v2793_v20, %v2453_v22  ;;  %v2459_v16 = vld [vmem:[%s5154_s0 + $0x150] sm:$0xf]  ;;  %v2796_v18 = vld [vmem:[%s5154_s0 + $0x154] sm:$0xf0]  ;;  %v2795_v20 = vld [vmem:[%s5154_s0 + $0x154] sm:$0xf] }
 0x14a   :  { %5266 = vst [vmem:[#allocation32_spill] sm:$0xff] %v3440_v23  ;;  %v2461_v22 = vld [vmem:[%s5154_s0 + $0x158] sm:$0xf0] }
 0x14b   :  { %5271 = vst [vmem:[#allocation37_spill] sm:$0xff] %v3486_v30  ;;  %v2659_v30 = vld [vmem:[%s5154_s0 + $0x2e0] sm:$0xf] }
 0x14e   :  { %v803_v43 = vpop.f32.mrf.mxu0 }
 0x14f   :  { %v1062_v48 = vpop.f32.mrf.mxu1 }
 0x150   :  { %v3456_v49 = vadd.f32 %v1062_v48, %v803_v43  ;;  %v915_v43 = vpop.f32.mrf.mxu2  ;;  %v1174_v48 = vpop.f32.mrf.mxu3 }
 0x151   :  { %842 = vmatmul.bf16.gmra.mxu0 %v2444_v39  ;;  %v3490_v52 = vadd.f32 %v1174_v48, %v915_v43 }
 0x152   :  { %5268 = vst [vmem:[#allocation34_spill] sm:$0xff] %v3456_v49  ;;  %1101 = vmatmul.bf16.gmra.mxu1 %v2448_v41 }
 0x153   :  { %5273 = vst [vmem:[#allocation39_spill] sm:$0xff] %v3490_v52 }
 0x155   :  { %957 = vmatmul.bf16.gmra.mxu2 %v2628_v61  ;;  %v2635_v61 = vld [vmem:[%s5154_s0 + $0x2b0] sm:$0xf] }
 0x156   :  { %v805_v6 = vpop.f32.mrf.mxu0 }
 0x157   :  { %v1064_v7 = vpop.f32.mrf.mxu1 }
 0x158   :  { %v3472_v13 = vadd.f32 %v1064_v7, %v805_v6  ;;  %v2632_v7 = vor.u32 %v2837_v60, %v2629_v2  ;;  %v918_v25 = vpop.f32.mrf.mxu2  ;;  %v1177_v29 = vpop.f32.mrf.mxu3  ;;  %v2840_v2 = vld [vmem:[%s5154_s0 + $0x2b4] sm:$0xf0] }
 0x15a   :  { %5270 = vst [vmem:[#allocation36_spill] sm:$0xff] %v3472_v13  ;;  %1216 = vmatmul.bf16.gmra.mxu3 %v2632_v7  ;;  %v2637_v7 = vld [vmem:[%s5154_s0 + $0x2b8] sm:$0xf0] }
 0x15e   :  { %v808_v33 = vpop.f32.mrf.mxu0 }
 0x15f   :  { %v1067_v39 = vpop.f32.mrf.mxu1 }
 0x160   :  { %v3488_v41 = vadd.f32 %v1067_v39, %v808_v33  ;;  %v2464_v33 = vor.u32 %v2795_v20, %v2461_v22  ;;  %v920_v53 = vpop.f32.mrf.mxu2  ;;  %v1179_v58 = vpop.f32.mrf.mxu3 }
 0x161   :  { %847 = vmatmul.bf16.gmra.mxu0 %v2452_v31  ;;  %v3518_v31 = vadd.f32 %v1177_v29, %v918_v25  ;;  %v3522_v60 = vadd.f32 %v1179_v58, %v920_v53  ;;  %v2467_v25 = vld [vmem:[%s5154_s0 + $0x160] sm:$0xf]  ;;  %v2798_v29 = vld [vmem:[%s5154_s0 + $0x164] sm:$0xf0] }
 0x162   :  { %5272 = vst [vmem:[#allocation38_spill] sm:$0xff] %v3488_v41  ;;  %1106 = vmatmul.bf16.gmra.mxu1 %v2456_v32  ;;  %v2460_v32 = vor.u32 %v2796_v18, %v2459_v16  ;;  %v2468_v58 = vor.u32 %v2798_v29, %v2467_v25  ;;  %v2841_v25 = vld [vmem:[%s5154_s0 + $0x2c4] sm:$0xf] }
 0x163   :  { %5275 = vst [vmem:[#allocation41_spill] sm:$0xff] %v3518_v31  ;;  %v2651_v31 = vld [vmem:[%s5154_s0 + $0x2d0] sm:$0xf] }
 0x164   :  { %5277 = vst [vmem:[#allocation43_spill] sm:$0xff] %v3522_v60 }
 0x166   :  { %v810_v3 = vpop.f32.mrf.mxu0 }
 0x167   :  { %v1069_v6 = vpop.f32.mrf.mxu1 }
 0x168   :  { %v3504_v9 = vadd.f32 %v1069_v6, %v810_v3  ;;  %v2839_v3 = vld [vmem:[%s5154_s0 + $0x2b4] sm:$0xf]  ;;  %v2636_v6 = vor.u32 %v2840_v2, %v2635_v61 }
 0x169   :  { %v2640_v20 = vor.u32 %v2839_v3, %v2637_v7 }
 0x16a   :  { %5274 = vst [vmem:[#allocation40_spill] sm:$0xff] %v3504_v9  ;;  %962 = vmatmul.bf16.gmra.mxu2 %v2636_v6 }
 0x16b   :  { %1221 = vmatmul.bf16.gmra.mxu3 %v2640_v20  ;;  %v2643_v20 = vld [vmem:[%s5154_s0 + $0x2c0] sm:$0xf] }
 0x16e   :  { %v813_v39 = vpop.f32.mrf.mxu0 }
 0x16f   :  { %v1072_v43 = vpop.f32.mrf.mxu1 }
 0x170   :  { %v3520_v48 = vadd.f32 %v1072_v43, %v813_v39  ;;  %v923_v39 = vpop.f32.mrf.mxu2  ;;  %v1182_v43 = vpop.f32.mrf.mxu3 }
 0x171   :  { %852 = vmatmul.bf16.gmra.mxu0 %v2460_v32  ;;  %v2797_v32 = vld [vmem:[%s5154_s0 + $0x164] sm:$0xf]  ;;  %v3550_v53 = vadd.f32 %v1182_v43, %v923_v39  ;;  %v2842_v39 = vld [vmem:[%s5154_s0 + $0x2c4] sm:$0xf0] }
 0x172   :  { %5276 = vst [vmem:[#allocation42_spill] sm:$0xff] %v3520_v48  ;;  %1111 = vmatmul.bf16.gmra.mxu1 %v2464_v33  ;;  %v2469_v33 = vld [vmem:[%s5154_s0 + $0x168] sm:$0xf0]  ;;  %v2644_v29 = vor.u32 %v2842_v39, %v2643_v20 }
 0x173   :  { %5279 = vst [vmem:[#allocation45_spill] sm:$0xff] %v3550_v53  ;;  %v2472_v61 = vor.u32 %v2797_v32, %v2469_v33  ;;  %v2645_v32 = vld [vmem:[%s5154_s0 + $0x2c8] sm:$0xf0] }
 0x176   :  { %v815_v16 = vpop.f32.mrf.mxu0 }
 0x177   :  { %v1074_v18 = vpop.f32.mrf.mxu1 }
 0x178   :  { %v3536_v22 = vadd.f32 %v1074_v18, %v815_v16  ;;  %v925_v7 = vpop.f32.mrf.mxu2  ;;  %v1184_v16 = vpop.f32.mrf.mxu3 }
 0x179   :  { %v3554_v18 = vadd.f32 %v1184_v16, %v925_v7  ;;  %v2799_v7 = vld [vmem:[%s5154_s0 + $0x174] sm:$0xf]  ;;  %v2477_v16 = vld [vmem:[%s5154_s0 + $0x178] sm:$0xf0] }
 0x17a   :  { %5278 = vst [vmem:[#allocation44_spill] sm:$0xff] %v3536_v22  ;;  %967 = vmatmul.bf16.gmra.mxu2 %v2644_v29 }
 0x17b   :  { %5281 = vst [vmem:[#allocation47_spill] sm:$0xff] %v3554_v18 }
 0x17e   :  { %v818_v2 = vpop.f32.mrf.mxu0 }
 0x17f   :  { %v1077_v3 = vpop.f32.mrf.mxu1 }
 0x180   :  { %v3552_v6 = vadd.f32 %v1077_v3, %v818_v2  ;;  %v2475_v2 = vld [vmem:[%s5154_s0 + $0x170] sm:$0xf]  ;;  %v2800_v3 = vld [vmem:[%s5154_s0 + $0x174] sm:$0xf0]  ;;  %v928_v20 = vpop.f32.mrf.mxu2  ;;  %v1187_v39 = vpop.f32.mrf.mxu3 }
 0x181   :  { %857 = vmatmul.bf16.gmra.mxu0 %v2468_v58  ;;  %v2648_v58 = vor.u32 %v2841_v25, %v2645_v32  ;;  %v3582_v25 = vadd.f32 %v1187_v39, %v928_v20  ;;  %v2476_v29 = vor.u32 %v2800_v3, %v2475_v2  ;;  %v2480_v32 = vor.u32 %v2799_v7, %v2477_v16  ;;  %v2844_v20 = vld [vmem:[%s5154_s0 + $0x2d4] sm:$0xf0]  ;;  %v2843_v2 = vld [vmem:[%s5154_s0 + $0x2d4] sm:$0xf]  ;;  %v2653_v7 = vld [vmem:[%s5154_s0 + $0x2d8] sm:$0xf0] }
 0x182   :  { %5280 = vst [vmem:[#allocation46_spill] sm:$0xff] %v3552_v6  ;;  %1116 = vmatmul.bf16.gmra.mxu1 %v2472_v61  ;;  %v2652_v3 = vor.u32 %v2844_v20, %v2651_v31  ;;  %v2801_v31 = vld [vmem:[%s5154_s0 + $0x184] sm:$0xf] }
 0x183   :  { %1226 = vmatmul.bf16.gmra.mxu3 %v2648_v58  ;;  %5283 = vst [vmem:[#allocation49_spill] sm:$0xff] %v3582_v25 }
 0x186   :  { %v820_v33 = vpop.f32.mrf.mxu0 }
 0x187   :  { %v1079_v43 = vpop.f32.mrf.mxu1 }
 0x188   :  { %v3568_v61 = vadd.f32 %v1079_v43, %v820_v33  ;;  %v930_v18 = vpop.f32.mrf.mxu2  ;;  %v1189_v53 = vpop.f32.mrf.mxu3 }
 0x189   :  { %v3586_v60 = vadd.f32 %v1189_v53, %v930_v18  ;;  %v2656_v18 = vor.u32 %v2843_v2, %v2653_v7 }
 0x18a   :  { %5282 = vst [vmem:[#allocation48_spill] sm:$0xff] %v3568_v61  ;;  %972 = vmatmul.bf16.gmra.mxu2 %v2652_v3 }
 0x18b   :  { %5285 = vst [vmem:[#allocation51_spill] sm:$0xff] %v3586_v60 }
 0x18e   :  { %v823_v33 = vpop.f32.mrf.mxu0 }
 0x18f   :  { %v1082_v43 = vpop.f32.mrf.mxu1 }
 0x190   :  { %v3584_v58 = vadd.f32 %v1082_v43, %v823_v33  ;;  %v2485_v33 = vld [vmem:[%s5154_s0 + $0x188] sm:$0xf0]  ;;  %v933_v43 = vpop.f32.mrf.mxu2  ;;  %v1192_v20 = vpop.f32.mrf.mxu3 }
 0x191   :  { %862 = vmatmul.bf16.gmra.mxu0 %v2476_v29  ;;  %v2483_v29 = vld [vmem:[%s5154_s0 + $0x180] sm:$0xf]  ;;  %v3614_v2 = vadd.f32 %v1192_v20, %v933_v43  ;;  %v2488_v7 = vor.u32 %v2801_v31, %v2485_v33  ;;  %v2846_v43 = vld [vmem:[%s5154_s0 + $0x2e4] sm:$0xf0]  ;;  %v2661_v31 = vld [vmem:[%s5154_s0 + $0x2e8] sm:$0xf0] }
 0x192   :  { %5284 = vst [vmem:[#allocation50_spill] sm:$0xff] %v3584_v58  ;;  %1121 = vmatmul.bf16.gmra.mxu1 %v2480_v32  ;;  %v2802_v32 = vld [vmem:[%s5154_s0 + $0x184] sm:$0xf0] }
 0x193   :  { %1231 = vmatmul.bf16.gmra.mxu3 %v2656_v18  ;;  %5287 = vst [vmem:[#allocation53_spill] sm:$0xff] %v3614_v2  ;;  %v2484_v3 = vor.u32 %v2802_v32, %v2483_v29  ;;  %v2845_v29 = vld [vmem:[%s5154_s0 + $0x2e4] sm:$0xf]  ;;  %v2660_v32 = vor.u32 %v2846_v43, %v2659_v30 }
 0x196   :  { %v825_v16 = vpop.f32.mrf.mxu0 }
 0x197   :  { %v1084_v53 = vpop.f32.mrf.mxu1 }
 0x198   :  { %v3600_v39 = vadd.f32 %v1084_v53, %v825_v16  ;;  %v935_v60 = vpop.f32.mrf.mxu2  ;;  %v1194_v25 = vpop.f32.mrf.mxu3 }
 0x199   :  { %v3618_v52 = vadd.f32 %v1194_v25, %v935_v60  ;;  %v2664_v25 = vor.u32 %v2845_v29, %v2661_v31  ;;  %v2667_v29 = vld [vmem:[%s5154_s0 + $0x2f0] sm:$0xf]  ;;  %v2847_v31 = vld [vmem:[%s5154_s0 + $0x2f4] sm:$0xf] }
 0x19a   :  { %5286 = vst [vmem:[#allocation52_spill] sm:$0xff] %v3600_v39  ;;  %977 = vmatmul.bf16.gmra.mxu2 %v2660_v32  ;;  %v2848_v32 = vld [vmem:[%s5154_s0 + $0x2f4] sm:$0xf0] }
 0x19b   :  { %5289 = vst [vmem:[#allocation55_spill] sm:$0xff] %v3618_v52 }
 0x19e   :  { %v828_v16 = vpop.f32.mrf.mxu0 }
 0x19f   :  { %v1087_v53 = vpop.f32.mrf.mxu1 }
 0x1a0   :  { %v3616_v18 = vadd.f32 %v1087_v53, %v828_v16 }
 0x1a1   :  { %867 = vmatmul.bf16.gmra.mxu0 %v2484_v3  ;;  %v938_v3 = vpop.f32.mrf.mxu2 }
 0x1a2   :  { %5288 = vst [vmem:[#allocation54_spill] sm:$0xff] %v3616_v18  ;;  %1126 = vmatmul.bf16.gmra.mxu1 %v2488_v7  ;;  %v1197_v7 = vpop.f32.mrf.mxu3 }
 0x1a3   :  { %1236 = vmatmul.bf16.gmra.mxu3 %v2664_v25  ;;  %v3634_v16 = vadd.f32 %v1197_v7, %v938_v3 }
 0x1a5   :  { %5291 = vst [vmem:[#allocation57_spill] sm:$0xff] %v3634_v16 }
 0x1a6   :  { %v830_v33 = vpop.f32.mrf.mxu0 }
 0x1a7   :  { %v1089_v60 = vpop.f32.mrf.mxu1 }
 0x1a8   :  { %v3632_v20 = vadd.f32 %v1089_v60, %v830_v33  ;;  %v2668_v33 = vor.u32 %v2848_v32, %v2667_v29 }
 0x1a9   :  { %v940_v30 = vpop.f32.mrf.mxu2 }
 0x1aa   :  { %5290 = vst [vmem:[#allocation56_spill] sm:$0xff] %v3632_v20  ;;  %v1199_v43 = vpop.f32.mrf.mxu3  ;;  %982 = vmatmul.bf16.gmra.mxu2 %v2668_v33  ;;  %v2850_v33 = vld [vmem:[%s5154_s0 + $0x304] sm:$0xf0] }
 0x1ab   :  { %v3638_v57 = vadd.f32 %v1199_v43, %v940_v30 }
 0x1ad   :  { %5293 = vst [vmem:[#allocation59_spill] sm:$0xff] %v3638_v57 }
 0x1ae   :  { %v833_v53 = vpop.f32.mrf.mxu0 }
 0x1af   :  { %v1092_v52 = vpop.f32.mrf.mxu1 }
 0x1b0   :  { %v3636_v2 = vadd.f32 %v1092_v52, %v833_v53  ;;  %v2669_v52 = vld [vmem:[%s5154_s0 + $0x2f8] sm:$0xf0] }
 0x1b1   :  { %v2672_v3 = vor.u32 %v2847_v31, %v2669_v52  ;;  %v943_v53 = vpop.f32.mrf.mxu2  ;;  %v2675_v31 = vld [vmem:[%s5154_s0 + $0x300] sm:$0xf]  ;;  %v2849_v52 = vld [vmem:[%s5154_s0 + $0x304] sm:$0xf] }
 0x1b2   :  { %5292 = vst [vmem:[#allocation58_spill] sm:$0xff] %v3636_v2  ;;  %v1202_v30 = vpop.f32.mrf.mxu3 }
 0x1b3   :  { %1241 = vmatmul.bf16.gmra.mxu3 %v2672_v3  ;;  %v3654_v43 = vadd.f32 %v1202_v30, %v943_v53  ;;  %v1463_v30 = vmul.f32 %v3118_v38, %v3118_v38 }
 0x1b5   :  { %5295 = vst [vmem:[#allocation61_spill] sm:$0xff] %v3654_v43  ;;  %v1563_v55 = vsel %vm1257_vm0, %v1463_v30, 0.0  ;;  %v1468_v30 = vmul.f32 %v3188_v19, %v3188_v19 }
 0x1b6   :  { %v835_v60 = vpop.f32.mrf.mxu0 }
 0x1b7   :  { %v1094_v25 = vpop.f32.mrf.mxu1 }
 0x1b8   :  { %v3652_v7 = vadd.f32 %v1094_v25, %v835_v60  ;;  %v2677_v60 = vld [vmem:[%s5154_s0 + $0x308] sm:$0xf0] }
 0x1b9   :  { %v945_v29 = vpop.f32.mrf.mxu2  ;;  %v2680_v53 = vor.u32 %v2849_v52, %v2677_v60  ;;  %v1261_v52 = vsel %vm1257_vm0, %v3146_v56, 0.0  ;;  %v1466_v60 = vmul.f32 %v3160_v1, %v3160_v1 }
 0x1ba   :  { %5294 = vst [vmem:[#allocation60_spill] sm:$0xff] %v3652_v7  ;;  %v1204_v32 = vpop.f32.mrf.mxu3 }
 0x1bb   :  { %v3658_v5 = vadd.f32 %v1204_v32, %v945_v29  ;;  %v1259_v29 = vsel %vm1257_vm0, %v3132_v47, 0.0  ;;  %v1465_v32 = vmul.f32 %v3146_v56, %v3146_v56  ;;  %v1568_v56 = vsel %vm1257_vm0, %v1466_v60, 0.0 }
 0x1bc   :  { %v1572_v60 = vsel %vm1257_vm0, %v1468_v30, 0.0 }
 0x1bd   :  { %5297 = vst [vmem:[#allocation63_spill] sm:$0xff] %v3658_v5 }
 0x1be   :  { %v838_v57 = vpop.f32.mrf.mxu0 }
 0x1bf   :  { %v1097_v16 = vpop.f32.mrf.mxu1 }
 0x1c0   :  { %v3656_v34 = vadd.f32 %v1097_v16, %v838_v57  ;;  %v1464_v57 = vmul.f32 %v3132_v47, %v3132_v47  ;;  %v2676_v16 = vor.u32 %v2850_v33, %v2675_v31  ;;  %v1258_v31 = vsel %vm1257_vm0, %v3118_v38, 0.0 }
 0x1c1   :  { %v1260_v43 = vadd.f32 %v1259_v29, %v1258_v31  ;;  %v948_v47 = vpop.f32.mrf.mxu2  ;;  %v1265_v29 = vsel %vm1257_vm0, %v3174_v10, 0.0 }
 0x1c2   :  { %5296 = vst [vmem:[#allocation62_spill] sm:$0xff] %v3656_v34  ;;  %987 = vmatmul.bf16.gmra.mxu2 %v2676_v16  ;;  %v1564_v33 = vsel %vm1257_vm0, %v1464_v57, 0.0  ;;  %v1263_v16 = vsel %vm1257_vm0, %v3160_v1, 0.0 }
 0x1c3   :  { %1246 = vmatmul.bf16.gmra.mxu3 %v2680_v53  ;;  %v1207_v53 = vpop.f32.mrf.mxu3  ;;  %v1565_v57 = vadd.f32 %v1564_v33, %v1563_v55  ;;  %v1262_v38 = vadd.f32 %v1261_v52, %v1260_v43  ;;  %v1267_v55 = vsel %vm1257_vm0, %v3188_v19, 0.0  ;;  %v1271_v19 = vsel %vm1257_vm0, %v3216_v37, 0.0 }
 0x1c4   :  { %v3695_v24 = vadd.f32 %v1207_v53, %v948_v47  ;;  %v1469_v47 = vmul.f32 %v3202_v28, %v3202_v28 }
 0x1c5   :  { %v1264_v31 = vadd.f32 %v1263_v16, %v1262_v38  ;;  %v1470_v38 = vmul.f32 %v3216_v37, %v3216_v37  ;;  %v1473_v37 = vmul.f32 %v3264_v14, %v3264_v14 }
 0x1c6   :  { %v840_v25 = vpop.f32.mrf.mxu0 }
 0x1c7   :  { %v1099_v3 = vpop.f32.mrf.mxu1  ;;  %v1266_v52 = vadd.f32 %v1265_v29, %v1264_v31  ;;  %v2851_v31 = vld [vmem:[%s5154_s0 + $0x314] sm:$0xf] }
 0x1c8   :  { %v3680_v5 = vadd.f32 %v1099_v3, %v840_v25  ;;  %v1566_v25 = vsel %vm1257_vm0, %v1465_v32, 0.0  ;;  %v1467_v3 = vmul.f32 %v3174_v10, %v3174_v10 }
 0x1c9   :  { %v1567_v32 = vadd.f32 %v1566_v25, %v1565_v57  ;;  %v1269_v25 = vsel %vm1257_vm0, %v3202_v28, 0.0  ;;  %v950_v53 = vpop.f32.mrf.mxu2  ;;  %v1574_v57 = vsel %vm1257_vm0, %v1469_v47, 0.0  ;;  %v1273_v47 = vsel %vm1257_vm0, %v3232_v51, 0.0 }
 0x1ca   :  { %5298 = vst [vmem:[#allocation64_spill] sm:$0xff] %v3680_v5  ;;  %v1570_v50 = vsel %vm1257_vm0, %v1467_v3, 0.0  ;;  %v1268_v3 = vadd.f32 %v1267_v55, %v1266_v52  ;;  %v1576_v55 = vsel %vm1257_vm0, %v1470_v38, 0.0 }
 0x1cb   :  { %v1569_v33 = vadd.f32 %v1568_v56, %v1567_v32  ;;  %v1471_v56 = vmul.f32 %v3232_v51, %v3232_v51  ;;  %v2683_v32 = vld [vmem:[%s5154_s0 + $0x310] sm:$0xf]  ;;  %v1275_v51 = vsel %vm1257_vm0, %v3248_v0, 0.0 }
 0x1cc   :  { %v1270_v29 = vadd.f32 %v1269_v25, %v1268_v3 }
 0x1cd   :  { %v1571_v16 = vadd.f32 %v1570_v50, %v1569_v33  ;;  %v2852_v50 = vld [vmem:[%s5154_s0 + $0x314] sm:$0xf0]  ;;  %v1472_v33 = vmul.f32 %v3248_v0, %v3248_v0  ;;  %v1578_v38 = vsel %vm1257_vm0, %v1471_v56, 0.0  ;;  %v1279_v0 = vsel %vm1257_vm0, %v3280_v27, 0.0 }
 0x1ce   :  { %v843_v12 = vpop.f32.mrf.mxu0  ;;  %v2684_v52 = vor.u32 %v2852_v50, %v2683_v32 }
 0x1cf   :  { %v1102_v1 = vpop.f32.mrf.mxu1 }
 0x1d0   :  { %v3707_v43 = vadd.f32 %v1102_v1, %v843_v12  ;;  %v1209_v1 = vpop.f32.mrf.mxu3  ;;  %v1573_v12 = vadd.f32 %v1572_v60, %v1571_v16  ;;  %v2685_v60 = vld [vmem:[%s5154_s0 + $0x318] sm:$0xf0]  ;;  %v1272_v16 = vadd.f32 %v1271_v19, %v1270_v29  ;;  %v1277_v19 = vsel %vm1257_vm0, %v3264_v14, 0.0 }
 0x1d1   :  { %v3719_v30 = vadd.f32 %v1209_v1, %v950_v53  ;;  %v2688_v1 = vor.u32 %v2851_v31, %v2685_v60  ;;  %v953_v31 = vpop.f32.mrf.mxu2  ;;  %v1582_v60 = vsel %vm1257_vm0, %v1473_v37, 0.0 }
 0x1d2   :  { %5299 = vst [vmem:[#allocation65_spill] sm:$0xff] %v3707_v43  ;;  %v1575_v25 = vadd.f32 %v1574_v57, %v1573_v12  ;;  %992 = vmatmul.bf16.gmra.mxu2 %v2684_v52  ;;  %v1274_v50 = vadd.f32 %v1273_v47, %v1272_v16  ;;  %v1580_v57 = vsel %vm1257_vm0, %v1472_v33, 0.0  ;;  %v1474_v12 = vmul.f32 %v3280_v27, %v3280_v27 }
 0x1d3   :  { %1251 = vmatmul.bf16.gmra.mxu3 %v2688_v1  ;;  %v1281_v1 = vsel %vm1257_vm0, %v3296_v42, 0.0 }
 0x1d4   :  { %v1577_v32 = vadd.f32 %v1576_v55, %v1575_v25  ;;  %v1276_v56 = vadd.f32 %v1275_v51, %v1274_v50  ;;  %v1475_v55 = vmul.f32 %v3296_v42, %v3296_v42  ;;  %v1584_v16 = vsel %vm1257_vm0, %v1474_v12, 0.0 }
 0x1d5   :  { %v1476_v51 = vmul.f32 %v3312_v59, %v3312_v59 }
 0x1d6   :  { %v3738_v3 = vpop.f32.mrf.mxu0  ;;  %v1579_v29 = vadd.f32 %v1578_v38, %v1577_v32  ;;  %v1278_v33 = vadd.f32 %v1277_v19, %v1276_v56  ;;  %v1586_v27 = vsel %vm1257_vm0, %v1475_v55, 0.0  ;;  %v1477_v19 = vmul.f32 %v3328_v11, %v3328_v11 }
 0x1d7   :  { %v3740_v53 = vpop.f32.mrf.mxu1  ;;  %v1588_v56 = vsel %vm1257_vm0, %v1476_v51, 0.0 }
 0x1d8   :  { %v1212_v47 = vpop.f32.mrf.mxu3  ;;  %v1581_v52 = vadd.f32 %v1580_v57, %v1579_v29  ;;  %v1280_v38 = vadd.f32 %v1279_v0, %v1278_v33  ;;  %v1283_v57 = vsel %vm1257_vm0, %v3312_v59, 0.0  ;;  %v1478_v0 = vmul.f32 %v3344_v26, %v3344_v26 }
 0x1d9   :  { %v3757_v25 = vadd.f32 %v1212_v47, %v953_v31  ;;  %v1285_v31 = vsel %vm1257_vm0, %v3328_v11, 0.0  ;;  %v1590_v55 = vsel %vm1257_vm0, %v1477_v19, 0.0  ;;  %v1287_v33 = vsel %vm1257_vm0, %v3344_v26, 0.0 }
 0x1da   :  { %v1583_v37 = vadd.f32 %v1582_v60, %v1581_v52  ;;  %v1282_v29 = vadd.f32 %v1281_v1, %v1280_v38  ;;  %v955_v52 = vpop.f32.mrf.mxu2  ;;  %v1592_v11 = vsel %vm1257_vm0, %v1478_v0, 0.0 }
 0x1dc   :  { %v1585_v12 = vadd.f32 %v1584_v16, %v1583_v37  ;;  %v1284_v47 = vadd.f32 %v1283_v57, %v1282_v29  ;;  %v1479_v16 = vmul.f32 %v3360_v44, %v3360_v44  ;;  %v1480_v57 = vmul.f32 %v3376_v63, %v3376_v63 }
 0x1de   :  { %v3764_v32 = vpop.f32.mrf.mxu0  ;;  %v1587_v60 = vadd.f32 %v1586_v27, %v1585_v12  ;;  %v1286_v51 = vadd.f32 %v1285_v31, %v1284_v47  ;;  %v1289_v27 = vsel %vm1257_vm0, %v3360_v44, 0.0  ;;  %v1594_v59 = vsel %vm1257_vm0, %v1479_v16, 0.0 }
 0x1df   :  { %v3766_v50 = vpop.f32.mrf.mxu1  ;;  %v1481_v31 = vmul.f32 %v3392_v21, %v3392_v21  ;;  %v1596_v47 = vsel %vm1257_vm0, %v1480_v57, 0.0 }
 0x1e0   :  { %v1214_v1 = vpop.f32.mrf.mxu3  ;;  %v1589_v37 = vadd.f32 %v1588_v56, %v1587_v60  ;;  %v1288_v12 = vadd.f32 %v1287_v33, %v1286_v51  ;;  %v1291_v56 = vsel %vm1257_vm0, %v3376_v63, 0.0  ;;  %v1295_v51 = vsel %vm1257_vm0, %v3408_v40, 0.0 }
 0x1e1   :  { %v3783_v38 = vadd.f32 %v1214_v1, %v955_v52  ;;  %v1293_v52 = vsel %vm1257_vm0, %v3392_v21, 0.0  ;;  %v1598_v16 = vsel %vm1257_vm0, %v1481_v31, 0.0 }
 0x1e2   :  { %v1591_v19 = vadd.f32 %v1590_v55, %v1589_v37  ;;  %v1290_v60 = vadd.f32 %v1289_v27, %v1288_v12  ;;  %v1482_v55 = vmul.f32 %v3408_v40, %v3408_v40  ;;  %v958_v37 = vpop.f32.mrf.mxu2 }
 0x1e4   :  { %v1593_v0 = vadd.f32 %v1592_v11, %v1591_v19  ;;  %v1292_v1 = vadd.f32 %v1291_v56, %v1290_v60  ;;  %v1483_v11 = vmul.f32 %v3424_v62, %v3424_v62  ;;  %v1600_v21 = vsel %vm1257_vm0, %v1482_v55, 0.0 }
 0x1e5   :  { %v1484_v56 = vmul.f32 %v3440_v23, %v3440_v23 }
 0x1e6   :  { %v3790_v29 = vpop.f32.mrf.mxu0  ;;  %v1595_v33 = vadd.f32 %v1594_v59, %v1593_v0  ;;  %v1294_v57 = vadd.f32 %v1293_v52, %v1292_v1  ;;  %v1297_v59 = vsel %vm1257_vm0, %v3424_v62, 0.0  ;;  %v1602_v63 = vsel %vm1257_vm0, %v1483_v11, 0.0 }
 0x1e7   :  { %v3792_v26 = vpop.f32.mrf.mxu1  ;;  %v1485_v52 = vmul.f32 %v3456_v49, %v3456_v49  ;;  %v1604_v1 = vsel %vm1257_vm0, %v1484_v56, 0.0 }
 0x1e8   :  { %v1217_v27 = vpop.f32.mrf.mxu3  ;;  %v1597_v19 = vadd.f32 %v1596_v47, %v1595_v33  ;;  %v1296_v0 = vadd.f32 %v1295_v51, %v1294_v57  ;;  %v1299_v47 = vsel %vm1257_vm0, %v3440_v23, 0.0  ;;  %v1303_v57 = vsel %vm1257_vm0, %v3472_v13, 0.0 }
 0x1e9   :  { %v3809_v12 = vadd.f32 %v1217_v27, %v958_v37  ;;  %v1301_v37 = vsel %vm1257_vm0, %v3456_v49, 0.0  ;;  %v1606_v11 = vsel %vm1257_vm0, %v1485_v52, 0.0 }
 0x1ea   :  { %v1599_v31 = vadd.f32 %v1598_v16, %v1597_v19  ;;  %v1298_v33 = vadd.f32 %v1297_v59, %v1296_v0  ;;  %v1486_v16 = vmul.f32 %v3472_v13, %v3472_v13  ;;  %v960_v19 = vpop.f32.mrf.mxu2 }
 0x1ec   :  { %v1601_v55 = vadd.f32 %v1600_v21, %v1599_v31  ;;  %v1300_v27 = vadd.f32 %v1299_v47, %v1298_v33  ;;  %v1487_v21 = vmul.f32 %v3488_v41, %v3488_v41  ;;  %v1608_v49 = vsel %vm1257_vm0, %v1486_v16, 0.0 }
 0x1ed   :  { %v1488_v47 = vmul.f32 %v3504_v9, %v3504_v9 }
 0x1ee   :  { %v3816_v60 = vpop.f32.mrf.mxu0  ;;  %v1603_v51 = vadd.f32 %v1602_v63, %v1601_v55  ;;  %v1302_v56 = vadd.f32 %v1301_v37, %v1300_v27  ;;  %v1305_v63 = vsel %vm1257_vm0, %v3488_v41, 0.0  ;;  %v1610_v23 = vsel %vm1257_vm0, %v1487_v21, 0.0 }
 0x1ef   :  { %v3818_v40 = vpop.f32.mrf.mxu1  ;;  %v1489_v37 = vmul.f32 %v3520_v48, %v3520_v48  ;;  %v1612_v27 = vsel %vm1257_vm0, %v1488_v47, 0.0 }
 0x1f0   :  { %v1219_v59 = vpop.f32.mrf.mxu3  ;;  %v1605_v31 = vadd.f32 %v1604_v1, %v1603_v51  ;;  %v1304_v55 = vadd.f32 %v1303_v57, %v1302_v56  ;;  %v1307_v1 = vsel %vm1257_vm0, %v3504_v9, 0.0  ;;  %v1311_v56 = vsel %vm1257_vm0, %v3536_v22, 0.0 }
 0x1f1   :  { %v3835_v0 = vadd.f32 %v1219_v59, %v960_v19  ;;  %v1309_v19 = vsel %vm1257_vm0, %v3520_v48, 0.0  ;;  %v1614_v21 = vsel %vm1257_vm0, %v1489_v37, 0.0 }
 0x1f2   :  { %v1607_v52 = vadd.f32 %v1606_v11, %v1605_v31  ;;  %v1306_v51 = vadd.f32 %v1305_v63, %v1304_v55  ;;  %v1490_v11 = vmul.f32 %v3536_v22, %v3536_v22  ;;  %v963_v31 = vpop.f32.mrf.mxu2 }
 0x1f3   :  { %v1427_v41 = vsel %vm1257_vm0, %v3835_v0, 0.0 }
 0x1f4   :  { %v1609_v16 = vadd.f32 %v1608_v49, %v1607_v52  ;;  %v1308_v59 = vadd.f32 %v1307_v1, %v1306_v51  ;;  %v1491_v49 = vmul.f32 %v3552_v6, %v3552_v6  ;;  %v1616_v48 = vsel %vm1257_vm0, %v1490_v11, 0.0 }
 0x1f5   :  { %v1492_v1 = vmul.f32 %v3568_v61, %v3568_v61 }
 0x1f6   :  { %v3842_v33 = vpop.f32.mrf.mxu0  ;;  %v1611_v57 = vadd.f32 %v1610_v23, %v1609_v16  ;;  %v1310_v47 = vadd.f32 %v1309_v19, %v1308_v59  ;;  %v1313_v23 = vsel %vm1257_vm0, %v3552_v6, 0.0  ;;  %v1618_v9 = vsel %vm1257_vm0, %v1491_v49, 0.0 }
 0x1f7   :  { %v3844_v13 = vpop.f32.mrf.mxu1  ;;  %v1493_v19 = vmul.f32 %v3584_v58, %v3584_v58  ;;  %v1620_v59 = vsel %vm1257_vm0, %v1492_v1, 0.0  ;;  %v1546_v6 = vmul.f32 %v3783_v38, %v3783_v38 }
 0x1f8   :  { %v1222_v63 = vpop.f32.mrf.mxu3  ;;  %v1613_v52 = vadd.f32 %v1612_v27, %v1611_v57  ;;  %v1312_v16 = vadd.f32 %v1311_v56, %v1310_v47  ;;  %v1315_v27 = vsel %vm1257_vm0, %v3568_v61, 0.0  ;;  %v1319_v47 = vsel %vm1257_vm0, %v3600_v39, 0.0 }
 0x1f9   :  { %v3861_v55 = vadd.f32 %v1222_v63, %v963_v31  ;;  %v1317_v31 = vsel %vm1257_vm0, %v3584_v58, 0.0  ;;  %v1622_v49 = vsel %vm1257_vm0, %v1493_v19, 0.0 }
 0x1fa   :  { %v1615_v37 = vadd.f32 %v1614_v21, %v1613_v52  ;;  %v1314_v57 = vadd.f32 %v1313_v23, %v1312_v16  ;;  %v1494_v21 = vmul.f32 %v3600_v39, %v3600_v39  ;;  %v965_v52 = vpop.f32.mrf.mxu2 }
 0x1fc   :  { %v1617_v11 = vadd.f32 %v1616_v48, %v1615_v37  ;;  %v1316_v63 = vadd.f32 %v1315_v27, %v1314_v57  ;;  %v1495_v48 = vmul.f32 %v3616_v18, %v3616_v18  ;;  %v1624_v58 = vsel %vm1257_vm0, %v1494_v21, 0.0 }
 0x1fd   :  { %v1496_v27 = vmul.f32 %v3632_v20, %v3632_v20 }
 0x1fe   :  { %v3868_v51 = vpop.f32.mrf.mxu0  ;;  %v1619_v56 = vadd.f32 %v1618_v9, %v1617_v11  ;;  %v1318_v1 = vadd.f32 %v1317_v31, %v1316_v63  ;;  %v1321_v9 = vsel %vm1257_vm0, %v3616_v18, 0.0  ;;  %v1626_v61 = vsel %vm1257_vm0, %v1495_v48, 0.0 }
 0x1ff   :  { %v3870_v22 = vpop.f32.mrf.mxu1  ;;  %v1497_v31 = vmul.f32 %v3636_v2, %v3636_v2  ;;  %v1628_v63 = vsel %vm1257_vm0, %v1496_v27, 0.0  ;;  %v1421_v18 = vsel %vm1257_vm0, %v3757_v25, 0.0 }
 0x200   :  { %v1224_v23 = vpop.f32.mrf.mxu3  ;;  %v1621_v37 = vadd.f32 %v1620_v59, %v1619_v56  ;;  %v1320_v11 = vadd.f32 %v1319_v47, %v1318_v1  ;;  %v1323_v59 = vsel %vm1257_vm0, %v3632_v20, 0.0  ;;  %v1499_v1 = vmul.f32 %v3656_v34, %v3656_v34 }
 0x201   :  { %v3887_v16 = vadd.f32 %v1224_v23, %v965_v52  ;;  %v1325_v52 = vsel %vm1257_vm0, %v3636_v2, 0.0  ;;  %v1630_v48 = vsel %vm1257_vm0, %v1497_v31, 0.0 }
 0x202   :  { %v1623_v19 = vadd.f32 %v1622_v49, %v1621_v37  ;;  %v1322_v56 = vadd.f32 %v1321_v9, %v1320_v11  ;;  %v1498_v49 = vmul.f32 %v3652_v7, %v3652_v7  ;;  %v1327_v37 = vsel %vm1257_vm0, %v3652_v7, 0.0  ;;  %v5330_v7 = vld [vmem:[#allocation61_spill] sm:$0xff] }
 0x203   :  { %v1500_v11 = vmul.f32 %v3680_v5, %v3680_v5  ;;  %v1541_v2 = vmul.f32 %v5330_v7, %v5330_v7 }
 0x204   :  { %v1625_v21 = vadd.f32 %v1624_v58, %v1623_v19  ;;  %v1324_v23 = vadd.f32 %v1323_v59, %v1322_v56  ;;  %v1632_v27 = vsel %vm1257_vm0, %v1498_v49, 0.0  ;;  %v1329_v19 = vsel %vm1257_vm0, %v3656_v34, 0.0 }
 0x205   :  { %v1331_v49 = vsel %vm1257_vm0, %v3680_v5, 0.0 }
 0x206   :  { %v3894_v57 = vpop.f32.mrf.mxu0  ;;  %v1627_v47 = vadd.f32 %v1626_v61, %v1625_v21  ;;  %v1326_v9 = vadd.f32 %v1325_v52, %v1324_v23  ;;  %v3918_v61 = vadd.f32 %v3740_v53, %v3738_v3  ;;  %v1501_v21 = vmul.f32 %v3707_v43, %v3707_v43 }
 0x207   :  { %v1119_v39 = vpop.f32.mrf.mxu1  ;;  %v1634_v52 = vsel %vm1257_vm0, %v1499_v1, 0.0  ;;  %v1636_v3 = vsel %vm1257_vm0, %v1500_v11, 0.0  ;;  %v1333_v53 = vsel %vm1257_vm0, %v3707_v43, 0.0  ;;  %v3945_v11 = vadd.f32 %v3818_v40, %v3816_v60 }
 0x208   :  { %v1629_v58 = vadd.f32 %v1628_v63, %v1627_v47  ;;  %5300 = vst [vmem:[#allocation66_spill] sm:$0xff] %v3918_v61  ;;  %v1328_v31 = vadd.f32 %v1327_v37, %v1326_v9  ;;  %v3927_v47 = vadd.f32 %v3766_v50, %v3764_v32  ;;  %v3936_v37 = vadd.f32 %v3792_v26, %v3790_v29  ;;  %v968_v32 = vpop.f32.mrf.mxu2  ;;  %v1227_v50 = vpop.f32.mrf.mxu3 }
 0x209   :  { %v1638_v9 = vsel %vm1257_vm0, %v1501_v21, 0.0  ;;  %5303 = vst [vmem:[#allocation69_spill] sm:$0xff] %v3945_v11 }
 0x20a   :  { %v1631_v59 = vadd.f32 %v1630_v48, %v1629_v58  ;;  %5301 = vst [vmem:[#allocation67_spill] sm:$0xff] %v3927_v47  ;;  %v1330_v34 = vadd.f32 %v1329_v19, %v1328_v31  ;;  %v1502_v48 = vmul.f32 %v3918_v61, %v3918_v61  ;;  %v1503_v19 = vmul.f32 %v3927_v47, %v3927_v47 }
 0x20b   :  { %5302 = vst [vmem:[#allocation68_spill] sm:$0xff] %v3936_v37  ;;  %v1337_v31 = vsel %vm1257_vm0, %v3927_v47, 0.0  ;;  %v1504_v21 = vmul.f32 %v3936_v37, %v3936_v37 }
 0x20c   :  { %v1633_v23 = vadd.f32 %v1632_v27, %v1631_v59  ;;  %v1332_v58 = vadd.f32 %v1331_v49, %v1330_v34  ;;  %v1335_v27 = vsel %vm1257_vm0, %v3918_v61, 0.0  ;;  %v3947_v59 = vadd.f32 %v1227_v50, %v968_v32 }
 0x20d   :  { %v1640_v34 = vsel %vm1257_vm0, %v1502_v48, 0.0  ;;  %v1642_v32 = vsel %vm1257_vm0, %v1503_v19, 0.0  ;;  %v3965_v48 = vadd.f32 %v3870_v22, %v3868_v51  ;;  %v3973_v50 = vadd.f32 %v1119_v39, %v3894_v57 }
 0x20e   :  { %v863_v56 = vpop.f32.mrf.mxu0  ;;  %v1635_v1 = vadd.f32 %v1634_v52, %v1633_v23  ;;  %v1334_v29 = vadd.f32 %v1333_v53, %v1332_v58  ;;  %v3956_v52 = vadd.f32 %v3844_v13, %v3842_v33  ;;  %v1505_v53 = vmul.f32 %v3945_v11, %v3945_v11 }
 0x20f   :  { %v1122_v63 = vpop.f32.mrf.mxu1  ;;  %5305 = vst [vmem:[#allocation71_spill] sm:$0xff] %v3965_v48  ;;  %v1644_v13 = vsel %vm1257_vm0, %v1504_v21, 0.0  ;;  %v1341_v33 = vsel %vm1257_vm0, %v3945_v11, 0.0  ;;  %v1507_v51 = vmul.f32 %v3965_v48, %v3965_v48  ;;  %v1345_v39 = vsel %vm1257_vm0, %v3965_v48, 0.0 }
 0x210   :  { %v1637_v26 = vadd.f32 %v1636_v3, %v1635_v1  ;;  %5304 = vst [vmem:[#allocation70_spill] sm:$0xff] %v3956_v52  ;;  %v1336_v23 = vadd.f32 %v1335_v27, %v1334_v29  ;;  %v1339_v3 = vsel %vm1257_vm0, %v3936_v37, 0.0  ;;  %v1343_v22 = vsel %vm1257_vm0, %v3956_v52, 0.0 }
 0x211   :  { %5306 = vst [vmem:[#allocation72_spill] sm:$0xff] %v3973_v50  ;;  %v3980_v29 = vadd.f32 %v1122_v63, %v863_v56  ;;  %v1508_v57 = vmul.f32 %v3973_v50, %v3973_v50  ;;  %v1347_v56 = vsel %vm1257_vm0, %v3973_v50, 0.0 }
 0x212   :  { %v1639_v49 = vadd.f32 %v1638_v9, %v1637_v26  ;;  %v1338_v58 = vadd.f32 %v1337_v31, %v1336_v23  ;;  %v1506_v9 = vmul.f32 %v3956_v52, %v3956_v52  ;;  %v1646_v26 = vsel %vm1257_vm0, %v1505_v53, 0.0  ;;  %v5325_v52 = vld [vmem:[#allocation51_spill] sm:$0xff] }
 0x213   :  { %5307 = vst [vmem:[#allocation73_spill] sm:$0xff] %v3980_v29  ;;  %v1509_v63 = vmul.f32 %v3980_v29, %v3980_v29  ;;  %v1536_v11 = vmul.f32 %v5325_v52, %v5325_v52 }
 0x214   :  { %v1641_v1 = vadd.f32 %v1640_v34, %v1639_v49  ;;  %v1340_v19 = vadd.f32 %v1339_v3, %v1338_v58  ;;  %v1648_v21 = vsel %vm1257_vm0, %v1506_v9, 0.0  ;;  %v3996_v9 = vpop.f32.mrf.mxu2 }
 0x216   :  { %v865_v40 = vpop.f32.mrf.mxu0  ;;  %v1643_v27 = vadd.f32 %v1642_v32, %v1641_v1  ;;  %v1342_v31 = vadd.f32 %v1341_v33, %v1340_v19  ;;  %v1650_v1 = vsel %vm1257_vm0, %v1507_v51, 0.0  ;;  %v1654_v51 = vsel %vm1257_vm0, %v1509_v63, 0.0 }
 0x217   :  { %v1124_v60 = vpop.f32.mrf.mxu1 }
 0x218   :  { %v1645_v34 = vadd.f32 %v1644_v13, %v1643_v27  ;;  %v3987_v49 = vadd.f32 %v1124_v60, %v865_v40  ;;  %v1344_v32 = vadd.f32 %v1343_v22, %v1342_v31  ;;  %v3998_v40 = vpop.f32.mrf.mxu3  ;;  %v1652_v60 = vsel %vm1257_vm0, %v1508_v57, 0.0 }
 0x219   :  { %v1349_v27 = vsel %vm1257_vm0, %v3980_v29, 0.0 }
 0x21a   :  { %5308 = vst [vmem:[#allocation74_spill] sm:$0xff] %v3987_v49  ;;  %v1647_v23 = vadd.f32 %v1646_v26, %v1645_v34  ;;  %v1346_v33 = vadd.f32 %v1345_v39, %v1344_v32  ;;  %v1510_v19 = vmul.f32 %v3987_v49, %v3987_v49  ;;  %v1351_v34 = vsel %vm1257_vm0, %v3987_v49, 0.0 }
 0x21b   :  { %v1513_v49 = vmul.f32 %v3230_v45, %v3230_v45 }
 0x21c   :  { %v1649_v13 = vadd.f32 %v1648_v21, %v1647_v23  ;;  %v1348_v22 = vadd.f32 %v1347_v56, %v1346_v33  ;;  %v1656_v57 = vsel %vm1257_vm0, %v1510_v19, 0.0 }
 0x21e   :  { %v868_v3 = vpop.f32.mrf.mxu0  ;;  %v1651_v26 = vadd.f32 %v1650_v1, %v1649_v13  ;;  %v1350_v39 = vadd.f32 %v1349_v27, %v1348_v22  ;;  %v4022_v22 = vpop.f32.mrf.mxu2 }
 0x21f   :  { %v1127_v53 = vpop.f32.mrf.mxu1 }
 0x220   :  { %v3994_v58 = vadd.f32 %v1127_v53, %v868_v3  ;;  %v1653_v21 = vadd.f32 %v1652_v60, %v1651_v26  ;;  %v1352_v3 = vadd.f32 %v1351_v34, %v1350_v39  ;;  %v1357_v34 = vsel %vm1257_vm0, %v3230_v45, 0.0 }
 0x222   :  { %5309 = vst [vmem:[#allocation75_spill] sm:$0xff] %v3994_v58  ;;  %v1511_v31 = vmul.f32 %v3994_v58, %v3994_v58  ;;  %v1353_v23 = vsel %vm1257_vm0, %v3994_v58, 0.0  ;;  %v1655_v32 = vadd.f32 %v1654_v51, %v1653_v21  ;;  %v4024_v51 = vpop.f32.mrf.mxu3 }
 0x223   :  { %v1354_v33 = vadd.f32 %v1353_v23, %v1352_v3  ;;  %v1662_v23 = vsel %vm1257_vm0, %v1513_v49, 0.0  ;;  %v1515_v3 = vmul.f32 %v3262_v8, %v3262_v8 }
 0x224   :  { %v1658_v56 = vsel %vm1257_vm0, %v1511_v31, 0.0  ;;  %v1657_v13 = vadd.f32 %v1656_v57, %v1655_v32  ;;  %v1514_v31 = vmul.f32 %v3234_v54, %v3234_v54  ;;  %v1359_v32 = vsel %vm1257_vm0, %v3234_v54, 0.0  ;;  %v5320_v54 = vld [vmem:[#allocation41_spill] sm:$0xff] }
 0x225   :  { %v1666_v49 = vsel %vm1257_vm0, %v1515_v3, 0.0  ;;  %v1531_v45 = vmul.f32 %v5320_v54, %v5320_v54 }
 0x226   :  { %v870_v53 = vpop.f32.mrf.mxu0  ;;  %v1659_v19 = vadd.f32 %v1658_v56, %v1657_v13  ;;  %v1664_v56 = vsel %vm1257_vm0, %v1514_v31, 0.0  ;;  %v1361_v13 = vsel %vm1257_vm0, %v3262_v8, 0.0 }
 0x227   :  { %v1129_v1 = vpop.f32.mrf.mxu1 }
 0x228   :  { %v4014_v63 = vadd.f32 %v1129_v1, %v870_v53 }
 0x22a   :  { %5310 = vst [vmem:[#allocation76_spill] sm:$0xff] %v4014_v63  ;;  %v1355_v60 = vsel %vm1257_vm0, %v4014_v63, 0.0  ;;  %v1512_v27 = vmul.f32 %v4014_v63, %v4014_v63  ;;  %v4053_v3 = vpop.f32.mrf.mxu3 }
 0x22b   :  { %v1356_v26 = vadd.f32 %v1355_v60, %v1354_v33  ;;  %v1516_v33 = vmul.f32 %v3266_v17, %v3266_v17 }
 0x22c   :  { %v1660_v21 = vsel %vm1257_vm0, %v1512_v27, 0.0 }
 0x22d   :  { %v1358_v39 = vadd.f32 %v1357_v34, %v1356_v26  ;;  %v1661_v57 = vadd.f32 %v1660_v21, %v1659_v19  ;;  %v1363_v19 = vsel %vm1257_vm0, %v3266_v17, 0.0  ;;  %v1517_v26 = vmul.f32 %v3294_v35, %v3294_v35 }
 0x22e   :  { %v1668_v31 = vsel %vm1257_vm0, %v1516_v33, 0.0 }
 0x22f   :  { %v1360_v53 = vadd.f32 %v1359_v32, %v1358_v39  ;;  %v1663_v1 = vadd.f32 %v1662_v23, %v1661_v57  ;;  %v1365_v39 = vsel %vm1257_vm0, %v3294_v35, 0.0  ;;  %v1518_v57 = vmul.f32 %v3298_v46, %v3298_v46 }
 0x231   :  { %v1362_v60 = vadd.f32 %v1361_v13, %v1360_v53  ;;  %v1665_v27 = vadd.f32 %v1664_v56, %v1663_v1  ;;  %v4051_v53 = vpop.f32.mrf.mxu2  ;;  %v1670_v1 = vsel %vm1257_vm0, %v1517_v26, 0.0  ;;  %v1367_v56 = vsel %vm1257_vm0, %v3298_v46, 0.0  ;;  %v5315_v46 = vld [vmem:[#allocation31_spill] sm:$0xff] }
 0x232   :  { %v1519_v13 = vmul.f32 %v3326_v4, %v3326_v4  ;;  %v1526_v35 = vmul.f32 %v5315_v46, %v5315_v46 }
 0x233   :  { %v1364_v34 = vadd.f32 %v1363_v19, %v1362_v60  ;;  %v1667_v21 = vadd.f32 %v1666_v49, %v1665_v27  ;;  %v1672_v27 = vsel %vm1257_vm0, %v1518_v57, 0.0  ;;  %v1369_v49 = vsel %vm1257_vm0, %v3326_v4, 0.0 }
 0x234   :  { %v1520_v19 = vmul.f32 %v3330_v15, %v3330_v15  ;;  %v1674_v26 = vsel %vm1257_vm0, %v1519_v13, 0.0 }
 0x235   :  { %v1366_v23 = vadd.f32 %v1365_v39, %v1364_v34  ;;  %v1669_v32 = vadd.f32 %v1668_v31, %v1667_v21  ;;  %v1371_v31 = vsel %vm1257_vm0, %v3330_v15, 0.0  ;;  %v1521_v39 = vmul.f32 %v3358_v36, %v3358_v36 }
 0x236   :  { %v1676_v57 = vsel %vm1257_vm0, %v1520_v19, 0.0  ;;  %v4082_v19 = vpop.f32.mrf.mxu3 }
 0x237   :  { %v1368_v33 = vadd.f32 %v1367_v56, %v1366_v23  ;;  %v1671_v60 = vadd.f32 %v1670_v1, %v1669_v32  ;;  %v1373_v1 = vsel %vm1257_vm0, %v3358_v36, 0.0  ;;  %v5311_v56 = vld [vmem:[#allocation23_spill] sm:$0xff]  ;;  %v1678_v13 = vsel %vm1257_vm0, %v1521_v39, 0.0 }
 0x238   :  { %v1522_v4 = vmul.f32 %v5311_v56, %v5311_v56 }
 0x239   :  { %v1370_v34 = vadd.f32 %v1369_v49, %v1368_v33  ;;  %v1673_v21 = vadd.f32 %v1672_v27, %v1671_v60  ;;  %v1375_v27 = vsel %vm1257_vm0, %v5311_v56, 0.0  ;;  %v5312_v49 = vld [vmem:[#allocation25_spill] sm:$0xff] }
 0x23a   :  { %v1523_v15 = vmul.f32 %v5312_v49, %v5312_v49 }
 0x23b   :  { %v1372_v23 = vadd.f32 %v1371_v31, %v1370_v34  ;;  %v1675_v32 = vadd.f32 %v1674_v26, %v1673_v21  ;;  %v4080_v26 = vpop.f32.mrf.mxu2  ;;  %v1680_v31 = vsel %vm1257_vm0, %v1522_v4, 0.0 }
 0x23c   :  { %v1682_v56 = vsel %vm1257_vm0, %v1523_v15, 0.0 }
 0x23d   :  { %v1374_v33 = vadd.f32 %v1373_v1, %v1372_v23  ;;  %v1677_v60 = vadd.f32 %v1676_v57, %v1675_v32  ;;  %v1377_v23 = vsel %vm1257_vm0, %v5312_v49, 0.0  ;;  %v5313_v32 = vld [vmem:[#allocation27_spill] sm:$0xff] }
 0x23e   :  { %v1524_v39 = vmul.f32 %v5313_v32, %v5313_v32 }
 0x23f   :  { %v1376_v34 = vadd.f32 %v1375_v27, %v1374_v33  ;;  %v1679_v21 = vadd.f32 %v1678_v13, %v1677_v60  ;;  %v1379_v33 = vsel %vm1257_vm0, %v5313_v32, 0.0  ;;  %v5314_v60 = vld [vmem:[#allocation29_spill] sm:$0xff] }
 0x240   :  { %v1525_v13 = vmul.f32 %v5314_v60, %v5314_v60  ;;  %v1684_v4 = vsel %vm1257_vm0, %v1524_v39, 0.0  ;;  %v1381_v49 = vsel %vm1257_vm0, %v5314_v60, 0.0  ;;  %v1688_v39 = vsel %vm1257_vm0, %v1526_v35, 0.0 }
 0x241   :  { %v1378_v57 = vadd.f32 %v1377_v23, %v1376_v34  ;;  %v1681_v1 = vadd.f32 %v1680_v31, %v1679_v21  ;;  %v1383_v31 = vsel %vm1257_vm0, %v5315_v46, 0.0  ;;  %v5316_v23 = vld [vmem:[#allocation33_spill] sm:$0xff] }
 0x242   :  { %v1686_v15 = vsel %vm1257_vm0, %v1525_v13, 0.0  ;;  %v1527_v32 = vmul.f32 %v5316_v23, %v5316_v23  ;;  %v4111_v13 = vpop.f32.mrf.mxu3 }
 0x243   :  { %v1380_v27 = vadd.f32 %v1379_v33, %v1378_v57  ;;  %v1683_v36 = vadd.f32 %v1682_v56, %v1681_v1  ;;  %v1385_v1 = vsel %vm1257_vm0, %v5316_v23, 0.0  ;;  %v5317_v33 = vld [vmem:[#allocation35_spill] sm:$0xff] }
 0x244   :  { %v1528_v60 = vmul.f32 %v5317_v33, %v5317_v33 }
 0x245   :  { %v1382_v34 = vadd.f32 %v1381_v49, %v1380_v27  ;;  %v1685_v21 = vadd.f32 %v1684_v4, %v1683_v36  ;;  %v4109_v27 = vpop.f32.mrf.mxu2  ;;  %v1690_v4 = vsel %vm1257_vm0, %v1527_v32, 0.0 }
 0x246   :  { %v1692_v46 = vsel %vm1257_vm0, %v1528_v60, 0.0 }
 0x247   :  { %v1384_v57 = vadd.f32 %v1383_v31, %v1382_v34  ;;  %v1687_v56 = vadd.f32 %v1686_v15, %v1685_v21  ;;  %v1387_v34 = vsel %vm1257_vm0, %v5317_v33, 0.0  ;;  %v5318_v21 = vld [vmem:[#allocation37_spill] sm:$0xff] }
 0x248   :  { %v1529_v35 = vmul.f32 %v5318_v21, %v5318_v21 }
 0x249   :  { %v1386_v49 = vadd.f32 %v1385_v1, %v1384_v57  ;;  %v1689_v36 = vadd.f32 %v1688_v39, %v1687_v56  ;;  %v1389_v57 = vsel %vm1257_vm0, %v5318_v21, 0.0  ;;  %v5319_v56 = vld [vmem:[#allocation39_spill] sm:$0xff] }
 0x24a   :  { %v1530_v39 = vmul.f32 %v5319_v56, %v5319_v56  ;;  %v1694_v32 = vsel %vm1257_vm0, %v1529_v35, 0.0  ;;  %v1391_v8 = vsel %vm1257_vm0, %v5319_v56, 0.0  ;;  %v1698_v35 = vsel %vm1257_vm0, %v1531_v45, 0.0 }
 0x24b   :  { %v1388_v15 = vadd.f32 %v1387_v34, %v1386_v49  ;;  %v1691_v31 = vadd.f32 %v1690_v4, %v1689_v36  ;;  %v1393_v4 = vsel %vm1257_vm0, %v5320_v54, 0.0  ;;  %v5321_v34 = vld [vmem:[#allocation43_spill] sm:$0xff] }
 0x24c   :  { %v1696_v60 = vsel %vm1257_vm0, %v1530_v39, 0.0  ;;  %v1532_v63 = vmul.f32 %v5321_v34, %v5321_v34  ;;  %v4140_v39 = vpop.f32.mrf.mxu3 }
 0x24d   :  { %v1390_v1 = vadd.f32 %v1389_v57, %v1388_v15  ;;  %v1693_v17 = vadd.f32 %v1692_v46, %v1691_v31  ;;  %v1395_v31 = vsel %vm1257_vm0, %v5321_v34, 0.0  ;;  %v5322_v57 = vld [vmem:[#allocation45_spill] sm:$0xff] }
 0x24e   :  { %v1533_v58 = vmul.f32 %v5322_v57, %v5322_v57 }
 0x24f   :  { %v1392_v49 = vadd.f32 %v1391_v8, %v1390_v1  ;;  %v1695_v36 = vadd.f32 %v1694_v32, %v1693_v17  ;;  %v4138_v1 = vpop.f32.mrf.mxu2  ;;  %v1700_v32 = vsel %vm1257_vm0, %v1532_v63, 0.0 }
 0x250   :  { %v1702_v29 = vsel %vm1257_vm0, %v1533_v58, 0.0 }
 0x251   :  { %v1394_v15 = vadd.f32 %v1393_v4, %v1392_v49  ;;  %v1697_v46 = vadd.f32 %v1696_v60, %v1695_v36  ;;  %v1397_v49 = vsel %vm1257_vm0, %v5322_v57, 0.0  ;;  %v5323_v36 = vld [vmem:[#allocation47_spill] sm:$0xff] }
 0x252   :  { %v1534_v45 = vmul.f32 %v5323_v36, %v5323_v36 }
 0x253   :  { %v1699_v8 = vadd.f32 %v1698_v35, %v1697_v46  ;;  %v1396_v17 = vadd.f32 %v1395_v31, %v1394_v15  ;;  %v1399_v46 = vsel %vm1257_vm0, %v5323_v36, 0.0  ;;  %v5324_v15 = vld [vmem:[#allocation49_spill] sm:$0xff] }
 0x254   :  { %v1535_v35 = vmul.f32 %v5324_v15, %v5324_v15  ;;  %v1704_v63 = vsel %vm1257_vm0, %v1534_v45, 0.0  ;;  %v1401_v48 = vsel %vm1257_vm0, %v5324_v15, 0.0  ;;  %v1708_v45 = vsel %vm1257_vm0, %v1536_v11, 0.0 }
 0x255   :  { %v1398_v60 = vadd.f32 %v1397_v49, %v1396_v17  ;;  %v1701_v4 = vadd.f32 %v1700_v32, %v1699_v8  ;;  %v1403_v32 = vsel %vm1257_vm0, %v5325_v52, 0.0  ;;  %v5326_v49 = vld [vmem:[#allocation53_spill] sm:$0xff] }
 0x256   :  { %v1706_v58 = vsel %vm1257_vm0, %v1535_v35, 0.0  ;;  %v1537_v37 = vmul.f32 %v5326_v49, %v5326_v49  ;;  %v4169_v35 = vpop.f32.mrf.mxu3 }
 0x257   :  { %v1400_v31 = vadd.f32 %v1399_v46, %v1398_v60  ;;  %v1703_v50 = vadd.f32 %v1702_v29, %v1701_v4  ;;  %v1405_v4 = vsel %vm1257_vm0, %v5326_v49, 0.0  ;;  %v5327_v46 = vld [vmem:[#allocation55_spill] sm:$0xff] }
 0x258   :  { %v1538_v47 = vmul.f32 %v5327_v46, %v5327_v46 }
 0x259   :  { %v1402_v17 = vadd.f32 %v1401_v48, %v1400_v31  ;;  %v1705_v8 = vadd.f32 %v1704_v63, %v1703_v50  ;;  %v4167_v31 = vpop.f32.mrf.mxu2  ;;  %v1710_v63 = vsel %vm1257_vm0, %v1537_v37, 0.0 }
 0x25a   :  { %v1712_v61 = vsel %vm1257_vm0, %v1538_v47, 0.0 }
 0x25b   :  { %v1404_v60 = vadd.f32 %v1403_v32, %v1402_v17  ;;  %v1707_v29 = vadd.f32 %v1706_v58, %v1705_v8  ;;  %v1407_v17 = vsel %vm1257_vm0, %v5327_v46, 0.0  ;;  %v5328_v8 = vld [vmem:[#allocation57_spill] sm:$0xff] }
 0x25c   :  { %v1539_v11 = vmul.f32 %v5328_v8, %v5328_v8 }
 0x25d   :  { %v1406_v48 = vadd.f32 %v1405_v4, %v1404_v60  ;;  %v1709_v50 = vadd.f32 %v1708_v45, %v1707_v29  ;;  %v1409_v60 = vsel %vm1257_vm0, %v5328_v8, 0.0  ;;  %v5329_v29 = vld [vmem:[#allocation59_spill] sm:$0xff] }
 0x25e   :  { %v1540_v45 = vmul.f32 %v5329_v29, %v5329_v29  ;;  %v1714_v37 = vsel %vm1257_vm0, %v1539_v11, 0.0  ;;  %v1411_v5 = vsel %vm1257_vm0, %v5329_v29, 0.0  ;;  %v1718_v11 = vsel %vm1257_vm0, %v1541_v2, 0.0 }
 0x25f   :  { %v1408_v58 = vadd.f32 %v1407_v17, %v1406_v48  ;;  %v1711_v32 = vadd.f32 %v1710_v63, %v1709_v50  ;;  %v1413_v63 = vsel %vm1257_vm0, %v5330_v7, 0.0  ;;  %v5331_v17 = vld [vmem:[#allocation63_spill] sm:$0xff]  ;;  %v1544_v2 = vmul.f32 %v3719_v30, %v3719_v30 }
 0x260   :  { %v1716_v47 = vsel %vm1257_vm0, %v1540_v45, 0.0  ;;  %v1542_v20 = vmul.f32 %v5331_v17, %v5331_v17  ;;  %v4198_v45 = vpop.f32.mrf.mxu3 }
 0x261   :  { %v1410_v4 = vadd.f32 %v1409_v60, %v1408_v58  ;;  %v1713_v43 = vadd.f32 %v1712_v61, %v1711_v32  ;;  %v1415_v32 = vsel %vm1257_vm0, %v5331_v17, 0.0  ;;  %v1543_v60 = vmul.f32 %v3695_v24, %v3695_v24 }
 0x263   :  { %v1412_v48 = vadd.f32 %v1411_v5, %v1410_v4  ;;  %v1715_v50 = vadd.f32 %v1714_v37, %v1713_v43  ;;  %v4196_v4 = vpop.f32.mrf.mxu2  ;;  %v1720_v37 = vsel %vm1257_vm0, %v1542_v20, 0.0  ;;  %v1724_v20 = vsel %vm1257_vm0, %v1544_v2, 0.0 }
 0x264   :  { %v1728_v2 = vsel %vm1257_vm0, %v1546_v6, 0.0 }
 0x265   :  { %v1414_v58 = vadd.f32 %v1413_v63, %v1412_v48  ;;  %v1717_v61 = vadd.f32 %v1716_v47, %v1715_v50  ;;  %v1417_v48 = vsel %vm1257_vm0, %v3695_v24, 0.0  ;;  %v1722_v63 = vsel %vm1257_vm0, %v1543_v60, 0.0 }
 0x267   :  { %v1416_v5 = vadd.f32 %v1415_v32, %v1414_v58  ;;  %v1719_v43 = vadd.f32 %v1718_v11, %v1717_v61  ;;  %v1419_v58 = vsel %vm1257_vm0, %v3719_v30, 0.0  ;;  %v1545_v61 = vmul.f32 %v3757_v25, %v3757_v25 }
 0x269   :  { %v1418_v50 = vadd.f32 %v1417_v48, %v1416_v5  ;;  %v1721_v47 = vadd.f32 %v1720_v37, %v1719_v43  ;;  %v1726_v60 = vsel %vm1257_vm0, %v1545_v61, 0.0  ;;  %v1423_v37 = vsel %vm1257_vm0, %v3783_v38, 0.0  ;;  %v1249_v61 = vpop.f32.mrf.mxu3 }
 0x26a   :  { %v1547_v48 = vmul.f32 %v3809_v12, %v3809_v12 }
 0x26b   :  { %v1420_v11 = vadd.f32 %v1419_v58, %v1418_v50  ;;  %v1723_v32 = vadd.f32 %v1722_v63, %v1721_v47  ;;  %v1425_v63 = vsel %vm1257_vm0, %v3809_v12, 0.0  ;;  %v1548_v58 = vmul.f32 %v3835_v0, %v3835_v0 }
 0x26d   :  { %v1422_v5 = vadd.f32 %v1421_v18, %v1420_v11  ;;  %v1725_v43 = vadd.f32 %v1724_v20, %v1723_v32  ;;  %v990_v32 = vpop.f32.mrf.mxu2  ;;  %v1730_v20 = vsel %vm1257_vm0, %v1547_v48, 0.0 }
 0x26f   :  { %v1424_v50 = vadd.f32 %v1423_v37, %v1422_v5  ;;  %v1727_v47 = vadd.f32 %v1726_v60, %v1725_v43  ;;  %v1549_v5 = vmul.f32 %v3861_v55, %v3861_v55  ;;  %v1732_v60 = vsel %vm1257_vm0, %v1548_v58, 0.0 }
 0x270   :  { %v1429_v37 = vsel %vm1257_vm0, %v3861_v55, 0.0  ;;  %v1551_v58 = vmul.f32 %v3947_v59, %v3947_v59 }
 0x271   :  { %v1426_v18 = vadd.f32 %v1425_v63, %v1424_v50  ;;  %v1729_v11 = vadd.f32 %v1728_v2, %v1727_v47  ;;  %v1550_v50 = vmul.f32 %v3887_v16, %v3887_v16  ;;  %v4237_v47 = vadd.f32 %v3998_v40, %v3996_v9 }
 0x272   :  { %v1734_v63 = vsel %vm1257_vm0, %v1549_v5, 0.0  ;;  %v1433_v9 = vsel %vm1257_vm0, %v3947_v59, 0.0  ;;  %v4255_v5 = vadd.f32 %v4053_v3, %v4051_v53 }
 0x273   :  { %v1428_v43 = vadd.f32 %v1427_v41, %v1426_v18  ;;  %v1731_v6 = vadd.f32 %v1730_v20, %v1729_v11  ;;  %v1431_v41 = vsel %vm1257_vm0, %v3887_v16, 0.0  ;;  %v4246_v18 = vadd.f32 %v4024_v51, %v4022_v22 }
 0x274   :  { %v1736_v62 = vsel %vm1257_vm0, %v1550_v50, 0.0  ;;  %v1552_v40 = vmul.f32 %v4237_v47, %v4237_v47  ;;  %v1435_v22 = vsel %vm1257_vm0, %v4237_v47, 0.0  ;;  %v1554_v3 = vmul.f32 %v4255_v5, %v4255_v5 }
 0x275   :  { %v1430_v48 = vadd.f32 %v1429_v37, %v1428_v43  ;;  %v1733_v2 = vadd.f32 %v1732_v60, %v1731_v6  ;;  %v1738_v60 = vsel %vm1257_vm0, %v1551_v58, 0.0  ;;  %v1553_v51 = vmul.f32 %v4246_v18, %v4246_v18 }
 0x276   :  { %v4264_v37 = vadd.f32 %v4082_v19, %v4080_v26  ;;  %v1740_v53 = vsel %vm1257_vm0, %v1552_v40, 0.0  ;;  %v1439_v19 = vsel %vm1257_vm0, %v4255_v5, 0.0 }
 0x277   :  { %v1432_v11 = vadd.f32 %v1431_v41, %v1430_v48  ;;  %v1735_v20 = vadd.f32 %v1734_v63, %v1733_v2  ;;  %v993_v2 = vpop.f32.mrf.mxu2  ;;  %v1252_v63 = vpop.f32.mrf.mxu3  ;;  %v4273_v41 = vadd.f32 %v4111_v13, %v4109_v27  ;;  %v1742_v26 = vsel %vm1257_vm0, %v1553_v51, 0.0 }
 0x278   :  { %v1441_v27 = vsel %vm1257_vm0, %v4264_v37, 0.0 }
 0x279   :  { %v1434_v43 = vadd.f32 %v1433_v9, %v1432_v11  ;;  %v1737_v6 = vadd.f32 %v1736_v62, %v1735_v20  ;;  %v1437_v62 = vsel %vm1257_vm0, %v4246_v18, 0.0  ;;  %v1555_v20 = vmul.f32 %v4264_v37, %v4264_v37 }
 0x27a   :  { %v4282_v9 = vadd.f32 %v4140_v39, %v4138_v1  ;;  %v1556_v13 = vmul.f32 %v4273_v41, %v4273_v41  ;;  %v1443_v1 = vsel %vm1257_vm0, %v4273_v41, 0.0 }
 0x27b   :  { %v1739_v50 = vadd.f32 %v1738_v60, %v1737_v6  ;;  %v1436_v48 = vadd.f32 %v1435_v22, %v1434_v43  ;;  %v1744_v6 = vsel %vm1257_vm0, %v1554_v3, 0.0  ;;  %v4291_v60 = vadd.f32 %v4169_v35, %v4167_v31 }
 0x27c   :  { %v1557_v39 = vmul.f32 %v4282_v9, %v4282_v9  ;;  %v1748_v3 = vsel %vm1257_vm0, %v1556_v13, 0.0  ;;  %v1445_v31 = vsel %vm1257_vm0, %v4282_v9, 0.0 }
 0x27d   :  { %v1741_v58 = vadd.f32 %v1740_v53, %v1739_v50  ;;  %v1438_v11 = vadd.f32 %v1437_v62, %v1436_v48  ;;  %v1746_v50 = vsel %vm1257_vm0, %v1555_v20, 0.0  ;;  %v4300_v48 = vadd.f32 %v4198_v45, %v4196_v4 }
 0x27e   :  { %v1558_v35 = vmul.f32 %v4291_v60, %v4291_v60  ;;  %v1447_v4 = vsel %vm1257_vm0, %v4291_v60, 0.0 }
 0x27f   :  { %v1743_v40 = vadd.f32 %v1742_v26, %v1741_v58  ;;  %v1440_v43 = vadd.f32 %v1439_v19, %v1438_v11  ;;  %v4307_v58 = vadd.f32 %v1249_v61, %v990_v32  ;;  %v995_v19 = vpop.f32.mrf.mxu2  ;;  %v1254_v20 = vpop.f32.mrf.mxu3  ;;  %v1559_v45 = vmul.f32 %v4300_v48, %v4300_v48 }
 0x280   :  { %v1752_v13 = vsel %vm1257_vm0, %v1558_v35, 0.0  ;;  %v1449_v32 = vsel %vm1257_vm0, %v4300_v48, 0.0 }
 0x281   :  { %v1745_v22 = vadd.f32 %v1744_v6, %v1743_v40  ;;  %v1442_v51 = vadd.f32 %v1441_v27, %v1440_v43  ;;  %v1750_v40 = vsel %vm1257_vm0, %v1557_v39, 0.0  ;;  %v4314_v43 = vadd.f32 %v1252_v63, %v993_v2 }
 0x282   :  { %v1560_v61 = vmul.f32 %v4307_v58, %v4307_v58  ;;  %v1451_v2 = vsel %vm1257_vm0, %v4307_v58, 0.0 }
 0x283   :  { %v1747_v53 = vadd.f32 %v1746_v50, %v1745_v22  ;;  %v1444_v62 = vadd.f32 %v1443_v1, %v1442_v51  ;;  %v4321_v22 = vadd.f32 %v1254_v20, %v995_v19  ;;  %v1754_v1 = vsel %vm1257_vm0, %v1559_v45, 0.0 }
 0x284   :  { %v1561_v63 = vmul.f32 %v4314_v43, %v4314_v43 }
 0x285   :  { %v1749_v11 = vadd.f32 %v1748_v3, %v1747_v53  ;;  %v1446_v26 = vadd.f32 %v1445_v31, %v1444_v62  ;;  %v1756_v62 = vsel %vm1257_vm0, %v1560_v61, 0.0  ;;  %v1453_v3 = vsel %vm1257_vm0, %v4314_v43, 0.0 }
 0x286   :  { %v1562_v31 = vmul.f32 %v4321_v22, %v4321_v22  ;;  %v1455_v19 = vsel %vm1257_vm0, %v4321_v22, 0.0 }
 0x287   :  { %v1751_v6 = vadd.f32 %v1750_v40, %v1749_v11  ;;  %v1448_v27 = vadd.f32 %v1447_v4, %v1446_v26  ;;  %v1758_v26 = vsel %vm1257_vm0, %v1561_v63, 0.0 }
 0x288   :  { %v1760_v4 = vsel %vm1257_vm0, %v1562_v31, 0.0 }
 0x289   :  { %v1753_v51 = vadd.f32 %v1752_v13, %v1751_v6  ;;  %v1450_v50 = vadd.f32 %v1449_v32, %v1448_v27 }
 0x28b   :  { %v1755_v39 = vadd.f32 %v1754_v1, %v1753_v51  ;;  %v1452_v53 = vadd.f32 %v1451_v2, %v1450_v50 }
 0x28d   :  { %v1757_v35 = vadd.f32 %v1756_v62, %v1755_v39  ;;  %v1454_v11 = vadd.f32 %v1453_v3, %v1452_v53 }
 0x28f   :  { %v1759_v20 = vadd.f32 %v1758_v26, %v1757_v35  ;;  %v1456_v40 = vadd.f32 %v1455_v19, %v1454_v11 }
 0x291   :  { %v1457_v45 = vrot.slane %v1456_v40, 4  ;;  %v1761_v6 = vadd.f32 %v1760_v4, %v1759_v20 }
 0x293   :  { %v1458_v27 = vadd.f32 %v1457_v45, %v1456_v40  ;;  %v1762_v13 = vrot.slane %v1761_v6, 4 }
 0x295   :  { %v1459_v32 = vrot.slane %v1458_v27, 2  ;;  %v1763_v61 = vadd.f32 %v1762_v13, %v1761_v6 }
 0x297   :  { %v1460_v51 = vadd.f32 %v1459_v32, %v1458_v27  ;;  %v1764_v50 = vrot.slane %v1763_v61, 2 }
 0x299   :  { %v1461_v1 = vrot.slane %v1460_v51, 1  ;;  %v1765_v2 = vadd.f32 %v1764_v50, %v1763_v61 }
 0x29b   :  { %v1462_v39 = vadd.f32 %v1461_v1, %v1460_v51  ;;  %v1766_v53 = vrot.slane %v1765_v2, 1 }
 0x29d   :  { %v1767_v63 = vadd.f32 %v1766_v53, %v1765_v2  ;;  %v4337_v62 = vmul.f32 0.00125, %v1462_v39 }
 0x29f   :  { %v1769_v3 = vmul.f32 0.00125, %v1767_v63  ;;  %v1770_v35 = vmul.f32 %v4337_v62, %v4337_v62  ;;  %v1848_v6 = vsub.f32 %v5316_v23, %v4337_v62  ;;  %v1849_v27 = vsub.f32 %v5317_v33, %v4337_v62 }
 0x2a0   :  { %v1850_v13 = vsub.f32 %v5318_v21, %v4337_v62  ;;  %v1851_v32 = vsub.f32 %v5319_v56, %v4337_v62  ;;  %v1852_v61 = vsub.f32 %v5320_v54, %v4337_v62  ;;  %v1853_v51 = vsub.f32 %v5321_v34, %v4337_v62 }
 0x2a1   :  { %v1771_v31 = vsub.f32 %v1769_v3, %v1770_v35  ;;  %v1854_v50 = vsub.f32 %v5322_v57, %v4337_v62  ;;  %v1855_v23 = vsub.f32 %v5323_v36, %v4337_v62  ;;  %v1856_v33 = vsub.f32 %v5324_v15, %v4337_v62 }
 0x2a2   :  { %v1857_v21 = vsub.f32 %v5325_v52, %v4337_v62  ;;  %v1858_v56 = vsub.f32 %v5326_v49, %v4337_v62  ;;  %v1859_v54 = vsub.f32 %v5327_v46, %v4337_v62  ;;  %v1860_v34 = vsub.f32 %v5328_v8, %v4337_v62 }
 0x2a3   :  { %v1772_v11 = vmax.f32 %v1771_v31, 0.0  ;;  %v1861_v57 = vsub.f32 %v5329_v29, %v4337_v62  ;;  %v1862_v36 = vsub.f32 %v5330_v7, %v4337_v62  ;;  %v1863_v15 = vsub.f32 %v5331_v17, %v4337_v62 }
 0x2a4   :  { %v1864_v52 = vsub.f32 %v3695_v24, %v4337_v62  ;;  %v1865_v49 = vsub.f32 %v3719_v30, %v4337_v62  ;;  %v1866_v46 = vsub.f32 %v3757_v25, %v4337_v62  ;;  %v1867_v8 = vsub.f32 %v3783_v38, %v4337_v62 }
 0x2a5   :  { %v1773_v26 = vadd.f32 1e-05, %v1772_v11  ;;  %v1868_v7 = vsub.f32 %v3809_v12, %v4337_v62  ;;  %v1869_v29 = vsub.f32 %v3835_v0, %v4337_v62  ;;  %v1870_v24 = vsub.f32 %v3861_v55, %v4337_v62 }
 0x2a6   :  { %v1871_v30 = vsub.f32 %v3887_v16, %v4337_v62  ;;  %v1872_v25 = vsub.f32 %v3947_v59, %v4337_v62  ;;  %v1873_v38 = vsub.f32 %v4237_v47, %v4337_v62  ;;  %v1874_v12 = vsub.f32 %v4246_v18, %v4337_v62 }
 0x2a7   :  { %2885 = vrsqrt.f32 %v1773_v26  ;;  %vm1780_vm1 = vweird.f32 %v1773_v26  ;;  %v1875_v0 = vsub.f32 %v4255_v5, %v4337_v62  ;;  %v1876_v55 = vsub.f32 %v4264_v37, %v4337_v62 }
 0x2a8   :  { %v1877_v2 = vsub.f32 %v4273_v41, %v4337_v62  ;;  %v1878_v16 = vsub.f32 %v4282_v9, %v4337_v62  ;;  %v1879_v59 = vsub.f32 %v4291_v60, %v4337_v62  ;;  %v1880_v47 = vsub.f32 %v4300_v48, %v4337_v62 }
 0x2a9   :  { %v1881_v18 = vsub.f32 %v4307_v58, %v4337_v62  ;;  %v1882_v5 = vsub.f32 %v4314_v43, %v4337_v62  ;;  %v1883_v37 = vsub.f32 %v4321_v22, %v4337_v62 }
 0x2ad   :  { %v2886_v19 = vpop.eup %2885 }
 0x2ae   :  { %v1775_v20 = vmul.f32 %v2886_v19, %v1773_v26  ;;  %vm1781_vm2 = vweird.f32 %v2886_v19 }
 0x2af   :  { %vm1782_vm3 = vmor %vm1780_vm1, %vm1781_vm2 }
 0x2b0   :  { %v1776_v40 = vmul.f32 %v2886_v19, %v1775_v20 }
 0x2b2   :  { %v1777_v4 = vmul.f32 0.5, %v1776_v40 }
 0x2b4   :  { %v1778_v45 = vsub.f32 1.5, %v1777_v4 }
 0x2b6   :  { %v1779_v1 = vmul.f32 %v2886_v19, %v1778_v45 }
 0x2b8   :  { %v4389_v17 = vsel %vm1782_vm3, %v2886_v19, %v1779_v1 }
 0x2b9   :  { %v4418_v41 = vmul.f32 %v1848_v6, %v4389_v17  ;;  %v4421_v9 = vmul.f32 %v1849_v27, %v4389_v17  ;;  %v4424_v60 = vmul.f32 %v1850_v13, %v4389_v17  ;;  %v4427_v48 = vmul.f32 %v1851_v32, %v4389_v17 }
 0x2ba   :  { %v4430_v58 = vmul.f32 %v1852_v61, %v4389_v17  ;;  %v4433_v43 = vmul.f32 %v1853_v51, %v4389_v17  ;;  %v4436_v22 = vmul.f32 %v1854_v50, %v4389_v17  ;;  %v4439_v39 = vmul.f32 %v1855_v23, %v4389_v17 }
 0x2bb   :  { %v4442_v53 = vmul.f32 %v1856_v33, %v4389_v17  ;;  %v4445_v63 = vmul.f32 %v1857_v21, %v4389_v17  ;;  %v4448_v3 = vmul.f32 %v1858_v56, %v4389_v17  ;;  %v4451_v35 = vmul.f32 %v1859_v54, %v4389_v17 }
 0x2bc   :  { %v4454_v31 = vmul.f32 %v1860_v34, %v4389_v17  ;;  %v4457_v11 = vmul.f32 %v1861_v57, %v4389_v17  ;;  %v4460_v26 = vmul.f32 %v1862_v36, %v4389_v17  ;;  %v4463_v19 = vmul.f32 %v1863_v15, %v4389_v17  ;;  %v5334_v15 = vld [vmem:[#allocation2_spill] sm:$0xff] }
 0x2bd   :  { %v4466_v20 = vmul.f32 %v1864_v52, %v4389_v17  ;;  %v4469_v40 = vmul.f32 %v1865_v49, %v4389_v17  ;;  %v4472_v4 = vmul.f32 %v1866_v46, %v4389_v17  ;;  %v4475_v45 = vmul.f32 %v1867_v8, %v4389_v17  ;;  %v5335_v49 = vld [vmem:[#allocation3_spill] sm:$0xff]  ;;  %v5336_v8 = vld [vmem:[#allocation4_spill] sm:$0xff] }
 0x2be   :  { %v4478_v6 = vmul.f32 %v1868_v7, %v4389_v17  ;;  %v4481_v27 = vmul.f32 %v1869_v29, %v4389_v17  ;;  %v4484_v13 = vmul.f32 %v1870_v24, %v4389_v17  ;;  %v4487_v32 = vmul.f32 %v1871_v30, %v4389_v17  ;;  %v5337_v24 = vld [vmem:[#allocation5_spill] sm:$0xff] }
 0x2bf   :  { %v4490_v61 = vmul.f32 %v1872_v25, %v4389_v17  ;;  %v4493_v51 = vmul.f32 %v1873_v38, %v4389_v17  ;;  %v4496_v50 = vmul.f32 %v1874_v12, %v4389_v17  ;;  %v4499_v23 = vmul.f32 %v1875_v0, %v4389_v17  ;;  %v5338_v0 = vld [vmem:[#allocation6_spill] sm:$0xff] }
 0x2c0   :  { %v4502_v1 = vmul.f32 %v1876_v55, %v4389_v17  ;;  %v4505_v33 = vmul.f32 %v1877_v2, %v4389_v17  ;;  %v4508_v21 = vmul.f32 %v1878_v16, %v4389_v17  ;;  %v4511_v56 = vmul.f32 %v1879_v59, %v4389_v17 }
 0x2c1   :  { %v4514_v54 = vmul.f32 %v1880_v47, %v4389_v17  ;;  %v4517_v34 = vmul.f32 %v1881_v18, %v4389_v17  ;;  %v4520_v57 = vmul.f32 %v1882_v5, %v4389_v17  ;;  %v4523_v36 = vmul.f32 %v1883_v37, %v4389_v17  ;;  %v5339_v18 = vld [vmem:[#allocation7_spill] sm:$0xff] }
 0x2c2   :  { %v1784_v52 = vsub.f32 %v5334_v15, %v4337_v62  ;;  %v1785_v46 = vsub.f32 %v5335_v49, %v4337_v62  ;;  %v1786_v7 = vsub.f32 %v5336_v8, %v4337_v62  ;;  %v1787_v30 = vsub.f32 %v5337_v24, %v4337_v62  ;;  %v5341_v8 = vld [vmem:[#allocation11_spill] sm:$0xff] }
 0x2c3   :  { %5332 = vst [vmem:[#allocation33_spill] sm:$0xff] %v4520_v57  ;;  %v1788_v38 = vsub.f32 %v3174_v10, %v4337_v62  ;;  %v1789_v55 = vsub.f32 %v5338_v0, %v4337_v62  ;;  %v1790_v16 = vsub.f32 %v3202_v28, %v4337_v62  ;;  %v1791_v5 = vsub.f32 %v5339_v18, %v4337_v62  ;;  %v5340_v10 = vld [vmem:[#allocation9_spill] sm:$0xff] }
 0x2c4   :  { %5333 = vst [vmem:[#allocation35_spill] sm:$0xff] %v4523_v36  ;;  %v1884_v29 = vmul.f32 %v1784_v52, %v4389_v17  ;;  %v1885_v25 = vmul.f32 %v1785_v46, %v4389_v17  ;;  %v1886_v12 = vmul.f32 %v1786_v7, %v4389_v17  ;;  %v1887_v2 = vmul.f32 %v1787_v30, %v4389_v17  ;;  %v5342_v30 = vld [vmem:[#allocation14_spill] sm:$0xff] }
 0x2c5   :  { %v1888_v59 = vmul.f32 %v1788_v38, %v4389_v17  ;;  %v1889_v37 = vmul.f32 %v1789_v55, %v4389_v17  ;;  %v1792_v52 = vsub.f32 %v5340_v10, %v4337_v62  ;;  %v1890_v49 = vmul.f32 %v1790_v16, %v4389_v17 }
 0x2c6   :  { %v1984_v47 = vmax.f32 %v1884_v29, 0.0  ;;  %v1985_v15 = vmax.f32 %v1885_v25, 0.0  ;;  %v1986_v46 = vmax.f32 %v1886_v12, 0.0  ;;  %v1793_v7 = vsub.f32 %v5341_v8, %v4337_v62  ;;  %v5343_v8 = vld [vmem:[#allocation17_spill] sm:$0xff] }
 0x2c7   :  { %v1794_v28 = vsub.f32 %v3264_v14, %v4337_v62  ;;  %v1891_v29 = vmul.f32 %v1791_v5, %v4389_v17  ;;  %v1987_v24 = vmax.f32 %v1887_v2, 0.0  ;;  %v1795_v38 = vsub.f32 %v5342_v30, %v4337_v62 }
 0x2c8   :  { %v1892_v25 = vmul.f32 %v1792_v52, %v4389_v17  ;;  %v1988_v0 = vmax.f32 %v1888_v59, 0.0  ;;  %v2084_v55 = vpack.c.bf16 %v1984_v47, %v1984_v47  ;;  %v1796_v16 = vsub.f32 %v3296_v42, %v4337_v62  ;;  %v5344_v59 = vld [vmem:[#allocation19_spill] sm:$0xff] }
 0x2c9   :  { %v1893_v12 = vmul.f32 %v1793_v7, %v4389_v17  ;;  %v1989_v18 = vmax.f32 %v1889_v37, 0.0  ;;  %v2085_v10 = vpack.c.bf16 %v1985_v15, %v1985_v15  ;;  %v1797_v14 = vsub.f32 %v5343_v8, %v4337_v62  ;;  %v5345_v15 = vld [vmem:[#allocation21_spill] sm:$0xff] }
 0x2ca   :  { %v1894_v5 = vmul.f32 %v1794_v28, %v4389_v17  ;;  %v1990_v2 = vmax.f32 %v1890_v49, 0.0  ;;  %v2086_v36 = vpack.c.bf16 %v1986_v46, %v1986_v46  ;;  %v1895_v30 = vmul.f32 %v1795_v38, %v4389_v17  ;;  %2185 = vst.msk [vmem:[%s5155_s2] sm:$0xf] %vm2184_vm4, %v2084_v55  ;;  %v5346_v55 = vld [vmem:[#allocation24_spill] sm:$0xff] }
 0x2cb   :  { %v1991_v57 = vmax.f32 %v1891_v29, 0.0  ;;  %v2087_v52 = vpack.c.bf16 %v1987_v24, %v1987_v24  ;;  %v1798_v47 = vsub.f32 %v5344_v59, %v4337_v62  ;;  %v1896_v42 = vmul.f32 %v1796_v16, %v4389_v17  ;;  %2186 = vst.msk [vmem:[%s5155_s2 + $0x4] sm:$0xf] %vm2184_vm4, %v2085_v10 }
 0x2cc   :  { %v1992_v7 = vmax.f32 %v1892_v25, 0.0  ;;  %v2088_v37 = vpack.c.bf16 %v1988_v0, %v1988_v0  ;;  %v1799_v49 = vsub.f32 %v5345_v15, %v4337_v62  ;;  %v1897_v46 = vmul.f32 %v1797_v14, %v4389_v17  ;;  %2187 = vst.msk [vmem:[%s5155_s2 + $0x8] sm:$0xf] %vm2184_vm4, %v2086_v36  ;;  %v5348_v36 = vld [vmem:[#allocation28_spill] sm:$0xff] }
 0x2cd   :  { %v1993_v28 = vmax.f32 %v1893_v12, 0.0  ;;  %v2089_v29 = vpack.c.bf16 %v1989_v18, %v1989_v18  ;;  %v1800_v24 = vsub.f32 %v3360_v44, %v4337_v62  ;;  %v1898_v38 = vmul.f32 %v1798_v47, %v4389_v17  ;;  %2188 = vst.msk [vmem:[%s5155_s2 + $0xc] sm:$0xf] %vm2184_vm4, %v2087_v52  ;;  %v5347_v44 = vld [vmem:[#allocation26_spill] sm:$0xff] }
 0x2ce   :  { %v1994_v25 = vmax.f32 %v1894_v5, 0.0  ;;  %v2090_v0 = vpack.c.bf16 %v1990_v2, %v1990_v2  ;;  %v1801_v16 = vsub.f32 %v5346_v55, %v4337_v62  ;;  %v1899_v12 = vmul.f32 %v1799_v49, %v4389_v17  ;;  %2189 = vst.msk [vmem:[%s5155_s2 + $0x10] sm:$0xf] %vm2184_vm4, %v2088_v37  ;;  %v5349_v52 = vld [vmem:[#allocation30_spill] sm:$0xff]  ;;  %v5350_v37 = vld [vmem:[#allocation32_spill] sm:$0xff] }
 0x2cf   :  { %v1995_v18 = vmax.f32 %v1895_v30, 0.0  ;;  %v2091_v8 = vpack.c.bf16 %v1991_v57, %v1991_v57  ;;  %v1802_v10 = vsub.f32 %v5347_v44, %v4337_v62  ;;  %v1900_v14 = vmul.f32 %v1800_v24, %v4389_v17  ;;  %2190 = vst.msk [vmem:[%s5155_s2 + $0x14] sm:$0xf] %vm2184_vm4, %v2089_v29  ;;  %v5351_v29 = vld [vmem:[#allocation34_spill] sm:$0xff] }
 0x2d0   :  { %v1996_v5 = vmax.f32 %v1896_v42, 0.0  ;;  %v2092_v2 = vpack.c.bf16 %v1992_v7, %v1992_v7  ;;  %v1803_v57 = vsub.f32 %v5348_v36, %v4337_v62  ;;  %v1901_v30 = vmul.f32 %v1801_v16, %v4389_v17  ;;  %2191 = vst.msk [vmem:[%s5155_s2 + $0x18] sm:$0xf] %vm2184_vm4, %v2090_v0  ;;  %v5352_v0 = vld [vmem:[#allocation36_spill] sm:$0xff] }
 0x2d1   :  { %v1997_v59 = vmax.f32 %v1897_v46, 0.0  ;;  %v2093_v47 = vpack.c.bf16 %v1993_v28, %v1993_v28  ;;  %v1804_v42 = vsub.f32 %v5349_v52, %v4337_v62  ;;  %v1902_v7 = vmul.f32 %v1802_v10, %v4389_v17  ;;  %2192 = vst.msk [vmem:[%s5155_s2 + $0x1c] sm:$0xf] %vm2184_vm4, %v2091_v8  ;;  %v5353_v8 = vld [vmem:[#allocation38_spill] sm:$0xff] }
 0x2d2   :  { %v1998_v15 = vmax.f32 %v1898_v38, 0.0  ;;  %v2094_v49 = vpack.c.bf16 %v1994_v25, %v1994_v25  ;;  %v1805_v46 = vsub.f32 %v5350_v37, %v4337_v62  ;;  %v1903_v28 = vmul.f32 %v1803_v57, %v4389_v17  ;;  %2193 = vst.msk [vmem:[%s5155_s2 + $0x20] sm:$0xf] %vm2184_vm4, %v2092_v2  ;;  %v5354_v2 = vld [vmem:[#allocation40_spill] sm:$0xff] }
 0x2d3   :  { %v1999_v24 = vmax.f32 %v1899_v12, 0.0  ;;  %v2095_v55 = vpack.c.bf16 %v1995_v18, %v1995_v18  ;;  %v1806_v38 = vsub.f32 %v5351_v29, %v4337_v62  ;;  %v1904_v25 = vmul.f32 %v1804_v42, %v4389_v17  ;;  %2194 = vst.msk [vmem:[%s5155_s2 + $0x24] sm:$0xf] %vm2184_vm4, %v2093_v47  ;;  %v5355_v47 = vld [vmem:[#allocation42_spill] sm:$0xff] }
 0x2d4   :  { %v2000_v16 = vmax.f32 %v1900_v14, 0.0  ;;  %v2096_v44 = vpack.c.bf16 %v1996_v5, %v1996_v5  ;;  %v1807_v12 = vsub.f32 %v5352_v0, %v4337_v62  ;;  %v1905_v18 = vmul.f32 %v1805_v46, %v4389_v17  ;;  %2195 = vst.msk [vmem:[%s5155_s2 + $0x28] sm:$0xf] %vm2184_vm4, %v2094_v49  ;;  %v5356_v49 = vld [vmem:[#allocation44_spill] sm:$0xff] }
 0x2d5   :  { %v2001_v10 = vmax.f32 %v1901_v30, 0.0  ;;  %v2097_v36 = vpack.c.bf16 %v1997_v59, %v1997_v59  ;;  %v1808_v14 = vsub.f32 %v5353_v8, %v4337_v62  ;;  %v1906_v5 = vmul.f32 %v1806_v38, %v4389_v17  ;;  %2196 = vst.msk [vmem:[%s5155_s2 + $0x2c] sm:$0xf] %vm2184_vm4, %v2095_v55  ;;  %v5357_v55 = vld [vmem:[#allocation46_spill] sm:$0xff] }
 0x2d6   :  { %v2002_v57 = vmax.f32 %v1902_v7, 0.0  ;;  %v2098_v52 = vpack.c.bf16 %v1998_v15, %v1998_v15  ;;  %v1809_v30 = vsub.f32 %v5354_v2, %v4337_v62  ;;  %v1907_v59 = vmul.f32 %v1807_v12, %v4389_v17  ;;  %2197 = vst.msk [vmem:[%s5155_s2 + $0x30] sm:$0xf] %vm2184_vm4, %v2096_v44  ;;  %v5358_v44 = vld [vmem:[#allocation48_spill] sm:$0xff] }
 0x2d7   :  { %v2003_v42 = vmax.f32 %v1903_v28, 0.0  ;;  %v2099_v37 = vpack.c.bf16 %v1999_v24, %v1999_v24  ;;  %v1810_v7 = vsub.f32 %v5355_v47, %v4337_v62  ;;  %v1908_v15 = vmul.f32 %v1808_v14, %v4389_v17  ;;  %2198 = vst.msk [vmem:[%s5155_s2 + $0x34] sm:$0xf] %vm2184_vm4, %v2097_v36  ;;  %v5359_v36 = vld [vmem:[#allocation50_spill] sm:$0xff] }
 0x2d8   :  { %v2004_v46 = vmax.f32 %v1904_v25, 0.0  ;;  %v2100_v29 = vpack.c.bf16 %v2000_v16, %v2000_v16  ;;  %v1811_v28 = vsub.f32 %v5356_v49, %v4337_v62  ;;  %v1909_v24 = vmul.f32 %v1809_v30, %v4389_v17  ;;  %2199 = vst.msk [vmem:[%s5155_s2 + $0x38] sm:$0xf] %vm2184_vm4, %v2098_v52  ;;  %v5360_v52 = vld [vmem:[#allocation52_spill] sm:$0xff] }
 0x2d9   :  { %v2005_v38 = vmax.f32 %v1905_v18, 0.0  ;;  %v2101_v0 = vpack.c.bf16 %v2001_v10, %v2001_v10  ;;  %v1812_v25 = vsub.f32 %v5357_v55, %v4337_v62  ;;  %v1910_v16 = vmul.f32 %v1810_v7, %v4389_v17  ;;  %2200 = vst.msk [vmem:[%s5155_s2 + $0x3c] sm:$0xf] %vm2184_vm4, %v2099_v37  ;;  %v5361_v37 = vld [vmem:[#allocation54_spill] sm:$0xff] }
 0x2da   :  { %v2006_v12 = vmax.f32 %v1906_v5, 0.0  ;;  %v2102_v8 = vpack.c.bf16 %v2002_v57, %v2002_v57  ;;  %v1813_v18 = vsub.f32 %v5358_v44, %v4337_v62  ;;  %v1911_v10 = vmul.f32 %v1811_v28, %v4389_v17  ;;  %2201 = vst.msk [vmem:[%s5155_s2 + $0x40] sm:$0xf] %vm2184_vm4, %v2100_v29  ;;  %v5362_v29 = vld [vmem:[#allocation56_spill] sm:$0xff] }
 0x2db   :  { %v2007_v14 = vmax.f32 %v1907_v59, 0.0  ;;  %v2103_v2 = vpack.c.bf16 %v2003_v42, %v2003_v42  ;;  %v1814_v5 = vsub.f32 %v5359_v36, %v4337_v62  ;;  %v1912_v57 = vmul.f32 %v1812_v25, %v4389_v17  ;;  %2202 = vst.msk [vmem:[%s5155_s2 + $0x44] sm:$0xf] %vm2184_vm4, %v2101_v0  ;;  %v5363_v0 = vld [vmem:[#allocation58_spill] sm:$0xff] }
 0x2dc   :  { %v2008_v30 = vmax.f32 %v1908_v15, 0.0  ;;  %v2104_v47 = vpack.c.bf16 %v2004_v46, %v2004_v46  ;;  %v1815_v59 = vsub.f32 %v5360_v52, %v4337_v62  ;;  %v1913_v42 = vmul.f32 %v1813_v18, %v4389_v17  ;;  %2203 = vst.msk [vmem:[%s5155_s2 + $0x48] sm:$0xf] %vm2184_vm4, %v2102_v8  ;;  %v5364_v8 = vld [vmem:[#allocation60_spill] sm:$0xff] }
 0x2dd   :  { %v2009_v7 = vmax.f32 %v1909_v24, 0.0  ;;  %v2105_v49 = vpack.c.bf16 %v2005_v38, %v2005_v38  ;;  %v1816_v15 = vsub.f32 %v5361_v37, %v4337_v62  ;;  %v1914_v46 = vmul.f32 %v1814_v5, %v4389_v17  ;;  %2204 = vst.msk [vmem:[%s5155_s2 + $0x4c] sm:$0xf] %vm2184_vm4, %v2103_v2  ;;  %v5365_v2 = vld [vmem:[#allocation62_spill] sm:$0xff] }
 0x2de   :  { %v2010_v28 = vmax.f32 %v1910_v16, 0.0  ;;  %v2106_v55 = vpack.c.bf16 %v2006_v12, %v2006_v12  ;;  %v1817_v24 = vsub.f32 %v5362_v29, %v4337_v62  ;;  %v1915_v38 = vmul.f32 %v1815_v59, %v4389_v17  ;;  %2205 = vst.msk [vmem:[%s5155_s2 + $0x50] sm:$0xf] %vm2184_vm4, %v2104_v47  ;;  %v5366_v47 = vld [vmem:[#allocation64_spill] sm:$0xff] }
 0x2df   :  { %v2011_v25 = vmax.f32 %v1911_v10, 0.0  ;;  %v2107_v44 = vpack.c.bf16 %v2007_v14, %v2007_v14  ;;  %v1818_v16 = vsub.f32 %v5363_v0, %v4337_v62  ;;  %v1916_v12 = vmul.f32 %v1816_v15, %v4389_v17  ;;  %2206 = vst.msk [vmem:[%s5155_s2 + $0x54] sm:$0xf] %vm2184_vm4, %v2105_v49  ;;  %v5367_v49 = vld [vmem:[#allocation65_spill] sm:$0xff] }
 0x2e0   :  { %v2012_v18 = vmax.f32 %v1912_v57, 0.0  ;;  %v2108_v36 = vpack.c.bf16 %v2008_v30, %v2008_v30  ;;  %v1819_v10 = vsub.f32 %v5364_v8, %v4337_v62  ;;  %v1917_v14 = vmul.f32 %v1817_v24, %v4389_v17  ;;  %2207 = vst.msk [vmem:[%s5155_s2 + $0x58] sm:$0xf] %vm2184_vm4, %v2106_v55  ;;  %v5368_v55 = vld [vmem:[#allocation66_spill] sm:$0xff] }
 0x2e1   :  { %v2013_v5 = vmax.f32 %v1913_v42, 0.0  ;;  %v2109_v52 = vpack.c.bf16 %v2009_v7, %v2009_v7  ;;  %v1820_v57 = vsub.f32 %v5365_v2, %v4337_v62  ;;  %v1918_v30 = vmul.f32 %v1818_v16, %v4389_v17  ;;  %2208 = vst.msk [vmem:[%s5155_s2 + $0x5c] sm:$0xf] %vm2184_vm4, %v2107_v44  ;;  %v5369_v44 = vld [vmem:[#allocation67_spill] sm:$0xff] }
 0x2e2   :  { %v2014_v59 = vmax.f32 %v1914_v46, 0.0  ;;  %v2110_v37 = vpack.c.bf16 %v2010_v28, %v2010_v28  ;;  %v1821_v42 = vsub.f32 %v5366_v47, %v4337_v62  ;;  %v1919_v7 = vmul.f32 %v1819_v10, %v4389_v17  ;;  %2209 = vst.msk [vmem:[%s5155_s2 + $0x60] sm:$0xf] %vm2184_vm4, %v2108_v36  ;;  %v5370_v36 = vld [vmem:[#allocation68_spill] sm:$0xff] }
 0x2e3   :  { %v2015_v15 = vmax.f32 %v1915_v38, 0.0  ;;  %v2111_v29 = vpack.c.bf16 %v2011_v25, %v2011_v25  ;;  %v1822_v46 = vsub.f32 %v5367_v49, %v4337_v62  ;;  %v1920_v28 = vmul.f32 %v1820_v57, %v4389_v17  ;;  %2210 = vst.msk [vmem:[%s5155_s2 + $0x64] sm:$0xf] %vm2184_vm4, %v2109_v52  ;;  %v5371_v52 = vld [vmem:[#allocation69_spill] sm:$0xff] }
 0x2e4   :  { %v2016_v24 = vmax.f32 %v1916_v12, 0.0  ;;  %v2112_v0 = vpack.c.bf16 %v2012_v18, %v2012_v18  ;;  %v1823_v38 = vsub.f32 %v5368_v55, %v4337_v62  ;;  %v1921_v25 = vmul.f32 %v1821_v42, %v4389_v17  ;;  %2211 = vst.msk [vmem:[%s5155_s2 + $0x68] sm:$0xf] %vm2184_vm4, %v2110_v37  ;;  %v5372_v37 = vld [vmem:[#allocation70_spill] sm:$0xff] }
 0x2e5   :  { %v2017_v16 = vmax.f32 %v1917_v14, 0.0  ;;  %v2113_v8 = vpack.c.bf16 %v2013_v5, %v2013_v5  ;;  %v1824_v12 = vsub.f32 %v5369_v44, %v4337_v62  ;;  %v1922_v18 = vmul.f32 %v1822_v46, %v4389_v17  ;;  %2212 = vst.msk [vmem:[%s5155_s2 + $0x6c] sm:$0xf] %vm2184_vm4, %v2111_v29  ;;  %v5373_v29 = vld [vmem:[#allocation71_spill] sm:$0xff] }
 0x2e6   :  { %v2018_v10 = vmax.f32 %v1918_v30, 0.0  ;;  %v2114_v2 = vpack.c.bf16 %v2014_v59, %v2014_v59  ;;  %v1825_v14 = vsub.f32 %v5370_v36, %v4337_v62  ;;  %v1923_v5 = vmul.f32 %v1823_v38, %v4389_v17  ;;  %2213 = vst.msk [vmem:[%s5155_s2 + $0x70] sm:$0xf] %vm2184_vm4, %v2112_v0  ;;  %v5374_v0 = vld [vmem:[#allocation72_spill] sm:$0xff] }
 0x2e7   :  { %v2019_v57 = vmax.f32 %v1919_v7, 0.0  ;;  %v2115_v47 = vpack.c.bf16 %v2015_v15, %v2015_v15  ;;  %v1826_v30 = vsub.f32 %v5371_v52, %v4337_v62  ;;  %v1924_v59 = vmul.f32 %v1824_v12, %v4389_v17  ;;  %2214 = vst.msk [vmem:[%s5155_s2 + $0x74] sm:$0xf] %vm2184_vm4, %v2113_v8  ;;  %v5375_v8 = vld [vmem:[#allocation73_spill] sm:$0xff] }
 0x2e8   :  { %v2020_v42 = vmax.f32 %v1920_v28, 0.0  ;;  %v2116_v49 = vpack.c.bf16 %v2016_v24, %v2016_v24  ;;  %v1827_v7 = vsub.f32 %v5372_v37, %v4337_v62  ;;  %v1925_v15 = vmul.f32 %v1825_v14, %v4389_v17  ;;  %2215 = vst.msk [vmem:[%s5155_s2 + $0x78] sm:$0xf] %vm2184_vm4, %v2114_v2  ;;  %v5376_v2 = vld [vmem:[#allocation74_spill] sm:$0xff] }
 0x2e9   :  { %v2021_v46 = vmax.f32 %v1921_v25, 0.0  ;;  %v2117_v55 = vpack.c.bf16 %v2017_v16, %v2017_v16  ;;  %v1828_v28 = vsub.f32 %v5373_v29, %v4337_v62  ;;  %v1926_v24 = vmul.f32 %v1826_v30, %v4389_v17  ;;  %2216 = vst.msk [vmem:[%s5155_s2 + $0x7c] sm:$0xf] %vm2184_vm4, %v2115_v47  ;;  %v5377_v47 = vld [vmem:[#allocation75_spill] sm:$0xff] }
 0x2ea   :  { %v2022_v38 = vmax.f32 %v1922_v18, 0.0  ;;  %v2118_v44 = vpack.c.bf16 %v2018_v10, %v2018_v10  ;;  %v1829_v25 = vsub.f32 %v5374_v0, %v4337_v62  ;;  %v1927_v16 = vmul.f32 %v1827_v7, %v4389_v17  ;;  %2217 = vst.msk [vmem:[%s5155_s2 + $0x80] sm:$0xf] %vm2184_vm4, %v2116_v49  ;;  %v5378_v49 = vld [vmem:[#allocation76_spill] sm:$0xff] }
 0x2eb   :  { %v2023_v12 = vmax.f32 %v1923_v5, 0.0  ;;  %v2119_v36 = vpack.c.bf16 %v2019_v57, %v2019_v57  ;;  %v1830_v18 = vsub.f32 %v5375_v8, %v4337_v62  ;;  %v1928_v10 = vmul.f32 %v1828_v28, %v4389_v17  ;;  %2218 = vst.msk [vmem:[%s5155_s2 + $0x84] sm:$0xf] %vm2184_vm4, %v2117_v55  ;;  %v5379_v55 = vld [vmem:[#allocation8_spill] sm:$0xff] }
 0x2ec   :  { %v2024_v14 = vmax.f32 %v1924_v59, 0.0  ;;  %v2120_v52 = vpack.c.bf16 %v2020_v42, %v2020_v42  ;;  %v1831_v5 = vsub.f32 %v5376_v2, %v4337_v62  ;;  %v1929_v57 = vmul.f32 %v1829_v25, %v4389_v17  ;;  %2219 = vst.msk [vmem:[%s5155_s2 + $0x88] sm:$0xf] %vm2184_vm4, %v2118_v44  ;;  %v5380_v44 = vld [vmem:[#allocation10_spill] sm:$0xff] }
 0x2ed   :  { %v2025_v30 = vmax.f32 %v1925_v15, 0.0  ;;  %v2121_v37 = vpack.c.bf16 %v2021_v46, %v2021_v46  ;;  %v1832_v59 = vsub.f32 %v5377_v47, %v4337_v62  ;;  %v1930_v42 = vmul.f32 %v1830_v18, %v4389_v17  ;;  %2220 = vst.msk [vmem:[%s5155_s2 + $0x8c] sm:$0xf] %vm2184_vm4, %v2119_v36  ;;  %v5381_v36 = vld [vmem:[#allocation12_spill] sm:$0xff] }
 0x2ee   :  { %v2026_v7 = vmax.f32 %v1926_v24, 0.0  ;;  %v2122_v29 = vpack.c.bf16 %v2022_v38, %v2022_v38  ;;  %v1833_v15 = vsub.f32 %v5378_v49, %v4337_v62  ;;  %v1931_v46 = vmul.f32 %v1831_v5, %v4389_v17  ;;  %2221 = vst.msk [vmem:[%s5155_s2 + $0x90] sm:$0xf] %vm2184_vm4, %v2120_v52  ;;  %v5382_v52 = vld [vmem:[#allocation13_spill] sm:$0xff] }
 0x2ef   :  { %v2027_v28 = vmax.f32 %v1927_v16, 0.0  ;;  %v2123_v0 = vpack.c.bf16 %v2023_v12, %v2023_v12  ;;  %v1834_v24 = vsub.f32 %v5379_v55, %v4337_v62  ;;  %v1932_v38 = vmul.f32 %v1832_v59, %v4389_v17  ;;  %2222 = vst.msk [vmem:[%s5155_s2 + $0x94] sm:$0xf] %vm2184_vm4, %v2121_v37  ;;  %v5383_v37 = vld [vmem:[#allocation15_spill] sm:$0xff] }
 0x2f0   :  { %v2028_v25 = vmax.f32 %v1928_v10, 0.0  ;;  %v2124_v8 = vpack.c.bf16 %v2024_v14, %v2024_v14  ;;  %v1835_v16 = vsub.f32 %v5380_v44, %v4337_v62  ;;  %v1933_v12 = vmul.f32 %v1833_v15, %v4389_v17  ;;  %2223 = vst.msk [vmem:[%s5155_s2 + $0x98] sm:$0xf] %vm2184_vm4, %v2122_v29  ;;  %v5384_v29 = vld [vmem:[#allocation16_spill] sm:$0xff] }
 0x2f1   :  { %v2029_v18 = vmax.f32 %v1929_v57, 0.0  ;;  %v2125_v2 = vpack.c.bf16 %v2025_v30, %v2025_v30  ;;  %v1836_v10 = vsub.f32 %v5381_v36, %v4337_v62  ;;  %v1934_v14 = vmul.f32 %v1834_v24, %v4389_v17  ;;  %2224 = vst.msk [vmem:[%s5155_s2 + $0x9c] sm:$0xf] %vm2184_vm4, %v2123_v0  ;;  %v5385_v0 = vld [vmem:[#allocation18_spill] sm:$0xff] }
 0x2f2   :  { %v2030_v5 = vmax.f32 %v1930_v42, 0.0  ;;  %v2126_v47 = vpack.c.bf16 %v2026_v7, %v2026_v7  ;;  %v1837_v57 = vsub.f32 %v5382_v52, %v4337_v62  ;;  %v1935_v30 = vmul.f32 %v1835_v16, %v4389_v17  ;;  %2225 = vst.msk [vmem:[%s5155_s2 + $0xa0] sm:$0xf] %vm2184_vm4, %v2124_v8  ;;  %v5386_v8 = vld [vmem:[#allocation20_spill] sm:$0xff] }
 0x2f3   :  { %v2031_v59 = vmax.f32 %v1931_v46, 0.0  ;;  %v2127_v49 = vpack.c.bf16 %v2027_v28, %v2027_v28  ;;  %v1838_v42 = vsub.f32 %v5383_v37, %v4337_v62  ;;  %v1936_v7 = vmul.f32 %v1836_v10, %v4389_v17  ;;  %2226 = vst.msk [vmem:[%s5155_s2 + $0xa4] sm:$0xf] %vm2184_vm4, %v2125_v2  ;;  %v5387_v2 = vld [vmem:[#allocation22_spill] sm:$0xff] }
 0x2f4   :  { %v2032_v15 = vmax.f32 %v1932_v38, 0.0  ;;  %v2128_v55 = vpack.c.bf16 %v2028_v25, %v2028_v25  ;;  %v1839_v46 = vsub.f32 %v5384_v29, %v4337_v62  ;;  %v1937_v28 = vmul.f32 %v1837_v57, %v4389_v17  ;;  %2227 = vst.msk [vmem:[%s5155_s2 + $0xa8] sm:$0xf] %vm2184_vm4, %v2126_v47  ;;  %v5388_v47 = vld [vmem:[#allocation23_spill] sm:$0xff] }
 0x2f5   :  { %v2033_v24 = vmax.f32 %v1933_v12, 0.0  ;;  %v2129_v44 = vpack.c.bf16 %v2029_v18, %v2029_v18  ;;  %v1840_v38 = vsub.f32 %v5385_v0, %v4337_v62  ;;  %v1938_v25 = vmul.f32 %v1838_v42, %v4389_v17  ;;  %2228 = vst.msk [vmem:[%s5155_s2 + $0xac] sm:$0xf] %vm2184_vm4, %v2127_v49  ;;  %v5389_v49 = vld [vmem:[#allocation25_spill] sm:$0xff] }
 0x2f6   :  { %v2034_v16 = vmax.f32 %v1934_v14, 0.0  ;;  %v2130_v36 = vpack.c.bf16 %v2030_v5, %v2030_v5  ;;  %v1841_v12 = vsub.f32 %v5386_v8, %v4337_v62  ;;  %v1939_v18 = vmul.f32 %v1839_v46, %v4389_v17  ;;  %2229 = vst.msk [vmem:[%s5155_s2 + $0xb0] sm:$0xf] %vm2184_vm4, %v2128_v55  ;;  %v5390_v55 = vld [vmem:[#allocation27_spill] sm:$0xff] }
 0x2f7   :  { %v2035_v10 = vmax.f32 %v1935_v30, 0.0  ;;  %v2131_v52 = vpack.c.bf16 %v2031_v59, %v2031_v59  ;;  %v1842_v14 = vsub.f32 %v5387_v2, %v4337_v62  ;;  %v1940_v5 = vmul.f32 %v1840_v38, %v4389_v17  ;;  %2230 = vst.msk [vmem:[%s5155_s2 + $0xb4] sm:$0xf] %vm2184_vm4, %v2129_v44  ;;  %v5391_v44 = vld [vmem:[#allocation29_spill] sm:$0xff] }
 0x2f8   :  { %v2036_v57 = vmax.f32 %v1936_v7, 0.0  ;;  %v2132_v37 = vpack.c.bf16 %v2032_v15, %v2032_v15  ;;  %v1843_v30 = vsub.f32 %v5388_v47, %v4337_v62  ;;  %v1941_v59 = vmul.f32 %v1841_v12, %v4389_v17  ;;  %2231 = vst.msk [vmem:[%s5155_s2 + $0xb8] sm:$0xf] %vm2184_vm4, %v2130_v36  ;;  %v5392_v36 = vld [vmem:[#allocation31_spill] sm:$0xff] }
 0x2f9   :  { %v2037_v42 = vmax.f32 %v1937_v28, 0.0  ;;  %v2133_v29 = vpack.c.bf16 %v2033_v24, %v2033_v24  ;;  %v1844_v7 = vsub.f32 %v5389_v49, %v4337_v62  ;;  %v1942_v15 = vmul.f32 %v1842_v14, %v4389_v17  ;;  %2232 = vst.msk [vmem:[%s5155_s2 + $0xbc] sm:$0xf] %vm2184_vm4, %v2131_v52 }
 0x2fa   :  { %v2038_v46 = vmax.f32 %v1938_v25, 0.0  ;;  %v2134_v0 = vpack.c.bf16 %v2034_v16, %v2034_v16  ;;  %v1845_v28 = vsub.f32 %v5390_v55, %v4337_v62  ;;  %v1943_v24 = vmul.f32 %v1843_v30, %v4389_v17  ;;  %2233 = vst.msk [vmem:[%s5155_s2 + $0xc0] sm:$0xf] %vm2184_vm4, %v2132_v37 }
 0x2fb   :  { %v2039_v38 = vmax.f32 %v1939_v18, 0.0  ;;  %v2135_v8 = vpack.c.bf16 %v2035_v10, %v2035_v10  ;;  %v1846_v25 = vsub.f32 %v5391_v44, %v4337_v62  ;;  %v1944_v16 = vmul.f32 %v1844_v7, %v4389_v17  ;;  %2234 = vst.msk [vmem:[%s5155_s2 + $0xc4] sm:$0xf] %vm2184_vm4, %v2133_v29 }
 0x2fc   :  { %v2040_v12 = vmax.f32 %v1940_v5, 0.0  ;;  %v2136_v2 = vpack.c.bf16 %v2036_v57, %v2036_v57  ;;  %v1847_v18 = vsub.f32 %v5392_v36, %v4337_v62  ;;  %v1945_v10 = vmul.f32 %v1845_v28, %v4389_v17  ;;  %2235 = vst.msk [vmem:[%s5155_s2 + $0xc8] sm:$0xf] %vm2184_vm4, %v2134_v0 }
 0x2fd   :  { %v2041_v14 = vmax.f32 %v1941_v59, 0.0  ;;  %v2137_v47 = vpack.c.bf16 %v2037_v42, %v2037_v42  ;;  %v1946_v52 = vmul.f32 %v1846_v25, %v4389_v17  ;;  %v2042_v5 = vmax.f32 %v1942_v15, 0.0  ;;  %2236 = vst.msk [vmem:[%s5155_s2 + $0xcc] sm:$0xf] %vm2184_vm4, %v2135_v8 }
 0x2fe   :  { %v2138_v57 = vpack.c.bf16 %v2038_v46, %v2038_v46  ;;  %v1947_v62 = vmul.f32 %v1847_v18, %v4389_v17  ;;  %v2043_v37 = vmax.f32 %v1943_v24, 0.0  ;;  %v2139_v30 = vpack.c.bf16 %v2039_v38, %v2039_v38  ;;  %2237 = vst.msk [vmem:[%s5155_s2 + $0xd0] sm:$0xf] %vm2184_vm4, %v2136_v2 }
 0x2ff   :  { %v2044_v59 = vmax.f32 %v1944_v16, 0.0  ;;  %v2140_v42 = vpack.c.bf16 %v2040_v12, %v2040_v12  ;;  %v2045_v29 = vmax.f32 %v1945_v10, 0.0  ;;  %v2141_v49 = vpack.c.bf16 %v2041_v14, %v2041_v14  ;;  %2238 = vst.msk [vmem:[%s5155_s2 + $0xd4] sm:$0xf] %vm2184_vm4, %v2137_v47 }
 0x300   :  { %v2046_v17 = vmax.f32 %v1946_v52, 0.0  ;;  %v2142_v7 = vpack.c.bf16 %v2042_v5, %v2042_v5  ;;  %2239 = vst.msk [vmem:[%s5155_s2 + $0xd8] sm:$0xf] %vm2184_vm4, %v2138_v57  ;;  %v2047_v15 = vmax.f32 %v1947_v62, 0.0  ;;  %v2143_v46 = vpack.c.bf16 %v2043_v37, %v2043_v37 }
 0x301   :  { %2240 = vst.msk [vmem:[%s5155_s2 + $0xdc] sm:$0xf] %vm2184_vm4, %v2139_v30  ;;  %v2048_v0 = vmax.f32 %v4418_v41, 0.0  ;;  %v2144_v55 = vpack.c.bf16 %v2044_v59, %v2044_v59  ;;  %v2049_v28 = vmax.f32 %v4421_v9, 0.0  ;;  %v2145_v24 = vpack.c.bf16 %v2045_v29, %v2045_v29 }
 0x302   :  { %2241 = vst.msk [vmem:[%s5155_s2 + $0xe0] sm:$0xf] %vm2184_vm4, %v2140_v42  ;;  %v2050_v38 = vmax.f32 %v4424_v60, 0.0  ;;  %v2146_v8 = vpack.c.bf16 %v2046_v17, %v2046_v17  ;;  %v2051_v41 = vmax.f32 %v4427_v48, 0.0  ;;  %v2147_v44 = vpack.c.bf16 %v2047_v15, %v2047_v15 }
 0x303   :  { %2242 = vst.msk [vmem:[%s5155_s2 + $0xe4] sm:$0xf] %vm2184_vm4, %v2141_v49  ;;  %v2052_v9 = vmax.f32 %v4430_v58, 0.0  ;;  %v2148_v25 = vpack.c.bf16 %v2048_v0, %v2048_v0  ;;  %v2053_v60 = vmax.f32 %v4433_v43, 0.0  ;;  %v2149_v16 = vpack.c.bf16 %v2049_v28, %v2049_v28 }
 0x304   :  { %2243 = vst.msk [vmem:[%s5155_s2 + $0xe8] sm:$0xf] %vm2184_vm4, %v2142_v7  ;;  %v2054_v48 = vmax.f32 %v4436_v22, 0.0  ;;  %v2150_v12 = vpack.c.bf16 %v2050_v38, %v2050_v38  ;;  %v2055_v58 = vmax.f32 %v4439_v39, 0.0  ;;  %v2151_v2 = vpack.c.bf16 %v2051_v41, %v2051_v41 }
 0x305   :  { %2244 = vst.msk [vmem:[%s5155_s2 + $0xec] sm:$0xf] %vm2184_vm4, %v2143_v46  ;;  %v2056_v43 = vmax.f32 %v4442_v53, 0.0  ;;  %v2152_v36 = vpack.c.bf16 %v2052_v9, %v2052_v9  ;;  %v2057_v22 = vmax.f32 %v4445_v63, 0.0  ;;  %v2153_v18 = vpack.c.bf16 %v2053_v60, %v2053_v60 }
 0x306   :  { %2245 = vst.msk [vmem:[%s5155_s2 + $0xf0] sm:$0xf] %vm2184_vm4, %v2144_v55  ;;  %v2058_v39 = vmax.f32 %v4448_v3, 0.0  ;;  %v2154_v10 = vpack.c.bf16 %v2054_v48, %v2054_v48  ;;  %v2059_v53 = vmax.f32 %v4451_v35, 0.0  ;;  %v2155_v14 = vpack.c.bf16 %v2055_v58, %v2055_v58 }
 0x307   :  { %2246 = vst.msk [vmem:[%s5155_s2 + $0xf4] sm:$0xf] %vm2184_vm4, %v2145_v24  ;;  %v2060_v63 = vmax.f32 %v4454_v31, 0.0  ;;  %v2156_v47 = vpack.c.bf16 %v2056_v43, %v2056_v43  ;;  %v2061_v3 = vmax.f32 %v4457_v11, 0.0  ;;  %v2157_v52 = vpack.c.bf16 %v2057_v22, %v2057_v22 }
 0x308   :  { %2247 = vst.msk [vmem:[%s5155_s2 + $0xf8] sm:$0xf] %vm2184_vm4, %v2146_v8  ;;  %v2062_v35 = vmax.f32 %v4460_v26, 0.0  ;;  %v2158_v5 = vpack.c.bf16 %v2058_v39, %v2058_v39  ;;  %v2063_v31 = vmax.f32 %v4463_v19, 0.0  ;;  %v2159_v57 = vpack.c.bf16 %v2059_v53, %v2059_v53 }
 0x309   :  { %2248 = vst.msk [vmem:[%s5155_s2 + $0xfc] sm:$0xf] %vm2184_vm4, %v2147_v44  ;;  %v2064_v11 = vmax.f32 %v4466_v20, 0.0  ;;  %v2160_v62 = vpack.c.bf16 %v2060_v63, %v2060_v63  ;;  %v2065_v26 = vmax.f32 %v4469_v40, 0.0  ;;  %v2161_v37 = vpack.c.bf16 %v2061_v3, %v2061_v3 }
 0x30a   :  { %2249 = vst.msk [vmem:[%s5155_s2 + $0x100] sm:$0xf] %vm2184_vm4, %v2148_v25  ;;  %v2066_v19 = vmax.f32 %v4472_v4, 0.0  ;;  %v2162_v30 = vpack.c.bf16 %v2062_v35, %v2062_v35  ;;  %v2067_v20 = vmax.f32 %v4475_v45, 0.0  ;;  %v2163_v59 = vpack.c.bf16 %v2063_v31, %v2063_v31 }
 0x30b   :  { %2250 = vst.msk [vmem:[%s5155_s2 + $0x104] sm:$0xf] %vm2184_vm4, %v2149_v16  ;;  %v2068_v40 = vmax.f32 %v4478_v6, 0.0  ;;  %v2164_v42 = vpack.c.bf16 %v2064_v11, %v2064_v11  ;;  %v2069_v4 = vmax.f32 %v4481_v27, 0.0  ;;  %v2165_v29 = vpack.c.bf16 %v2065_v26, %v2065_v26 }
 0x30c   :  { %2251 = vst.msk [vmem:[%s5155_s2 + $0x108] sm:$0xf] %vm2184_vm4, %v2150_v12  ;;  %v2070_v45 = vmax.f32 %v4484_v13, 0.0  ;;  %v2166_v49 = vpack.c.bf16 %v2066_v19, %v2066_v19  ;;  %v2071_v6 = vmax.f32 %v4487_v32, 0.0  ;;  %v2167_v17 = vpack.c.bf16 %v2067_v20, %v2067_v20 }
 0x30d   :  { %2252 = vst.msk [vmem:[%s5155_s2 + $0x10c] sm:$0xf] %vm2184_vm4, %v2151_v2  ;;  %v2072_v27 = vmax.f32 %v4490_v61, 0.0  ;;  %v2168_v7 = vpack.c.bf16 %v2068_v40, %v2068_v40  ;;  %v2073_v13 = vmax.f32 %v4493_v51, 0.0  ;;  %v2169_v15 = vpack.c.bf16 %v2069_v4, %v2069_v4 }
 0x30e   :  { %2253 = vst.msk [vmem:[%s5155_s2 + $0x110] sm:$0xf] %vm2184_vm4, %v2152_v36  ;;  %v2074_v32 = vmax.f32 %v4496_v50, 0.0  ;;  %v2170_v46 = vpack.c.bf16 %v2070_v45, %v2070_v45  ;;  %v2075_v61 = vmax.f32 %v4499_v23, 0.0  ;;  %v2171_v0 = vpack.c.bf16 %v2071_v6, %v2071_v6 }
 0x30f   :  { %2254 = vst.msk [vmem:[%s5155_s2 + $0x114] sm:$0xf] %vm2184_vm4, %v2153_v18  ;;  %v2076_v51 = vmax.f32 %v4502_v1, 0.0  ;;  %v2172_v55 = vpack.c.bf16 %v2072_v27, %v2072_v27  ;;  %v2077_v50 = vmax.f32 %v4505_v33, 0.0  ;;  %v2173_v28 = vpack.c.bf16 %v2073_v13, %v2073_v13 }
 0x310   :  { %2255 = vst.msk [vmem:[%s5155_s2 + $0x118] sm:$0xf] %vm2184_vm4, %v2154_v10  ;;  %v2078_v23 = vmax.f32 %v4508_v21, 0.0  ;;  %v2174_v24 = vpack.c.bf16 %v2074_v32, %v2074_v32  ;;  %v2079_v1 = vmax.f32 %v4511_v56, 0.0  ;;  %v2175_v38 = vpack.c.bf16 %v2075_v61, %v2075_v61  ;;  %v5393_v56 = vld [vmem:[#allocation33_spill] sm:$0xff] }
 0x311   :  { %2256 = vst.msk [vmem:[%s5155_s2 + $0x11c] sm:$0xf] %vm2184_vm4, %v2155_v14  ;;  %v2080_v33 = vmax.f32 %v4514_v54, 0.0  ;;  %v2176_v8 = vpack.c.bf16 %v2076_v51, %v2076_v51  ;;  %v2081_v21 = vmax.f32 %v4517_v34, 0.0  ;;  %v2177_v41 = vpack.c.bf16 %v2077_v50, %v2077_v50  ;;  %v5394_v54 = vld [vmem:[#allocation35_spill] sm:$0xff] }
 0x312   :  { %2257 = vst.msk [vmem:[%s5155_s2 + $0x120] sm:$0xf] %vm2184_vm4, %v2156_v47  ;;  %v2082_v44 = vmax.f32 %v5393_v56, 0.0  ;;  %v2178_v9 = vpack.c.bf16 %v2078_v23, %v2078_v23  ;;  %v2083_v25 = vmax.f32 %v5394_v54, 0.0  ;;  %v2179_v60 = vpack.c.bf16 %v2079_v1, %v2079_v1 }
 0x313   :  { %2258 = vst.msk [vmem:[%s5155_s2 + $0x124] sm:$0xf] %vm2184_vm4, %v2157_v52  ;;  %v2180_v34 = vpack.c.bf16 %v2080_v33, %v2080_v33  ;;  %v2181_v16 = vpack.c.bf16 %v2081_v21, %v2081_v21 }
 0x314   :  { %2259 = vst.msk [vmem:[%s5155_s2 + $0x128] sm:$0xf] %vm2184_vm4, %v2158_v5  ;;  %v2182_v48 = vpack.c.bf16 %v2082_v44, %v2082_v44  ;;  %v2183_v12 = vpack.c.bf16 %v2083_v25, %v2083_v25 }
 0x315   :  { %2260 = vst.msk [vmem:[%s5155_s2 + $0x12c] sm:$0xf] %vm2184_vm4, %v2159_v57 }
 0x316   :  { %2261 = vst.msk [vmem:[%s5155_s2 + $0x130] sm:$0xf] %vm2184_vm4, %v2160_v62 }
 0x317   :  { %2262 = vst.msk [vmem:[%s5155_s2 + $0x134] sm:$0xf] %vm2184_vm4, %v2161_v37 }
 0x318   :  { %2263 = vst.msk [vmem:[%s5155_s2 + $0x138] sm:$0xf] %vm2184_vm4, %v2162_v30 }
 0x319   :  { %2264 = vst.msk [vmem:[%s5155_s2 + $0x13c] sm:$0xf] %vm2184_vm4, %v2163_v59 }
 0x31a   :  { %2265 = vst.msk [vmem:[%s5155_s2 + $0x140] sm:$0xf] %vm2184_vm4, %v2164_v42 }
 0x31b   :  { %2266 = vst.msk [vmem:[%s5155_s2 + $0x144] sm:$0xf] %vm2184_vm4, %v2165_v29 }
 0x31c   :  { %2267 = vst.msk [vmem:[%s5155_s2 + $0x148] sm:$0xf] %vm2184_vm4, %v2166_v49 }
 0x31d   :  { %2268 = vst.msk [vmem:[%s5155_s2 + $0x14c] sm:$0xf] %vm2184_vm4, %v2167_v17 }
 0x31e   :  { %2269 = vst.msk [vmem:[%s5155_s2 + $0x150] sm:$0xf] %vm2184_vm4, %v2168_v7 }
 0x31f   :  { %2270 = vst.msk [vmem:[%s5155_s2 + $0x154] sm:$0xf] %vm2184_vm4, %v2169_v15 }
 0x320   :  { %2271 = vst.msk [vmem:[%s5155_s2 + $0x158] sm:$0xf] %vm2184_vm4, %v2170_v46 }
 0x321   :  { %2272 = vst.msk [vmem:[%s5155_s2 + $0x15c] sm:$0xf] %vm2184_vm4, %v2171_v0 }
 0x322   :  { %2273 = vst.msk [vmem:[%s5155_s2 + $0x160] sm:$0xf] %vm2184_vm4, %v2172_v55 }
 0x323   :  { %2274 = vst.msk [vmem:[%s5155_s2 + $0x164] sm:$0xf] %vm2184_vm4, %v2173_v28 }
 0x324   :  { %2275 = vst.msk [vmem:[%s5155_s2 + $0x168] sm:$0xf] %vm2184_vm4, %v2174_v24 }
 0x325   :  { %2276 = vst.msk [vmem:[%s5155_s2 + $0x16c] sm:$0xf] %vm2184_vm4, %v2175_v38 }
 0x326   :  { %2277 = vst.msk [vmem:[%s5155_s2 + $0x170] sm:$0xf] %vm2184_vm4, %v2176_v8 }
 0x327   :  { %2278 = vst.msk [vmem:[%s5155_s2 + $0x174] sm:$0xf] %vm2184_vm4, %v2177_v41 }
 0x328   :  { %2279 = vst.msk [vmem:[%s5155_s2 + $0x178] sm:$0xf] %vm2184_vm4, %v2178_v9 }
 0x329   :  { %2280 = vst.msk [vmem:[%s5155_s2 + $0x17c] sm:$0xf] %vm2184_vm4, %v2179_v60 }
 0x32a   :  { %2281 = vst.msk [vmem:[%s5155_s2 + $0x180] sm:$0xf] %vm2184_vm4, %v2180_v34 }
 0x32b   :  { %2282 = vst.msk [vmem:[%s5155_s2 + $0x184] sm:$0xf] %vm2184_vm4, %v2181_v16 }
 0x32c   :  { %2283 = vst.msk [vmem:[%s5155_s2 + $0x188] sm:$0xf] %vm2184_vm4, %v2182_v48 }
 0x32d   :  { %2284 = vst.msk [vmem:[%s5155_s2 + $0x18c] sm:$0xf] %vm2184_vm4, %v2183_v12 }

// kernel: esnet_forward.5
= control target key start
LH: loop header
LB: loop body
LE: loop exit
PB: predicated region body
PF: predicated region fallthrough
CT: control target
= control target key end

     0   :  { %vm787_vm0 = vcmask 523264   ;;  %vm1012_vm4 = vcmask 519168   ;;  %s2167_s1 = inlined_call_operand.vmem [shape: bf16[512,64], index: 1, kind: input, shape index: {}]   ;;  %s2168_s0 = inlined_call_operand.vmem [shape: bf16[176,512], index: 0, kind: input, shape index: {}]   ;;  %s2169_s2 = inlined_call_operand.vmem [shape: bf16[176,64], index: 2, kind: output, shape index: {}]  }
   0x1   :  { %v1394_v0 = vld [vmem:[%s2167_s1 + $0x38] sm:$0xff]  ;;  %v1393_v4 = vld [vmem:[%s2167_s1 + $0x30] sm:$0xff]  ;;  %v1392_v8 = vld [vmem:[%s2167_s1 + $0x28] sm:$0xff] }
   0x2   :  { %v1402_v1 = vld [vmem:[%s2167_s1 + $0x78] sm:$0xff]  ;;  %531 = vmatpush.bf16.msra.mxu0 %v1394_v0  ;;  %v1401_v5 = vld [vmem:[%s2167_s1 + $0x70] sm:$0xff]  ;;  %v1400_v9 = vld [vmem:[%s2167_s1 + $0x68] sm:$0xff] }
   0x3   :  { %v1410_v2 = vld [vmem:[%s2167_s1 + $0xb8] sm:$0xff]  ;;  %595 = vmatpush.bf16.msra.mxu1 %v1402_v1  ;;  %v1409_v6 = vld [vmem:[%s2167_s1 + $0xb0] sm:$0xff]  ;;  %v1408_v10 = vld [vmem:[%s2167_s1 + $0xa8] sm:$0xff] }
   0x4   :  { %v1418_v3 = vld [vmem:[%s2167_s1 + $0xf8] sm:$0xff]  ;;  %659 = vmatpush.bf16.msra.mxu2 %v1410_v2  ;;  %v1417_v7 = vld [vmem:[%s2167_s1 + $0xf0] sm:$0xff]  ;;  %v1416_v11 = vld [vmem:[%s2167_s1 + $0xe8] sm:$0xff] }
   0x5   :  { %723 = vmatpush.bf16.msra.mxu3 %v1418_v3  ;;  %v1391_v12 = vld [vmem:[%s2167_s1 + $0x20] sm:$0xff]  ;;  %v1390_v16 = vld [vmem:[%s2167_s1 + $0x18] sm:$0xff]  ;;  %v1389_v20 = vld [vmem:[%s2167_s1 + $0x10] sm:$0xff] }
   0x6   :  { %532 = vmatpush.bf16.msra.mxu0 %v1393_v4  ;;  %v1399_v13 = vld [vmem:[%s2167_s1 + $0x60] sm:$0xff]  ;;  %v1398_v17 = vld [vmem:[%s2167_s1 + $0x58] sm:$0xff]  ;;  %v1397_v21 = vld [vmem:[%s2167_s1 + $0x50] sm:$0xff] }
   0x7   :  { %596 = vmatpush.bf16.msra.mxu1 %v1401_v5  ;;  %v1407_v14 = vld [vmem:[%s2167_s1 + $0xa0] sm:$0xff]  ;;  %v1406_v18 = vld [vmem:[%s2167_s1 + $0x98] sm:$0xff]  ;;  %v1405_v22 = vld [vmem:[%s2167_s1 + $0x90] sm:$0xff] }
   0x8   :  { %660 = vmatpush.bf16.msra.mxu2 %v1409_v6  ;;  %v1415_v15 = vld [vmem:[%s2167_s1 + $0xe0] sm:$0xff]  ;;  %v1414_v19 = vld [vmem:[%s2167_s1 + $0xd8] sm:$0xff]  ;;  %v1413_v23 = vld [vmem:[%s2167_s1 + $0xd0] sm:$0xff] }
   0x9   :  { %724 = vmatpush.bf16.msra.mxu3 %v1417_v7  ;;  %v1388_v24 = vld [vmem:[%s2167_s1 + $0x8] sm:$0xff]  ;;  %v1387_v28 = vld [vmem:[%s2167_s1] sm:$0xff]  ;;  %v1345_v33 = vld [vmem:[%s2168_s0 + $0xc] sm:$0xf0] }
   0xa   :  { %533 = vmatpush.bf16.msra.mxu0 %v1392_v8  ;;  %v1396_v25 = vld [vmem:[%s2167_s1 + $0x48] sm:$0xff]  ;;  %v1395_v29 = vld [vmem:[%s2167_s1 + $0x40] sm:$0xff]  ;;  %v1043_v35 = vld [vmem:[%s2168_s0 + $0x10] sm:$0xf0] }
   0xb   :  { %597 = vmatpush.bf16.msra.mxu1 %v1400_v9  ;;  %v1404_v26 = vld [vmem:[%s2167_s1 + $0x88] sm:$0xff]  ;;  %v1403_v30 = vld [vmem:[%s2167_s1 + $0x80] sm:$0xff]  ;;  %v1346_v37 = vld [vmem:[%s2168_s0 + $0x14] sm:$0xf0] }
   0xc   :  { %661 = vmatpush.bf16.msra.mxu2 %v1408_v10  ;;  %v1412_v27 = vld [vmem:[%s2167_s1 + $0xc8] sm:$0xff]  ;;  %v1411_v31 = vld [vmem:[%s2167_s1 + $0xc0] sm:$0xff]  ;;  %v1051_v39 = vld [vmem:[%s2168_s0 + $0x18] sm:$0xf0] }
   0xd   :  { %725 = vmatpush.bf16.msra.mxu3 %v1416_v11  ;;  %v1041_v32 = vld [vmem:[%s2168_s0] sm:$0xf]  ;;  %v1343_v34 = vld [vmem:[%s2168_s0 + $0x4] sm:$0xf]  ;;  %v1049_v36 = vld [vmem:[%s2168_s0 + $0x8] sm:$0xf] }
   0xe   :  { %534 = vmatpush.bf16.msra.mxu0 %v1391_v12  ;;  %v1344_v38 = vld [vmem:[%s2168_s0 + $0xc] sm:$0xf]  ;;  %v1042_v40 = vor.u32 %v1345_v33, %v1041_v32  ;;  %v1046_v41 = vor.u32 %v1343_v34, %v1043_v35  ;;  %v1050_v42 = vor.u32 %v1346_v37, %v1049_v36  ;;  %v1057_v44 = vld [vmem:[%s2168_s0 + $0x20] sm:$0xf]  ;;  %v1349_v45 = vld [vmem:[%s2168_s0 + $0x2c] sm:$0xf0] }
   0xf   :  { %598 = vmatpush.bf16.msra.mxu1 %v1399_v13  ;;  %v1054_v43 = vor.u32 %v1344_v38, %v1051_v39  ;;  %v1347_v46 = vld [vmem:[%s2168_s0 + $0x24] sm:$0xf]  ;;  %v1059_v47 = vld [vmem:[%s2168_s0 + $0x30] sm:$0xf0]  ;;  %v1065_v48 = vld [vmem:[%s2168_s0 + $0x28] sm:$0xf]  ;;  %v1058_v52 = vor.u32 %v1349_v45, %v1057_v44 }
  0x10   :  { %662 = vmatpush.bf16.msra.mxu2 %v1407_v14  ;;  %v1350_v49 = vld [vmem:[%s2168_s0 + $0x34] sm:$0xf0]  ;;  %v1348_v50 = vld [vmem:[%s2168_s0 + $0x2c] sm:$0xf]  ;;  %v1067_v51 = vld [vmem:[%s2168_s0 + $0x38] sm:$0xf0]  ;;  %v1062_v53 = vor.u32 %v1347_v46, %v1059_v47 }
  0x11   :  { %726 = vmatpush.bf16.msra.mxu3 %v1415_v15  ;;  %v1066_v54 = vor.u32 %v1350_v49, %v1065_v48  ;;  %v1070_v55 = vor.u32 %v1348_v50, %v1067_v51  ;;  %v1073_v56 = vld [vmem:[%s2168_s0 + $0x40] sm:$0xf]  ;;  %v1353_v57 = vld [vmem:[%s2168_s0 + $0x4c] sm:$0xf0]  ;;  %v1351_v58 = vld [vmem:[%s2168_s0 + $0x44] sm:$0xf] }
  0x12   :  { %535 = vmatpush.bf16.msra.mxu0 %v1390_v16  ;;  %v1075_v59 = vld [vmem:[%s2168_s0 + $0x50] sm:$0xf0]  ;;  %v1081_v60 = vld [vmem:[%s2168_s0 + $0x48] sm:$0xf]  ;;  %v1354_v61 = vld [vmem:[%s2168_s0 + $0x54] sm:$0xf0]  ;;  %v1074_v0 = vor.u32 %v1353_v57, %v1073_v56 }
  0x13   :  { %599 = vmatpush.bf16.msra.mxu1 %v1398_v17  ;;  %v1352_v62 = vld [vmem:[%s2168_s0 + $0x4c] sm:$0xf]  ;;  %v1083_v63 = vld [vmem:[%s2168_s0 + $0x58] sm:$0xf0]  ;;  %v1078_v1 = vor.u32 %v1351_v58, %v1075_v59  ;;  %v1082_v2 = vor.u32 %v1354_v61, %v1081_v60  ;;  %v1089_v4 = vld [vmem:[%s2168_s0 + $0x60] sm:$0xf] }
  0x14   :  { %663 = vmatpush.bf16.msra.mxu2 %v1406_v18  ;;  %v1086_v3 = vor.u32 %v1352_v62, %v1083_v63  ;;  %v1357_v5 = vld [vmem:[%s2168_s0 + $0x6c] sm:$0xf0]  ;;  %v1355_v6 = vld [vmem:[%s2168_s0 + $0x64] sm:$0xf]  ;;  %v1091_v7 = vld [vmem:[%s2168_s0 + $0x70] sm:$0xf0] }
  0x15   :  { %727 = vmatpush.bf16.msra.mxu3 %v1414_v19  ;;  %v1097_v8 = vld [vmem:[%s2168_s0 + $0x68] sm:$0xf]  ;;  %v1358_v9 = vld [vmem:[%s2168_s0 + $0x74] sm:$0xf0]  ;;  %v1356_v10 = vld [vmem:[%s2168_s0 + $0x6c] sm:$0xf]  ;;  %v1090_v12 = vor.u32 %v1357_v5, %v1089_v4  ;;  %v1094_v13 = vor.u32 %v1355_v6, %v1091_v7 }
  0x16   :  { %536 = vmatpush.bf16.msra.mxu0 %v1389_v20  ;;  %v1099_v11 = vld [vmem:[%s2168_s0 + $0x78] sm:$0xf0]  ;;  %v1098_v14 = vor.u32 %v1358_v9, %v1097_v8  ;;  %v1105_v16 = vld [vmem:[%s2168_s0 + $0x80] sm:$0xf]  ;;  %v1361_v17 = vld [vmem:[%s2168_s0 + $0x8c] sm:$0xf0] }
  0x17   :  { %600 = vmatpush.bf16.msra.mxu1 %v1397_v21  ;;  %v1102_v15 = vor.u32 %v1356_v10, %v1099_v11  ;;  %v1359_v18 = vld [vmem:[%s2168_s0 + $0x84] sm:$0xf]  ;;  %v1107_v19 = vld [vmem:[%s2168_s0 + $0x90] sm:$0xf0]  ;;  %v1113_v20 = vld [vmem:[%s2168_s0 + $0x88] sm:$0xf] }
  0x18   :  { %664 = vmatpush.bf16.msra.mxu2 %v1405_v22  ;;  %v1362_v21 = vld [vmem:[%s2168_s0 + $0x94] sm:$0xf0]  ;;  %v1360_v22 = vld [vmem:[%s2168_s0 + $0x8c] sm:$0xf]  ;;  %v1129_v32 = vld [vmem:[%s2168_s0 + $0xa8] sm:$0xf] }
  0x19   :  { %728 = vmatpush.bf16.msra.mxu3 %v1413_v23  ;;  %v1115_v23 = vld [vmem:[%s2168_s0 + $0x98] sm:$0xf0]  ;;  %v1366_v33 = vld [vmem:[%s2168_s0 + $0xb4] sm:$0xf0]  ;;  %v1364_v34 = vld [vmem:[%s2168_s0 + $0xac] sm:$0xf] }
  0x1a   :  { %537 = vmatpush.bf16.msra.mxu0 %v1388_v24  ;;  %v1106_v24 = vor.u32 %v1361_v17, %v1105_v16  ;;  %v1131_v35 = vld [vmem:[%s2168_s0 + $0xb8] sm:$0xf0]  ;;  %v1130_v38 = vor.u32 %v1366_v33, %v1129_v32  ;;  %v1145_v44 = vld [vmem:[%s2168_s0 + $0xc8] sm:$0xf]  ;;  %v1370_v45 = vld [vmem:[%s2168_s0 + $0xd4] sm:$0xf0] }
  0x1b   :  { %601 = vmatpush.bf16.msra.mxu1 %v1396_v25  ;;  %v1110_v25 = vor.u32 %v1359_v18, %v1107_v19  ;;  %v1134_v39 = vor.u32 %v1364_v34, %v1131_v35  ;;  %v1368_v46 = vld [vmem:[%s2168_s0 + $0xcc] sm:$0xf]  ;;  %v1147_v47 = vld [vmem:[%s2168_s0 + $0xd8] sm:$0xf0]  ;;  %v1146_v50 = vor.u32 %v1370_v45, %v1145_v44  ;;  %v1161_v56 = vld [vmem:[%s2168_s0 + $0xe8] sm:$0xf] }
  0x1c   :  { %665 = vmatpush.bf16.msra.mxu2 %v1404_v26  ;;  %v1114_v26 = vor.u32 %v1362_v21, %v1113_v20  ;;  %v1150_v51 = vor.u32 %v1368_v46, %v1147_v47  ;;  %v1374_v57 = vld [vmem:[%s2168_s0 + $0xf4] sm:$0xf0]  ;;  %v1372_v58 = vld [vmem:[%s2168_s0 + $0xec] sm:$0xf]  ;;  %v1163_v59 = vld [vmem:[%s2168_s0 + $0xf8] sm:$0xf0] }
  0x1d   :  { %729 = vmatpush.bf16.msra.mxu3 %v1412_v27  ;;  %v1118_v27 = vor.u32 %v1360_v22, %v1115_v23  ;;  %v1162_v62 = vor.u32 %v1374_v57, %v1161_v56  ;;  %v1166_v63 = vor.u32 %v1372_v58, %v1163_v59  ;;  %v1177_v4 = vld [vmem:[%s2168_s0 + $0x108] sm:$0xf]  ;;  %v1378_v5 = vld [vmem:[%s2168_s0 + $0x114] sm:$0xf0]  ;;  %v1376_v6 = vld [vmem:[%s2168_s0 + $0x10c] sm:$0xf] }
  0x1e   :  { %538 = vmatpush.bf16.msra.mxu0 %v1387_v28  ;;  %v1121_v28 = vld [vmem:[%s2168_s0 + $0xa0] sm:$0xf]  ;;  %v1179_v7 = vld [vmem:[%s2168_s0 + $0x118] sm:$0xf0]  ;;  %v1381_v23 = vld [vmem:[%s2168_s0 + $0x12c] sm:$0xf0] }
  0x1f   :  { %602 = vmatpush.bf16.msra.mxu1 %v1395_v29  ;;  %v1365_v29 = vld [vmem:[%s2168_s0 + $0xac] sm:$0xf0]  ;;  %v1185_v22 = vld [vmem:[%s2168_s0 + $0x120] sm:$0xf] }
  0x20   :  { %666 = vmatpush.bf16.msra.mxu2 %v1403_v30  ;;  %v1363_v30 = vld [vmem:[%s2168_s0 + $0xa4] sm:$0xf]  ;;  %v1122_v36 = vor.u32 %v1365_v29, %v1121_v28  ;;  %v1380_v28 = vld [vmem:[%s2168_s0 + $0x12c] sm:$0xf]  ;;  %v1195_v29 = vld [vmem:[%s2168_s0 + $0x138] sm:$0xf0]  ;;  %v1186_v32 = vor.u32 %v1381_v23, %v1185_v22 }
  0x21   :  { %730 = vmatpush.bf16.msra.mxu3 %v1411_v31  ;;  %539 = vmatmul.bf16.vlgmr.msra.gmra.mxu0 %v1042_v40  ;;  %v1123_v31 = vld [vmem:[%s2168_s0 + $0xb0] sm:$0xf0]  ;;  %v1137_v40 = vld [vmem:[%s2168_s0 + $0xc0] sm:$0xf] }
  0x22   :  { %603 = vmatmul.bf16.vlgmr.msra.gmra.mxu1 %v1046_v41  ;;  %v1126_v37 = vor.u32 %v1363_v30, %v1123_v31  ;;  %v1369_v41 = vld [vmem:[%s2168_s0 + $0xcc] sm:$0xf0] }
  0x23   :  { %667 = vmatmul.bf16.vlgmr.msra.gmra.mxu2 %v1050_v42  ;;  %v1367_v42 = vld [vmem:[%s2168_s0 + $0xc4] sm:$0xf]  ;;  %v1138_v48 = vor.u32 %v1369_v41, %v1137_v40 }
  0x24   :  { %731 = vmatmul.bf16.vlgmr.msra.gmra.mxu3 %v1054_v43  ;;  %v1139_v43 = vld [vmem:[%s2168_s0 + $0xd0] sm:$0xf0] }
  0x25   :  { %v1142_v49 = vor.u32 %v1367_v42, %v1139_v43 }
  0x31   :  { %544 = vmatmul.bf16.gmra.mxu0 %v1058_v52  ;;  %v1153_v52 = vld [vmem:[%s2168_s0 + $0xe0] sm:$0xf] }
  0x32   :  { %608 = vmatmul.bf16.gmra.mxu1 %v1062_v53  ;;  %v1373_v53 = vld [vmem:[%s2168_s0 + $0xec] sm:$0xf0] }
  0x33   :  { %672 = vmatmul.bf16.gmra.mxu2 %v1066_v54  ;;  %v1371_v54 = vld [vmem:[%s2168_s0 + $0xe4] sm:$0xf]  ;;  %v1154_v60 = vor.u32 %v1373_v53, %v1153_v52  ;;  %v1209_v52 = vld [vmem:[%s2168_s0 + $0x148] sm:$0xf]  ;;  %v1386_v53 = vld [vmem:[%s2168_s0 + $0x154] sm:$0xf0] }
  0x34   :  { %736 = vmatmul.bf16.gmra.mxu3 %v1070_v55  ;;  %v1155_v55 = vld [vmem:[%s2168_s0 + $0xf0] sm:$0xf0] }
  0x35   :  { %v1158_v61 = vor.u32 %v1371_v54, %v1155_v55  ;;  %v1384_v54 = vld [vmem:[%s2168_s0 + $0x14c] sm:$0xf]  ;;  %v1211_v55 = vld [vmem:[%s2168_s0 + $0x158] sm:$0xf0] }
  0x41   :  { %549 = vmatmul.bf16.gmra.mxu0 %v1074_v0  ;;  %v1169_v0 = vld [vmem:[%s2168_s0 + $0x100] sm:$0xf] }
  0x42   :  { %613 = vmatmul.bf16.gmra.mxu1 %v1078_v1  ;;  %v1377_v1 = vld [vmem:[%s2168_s0 + $0x10c] sm:$0xf0] }
  0x43   :  { %677 = vmatmul.bf16.gmra.mxu2 %v1082_v2  ;;  %v1375_v2 = vld [vmem:[%s2168_s0 + $0x104] sm:$0xf]  ;;  %v1170_v8 = vor.u32 %v1377_v1, %v1169_v0  ;;  %v1214_v0 = vor.u32 %v1384_v54, %v1211_v55 }
  0x44   :  { %741 = vmatmul.bf16.gmra.mxu3 %v1086_v3  ;;  %v1171_v3 = vld [vmem:[%s2168_s0 + $0x110] sm:$0xf0] }
  0x45   :  { %v1174_v9 = vor.u32 %v1375_v2, %v1171_v3 }
  0x51   :  { %554 = vmatmul.bf16.gmra.mxu0 %v1090_v12  ;;  %v1178_v12 = vor.u32 %v1378_v5, %v1177_v4 }
  0x52   :  { %618 = vmatmul.bf16.gmra.mxu1 %v1094_v13  ;;  %v1182_v13 = vor.u32 %v1376_v6, %v1179_v7 }
  0x53   :  { %682 = vmatmul.bf16.gmra.mxu2 %v1098_v14 }
  0x54   :  { %746 = vmatmul.bf16.gmra.mxu3 %v1102_v15 }
  0x61   :  { %559 = vmatmul.bf16.gmra.mxu0 %v1106_v24  ;;  %v1379_v24 = vld [vmem:[%s2168_s0 + $0x124] sm:$0xf] }
  0x62   :  { %623 = vmatmul.bf16.gmra.mxu1 %v1110_v25  ;;  %v1187_v25 = vld [vmem:[%s2168_s0 + $0x130] sm:$0xf0] }
  0x63   :  { %687 = vmatmul.bf16.gmra.mxu2 %v1114_v26  ;;  %v1193_v26 = vld [vmem:[%s2168_s0 + $0x128] sm:$0xf]  ;;  %v1190_v33 = vor.u32 %v1379_v24, %v1187_v25 }
  0x64   :  { %751 = vmatmul.bf16.gmra.mxu3 %v1118_v27  ;;  %v1382_v27 = vld [vmem:[%s2168_s0 + $0x134] sm:$0xf0] }
  0x71   :  { %564 = vmatmul.bf16.gmra.mxu0 %v1122_v36 }
  0x72   :  { %628 = vmatmul.bf16.gmra.mxu1 %v1126_v37  ;;  %v1194_v37 = vor.u32 %v1382_v27, %v1193_v26 }
  0x73   :  { %692 = vmatmul.bf16.gmra.mxu2 %v1130_v38  ;;  %v1198_v38 = vor.u32 %v1380_v28, %v1195_v29 }
  0x74   :  { %756 = vmatmul.bf16.gmra.mxu3 %v1134_v39 }
  0x81   :  { %569 = vmatmul.bf16.gmra.mxu0 %v1138_v48  ;;  %v1201_v48 = vld [vmem:[%s2168_s0 + $0x140] sm:$0xf] }
  0x82   :  { %633 = vmatmul.bf16.gmra.mxu1 %v1142_v49  ;;  %v1385_v49 = vld [vmem:[%s2168_s0 + $0x14c] sm:$0xf0] }
  0x83   :  { %697 = vmatmul.bf16.gmra.mxu2 %v1146_v50  ;;  %v1383_v50 = vld [vmem:[%s2168_s0 + $0x144] sm:$0xf]  ;;  %v1202_v58 = vor.u32 %v1385_v49, %v1201_v48 }
  0x84   :  { %761 = vmatmul.bf16.gmra.mxu3 %v1150_v51  ;;  %v1203_v51 = vld [vmem:[%s2168_s0 + $0x150] sm:$0xf0] }
  0x85   :  { %v1206_v59 = vor.u32 %v1383_v50, %v1203_v51 }
  0x91   :  { %574 = vmatmul.bf16.gmra.mxu0 %v1154_v60 }
  0x92   :  { %638 = vmatmul.bf16.gmra.mxu1 %v1158_v61 }
  0x93   :  { %702 = vmatmul.bf16.gmra.mxu2 %v1162_v62 }
  0x94   :  { %766 = vmatmul.bf16.gmra.mxu3 %v1166_v63  ;;  %v1210_v63 = vor.u32 %v1386_v53, %v1209_v52 }
  0x9e   :  { %v540_v10 = vpop.f32.mrf.mxu0 }
  0x9f   :  { %v604_v11 = vpop.f32.mrf.mxu1 }
  0xa0   :  { %v605_v14 = vadd.f32 %v604_v11, %v540_v10 }
  0xa1   :  { %579 = vmatmul.bf16.gmra.mxu0 %v1170_v8 }
  0xa2   :  { %643 = vmatmul.bf16.gmra.mxu1 %v1174_v9 }
  0xa3   :  { %707 = vmatmul.bf16.gmra.mxu2 %v1178_v12 }
  0xa4   :  { %771 = vmatmul.bf16.gmra.mxu3 %v1182_v13 }
  0xa6   :  { %v668_v15 = vpop.f32.mrf.mxu2  ;;  %v542_v18 = vpop.f32.mrf.mxu0 }
  0xa7   :  { %v732_v16 = vpop.f32.mrf.mxu3  ;;  %v669_v17 = vadd.f32 %v668_v15, %v605_v14  ;;  %v606_v19 = vpop.f32.mrf.mxu1 }
  0xa8   :  { %v607_v20 = vadd.f32 %v606_v19, %v542_v18 }
  0xa9   :  { %v1748_v21 = vadd.f32 %v732_v16, %v669_v17 }
  0xae   :  { %v670_v30 = vpop.f32.mrf.mxu2  ;;  %v545_v35 = vpop.f32.mrf.mxu0 }
  0xaf   :  { %v734_v31 = vpop.f32.mrf.mxu3  ;;  %v671_v34 = vadd.f32 %v670_v30, %v607_v20  ;;  %v609_v36 = vpop.f32.mrf.mxu1 }
  0xb0   :  { %v610_v39 = vadd.f32 %v609_v36, %v545_v35 }
  0xb1   :  { %v1774_v40 = vadd.f32 %v734_v31, %v671_v34  ;;  %584 = vmatmul.bf16.gmra.mxu0 %v1186_v32 }
  0xb2   :  { %648 = vmatmul.bf16.gmra.mxu1 %v1190_v33 }
  0xb3   :  { %712 = vmatmul.bf16.gmra.mxu2 %v1194_v37 }
  0xb4   :  { %776 = vmatmul.bf16.gmra.mxu3 %v1198_v38 }
  0xb6   :  { %v673_v41 = vpop.f32.mrf.mxu2  ;;  %v547_v44 = vpop.f32.mrf.mxu0 }
  0xb7   :  { %v737_v42 = vpop.f32.mrf.mxu3  ;;  %v674_v43 = vadd.f32 %v673_v41, %v610_v39  ;;  %v611_v45 = vpop.f32.mrf.mxu1 }
  0xb8   :  { %v612_v46 = vadd.f32 %v611_v45, %v547_v44 }
  0xb9   :  { %v1776_v47 = vadd.f32 %v737_v42, %v674_v43 }
  0xbe   :  { %v675_v56 = vpop.f32.mrf.mxu2  ;;  %v550_v61 = vpop.f32.mrf.mxu0 }
  0xbf   :  { %v739_v57 = vpop.f32.mrf.mxu3  ;;  %v676_v60 = vadd.f32 %v675_v56, %v612_v46  ;;  %v614_v62 = vpop.f32.mrf.mxu1 }
  0xc0   :  { %v615_v1 = vadd.f32 %v614_v62, %v550_v61 }
  0xc1   :  { %v1802_v2 = vadd.f32 %v739_v57, %v676_v60  ;;  %589 = vmatmul.bf16.gmra.mxu0 %v1202_v58 }
  0xc2   :  { %653 = vmatmul.bf16.gmra.mxu1 %v1206_v59 }
  0xc3   :  { %717 = vmatmul.bf16.gmra.mxu2 %v1210_v63 }
  0xc4   :  { %781 = vmatmul.bf16.gmra.mxu3 %v1214_v0 }
  0xc6   :  { %v678_v3 = vpop.f32.mrf.mxu2  ;;  %v552_v6 = vpop.f32.mrf.mxu0 }
  0xc7   :  { %v742_v4 = vpop.f32.mrf.mxu3  ;;  %v679_v5 = vadd.f32 %v678_v3, %v615_v1  ;;  %v616_v7 = vpop.f32.mrf.mxu1 }
  0xc8   :  { %v617_v8 = vadd.f32 %v616_v7, %v552_v6 }
  0xc9   :  { %v1804_v9 = vadd.f32 %v742_v4, %v679_v5 }
  0xce   :  { %v680_v10 = vpop.f32.mrf.mxu2  ;;  %v555_v13 = vpop.f32.mrf.mxu0 }
  0xcf   :  { %v744_v11 = vpop.f32.mrf.mxu3  ;;  %v681_v12 = vadd.f32 %v680_v10, %v617_v8  ;;  %v619_v14 = vpop.f32.mrf.mxu1 }
  0xd0   :  { %v620_v15 = vadd.f32 %v619_v14, %v555_v13  ;;  %v837_v13 = vmul.f32 %v1748_v21, %v1748_v21  ;;  %v839_v14 = vmul.f32 %v1776_v47, %v1776_v47 }
  0xd1   :  { %v1806_v16 = vadd.f32 %v744_v11, %v681_v12  ;;  %v838_v12 = vmul.f32 %v1774_v40, %v1774_v40 }
  0xd6   :  { %v683_v17 = vpop.f32.mrf.mxu2  ;;  %v557_v20 = vpop.f32.mrf.mxu0 }
  0xd7   :  { %v747_v18 = vpop.f32.mrf.mxu3  ;;  %v684_v19 = vadd.f32 %v683_v17, %v620_v15  ;;  %v621_v22 = vpop.f32.mrf.mxu1 }
  0xd8   :  { %v622_v23 = vadd.f32 %v621_v22, %v557_v20  ;;  %v789_v20 = vsel %vm787_vm0, %v1774_v40, 0.0  ;;  %v860_v22 = vsel %vm787_vm0, %v838_v12, 0.0  ;;  %v797_v12 = vsel %vm787_vm0, %v1806_v16, 0.0 }
  0xd9   :  { %v1808_v24 = vadd.f32 %v747_v18, %v684_v19 }
  0xde   :  { %v685_v25 = vpop.f32.mrf.mxu2  ;;  %v560_v28 = vpop.f32.mrf.mxu0 }
  0xdf   :  { %v749_v26 = vpop.f32.mrf.mxu3  ;;  %v686_v27 = vadd.f32 %v685_v25, %v622_v23  ;;  %v624_v29 = vpop.f32.mrf.mxu1  ;;  %v840_v23 = vmul.f32 %v1802_v2, %v1802_v2  ;;  %v788_v25 = vsel %vm787_vm0, %v1748_v21, 0.0 }
  0xe0   :  { %v625_v30 = vadd.f32 %v624_v29, %v560_v28  ;;  %v862_v28 = vsel %vm787_vm0, %v839_v14, 0.0  ;;  %v841_v29 = vmul.f32 %v1804_v9, %v1804_v9 }
  0xe1   :  { %v1810_v31 = vadd.f32 %v749_v26, %v686_v27  ;;  %v859_v26 = vsel %vm787_vm0, %v837_v13, 0.0  ;;  %v791_v27 = vsel %vm787_vm0, %v1776_v47, 0.0 }
  0xe6   :  { %v688_v32 = vpop.f32.mrf.mxu2  ;;  %v562_v35 = vpop.f32.mrf.mxu0 }
  0xe7   :  { %v752_v33 = vpop.f32.mrf.mxu3  ;;  %v689_v34 = vadd.f32 %v688_v32, %v625_v30  ;;  %v626_v36 = vpop.f32.mrf.mxu1  ;;  %v790_v30 = vadd.f32 %v789_v20, %v788_v25  ;;  %v861_v32 = vadd.f32 %v860_v22, %v859_v26  ;;  %v799_v25 = vsel %vm787_vm0, %v1808_v24, 0.0 }
  0xe8   :  { %v627_v37 = vadd.f32 %v626_v36, %v562_v35  ;;  %v842_v35 = vmul.f32 %v1806_v16, %v1806_v16  ;;  %v844_v26 = vmul.f32 %v1810_v31, %v1810_v31 }
  0xe9   :  { %v1812_v38 = vadd.f32 %v752_v33, %v689_v34  ;;  %v793_v33 = vsel %vm787_vm0, %v1802_v2, 0.0  ;;  %v864_v34 = vsel %vm787_vm0, %v840_v23, 0.0  ;;  %v792_v36 = vadd.f32 %v791_v27, %v790_v30 }
  0xea   :  { %v868_v13 = vsel %vm787_vm0, %v842_v35, 0.0  ;;  %v872_v35 = vsel %vm787_vm0, %v844_v26, 0.0 }
  0xee   :  { %v690_v39 = vpop.f32.mrf.mxu2  ;;  %v565_v43 = vpop.f32.mrf.mxu0 }
  0xef   :  { %v754_v41 = vpop.f32.mrf.mxu3  ;;  %v691_v42 = vadd.f32 %v690_v39, %v627_v37  ;;  %v629_v44 = vpop.f32.mrf.mxu1  ;;  %v863_v37 = vadd.f32 %v862_v28, %v861_v32  ;;  %v795_v39 = vsel %vm787_vm0, %v1804_v9, 0.0  ;;  %v801_v32 = vsel %vm787_vm0, %v1810_v31, 0.0 }
  0xf0   :  { %v630_v45 = vadd.f32 %v629_v44, %v565_v43  ;;  %v794_v44 = vadd.f32 %v793_v33, %v792_v36 }
  0xf1   :  { %v1814_v46 = vadd.f32 %v754_v41, %v691_v42  ;;  %v866_v41 = vsel %vm787_vm0, %v841_v29, 0.0 }
  0xf2   :  { %v796_v20 = vadd.f32 %v795_v39, %v794_v44 }
  0xf3   :  { %v846_v44 = vmul.f32 %v1814_v46, %v1814_v46 }
  0xf4   :  { %v798_v27 = vadd.f32 %v797_v12, %v796_v20  ;;  %v805_v12 = vsel %vm787_vm0, %v1814_v46, 0.0 }
  0xf6   :  { %v693_v48 = vpop.f32.mrf.mxu2  ;;  %v567_v51 = vpop.f32.mrf.mxu0 }
  0xf7   :  { %v757_v49 = vpop.f32.mrf.mxu3  ;;  %v694_v50 = vadd.f32 %v693_v48, %v630_v45  ;;  %v631_v52 = vpop.f32.mrf.mxu1  ;;  %v865_v45 = vadd.f32 %v864_v34, %v863_v37  ;;  %v843_v48 = vmul.f32 %v1808_v24, %v1808_v24 }
  0xf8   :  { %v632_v23 = vadd.f32 %v631_v52, %v567_v51  ;;  %v800_v52 = vadd.f32 %v799_v25, %v798_v27 }
  0xf9   :  { %v1816_v53 = vadd.f32 %v757_v49, %v694_v50  ;;  %v867_v22 = vadd.f32 %v866_v41, %v865_v45  ;;  %v870_v29 = vsel %vm787_vm0, %v843_v48, 0.0 }
  0xfa   :  { %v802_v41 = vadd.f32 %v801_v32, %v800_v52 }
  0xfb   :  { %v869_v28 = vadd.f32 %v868_v13, %v867_v22 }
  0xfd   :  { %v871_v34 = vadd.f32 %v870_v29, %v869_v28 }
  0xfe   :  { %v1818_v54 = vpop.f32.mrf.mxu2  ;;  %v570_v56 = vpop.f32.mrf.mxu0 }
  0xff   :  { %v1820_v55 = vpop.f32.mrf.mxu3  ;;  %v634_v57 = vpop.f32.mrf.mxu1  ;;  %v696_v30 = vadd.f32 %v1818_v54, %v632_v23  ;;  %v803_v54 = vsel %vm787_vm0, %v1812_v38, 0.0  ;;  %v873_v48 = vadd.f32 %v872_v35, %v871_v34  ;;  %v876_v23 = vsel %vm787_vm0, %v846_v44, 0.0 }
 0x100   :  { %v635_v14 = vadd.f32 %v634_v57, %v570_v56  ;;  %v845_v56 = vmul.f32 %v1812_v38, %v1812_v38 }
 0x101   :  { %v1905_v45 = vadd.f32 %v1820_v55, %v696_v30 }
 0x106   :  { %v698_v58 = vpop.f32.mrf.mxu2  ;;  %v572_v60 = vpop.f32.mrf.mxu0 }
 0x107   :  { %v1822_v59 = vpop.f32.mrf.mxu3  ;;  %v636_v61 = vpop.f32.mrf.mxu1  ;;  %v699_v57 = vadd.f32 %v698_v58, %v635_v14  ;;  %v804_v14 = vadd.f32 %v803_v54, %v802_v41 }
 0x108   :  { %v637_v51 = vadd.f32 %v636_v61, %v572_v60  ;;  %v874_v61 = vsel %vm787_vm0, %v845_v56, 0.0 }
 0x109   :  { %v806_v25 = vadd.f32 %v805_v12, %v804_v14 }
 0x10e   :  { %v1824_v62 = vpop.f32.mrf.mxu2  ;;  %v575_v0 = vpop.f32.mrf.mxu0 }
 0x10f   :  { %v1826_v63 = vpop.f32.mrf.mxu3  ;;  %v639_v1 = vpop.f32.mrf.mxu1  ;;  %v701_v36 = vadd.f32 %v1824_v62, %v637_v51  ;;  %v1911_v62 = vadd.f32 %v1822_v59, %v699_v57  ;;  %v875_v59 = vadd.f32 %v874_v61, %v873_v48 }
 0x110   :  { %v640_v33 = vadd.f32 %v639_v1, %v575_v0  ;;  %v847_v0 = vmul.f32 %v1816_v53, %v1816_v53 }
 0x111   :  { %v1921_v20 = vadd.f32 %v1826_v63, %v701_v36  ;;  %v849_v63 = vmul.f32 %v1911_v62, %v1911_v62  ;;  %v877_v28 = vadd.f32 %v876_v23, %v875_v59 }
 0x113   :  { %v850_v30 = vmul.f32 %v1921_v20, %v1921_v20 }
 0x116   :  { %v1828_v3 = vpop.f32.mrf.mxu2  ;;  %v1832_v5 = vpop.f32.mrf.mxu0 }
 0x117   :  { %v1830_v4 = vpop.f32.mrf.mxu3  ;;  %v1834_v6 = vpop.f32.mrf.mxu1  ;;  %v704_v55 = vadd.f32 %v1828_v3, %v640_v33  ;;  %v878_v3 = vsel %vm787_vm0, %v847_v0, 0.0 }
 0x118   :  { %v642_v1 = vadd.f32 %v1834_v6, %v1832_v5  ;;  %v807_v5 = vsel %vm787_vm0, %v1816_v53, 0.0  ;;  %v848_v6 = vmul.f32 %v1905_v45, %v1905_v45  ;;  %v879_v52 = vadd.f32 %v878_v3, %v877_v28 }
 0x119   :  { %v808_v29 = vadd.f32 %v807_v5, %v806_v25 }
 0x11a   :  { %v880_v51 = vsel %vm787_vm0, %v848_v6, 0.0 }
 0x11b   :  { %v881_v41 = vadd.f32 %v880_v51, %v879_v52 }
 0x11e   :  { %v1836_v7 = vpop.f32.mrf.mxu2  ;;  %v1840_v10 = vpop.f32.mrf.mxu0 }
 0x11f   :  { %v1838_v8 = vpop.f32.mrf.mxu3  ;;  %v1842_v11 = vpop.f32.mrf.mxu1  ;;  %v706_v22 = vadd.f32 %v1836_v7, %v642_v1  ;;  %v1935_v7 = vadd.f32 %v1830_v4, %v704_v55  ;;  %v811_v4 = vsel %vm787_vm0, %v1911_v62, 0.0 }
 0x120   :  { %v645_v13 = vadd.f32 %v1842_v11, %v1840_v10  ;;  %v809_v10 = vsel %vm787_vm0, %v1905_v45, 0.0 }
 0x121   :  { %v1943_v32 = vadd.f32 %v1838_v8, %v706_v22  ;;  %v851_v8 = vmul.f32 %v1935_v7, %v1935_v7  ;;  %v815_v61 = vsel %vm787_vm0, %v1935_v7, 0.0 }
 0x123   :  { %v852_v44 = vmul.f32 %v1943_v32, %v1943_v32 }
 0x125   :  { %v888_v22 = vsel %vm787_vm0, %v852_v44, 0.0 }
 0x126   :  { %v1850_v15 = vpop.f32.mrf.mxu2  ;;  %v1854_v18 = vpop.f32.mrf.mxu0 }
 0x127   :  { %v1852_v17 = vpop.f32.mrf.mxu3  ;;  %v1856_v19 = vpop.f32.mrf.mxu1  ;;  %v709_v11 = vadd.f32 %v1850_v15, %v645_v13 }
 0x128   :  { %v647_v26 = vadd.f32 %v1856_v19, %v1854_v18  ;;  %v810_v18 = vadd.f32 %v809_v10, %v808_v29  ;;  %v882_v19 = vsel %vm787_vm0, %v849_v63, 0.0 }
 0x129   :  { %v1955_v34 = vadd.f32 %v1852_v17, %v709_v11  ;;  %v883_v12 = vadd.f32 %v882_v19, %v881_v41 }
 0x12a   :  { %v812_v54 = vadd.f32 %v811_v4, %v810_v18 }
 0x12b   :  { %v819_v23 = vsel %vm787_vm0, %v1955_v34, 0.0 }
 0x12e   :  { %v1879_v42 = vpop.f32.mrf.mxu2  ;;  %v585_v49 = vpop.f32.mrf.mxu0 }
 0x12f   :  { %v1881_v43 = vpop.f32.mrf.mxu3  ;;  %v649_v50 = vpop.f32.mrf.mxu1  ;;  %v711_v15 = vadd.f32 %v1879_v42, %v647_v26  ;;  %v884_v42 = vsel %vm787_vm0, %v850_v30, 0.0 }
 0x130   :  { %v650_v27 = vadd.f32 %v649_v50, %v585_v49  ;;  %v813_v49 = vsel %vm787_vm0, %v1921_v20, 0.0  ;;  %v885_v13 = vadd.f32 %v884_v42, %v883_v12 }
 0x131   :  { %v1963_v0 = vadd.f32 %v1881_v43, %v711_v15  ;;  %v814_v17 = vadd.f32 %v813_v49, %v812_v54 }
 0x133   :  { %v816_v14 = vadd.f32 %v815_v61, %v814_v17  ;;  %v854_v5 = vmul.f32 %v1963_v0, %v1963_v0  ;;  %v821_v63 = vsel %vm787_vm0, %v1963_v0, 0.0 }
 0x136   :  { %v713_v37 = vpop.f32.mrf.mxu2  ;;  %v587_v58 = vpop.f32.mrf.mxu0 }
 0x137   :  { %v777_v39 = vpop.f32.mrf.mxu3  ;;  %v651_v60 = vpop.f32.mrf.mxu1  ;;  %v714_v35 = vadd.f32 %v713_v37, %v650_v27  ;;  %v886_v37 = vsel %vm787_vm0, %v851_v8, 0.0 }
 0x138   :  { %v652_v36 = vadd.f32 %v651_v60, %v587_v58  ;;  %v817_v58 = vsel %vm787_vm0, %v1943_v32, 0.0  ;;  %v853_v60 = vmul.f32 %v1955_v34, %v1955_v34  ;;  %v887_v3 = vadd.f32 %v886_v37, %v885_v13 }
 0x139   :  { %v1970_v55 = vadd.f32 %v777_v39, %v714_v35  ;;  %v818_v10 = vadd.f32 %v817_v58, %v816_v14 }
 0x13a   :  { %v890_v39 = vsel %vm787_vm0, %v853_v60, 0.0  ;;  %v889_v27 = vadd.f32 %v888_v22, %v887_v3 }
 0x13b   :  { %v855_v11 = vmul.f32 %v1970_v55, %v1970_v55  ;;  %v820_v28 = vadd.f32 %v819_v23, %v818_v10 }
 0x13c   :  { %v891_v4 = vadd.f32 %v890_v39, %v889_v27 }
 0x13d   :  { %v822_v15 = vadd.f32 %v821_v63, %v820_v28  ;;  %v894_v52 = vsel %vm787_vm0, %v855_v11, 0.0 }
 0x13e   :  { %v715_v56 = vpop.f32.mrf.mxu2  ;;  %v590_v50 = vpop.f32.mrf.mxu0 }
 0x13f   :  { %v779_v57 = vpop.f32.mrf.mxu3  ;;  %v654_v33 = vpop.f32.mrf.mxu1  ;;  %v716_v1 = vadd.f32 %v715_v56, %v652_v36  ;;  %v892_v56 = vsel %vm787_vm0, %v854_v5, 0.0 }
 0x140   :  { %v655_v48 = vadd.f32 %v654_v33, %v590_v50  ;;  %v893_v50 = vadd.f32 %v892_v56, %v891_v4 }
 0x141   :  { %v1977_v6 = vadd.f32 %v779_v57, %v716_v1  ;;  %v823_v57 = vsel %vm787_vm0, %v1970_v55, 0.0 }
 0x142   :  { %v824_v33 = vadd.f32 %v823_v57, %v822_v15  ;;  %v895_v54 = vadd.f32 %v894_v52, %v893_v50 }
 0x143   :  { %v856_v51 = vmul.f32 %v1977_v6, %v1977_v6  ;;  %v825_v18 = vsel %vm787_vm0, %v1977_v6, 0.0 }
 0x144   :  { %v826_v42 = vadd.f32 %v825_v18, %v824_v33 }
 0x145   :  { %v896_v35 = vsel %vm787_vm0, %v856_v51, 0.0 }
 0x146   :  { %v718_v43 = vpop.f32.mrf.mxu2  ;;  %v592_v29 = vpop.f32.mrf.mxu0 }
 0x147   :  { %v782_v59 = vpop.f32.mrf.mxu3  ;;  %v719_v25 = vadd.f32 %v718_v43, %v655_v48  ;;  %v656_v30 = vpop.f32.mrf.mxu1  ;;  %v897_v48 = vadd.f32 %v896_v35, %v895_v54 }
 0x148   :  { %v657_v49 = vadd.f32 %v656_v30, %v592_v29 }
 0x149   :  { %v1984_v26 = vadd.f32 %v782_v59, %v719_v25 }
 0x14b   :  { %v857_v19 = vmul.f32 %v1984_v26, %v1984_v26  ;;  %v827_v36 = vsel %vm787_vm0, %v1984_v26, 0.0 }
 0x14c   :  { %v828_v12 = vadd.f32 %v827_v36, %v826_v42 }
 0x14d   :  { %v898_v61 = vsel %vm787_vm0, %v857_v19, 0.0 }
 0x14e   :  { %v720_v8 = vpop.f32.mrf.mxu2  ;;  %v899_v58 = vadd.f32 %v898_v61, %v897_v48 }
 0x14f   :  { %v721_v41 = vadd.f32 %v720_v8, %v657_v49  ;;  %v784_v44 = vpop.f32.mrf.mxu3 }
 0x151   :  { %v2000_v1 = vadd.f32 %v784_v44, %v721_v41 }
 0x153   :  { %v829_v17 = vsel %vm787_vm0, %v2000_v1, 0.0  ;;  %v858_v37 = vmul.f32 %v2000_v1, %v2000_v1 }
 0x154   :  { %v830_v60 = vadd.f32 %v829_v17, %v828_v12 }
 0x155   :  { %v900_v13 = vsel %vm787_vm0, %v858_v37, 0.0 }
 0x156   :  { %v831_v14 = vrot.slane %v830_v60, 4  ;;  %v901_v22 = vadd.f32 %v900_v13, %v899_v58 }
 0x158   :  { %v832_v43 = vadd.f32 %v831_v14, %v830_v60  ;;  %v902_v59 = vrot.slane %v901_v22, 4 }
 0x15a   :  { %v833_v23 = vrot.slane %v832_v43, 2  ;;  %v903_v5 = vadd.f32 %v902_v59, %v901_v22 }
 0x15c   :  { %v834_v25 = vadd.f32 %v833_v23, %v832_v43  ;;  %v904_v3 = vrot.slane %v903_v5, 2 }
 0x15e   :  { %v835_v10 = vrot.slane %v834_v25, 1  ;;  %v905_v39 = vadd.f32 %v904_v3, %v903_v5 }
 0x160   :  { %v836_v63 = vadd.f32 %v835_v10, %v834_v25  ;;  %v906_v11 = vrot.slane %v905_v39, 1 }
 0x162   :  { %v907_v27 = vadd.f32 %v906_v11, %v905_v39  ;;  %v2007_v28 = vmul.f32 0.0061728396, %v836_v63 }
 0x164   :  { %v909_v29 = vmul.f32 0.0061728396, %v907_v27  ;;  %v910_v30 = vmul.f32 %v2007_v28, %v2007_v28  ;;  %v924_v33 = vsub.f32 %v1748_v21, %v2007_v28  ;;  %v925_v8 = vsub.f32 %v1774_v40, %v2007_v28 }
 0x165   :  { %v926_v35 = vsub.f32 %v1776_v47, %v2007_v28  ;;  %v927_v36 = vsub.f32 %v1802_v2, %v2007_v28  ;;  %v928_v41 = vsub.f32 %v1804_v9, %v2007_v28  ;;  %v929_v21 = vsub.f32 %v1806_v16, %v2007_v28 }
 0x166   :  { %v911_v56 = vsub.f32 %v909_v29, %v910_v30  ;;  %v930_v47 = vsub.f32 %v1808_v24, %v2007_v28  ;;  %v931_v2 = vsub.f32 %v1810_v31, %v2007_v28  ;;  %v932_v9 = vsub.f32 %v1812_v38, %v2007_v28 }
 0x167   :  { %v933_v58 = vsub.f32 %v1814_v46, %v2007_v28  ;;  %v934_v24 = vsub.f32 %v1816_v53, %v2007_v28  ;;  %v935_v31 = vsub.f32 %v1905_v45, %v2007_v28  ;;  %v936_v38 = vsub.f32 %v1911_v62, %v2007_v28 }
 0x168   :  { %v912_v57 = vmax.f32 %v911_v56, 0.0  ;;  %v937_v3 = vsub.f32 %v1921_v20, %v2007_v28  ;;  %v938_v39 = vsub.f32 %v1935_v7, %v2007_v28  ;;  %v939_v29 = vsub.f32 %v1943_v32, %v2007_v28 }
 0x169   :  { %v940_v7 = vsub.f32 %v1955_v34, %v2007_v28  ;;  %v941_v32 = vsub.f32 %v1963_v0, %v2007_v28  ;;  %v942_v34 = vsub.f32 %v1970_v55, %v2007_v28  ;;  %v943_v0 = vsub.f32 %v1977_v6, %v2007_v28 }
 0x16a   :  { %v913_v51 = vadd.f32 1e-05, %v912_v57  ;;  %v944_v55 = vsub.f32 %v1984_v26, %v2007_v28  ;;  %v945_v6 = vsub.f32 %v2000_v1, %v2007_v28 }
 0x16c   :  { %1419 = vrsqrt.f32 %v913_v51  ;;  %vm920_vm2 = vweird.f32 %v913_v51 }
 0x172   :  { %v1420_v4 = vpop.eup %1419 }
 0x173   :  { %v915_v15 = vmul.f32 %v1420_v4, %v913_v51  ;;  %vm921_vm1 = vweird.f32 %v1420_v4 }
 0x174   :  { %vm922_vm3 = vmor %vm920_vm2, %vm921_vm1 }
 0x175   :  { %v916_v52 = vmul.f32 %v1420_v4, %v915_v15 }
 0x177   :  { %v917_v18 = vmul.f32 0.5, %v916_v52 }
 0x179   :  { %v918_v19 = vsub.f32 1.5, %v917_v18 }
 0x17b   :  { %v919_v49 = vmul.f32 %v1420_v4, %v918_v19 }
 0x17d   :  { %v2011_v50 = vsel %vm922_vm3, %v1420_v4, %v919_v49 }
 0x17e   :  { %v946_v54 = vmul.f32 %v924_v33, %v2011_v50  ;;  %v947_v42 = vmul.f32 %v925_v8, %v2011_v50  ;;  %v948_v44 = vmul.f32 %v926_v35, %v2011_v50  ;;  %v949_v40 = vmul.f32 %v927_v36, %v2011_v50 }
 0x17f   :  { %v950_v61 = vmul.f32 %v928_v41, %v2011_v50  ;;  %v951_v48 = vmul.f32 %v929_v21, %v2011_v50  ;;  %v952_v12 = vmul.f32 %v930_v47, %v2011_v50  ;;  %v953_v60 = vmul.f32 %v931_v2, %v2011_v50 }
 0x180   :  { %v968_v17 = vmax.f32 %v946_v54, 0.0  ;;  %v969_v37 = vmax.f32 %v947_v42, 0.0  ;;  %v970_v16 = vmax.f32 %v948_v44, 0.0  ;;  %v971_v13 = vmax.f32 %v949_v40, 0.0 }
 0x181   :  { %v954_v14 = vmul.f32 %v932_v9, %v2011_v50  ;;  %v972_v22 = vmax.f32 %v950_v61, 0.0  ;;  %v955_v43 = vmul.f32 %v933_v58, %v2011_v50  ;;  %v956_v59 = vmul.f32 %v934_v24, %v2011_v50 }
 0x182   :  { %v973_v46 = vmax.f32 %v951_v48, 0.0  ;;  %v974_v23 = vmax.f32 %v952_v12, 0.0  ;;  %v990_v53 = vpack.c.bf16 %v968_v17, %v968_v17  ;;  %v991_v5 = vpack.c.bf16 %v969_v37, %v969_v37 }
 0x183   :  { %v992_v25 = vpack.c.bf16 %v970_v16, %v970_v16  ;;  %v957_v45 = vmul.f32 %v935_v31, %v2011_v50  ;;  %v975_v10 = vmax.f32 %v953_v60, 0.0  ;;  %v993_v62 = vpack.c.bf16 %v971_v13, %v971_v13 }
 0x184   :  { %v958_v63 = vmul.f32 %v936_v38, %v2011_v50  ;;  %v976_v11 = vmax.f32 %v954_v14, 0.0  ;;  %v994_v27 = vpack.c.bf16 %v972_v22, %v972_v22  ;;  %1013 = vst.msk [vmem:[%s2169_s2] sm:$0xf] %vm1012_vm4, %v990_v53  ;;  %v959_v20 = vmul.f32 %v937_v3, %v2011_v50 }
 0x185   :  { %v977_v30 = vmax.f32 %v955_v43, 0.0  ;;  %v995_v56 = vpack.c.bf16 %v973_v46, %v973_v46  ;;  %1014 = vst.msk [vmem:[%s2169_s2 + $0x4] sm:$0xf] %vm1012_vm4, %v991_v5  ;;  %v960_v57 = vmul.f32 %v938_v39, %v2011_v50  ;;  %v978_v51 = vmax.f32 %v956_v59, 0.0 }
 0x186   :  { %v996_v4 = vpack.c.bf16 %v974_v23, %v974_v23  ;;  %1015 = vst.msk [vmem:[%s2169_s2 + $0x8] sm:$0xf] %vm1012_vm4, %v992_v25  ;;  %v961_v15 = vmul.f32 %v939_v29, %v2011_v50  ;;  %v979_v52 = vmax.f32 %v957_v45, 0.0  ;;  %v997_v18 = vpack.c.bf16 %v975_v10, %v975_v10 }
 0x187   :  { %1016 = vst.msk [vmem:[%s2169_s2 + $0xc] sm:$0xf] %vm1012_vm4, %v993_v62  ;;  %v962_v19 = vmul.f32 %v940_v7, %v2011_v50  ;;  %v980_v49 = vmax.f32 %v958_v63, 0.0  ;;  %v998_v33 = vpack.c.bf16 %v976_v11, %v976_v11  ;;  %v963_v8 = vmul.f32 %v941_v32, %v2011_v50 }
 0x188   :  { %1017 = vst.msk [vmem:[%s2169_s2 + $0x10] sm:$0xf] %vm1012_vm4, %v994_v27  ;;  %v981_v35 = vmax.f32 %v959_v20, 0.0  ;;  %v999_v36 = vpack.c.bf16 %v977_v30, %v977_v30  ;;  %v964_v41 = vmul.f32 %v942_v34, %v2011_v50  ;;  %v982_v54 = vmax.f32 %v960_v57, 0.0 }
 0x189   :  { %1018 = vst.msk [vmem:[%s2169_s2 + $0x14] sm:$0xf] %vm1012_vm4, %v995_v56  ;;  %v1000_v42 = vpack.c.bf16 %v978_v51, %v978_v51  ;;  %v965_v44 = vmul.f32 %v943_v0, %v2011_v50  ;;  %v983_v21 = vmax.f32 %v961_v15, 0.0  ;;  %v1001_v40 = vpack.c.bf16 %v979_v52, %v979_v52 }
 0x18a   :  { %1019 = vst.msk [vmem:[%s2169_s2 + $0x18] sm:$0xf] %vm1012_vm4, %v996_v4  ;;  %v966_v26 = vmul.f32 %v944_v55, %v2011_v50  ;;  %v984_v47 = vmax.f32 %v962_v19, 0.0  ;;  %v1002_v61 = vpack.c.bf16 %v980_v49, %v980_v49  ;;  %v967_v1 = vmul.f32 %v945_v6, %v2011_v50 }
 0x18b   :  { %1020 = vst.msk [vmem:[%s2169_s2 + $0x1c] sm:$0xf] %vm1012_vm4, %v997_v18  ;;  %v985_v28 = vmax.f32 %v963_v8, 0.0  ;;  %v1003_v2 = vpack.c.bf16 %v981_v35, %v981_v35  ;;  %v986_v9 = vmax.f32 %v964_v41, 0.0  ;;  %v1004_v48 = vpack.c.bf16 %v982_v54, %v982_v54 }
 0x18c   :  { %1021 = vst.msk [vmem:[%s2169_s2 + $0x20] sm:$0xf] %vm1012_vm4, %v998_v33  ;;  %v987_v12 = vmax.f32 %v965_v44, 0.0  ;;  %v1005_v17 = vpack.c.bf16 %v983_v21, %v983_v21  ;;  %v988_v50 = vmax.f32 %v966_v26, 0.0  ;;  %v1006_v37 = vpack.c.bf16 %v984_v47, %v984_v47 }
 0x18d   :  { %1022 = vst.msk [vmem:[%s2169_s2 + $0x24] sm:$0xf] %vm1012_vm4, %v999_v36  ;;  %v989_v16 = vmax.f32 %v967_v1, 0.0  ;;  %v1007_v58 = vpack.c.bf16 %v985_v28, %v985_v28  ;;  %v1008_v24 = vpack.c.bf16 %v986_v9, %v986_v9 }
 0x18e   :  { %1023 = vst.msk [vmem:[%s2169_s2 + $0x28] sm:$0xf] %vm1012_vm4, %v1000_v42  ;;  %v1009_v60 = vpack.c.bf16 %v987_v12, %v987_v12  ;;  %v1010_v13 = vpack.c.bf16 %v988_v50, %v988_v50 }
 0x18f   :  { %1024 = vst.msk [vmem:[%s2169_s2 + $0x2c] sm:$0xf] %vm1012_vm4, %v1001_v40  ;;  %v1011_v31 = vpack.c.bf16 %v989_v16, %v989_v16 }
 0x190   :  { %1025 = vst.msk [vmem:[%s2169_s2 + $0x30] sm:$0xf] %vm1012_vm4, %v1002_v61 }
 0x191   :  { %1026 = vst.msk [vmem:[%s2169_s2 + $0x34] sm:$0xf] %vm1012_vm4, %v1003_v2 }
 0x192   :  { %1027 = vst.msk [vmem:[%s2169_s2 + $0x38] sm:$0xf] %vm1012_vm4, %v1004_v48 }
 0x193   :  { %1028 = vst.msk [vmem:[%s2169_s2 + $0x3c] sm:$0xf] %vm1012_vm4, %v1005_v17 }
 0x194   :  { %1029 = vst.msk [vmem:[%s2169_s2 + $0x40] sm:$0xf] %vm1012_vm4, %v1006_v37 }
 0x195   :  { %1030 = vst.msk [vmem:[%s2169_s2 + $0x44] sm:$0xf] %vm1012_vm4, %v1007_v58 }
 0x196   :  { %1031 = vst.msk [vmem:[%s2169_s2 + $0x48] sm:$0xf] %vm1012_vm4, %v1008_v24 }
 0x197   :  { %1032 = vst.msk [vmem:[%s2169_s2 + $0x4c] sm:$0xf] %vm1012_vm4, %v1009_v60 }
 0x198   :  { %1033 = vst.msk [vmem:[%s2169_s2 + $0x50] sm:$0xf] %vm1012_vm4, %v1010_v13 }
 0x199   :  { %1034 = vst.msk [vmem:[%s2169_s2 + $0x54] sm:$0xf] %vm1012_vm4, %v1011_v31 }

// kernel: esnet_forward.6
= control target key start
LH: loop header
LB: loop body
LE: loop exit
PB: predicated region body
PF: predicated region fallthrough
CT: control target
= control target key end

     0   :  { %vm517_vm0 = vcmask 523264   ;;  %vm911_vm4 = vcmask 519168   ;;  %s1853_s1 = inlined_call_operand.vmem [shape: bf16[576,64], index: 1, kind: input, shape index: {}]   ;;  %s1854_s0 = inlined_call_operand.vmem [shape: bf16[112,576], index: 0, kind: input, shape index: {}]   ;;  %s1855_s2 = inlined_call_operand.vmem [shape: bf16[112,64], index: 2, kind: output, shape index: {}]  }
   0x1   :  { %v1263_v0 = vld [vmem:[%s1853_s1 + $0x38] sm:$0xff]  ;;  %v1262_v1 = vld [vmem:[%s1853_s1 + $0x30] sm:$0xff]  ;;  %v1261_v2 = vld [vmem:[%s1853_s1 + $0x28] sm:$0xff] }
   0x2   :  { %1292 = vmatpush.bf16.msra.mxu1 %v1263_v0  ;;  %1293 = vmatpush.bf16.msra.mxu2 %v1263_v0  ;;  %v1260_v3 = vld [vmem:[%s1853_s1 + $0x20] sm:$0xff]  ;;  %v1259_v4 = vld [vmem:[%s1853_s1 + $0x18] sm:$0xff]  ;;  %v1258_v5 = vld [vmem:[%s1853_s1 + $0x10] sm:$0xff] }
   0x3   :  { %1294 = vmatpush.bf16.msra.mxu3 %v1263_v0  ;;  %539 = vmatpush.bf16.msra.mxu0 %v1263_v0  ;;  %v1257_v6 = vld [vmem:[%s1853_s1 + $0x8] sm:$0xff]  ;;  %v1256_v7 = vld [vmem:[%s1853_s1] sm:$0xff]  ;;  %v972_v8 = vld [vmem:[%s1854_s0 + $0x50] sm:$0xf] }
   0x4   :  { %v1233_v9 = vld [vmem:[%s1854_s0 + $0x60] sm:$0xf0]  ;;  %v1012_v10 = vld [vmem:[%s1854_s0 + $0xa0] sm:$0xf]  ;;  %v1243_v11 = vld [vmem:[%s1854_s0 + $0xb0] sm:$0xf0] }
   0x5   :  { %v1287_v12 = vld [vmem:[%s1853_s1 + $0xf8] sm:$0xff]  ;;  %v932_v13 = vld [vmem:[%s1854_s0] sm:$0xf]  ;;  %v1223_v14 = vld [vmem:[%s1854_s0 + $0x10] sm:$0xf0]  ;;  %v973_v18 = vor.u32 %v1233_v9, %v972_v8  ;;  %v1013_v19 = vor.u32 %v1243_v11, %v1012_v10 }
   0x6   :  { %1295 = vmatpush.bf16.msra.mxu1 %v1262_v1  ;;  %1296 = vmatpush.bf16.msra.mxu2 %v1262_v1  ;;  %v1279_v15 = vld [vmem:[%s1853_s1 + $0xb8] sm:$0xff]  ;;  %v1052_v16 = vld [vmem:[%s1854_s0 + $0xf0] sm:$0xf]  ;;  %v1253_v17 = vld [vmem:[%s1854_s0 + $0x100] sm:$0xf0]  ;;  %v933_v21 = vor.u32 %v1223_v14, %v932_v13 }
   0x7   :  { %1297 = vmatpush.bf16.msra.mxu3 %v1262_v1  ;;  %540 = vmatpush.bf16.msra.mxu0 %v1262_v1  ;;  %v1271_v20 = vld [vmem:[%s1853_s1 + $0x78] sm:$0xff]  ;;  %v1053_v22 = vor.u32 %v1253_v17, %v1052_v16  ;;  %v1286_v24 = vld [vmem:[%s1853_s1 + $0xf0] sm:$0xff]  ;;  %v1285_v28 = vld [vmem:[%s1853_s1 + $0xe8] sm:$0xff] }
   0x8   :  { %v1291_v23 = vld [vmem:[%s1853_s1 + $0x118] sm:$0xff]  ;;  %v1278_v25 = vld [vmem:[%s1853_s1 + $0xb0] sm:$0xff]  ;;  %v1277_v29 = vld [vmem:[%s1853_s1 + $0xa8] sm:$0xff] }
   0x9   :  { %v1270_v26 = vld [vmem:[%s1853_s1 + $0x70] sm:$0xff]  ;;  %v1269_v30 = vld [vmem:[%s1853_s1 + $0x68] sm:$0xff]  ;;  %v1284_v32 = vld [vmem:[%s1853_s1 + $0xe0] sm:$0xff] }
   0xa   :  { %1298 = vmatpush.bf16.msra.mxu1 %v1261_v2  ;;  %1299 = vmatpush.bf16.msra.mxu2 %v1261_v2  ;;  %v1290_v27 = vld [vmem:[%s1853_s1 + $0x110] sm:$0xff]  ;;  %v1289_v31 = vld [vmem:[%s1853_s1 + $0x108] sm:$0xff]  ;;  %v1276_v33 = vld [vmem:[%s1853_s1 + $0xa0] sm:$0xff] }
   0xb   :  { %1300 = vmatpush.bf16.msra.mxu3 %v1261_v2  ;;  %541 = vmatpush.bf16.msra.mxu0 %v1261_v2  ;;  %v1268_v34 = vld [vmem:[%s1853_s1 + $0x60] sm:$0xff]  ;;  %v992_v35 = vld [vmem:[%s1854_s0 + $0x78] sm:$0xf]  ;;  %v1238_v36 = vld [vmem:[%s1854_s0 + $0x88] sm:$0xf0] }
   0xc   :  { %v1032_v37 = vld [vmem:[%s1854_s0 + $0xc8] sm:$0xf]  ;;  %v1248_v38 = vld [vmem:[%s1854_s0 + $0xd8] sm:$0xf0]  ;;  %v1288_v41 = vld [vmem:[%s1853_s1 + $0x100] sm:$0xff]  ;;  %v993_v44 = vor.u32 %v1238_v36, %v992_v35 }
   0xd   :  { %v952_v39 = vld [vmem:[%s1854_s0 + $0x28] sm:$0xf]  ;;  %v1228_v40 = vld [vmem:[%s1854_s0 + $0x38] sm:$0xf0]  ;;  %v1033_v45 = vor.u32 %v1248_v38, %v1032_v37  ;;  %v1282_v48 = vld [vmem:[%s1853_s1 + $0xd0] sm:$0xff] }
   0xe   :  { %1301 = vmatpush.bf16.msra.mxu1 %v1260_v3  ;;  %1302 = vmatpush.bf16.msra.mxu2 %v1260_v3  ;;  %v1283_v42 = vld [vmem:[%s1853_s1 + $0xd8] sm:$0xff]  ;;  %v953_v47 = vor.u32 %v1228_v40, %v952_v39  ;;  %v1274_v49 = vld [vmem:[%s1853_s1 + $0x90] sm:$0xff]  ;;  %v1281_v51 = vld [vmem:[%s1853_s1 + $0xc8] sm:$0xff] }
   0xf   :  { %1303 = vmatpush.bf16.msra.mxu3 %v1260_v3  ;;  %542 = vmatpush.bf16.msra.mxu0 %v1260_v3  ;;  %v1275_v43 = vld [vmem:[%s1853_s1 + $0x98] sm:$0xff]  ;;  %v1266_v50 = vld [vmem:[%s1853_s1 + $0x50] sm:$0xff]  ;;  %v1273_v52 = vld [vmem:[%s1853_s1 + $0x88] sm:$0xff] }
  0x10   :  { %v1267_v46 = vld [vmem:[%s1853_s1 + $0x58] sm:$0xff]  ;;  %v1265_v53 = vld [vmem:[%s1853_s1 + $0x48] sm:$0xff]  ;;  %v1280_v54 = vld [vmem:[%s1853_s1 + $0xc0] sm:$0xff] }
  0x11   :  { %v1272_v55 = vld [vmem:[%s1853_s1 + $0x80] sm:$0xff]  ;;  %v1222_v56 = vld [vmem:[%s1854_s0 + $0xc] sm:$0xf]  ;;  %v934_v60 = vld [vmem:[%s1854_s0 + $0x14] sm:$0xf0] }
  0x12   :  { %1304 = vmatpush.bf16.msra.mxu1 %v1259_v4  ;;  %1305 = vmatpush.bf16.msra.mxu2 %v1259_v4  ;;  %v942_v57 = vld [vmem:[%s1854_s0 + $0x1c] sm:$0xf0]  ;;  %v1221_v59 = vld [vmem:[%s1854_s0 + $0x4] sm:$0xf]  ;;  %v940_v61 = vld [vmem:[%s1854_s0 + $0x8] sm:$0xf] }
  0x13   :  { %1306 = vmatpush.bf16.msra.mxu3 %v1259_v4  ;;  %543 = vmatpush.bf16.msra.mxu0 %v1259_v4  ;;  %v1264_v58 = vld [vmem:[%s1853_s1 + $0x40] sm:$0xff]  ;;  %v1224_v62 = vld [vmem:[%s1854_s0 + $0x18] sm:$0xf0]  ;;  %v945_v63 = vor.u32 %v1222_v56, %v942_v57  ;;  %v948_v0 = vld [vmem:[%s1854_s0 + $0x10] sm:$0xf]  ;;  %v937_v2 = vor.u32 %v1221_v59, %v934_v60 }
  0x14   :  { %v1225_v1 = vld [vmem:[%s1854_s0 + $0x20] sm:$0xf0]  ;;  %v941_v3 = vor.u32 %v1224_v62, %v940_v61  ;;  %v954_v8 = vld [vmem:[%s1854_s0 + $0x3c] sm:$0xf0]  ;;  %v960_v9 = vld [vmem:[%s1854_s0 + $0x30] sm:$0xf] }
  0x15   :  { %v949_v4 = vor.u32 %v1225_v1, %v948_v0  ;;  %v1229_v10 = vld [vmem:[%s1854_s0 + $0x40] sm:$0xf0]  ;;  %v1230_v13 = vld [vmem:[%s1854_s0 + $0x48] sm:$0xf0]  ;;  %v1232_v17 = vld [vmem:[%s1854_s0 + $0x5c] sm:$0xf] }
  0x16   :  { %1307 = vmatpush.bf16.msra.mxu1 %v1258_v5  ;;  %1308 = vmatpush.bf16.msra.mxu2 %v1258_v5  ;;  %v1008_v36 = vld [vmem:[%s1854_s0 + $0x88] sm:$0xf]  ;;  %v1240_v37 = vld [vmem:[%s1854_s0 + $0x98] sm:$0xf0]  ;;  %v1034_v56 = vld [vmem:[%s1854_s0 + $0xdc] sm:$0xf0] }
  0x17   :  { %1309 = vmatpush.bf16.msra.mxu3 %v1258_v5  ;;  %544 = vmatpush.bf16.msra.mxu0 %v1258_v5  ;;  %v1227_v5 = vld [vmem:[%s1854_s0 + $0x34] sm:$0xf]  ;;  %v1009_v40 = vor.u32 %v1240_v37, %v1008_v36  ;;  %v1040_v57 = vld [vmem:[%s1854_s0 + $0xd0] sm:$0xf]  ;;  %v1048_v60 = vld [vmem:[%s1854_s0 + $0xd8] sm:$0xf] }
  0x18   :  { %v1250_v61 = vld [vmem:[%s1854_s0 + $0xe8] sm:$0xf0]  ;;  %v1252_v1 = vld [vmem:[%s1854_s0 + $0xfc] sm:$0xf] }
  0x19   :  { %v1049_v0 = vor.u32 %v1250_v61, %v1048_v60 }
  0x1a   :  { %1310 = vmatpush.bf16.msra.mxu1 %v1257_v6  ;;  %1311 = vmatpush.bf16.msra.mxu2 %v1257_v6 }
  0x1b   :  { %1312 = vmatpush.bf16.msra.mxu3 %v1257_v6  ;;  %545 = vmatpush.bf16.msra.mxu0 %v1257_v6  ;;  %v962_v6 = vld [vmem:[%s1854_s0 + $0x44] sm:$0xf0] }
  0x1c   :  { %v965_v11 = vor.u32 %v1227_v5, %v962_v6  ;;  %v1060_v5 = vld [vmem:[%s1854_s0 + $0xf8] sm:$0xf]  ;;  %v1254_v6 = vld [vmem:[%s1854_s0 + $0x108] sm:$0xf0] }
  0x1e   :  { %1313 = vmatpush.bf16.msra.mxu1 %v1256_v7  ;;  %1314 = vmatpush.bf16.msra.mxu2 %v1256_v7 }
  0x1f   :  { %1315 = vmatpush.bf16.msra.mxu3 %v1256_v7  ;;  %546 = vmatpush.bf16.msra.mxu0 %v1256_v7  ;;  %v1226_v7 = vld [vmem:[%s1854_s0 + $0x2c] sm:$0xf] }
  0x20   :  { %v957_v14 = vor.u32 %v1226_v7, %v954_v8  ;;  %v1068_v8 = vld [vmem:[%s1854_s0 + $0x100] sm:$0xf] }
  0x21   :  { %557 = vmatmul.bf16.vlgmr.msra.gmra.mxu1 %v973_v18  ;;  %567 = vmatmul.bf16.vlgmr.msra.gmra.mxu2 %v1013_v19  ;;  %v982_v18 = vld [vmem:[%s1854_s0 + $0x6c] sm:$0xf0]  ;;  %v1231_v19 = vld [vmem:[%s1854_s0 + $0x54] sm:$0xf] }
  0x22   :  { %627 = vmatpush.bf16.msrb.mxu2 %v1279_v15  ;;  %583 = vmatpush.bf16.msrb.mxu1 %v1271_v20  ;;  %v961_v15 = vor.u32 %v1229_v10, %v960_v9  ;;  %v974_v20 = vld [vmem:[%s1854_s0 + $0x64] sm:$0xf0]  ;;  %v1255_v9 = vld [vmem:[%s1854_s0 + $0x110] sm:$0xf0] }
  0x23   :  { %671 = vmatpush.bf16.msrb.mxu3 %v1287_v12  ;;  %547 = vmatmul.bf16.vlgmr.msra.gmra.mxu0 %v933_v21  ;;  %v968_v12 = vld [vmem:[%s1854_s0 + $0x38] sm:$0xf] }
  0x24   :  { %577 = vmatmul.bf16.vlgmr.msra.gmra.mxu3 %v1053_v22  ;;  %719 = vmatpush.bf16.msrb.mxu0 %v1291_v23  ;;  %v969_v16 = vor.u32 %v1230_v13, %v968_v12  ;;  %v980_v21 = vld [vmem:[%s1854_s0 + $0x58] sm:$0xf]  ;;  %v1234_v22 = vld [vmem:[%s1854_s0 + $0x68] sm:$0xf0]  ;;  %v985_v23 = vor.u32 %v1232_v17, %v982_v18  ;;  %v1069_v13 = vor.u32 %v1255_v9, %v1068_v8 }
  0x26   :  { %628 = vmatpush.bf16.msrb.mxu2 %v1278_v25  ;;  %584 = vmatpush.bf16.msrb.mxu1 %v1270_v26  ;;  %v1235_v25 = vld [vmem:[%s1854_s0 + $0x70] sm:$0xf0]  ;;  %v977_v26 = vor.u32 %v1231_v19, %v974_v20 }
  0x27   :  { %672 = vmatpush.bf16.msrb.mxu3 %v1286_v24  ;;  %v988_v24 = vld [vmem:[%s1854_s0 + $0x60] sm:$0xf] }
  0x28   :  { %720 = vmatpush.bf16.msrb.mxu0 %v1290_v27  ;;  %v981_v27 = vor.u32 %v1234_v22, %v980_v21 }
  0x2a   :  { %629 = vmatpush.bf16.msrb.mxu2 %v1277_v29  ;;  %585 = vmatpush.bf16.msrb.mxu1 %v1269_v30  ;;  %v1237_v29 = vld [vmem:[%s1854_s0 + $0x84] sm:$0xf]  ;;  %v1002_v30 = vld [vmem:[%s1854_s0 + $0x94] sm:$0xf0] }
  0x2b   :  { %673 = vmatpush.bf16.msrb.mxu3 %v1285_v28  ;;  %v989_v28 = vor.u32 %v1235_v25, %v988_v24  ;;  %v1005_v35 = vor.u32 %v1237_v29, %v1002_v30 }
  0x2c   :  { %721 = vmatpush.bf16.msrb.mxu0 %v1289_v31  ;;  %v1236_v31 = vld [vmem:[%s1854_s0 + $0x7c] sm:$0xf] }
  0x2e   :  { %630 = vmatpush.bf16.msrb.mxu2 %v1276_v33  ;;  %586 = vmatpush.bf16.msrb.mxu1 %v1268_v34  ;;  %v1000_v33 = vld [vmem:[%s1854_s0 + $0x80] sm:$0xf]  ;;  %v1239_v34 = vld [vmem:[%s1854_s0 + $0x90] sm:$0xf0] }
  0x2f   :  { %674 = vmatpush.bf16.msrb.mxu3 %v1284_v32  ;;  %v994_v32 = vld [vmem:[%s1854_s0 + $0x8c] sm:$0xf0]  ;;  %v1001_v39 = vor.u32 %v1239_v34, %v1000_v33 }
  0x30   :  { %722 = vmatpush.bf16.msrb.mxu0 %v1288_v41  ;;  %v997_v38 = vor.u32 %v1236_v31, %v994_v32  ;;  %v1242_v41 = vld [vmem:[%s1854_s0 + $0xac] sm:$0xf] }
  0x31   :  { %562 = vmatmul.bf16.gmra.mxu1 %v993_v44  ;;  %572 = vmatmul.bf16.gmra.mxu2 %v1033_v45  ;;  %v1014_v44 = vld [vmem:[%s1854_s0 + $0xb4] sm:$0xf0]  ;;  %v1020_v45 = vld [vmem:[%s1854_s0 + $0xa8] sm:$0xf] }
  0x32   :  { %631 = vmatpush.bf16.msrb.mxu2 %v1275_v43  ;;  %587 = vmatpush.bf16.msrb.mxu1 %v1267_v46  ;;  %v1241_v43 = vld [vmem:[%s1854_s0 + $0xa4] sm:$0xf]  ;;  %v1244_v46 = vld [vmem:[%s1854_s0 + $0xb8] sm:$0xf0] }
  0x33   :  { %675 = vmatpush.bf16.msrb.mxu3 %v1283_v42  ;;  %552 = vmatmul.bf16.gmra.mxu0 %v953_v47  ;;  %v1022_v42 = vld [vmem:[%s1854_s0 + $0xbc] sm:$0xf0] }
  0x34   :  { %v1025_v47 = vor.u32 %v1242_v41, %v1022_v42 }
  0x36   :  { %632 = vmatpush.bf16.msrb.mxu2 %v1274_v49  ;;  %588 = vmatpush.bf16.msrb.mxu1 %v1266_v50  ;;  %v1245_v49 = vld [vmem:[%s1854_s0 + $0xc0] sm:$0xf0]  ;;  %v1017_v50 = vor.u32 %v1241_v43, %v1014_v44 }
  0x37   :  { %676 = vmatpush.bf16.msrb.mxu3 %v1282_v48  ;;  %v1028_v48 = vld [vmem:[%s1854_s0 + $0xb0] sm:$0xf] }
  0x3a   :  { %633 = vmatpush.bf16.msrb.mxu2 %v1273_v52  ;;  %589 = vmatpush.bf16.msrb.mxu1 %v1265_v53  ;;  %v1029_v52 = vor.u32 %v1245_v49, %v1028_v48  ;;  %v1247_v53 = vld [vmem:[%s1854_s0 + $0xd4] sm:$0xf] }
  0x3b   :  { %677 = vmatpush.bf16.msrb.mxu3 %v1281_v51  ;;  %v1021_v51 = vor.u32 %v1244_v46, %v1020_v45 }
  0x3e   :  { %634 = vmatpush.bf16.msrb.mxu2 %v1272_v55  ;;  %590 = vmatpush.bf16.msrb.mxu1 %v1264_v58  ;;  %v1246_v55 = vld [vmem:[%s1854_s0 + $0xcc] sm:$0xf]  ;;  %v1249_v58 = vld [vmem:[%s1854_s0 + $0xe0] sm:$0xf0] }
  0x3f   :  { %678 = vmatpush.bf16.msrb.mxu3 %v1280_v54  ;;  %v1042_v54 = vld [vmem:[%s1854_s0 + $0xe4] sm:$0xf0]  ;;  %v1037_v62 = vor.u32 %v1246_v55, %v1034_v56 }
  0x40   :  { %v1045_v59 = vor.u32 %v1247_v53, %v1042_v54 }
  0x41   :  { %591 = vmatmul.bf16.vlgmr.msrb.gmra.mxu1 %v937_v2  ;;  %635 = vmatmul.bf16.vlgmr.msrb.gmra.mxu2 %v941_v3  ;;  %v1062_v2 = vld [vmem:[%s1854_s0 + $0x10c] sm:$0xf0]  ;;  %v1251_v3 = vld [vmem:[%s1854_s0 + $0xf4] sm:$0xf] }
  0x42   :  { %679 = vmatmul.bf16.vlgmr.msrb.gmra.mxu3 %v945_v63  ;;  %v1041_v63 = vor.u32 %v1249_v58, %v1040_v57  ;;  %v1065_v7 = vor.u32 %v1252_v1, %v1062_v2 }
  0x43   :  { %1214 = vmatmul.msk.bf16.vlgmr.msrb.gmra.mxu0 %vm517_vm0, %v949_v4  ;;  %v1054_v4 = vld [vmem:[%s1854_s0 + $0x104] sm:$0xf0] }
  0x44   :  { %v1057_v10 = vor.u32 %v1251_v3, %v1054_v4 }
  0x51   :  { %596 = vmatmul.bf16.gmra.mxu1 %v957_v14  ;;  %640 = vmatmul.bf16.gmra.mxu2 %v961_v15 }
  0x52   :  { %684 = vmatmul.bf16.gmra.mxu3 %v965_v11  ;;  %v1061_v11 = vor.u32 %v1254_v6, %v1060_v5 }
  0x53   :  { %1215 = vmatmul.msk.bf16.gmra.mxu0 %vm517_vm0, %v969_v16 }
  0x61   :  { %601 = vmatmul.bf16.gmra.mxu1 %v977_v26  ;;  %645 = vmatmul.bf16.gmra.mxu2 %v981_v27 }
  0x62   :  { %689 = vmatmul.bf16.gmra.mxu3 %v985_v23 }
  0x63   :  { %1216 = vmatmul.msk.bf16.gmra.mxu0 %vm517_vm0, %v989_v28 }
  0x71   :  { %606 = vmatmul.bf16.gmra.mxu1 %v997_v38  ;;  %650 = vmatmul.bf16.gmra.mxu2 %v1001_v39 }
  0x72   :  { %694 = vmatmul.bf16.gmra.mxu3 %v1005_v35 }
  0x73   :  { %1217 = vmatmul.msk.bf16.gmra.mxu0 %vm517_vm0, %v1009_v40 }
  0x81   :  { %611 = vmatmul.bf16.gmra.mxu1 %v1017_v50  ;;  %655 = vmatmul.bf16.gmra.mxu2 %v1021_v51 }
  0x82   :  { %699 = vmatmul.bf16.gmra.mxu3 %v1025_v47 }
  0x83   :  { %1218 = vmatmul.msk.bf16.gmra.mxu0 %vm517_vm0, %v1029_v52 }
  0x91   :  { %616 = vmatmul.bf16.gmra.mxu1 %v1037_v62  ;;  %660 = vmatmul.bf16.gmra.mxu2 %v1041_v63 }
  0x92   :  { %704 = vmatmul.bf16.gmra.mxu3 %v1045_v59 }
  0x93   :  { %1219 = vmatmul.msk.bf16.gmra.mxu0 %vm517_vm0, %v1049_v0 }
  0x9e   :  { %v558_v12 = vpop.f32.mrf.mxu1 }
  0xa0   :  { %v548_v14 = vpop.f32.mrf.mxu0 }
  0xa1   :  { %621 = vmatmul.bf16.gmra.mxu1 %v1057_v10  ;;  %665 = vmatmul.bf16.gmra.mxu2 %v1061_v11 }
  0xa2   :  { %709 = vmatmul.bf16.gmra.mxu3 %v1065_v7 }
  0xa3   :  { %1220 = vmatmul.msk.bf16.gmra.mxu0 %vm517_vm0, %v1069_v13 }
  0xa4   :  { %v1658_v15 = vpop.f32.mrf.mxu2 }
  0xa6   :  { %v1660_v16 = vpop.f32.mrf.mxu1 }
  0xa7   :  { %v1666_v21 = vpop.f32.mrf.mxu3 }
  0xa8   :  { %v550_v17 = vpop.f32.mrf.mxu0 }
  0xac   :  { %v1662_v18 = vpop.f32.mrf.mxu2 }
  0xae   :  { %v1664_v19 = vpop.f32.mrf.mxu1 }
  0xaf   :  { %v1672_v25 = vpop.f32.mrf.mxu3 }
  0xb0   :  { %v553_v20 = vpop.f32.mrf.mxu0 }
  0xb4   :  { %v1668_v22 = vpop.f32.mrf.mxu2 }
  0xb6   :  { %v1670_v23 = vpop.f32.mrf.mxu1 }
  0xb8   :  { %v555_v24 = vpop.f32.mrf.mxu0 }
  0xbc   :  { %v1674_v26 = vpop.f32.mrf.mxu2 }
  0xbe   :  { %v592_v27 = vpop.f32.mrf.mxu1 }
  0xbf   :  { %v593_v28 = vadd.f32 %v592_v27, %v548_v14 }
  0xc0   :  { %v724_v29 = vpop.f32.mrf.mxu0 }
  0xc4   :  { %v636_v31 = vpop.f32.mrf.mxu2 }
  0xc5   :  { %v680_v30 = vpop.f32.mrf.mxu3  ;;  %v637_v32 = vadd.f32 %v636_v31, %v593_v28 }
  0xc6   :  { %v594_v33 = vpop.f32.mrf.mxu1 }
  0xc7   :  { %v681_v34 = vadd.f32 %v680_v30, %v637_v32  ;;  %v595_v35 = vadd.f32 %v594_v33, %v550_v17 }
  0xc8   :  { %v726_v36 = vpop.f32.mrf.mxu0 }
  0xc9   :  { %v1676_v37 = vadd.f32 %v724_v29, %v681_v34 }
  0xcb   :  { %v792_v63 = vmul.f32 %v1676_v37, %v1676_v37  ;;  %v759_v3 = vsel %vm517_vm0, %v1676_v37, 0.0 }
  0xcc   :  { %v638_v39 = vpop.f32.mrf.mxu2 }
  0xcd   :  { %v682_v38 = vpop.f32.mrf.mxu3  ;;  %v639_v40 = vadd.f32 %v638_v39, %v595_v35  ;;  %v806_v11 = vsel %vm517_vm0, %v792_v63, 0.0 }
  0xce   :  { %v597_v41 = vpop.f32.mrf.mxu1 }
  0xcf   :  { %v683_v42 = vadd.f32 %v682_v38, %v639_v40  ;;  %v598_v43 = vadd.f32 %v597_v41, %v553_v20 }
  0xd0   :  { %v729_v44 = vpop.f32.mrf.mxu0 }
  0xd1   :  { %v1678_v45 = vadd.f32 %v726_v36, %v683_v42 }
  0xd3   :  { %v793_v60 = vmul.f32 %v1678_v45, %v1678_v45  ;;  %v760_v0 = vsel %vm517_vm0, %v1678_v45, 0.0 }
  0xd4   :  { %v641_v47 = vpop.f32.mrf.mxu2  ;;  %v761_v9 = vadd.f32 %v760_v0, %v759_v3 }
  0xd5   :  { %v685_v46 = vpop.f32.mrf.mxu3  ;;  %v642_v48 = vadd.f32 %v641_v47, %v598_v43  ;;  %v807_v5 = vsel %vm517_vm0, %v793_v60, 0.0 }
  0xd6   :  { %v599_v49 = vpop.f32.mrf.mxu1  ;;  %v808_v20 = vadd.f32 %v807_v5, %v806_v11 }
  0xd7   :  { %v686_v50 = vadd.f32 %v685_v46, %v642_v48  ;;  %v600_v54 = vadd.f32 %v599_v49, %v555_v24 }
  0xd8   :  { %v731_v51 = vpop.f32.mrf.mxu0 }
  0xd9   :  { %v1680_v52 = vadd.f32 %v729_v44, %v686_v50 }
  0xdb   :  { %v794_v1 = vmul.f32 %v1680_v52, %v1680_v52  ;;  %v762_v6 = vsel %vm517_vm0, %v1680_v52, 0.0 }
  0xdc   :  { %v643_v55 = vpop.f32.mrf.mxu2  ;;  %v763_v24 = vadd.f32 %v762_v6, %v761_v9 }
  0xdd   :  { %v687_v53 = vpop.f32.mrf.mxu3  ;;  %v644_v56 = vadd.f32 %v643_v55, %v600_v54  ;;  %v809_v13 = vsel %vm517_vm0, %v794_v1, 0.0 }
  0xde   :  { %v602_v57 = vpop.f32.mrf.mxu1  ;;  %v810_v29 = vadd.f32 %v809_v13, %v808_v20 }
  0xdf   :  { %v688_v58 = vadd.f32 %v687_v53, %v644_v56  ;;  %v603_v2 = vadd.f32 %v602_v57, %v558_v12 }
  0xe0   :  { %v734_v59 = vpop.f32.mrf.mxu0 }
  0xe1   :  { %v1684_v61 = vadd.f32 %v731_v51, %v688_v58 }
  0xe3   :  { %v795_v7 = vmul.f32 %v1684_v61, %v1684_v61  ;;  %v764_v12 = vsel %vm517_vm0, %v1684_v61, 0.0 }
  0xe4   :  { %v646_v4 = vpop.f32.mrf.mxu2  ;;  %v765_v30 = vadd.f32 %v764_v12, %v763_v24 }
  0xe5   :  { %v690_v62 = vpop.f32.mrf.mxu3  ;;  %v647_v8 = vadd.f32 %v646_v4, %v603_v2  ;;  %v811_v27 = vsel %vm517_vm0, %v795_v7, 0.0 }
  0xe6   :  { %v604_v10 = vpop.f32.mrf.mxu1  ;;  %v812_v35 = vadd.f32 %v811_v27, %v810_v29 }
  0xe7   :  { %v691_v14 = vadd.f32 %v690_v62, %v647_v8  ;;  %v605_v34 = vadd.f32 %v604_v10, %v1660_v16 }
  0xe8   :  { %v736_v17 = vpop.f32.mrf.mxu0 }
  0xe9   :  { %v1704_v28 = vadd.f32 %v734_v59, %v691_v14 }
  0xeb   :  { %v766_v32 = vsel %vm517_vm0, %v1704_v28, 0.0  ;;  %v796_v33 = vmul.f32 %v1704_v28, %v1704_v28 }
  0xec   :  { %v767_v36 = vadd.f32 %v766_v32, %v765_v30  ;;  %v648_v38 = vpop.f32.mrf.mxu2 }
  0xed   :  { %v692_v31 = vpop.f32.mrf.mxu3  ;;  %v813_v39 = vsel %vm517_vm0, %v796_v33, 0.0  ;;  %v649_v40 = vadd.f32 %v648_v38, %v605_v34 }
  0xee   :  { %v814_v41 = vadd.f32 %v813_v39, %v812_v35  ;;  %v607_v42 = vpop.f32.mrf.mxu1 }
  0xef   :  { %v693_v43 = vadd.f32 %v692_v31, %v649_v40  ;;  %v608_v16 = vadd.f32 %v607_v42, %v1664_v19 }
  0xf0   :  { %v739_v44 = vpop.f32.mrf.mxu0 }
  0xf1   :  { %v1712_v46 = vadd.f32 %v736_v17, %v693_v43 }
  0xf3   :  { %v768_v48 = vsel %vm517_vm0, %v1712_v46, 0.0  ;;  %v797_v49 = vmul.f32 %v1712_v46, %v1712_v46 }
  0xf4   :  { %v769_v50 = vadd.f32 %v768_v48, %v767_v36  ;;  %v651_v51 = vpop.f32.mrf.mxu2 }
  0xf5   :  { %v695_v47 = vpop.f32.mrf.mxu3  ;;  %v815_v53 = vsel %vm517_vm0, %v797_v49, 0.0  ;;  %v652_v54 = vadd.f32 %v651_v51, %v608_v16 }
  0xf6   :  { %v816_v55 = vadd.f32 %v815_v53, %v814_v41  ;;  %v609_v56 = vpop.f32.mrf.mxu1 }
  0xf7   :  { %v696_v57 = vadd.f32 %v695_v47, %v652_v54  ;;  %v610_v19 = vadd.f32 %v609_v56, %v1670_v23 }
  0xf8   :  { %v741_v58 = vpop.f32.mrf.mxu0 }
  0xf9   :  { %v1720_v59 = vadd.f32 %v739_v44, %v696_v57 }
  0xfb   :  { %v770_v62 = vsel %vm517_vm0, %v1720_v59, 0.0  ;;  %v798_v63 = vmul.f32 %v1720_v59, %v1720_v59 }
  0xfc   :  { %v771_v0 = vadd.f32 %v770_v62, %v769_v50  ;;  %v653_v1 = vpop.f32.mrf.mxu2 }
  0xfd   :  { %v697_v60 = vpop.f32.mrf.mxu3  ;;  %v817_v2 = vsel %vm517_vm0, %v798_v63, 0.0  ;;  %v654_v3 = vadd.f32 %v653_v1, %v610_v19 }
  0xfe   :  { %v818_v4 = vadd.f32 %v817_v2, %v816_v55  ;;  %v612_v5 = vpop.f32.mrf.mxu1 }
  0xff   :  { %v698_v6 = vadd.f32 %v697_v60, %v654_v3  ;;  %v613_v34 = vadd.f32 %v612_v5, %v1658_v15 }
 0x100   :  { %v744_v7 = vpop.f32.mrf.mxu0 }
 0x101   :  { %v1728_v8 = vadd.f32 %v741_v58, %v698_v6 }
 0x103   :  { %v772_v10 = vsel %vm517_vm0, %v1728_v8, 0.0  ;;  %v799_v11 = vmul.f32 %v1728_v8, %v1728_v8 }
 0x104   :  { %v773_v13 = vadd.f32 %v772_v10, %v771_v0  ;;  %v656_v23 = vpop.f32.mrf.mxu2 }
 0x105   :  { %v700_v9 = vpop.f32.mrf.mxu3  ;;  %v819_v12 = vsel %vm517_vm0, %v799_v11, 0.0  ;;  %v657_v35 = vadd.f32 %v656_v23, %v613_v34 }
 0x106   :  { %v820_v14 = vadd.f32 %v819_v12, %v818_v4  ;;  %v614_v17 = vpop.f32.mrf.mxu1 }
 0x107   :  { %v615_v36 = vadd.f32 %v614_v17, %v1662_v18  ;;  %v701_v43 = vadd.f32 %v700_v9, %v657_v35 }
 0x108   :  { %v746_v20 = vpop.f32.mrf.mxu0 }
 0x109   :  { %v1739_v50 = vadd.f32 %v744_v7, %v701_v43 }
 0x10b   :  { %v774_v58 = vsel %vm517_vm0, %v1739_v50, 0.0 }
 0x10c   :  { %v658_v27 = vpop.f32.mrf.mxu2  ;;  %v775_v3 = vadd.f32 %v774_v58, %v773_v13 }
 0x10d   :  { %v702_v24 = vpop.f32.mrf.mxu3  ;;  %v659_v39 = vadd.f32 %v658_v27, %v615_v36 }
 0x10e   :  { %v617_v29 = vpop.f32.mrf.mxu1 }
 0x10f   :  { %v618_v40 = vadd.f32 %v617_v29, %v1668_v22  ;;  %v703_v49 = vadd.f32 %v702_v24, %v659_v39  ;;  %v800_v22 = vmul.f32 %v1739_v50, %v1739_v50 }
 0x110   :  { %v749_v30 = vpop.f32.mrf.mxu0 }
 0x111   :  { %v1741_v15 = vadd.f32 %v746_v20, %v703_v49 }
 0x113   :  { %v801_v60 = vmul.f32 %v1741_v15, %v1741_v15  ;;  %v776_v0 = vsel %vm517_vm0, %v1741_v15, 0.0 }
 0x114   :  { %v661_v32 = vpop.f32.mrf.mxu2  ;;  %v777_v10 = vadd.f32 %v776_v0, %v775_v3 }
 0x115   :  { %v705_v31 = vpop.f32.mrf.mxu3  ;;  %v662_v44 = vadd.f32 %v661_v32, %v618_v40  ;;  %v823_v4 = vsel %vm517_vm0, %v801_v60, 0.0 }
 0x116   :  { %v619_v33 = vpop.f32.mrf.mxu1 }
 0x117   :  { %v620_v47 = vadd.f32 %v619_v33, %v1674_v26  ;;  %v706_v51 = vadd.f32 %v705_v31, %v662_v44 }
 0x118   :  { %v751_v41 = vpop.f32.mrf.mxu0 }
 0x119   :  { %v1746_v56 = vadd.f32 %v749_v30, %v706_v51 }
 0x11b   :  { %v802_v1 = vmul.f32 %v1746_v56, %v1746_v56  ;;  %v778_v5 = vsel %vm517_vm0, %v1746_v56, 0.0 }
 0x11c   :  { %v663_v42 = vpop.f32.mrf.mxu2  ;;  %v779_v24 = vadd.f32 %v778_v5, %v777_v10 }
 0x11d   :  { %v707_v38 = vpop.f32.mrf.mxu3  ;;  %v664_v16 = vadd.f32 %v663_v42, %v620_v47  ;;  %v825_v23 = vsel %vm517_vm0, %v802_v1, 0.0 }
 0x11e   :  { %v622_v48 = vpop.f32.mrf.mxu1 }
 0x11f   :  { %v708_v53 = vadd.f32 %v707_v38, %v664_v16  ;;  %v623_v18 = vadd.f32 %v622_v48, %v1666_v21  ;;  %v821_v21 = vsel %vm517_vm0, %v800_v22, 0.0 }
 0x120   :  { %v754_v26 = vpop.f32.mrf.mxu0  ;;  %v822_v9 = vadd.f32 %v821_v21, %v820_v14 }
 0x121   :  { %v1752_v62 = vadd.f32 %v751_v41, %v708_v53 }
 0x122   :  { %v824_v20 = vadd.f32 %v823_v4, %v822_v9 }
 0x123   :  { %v803_v6 = vmul.f32 %v1752_v62, %v1752_v62  ;;  %v780_v12 = vsel %vm517_vm0, %v1752_v62, 0.0 }
 0x124   :  { %v666_v55 = vpop.f32.mrf.mxu2  ;;  %v826_v30 = vadd.f32 %v825_v23, %v824_v20  ;;  %v781_v31 = vadd.f32 %v780_v12, %v779_v24 }
 0x125   :  { %v710_v54 = vpop.f32.mrf.mxu3  ;;  %v667_v57 = vadd.f32 %v666_v55, %v623_v18  ;;  %v827_v29 = vsel %vm517_vm0, %v803_v6, 0.0 }
 0x126   :  { %v624_v19 = vpop.f32.mrf.mxu1  ;;  %v828_v35 = vadd.f32 %v827_v29, %v826_v30 }
 0x127   :  { %v711_v63 = vadd.f32 %v710_v54, %v667_v57  ;;  %v625_v7 = vadd.f32 %v624_v19, %v1672_v25 }
 0x128   :  { %v756_v32 = vpop.f32.mrf.mxu0 }
 0x129   :  { %v1759_v2 = vadd.f32 %v754_v26, %v711_v63 }
 0x12b   :  { %v804_v13 = vmul.f32 %v1759_v2, %v1759_v2  ;;  %v782_v25 = vsel %vm517_vm0, %v1759_v2, 0.0 }
 0x12c   :  { %v668_v11 = vpop.f32.mrf.mxu2  ;;  %v783_v36 = vadd.f32 %v782_v25, %v781_v31 }
 0x12d   :  { %v669_v17 = vadd.f32 %v668_v11, %v625_v7  ;;  %v712_v27 = vpop.f32.mrf.mxu3  ;;  %v829_v33 = vsel %vm517_vm0, %v804_v13, 0.0 }
 0x12e   :  { %v830_v40 = vadd.f32 %v829_v33, %v828_v35 }
 0x12f   :  { %v713_v14 = vadd.f32 %v712_v27, %v669_v17 }
 0x131   :  { %v1776_v34 = vadd.f32 %v756_v32, %v713_v14 }
 0x133   :  { %v784_v38 = vsel %vm517_vm0, %v1776_v34, 0.0  ;;  %v805_v39 = vmul.f32 %v1776_v34, %v1776_v34 }
 0x134   :  { %v785_v41 = vadd.f32 %v784_v38, %v783_v36 }
 0x135   :  { %v831_v42 = vsel %vm517_vm0, %v805_v39, 0.0 }
 0x136   :  { %v786_v43 = vrot.slane %v785_v41, 4  ;;  %v832_v44 = vadd.f32 %v831_v42, %v830_v40 }
 0x138   :  { %v787_v47 = vadd.f32 %v786_v43, %v785_v41  ;;  %v833_v48 = vrot.slane %v832_v44, 4 }
 0x13a   :  { %v788_v49 = vrot.slane %v787_v47, 2  ;;  %v834_v16 = vadd.f32 %v833_v48, %v832_v44 }
 0x13c   :  { %v789_v51 = vadd.f32 %v788_v49, %v787_v47  ;;  %v835_v53 = vrot.slane %v834_v16, 2 }
 0x13e   :  { %v790_v18 = vrot.slane %v789_v51, 1  ;;  %v836_v54 = vadd.f32 %v835_v53, %v834_v16 }
 0x140   :  { %v791_v55 = vadd.f32 %v790_v18, %v789_v51  ;;  %v837_v22 = vrot.slane %v836_v54, 1 }
 0x142   :  { %v838_v57 = vadd.f32 %v837_v22, %v836_v54  ;;  %v839_v26 = vmul.f32 0.010204081, %v791_v55 }
 0x144   :  { %v840_v58 = vmul.f32 0.010204081, %v838_v57  ;;  %v841_v60 = vmul.f32 %v839_v26, %v839_v26  ;;  %v858_v63 = vsub.f32 %v1684_v61, %v839_v26  ;;  %v859_v19 = vsub.f32 %v1704_v28, %v839_v26 }
 0x145   :  { %v860_v21 = vsub.f32 %v1712_v46, %v839_v26  ;;  %v861_v1 = vsub.f32 %v1720_v59, %v839_v26  ;;  %v862_v3 = vsub.f32 %v1728_v8, %v839_v26  ;;  %v855_v61 = vsub.f32 %v1676_v37, %v839_v26 }
 0x146   :  { %v842_v0 = vsub.f32 %v840_v58, %v841_v60  ;;  %v856_v28 = vsub.f32 %v1678_v45, %v839_v26  ;;  %v857_v46 = vsub.f32 %v1680_v52, %v839_v26  ;;  %v863_v59 = vsub.f32 %v1739_v50, %v839_v26 }
 0x147   :  { %v864_v8 = vsub.f32 %v1741_v15, %v839_v26  ;;  %v865_v12 = vsub.f32 %v1746_v56, %v839_v26  ;;  %v866_v17 = vsub.f32 %v1752_v62, %v839_v26  ;;  %v867_v20 = vsub.f32 %v1759_v2, %v839_v26 }
 0x148   :  { %v843_v4 = vmax.f32 %v842_v0, 0.0  ;;  %v868_v24 = vsub.f32 %v1776_v34, %v839_v26 }
 0x14a   :  { %v844_v5 = vadd.f32 1e-05, %v843_v4 }
 0x14c   :  { %1316 = vrsqrt.f32 %v844_v5  ;;  %vm851_vm2 = vweird.f32 %v844_v5 }
 0x152   :  { %v1317_v6 = vpop.eup %1316 }
 0x153   :  { %v846_v7 = vmul.f32 %v1317_v6, %v844_v5  ;;  %vm852_vm1 = vweird.f32 %v1317_v6 }
 0x154   :  { %vm853_vm3 = vmor %vm851_vm2, %vm852_vm1 }
 0x155   :  { %v847_v9 = vmul.f32 %v1317_v6, %v846_v7 }
 0x157   :  { %v848_v10 = vmul.f32 0.5, %v847_v9 }
 0x159   :  { %v849_v11 = vsub.f32 1.5, %v848_v10 }
 0x15b   :  { %v850_v23 = vmul.f32 %v1317_v6, %v849_v11 }
 0x15d   :  { %v854_v13 = vsel %vm853_vm3, %v1317_v6, %v850_v23 }
 0x15e   :  { %v869_v27 = vmul.f32 %v855_v61, %v854_v13  ;;  %v870_v37 = vmul.f32 %v856_v28, %v854_v13  ;;  %v871_v29 = vmul.f32 %v857_v46, %v854_v13  ;;  %v872_v45 = vmul.f32 %v858_v63, %v854_v13 }
 0x15f   :  { %v873_v25 = vmul.f32 %v859_v19, %v854_v13  ;;  %v874_v14 = vmul.f32 %v860_v21, %v854_v13  ;;  %v875_v52 = vmul.f32 %v861_v1, %v854_v13  ;;  %v876_v30 = vmul.f32 %v862_v3, %v854_v13 }
 0x160   :  { %v877_v50 = vmul.f32 %v863_v59, %v854_v13  ;;  %v878_v31 = vmul.f32 %v864_v8, %v854_v13  ;;  %v879_v15 = vmul.f32 %v865_v12, %v854_v13  ;;  %v880_v32 = vmul.f32 %v866_v17, %v854_v13 }
 0x161   :  { %v881_v56 = vmul.f32 %v867_v20, %v854_v13  ;;  %v882_v33 = vmul.f32 %v868_v24, %v854_v13  ;;  %v883_v35 = vmax.f32 %v869_v27, 0.0  ;;  %v884_v62 = vmax.f32 %v870_v37, 0.0 }
 0x162   :  { %v885_v36 = vmax.f32 %v871_v29, 0.0  ;;  %v886_v2 = vmax.f32 %v872_v45, 0.0  ;;  %v887_v38 = vmax.f32 %v873_v25, 0.0  ;;  %v888_v34 = vmax.f32 %v874_v14, 0.0 }
 0x163   :  { %v889_v39 = vmax.f32 %v875_v52, 0.0  ;;  %v897_v40 = vpack.c.bf16 %v883_v35, %v883_v35  ;;  %v898_v41 = vpack.c.bf16 %v884_v62, %v884_v62  ;;  %v890_v43 = vmax.f32 %v876_v30, 0.0 }
 0x164   :  { %v899_v42 = vpack.c.bf16 %v885_v36, %v885_v36  ;;  %v900_v44 = vpack.c.bf16 %v886_v2, %v886_v2  ;;  %v891_v47 = vmax.f32 %v877_v50, 0.0  ;;  %v901_v48 = vpack.c.bf16 %v887_v38, %v887_v38 }
 0x165   :  { %912 = vst.msk [vmem:[%s1855_s2] sm:$0xf] %vm911_vm4, %v897_v40  ;;  %v892_v49 = vmax.f32 %v878_v31, 0.0  ;;  %v902_v16 = vpack.c.bf16 %v888_v34, %v888_v34  ;;  %v893_v51 = vmax.f32 %v879_v15, 0.0  ;;  %v903_v53 = vpack.c.bf16 %v889_v39, %v889_v39 }
 0x166   :  { %913 = vst.msk [vmem:[%s1855_s2 + $0x4] sm:$0xf] %vm911_vm4, %v898_v41  ;;  %v894_v18 = vmax.f32 %v880_v32, 0.0  ;;  %v904_v54 = vpack.c.bf16 %v890_v43, %v890_v43  ;;  %v895_v55 = vmax.f32 %v881_v56, 0.0  ;;  %v905_v22 = vpack.c.bf16 %v891_v47, %v891_v47 }
 0x167   :  { %914 = vst.msk [vmem:[%s1855_s2 + $0x8] sm:$0xf] %vm911_vm4, %v899_v42  ;;  %v896_v57 = vmax.f32 %v882_v33, 0.0  ;;  %v906_v26 = vpack.c.bf16 %v892_v49, %v892_v49  ;;  %v907_v58 = vpack.c.bf16 %v893_v51, %v893_v51 }
 0x168   :  { %915 = vst.msk [vmem:[%s1855_s2 + $0xc] sm:$0xf] %vm911_vm4, %v900_v44  ;;  %v908_v60 = vpack.c.bf16 %v894_v18, %v894_v18  ;;  %v909_v63 = vpack.c.bf16 %v895_v55, %v895_v55 }
 0x169   :  { %916 = vst.msk [vmem:[%s1855_s2 + $0x10] sm:$0xf] %vm911_vm4, %v901_v48  ;;  %v910_v19 = vpack.c.bf16 %v896_v57, %v896_v57 }
 0x16a   :  { %917 = vst.msk [vmem:[%s1855_s2 + $0x14] sm:$0xf] %vm911_vm4, %v902_v16 }
 0x16b   :  { %918 = vst.msk [vmem:[%s1855_s2 + $0x18] sm:$0xf] %vm911_vm4, %v903_v53 }
 0x16c   :  { %919 = vst.msk [vmem:[%s1855_s2 + $0x1c] sm:$0xf] %vm911_vm4, %v904_v54 }
 0x16d   :  { %920 = vst.msk [vmem:[%s1855_s2 + $0x20] sm:$0xf] %vm911_vm4, %v905_v22 }
 0x16e   :  { %921 = vst.msk [vmem:[%s1855_s2 + $0x24] sm:$0xf] %vm911_vm4, %v906_v26 }
 0x16f   :  { %922 = vst.msk [vmem:[%s1855_s2 + $0x28] sm:$0xf] %vm911_vm4, %v907_v58 }
 0x170   :  { %923 = vst.msk [vmem:[%s1855_s2 + $0x2c] sm:$0xf] %vm911_vm4, %v908_v60 }
 0x171   :  { %924 = vst.msk [vmem:[%s1855_s2 + $0x30] sm:$0xf] %vm911_vm4, %v909_v63 }
 0x172   :  { %925 = vst.msk [vmem:[%s1855_s2 + $0x34] sm:$0xf] %vm911_vm4, %v910_v19 }

// kernel: esnet_forward.7
= control target key start
LH: loop header
LB: loop body
LE: loop exit
PB: predicated region body
PF: predicated region fallthrough
CT: control target
= control target key end

     0   :  { %vm4873_vm0 = vcmask 523264   ;;  %s16570_s1 = inlined_call_operand.vmem [shape: bf16[3136,512], index: 1, kind: input, shape index: {}]   ;;  %s16571_s0 = inlined_call_operand.vmem [shape: bf16[16,3136], index: 0, kind: input, shape index: {}]   ;;  %s16572_s2 = inlined_call_operand.vmem [shape: bf16[512,128], index: 2, kind: input, shape index: {}]   ;;  %s16573_s3 = inlined_call_operand.vmem [shape: f32[1,128], index: 3, kind: input, shape index: {}]   ;;  %s16574_s4 = inlined_call_operand.vmem [shape: f32[16,128], index: 4, kind: output, shape index: {}]  }
   0x1   :  { %v7013_v0 = vld [vmem:[%s16570_s1 + $0xe0] sm:$0xf]  ;;  %v10222_v1 = vld [vmem:[%s16570_s1 + $0xec] sm:$0xf0] }
   0x2   :  { %v7141_v2 = vld [vmem:[%s16570_s1 + $0x1e0] sm:$0xf]  ;;  %v7014_v3 = vor.u32 %v10222_v1, %v7013_v0  ;;  %v10254_v4 = vld [vmem:[%s16570_s1 + $0x1ec] sm:$0xf0] }
   0x3   :  { %v7269_v5 = vld [vmem:[%s16570_s1 + $0x2e0] sm:$0xf]  ;;  %v10286_v6 = vld [vmem:[%s16570_s1 + $0x2ec] sm:$0xf0]  ;;  %v7142_v7 = vor.u32 %v10254_v4, %v7141_v2 }
   0x4   :  { %v7270_v8 = vor.u32 %v10286_v6, %v7269_v5  ;;  %v7397_v9 = vld [vmem:[%s16570_s1 + $0x3e0] sm:$0xf]  ;;  %v10318_v10 = vld [vmem:[%s16570_s1 + $0x3ec] sm:$0xf0]  ;;  %4877 = vmatpush.bf16.msra.mxu0 %v7014_v3 }
   0x5   :  { %v6997_v11 = vld [vmem:[%s16570_s1 + $0xc0] sm:$0xf]  ;;  %v7398_v12 = vor.u32 %v10318_v10, %v7397_v9  ;;  %v10218_v13 = vld [vmem:[%s16570_s1 + $0xcc] sm:$0xf0]  ;;  %4891 = vmatpush.bf16.msra.mxu1 %v7142_v7 }
   0x6   :  { %v7125_v14 = vld [vmem:[%s16570_s1 + $0x1c0] sm:$0xf]  ;;  %v10250_v15 = vld [vmem:[%s16570_s1 + $0x1cc] sm:$0xf0]  ;;  %4905 = vmatpush.bf16.msra.mxu2 %v7270_v8  ;;  %v6998_v16 = vor.u32 %v10218_v13, %v6997_v11 }
   0x7   :  { %v7126_v17 = vor.u32 %v10250_v15, %v7125_v14  ;;  %v7253_v18 = vld [vmem:[%s16570_s1 + $0x2c0] sm:$0xf]  ;;  %v10282_v19 = vld [vmem:[%s16570_s1 + $0x2cc] sm:$0xf0]  ;;  %4919 = vmatpush.bf16.msra.mxu3 %v7398_v12 }
   0x8   :  { %v7381_v20 = vld [vmem:[%s16570_s1 + $0x3c0] sm:$0xf]  ;;  %v7254_v21 = vor.u32 %v10282_v19, %v7253_v18  ;;  %v10314_v22 = vld [vmem:[%s16570_s1 + $0x3cc] sm:$0xf0]  ;;  %4878 = vmatpush.bf16.msra.mxu0 %v6998_v16 }
   0x9   :  { %v6981_v23 = vld [vmem:[%s16570_s1 + $0xa0] sm:$0xf]  ;;  %v10214_v24 = vld [vmem:[%s16570_s1 + $0xac] sm:$0xf0]  ;;  %v7382_v25 = vor.u32 %v10314_v22, %v7381_v20  ;;  %4892 = vmatpush.bf16.msra.mxu1 %v7126_v17 }
   0xa   :  { %v7109_v26 = vld [vmem:[%s16570_s1 + $0x1a0] sm:$0xf]  ;;  %v10246_v27 = vld [vmem:[%s16570_s1 + $0x1ac] sm:$0xf0]  ;;  %v6982_v29 = vor.u32 %v10214_v24, %v6981_v23  ;;  %4906 = vmatpush.bf16.msra.mxu2 %v7254_v21 }
   0xb   :  { %v7237_v28 = vld [vmem:[%s16570_s1 + $0x2a0] sm:$0xf]  ;;  %v10278_v30 = vld [vmem:[%s16570_s1 + $0x2ac] sm:$0xf0]  ;;  %v7110_v33 = vor.u32 %v10246_v27, %v7109_v26  ;;  %4920 = vmatpush.bf16.msra.mxu3 %v7382_v25 }
   0xc   :  { %v7365_v31 = vld [vmem:[%s16570_s1 + $0x3a0] sm:$0xf]  ;;  %v10310_v32 = vld [vmem:[%s16570_s1 + $0x3ac] sm:$0xf0]  ;;  %v7238_v34 = vor.u32 %v10278_v30, %v7237_v28  ;;  %4879 = vmatpush.bf16.msra.mxu0 %v6982_v29 }
   0xd   :  { %v6965_v35 = vld [vmem:[%s16570_s1 + $0x80] sm:$0xf]  ;;  %v10210_v36 = vld [vmem:[%s16570_s1 + $0x8c] sm:$0xf0]  ;;  %v7366_v38 = vor.u32 %v10310_v32, %v7365_v31  ;;  %4893 = vmatpush.bf16.msra.mxu1 %v7110_v33 }
   0xe   :  { %v7093_v37 = vld [vmem:[%s16570_s1 + $0x180] sm:$0xf]  ;;  %v10242_v39 = vld [vmem:[%s16570_s1 + $0x18c] sm:$0xf0]  ;;  %v6966_v44 = vor.u32 %v10210_v36, %v6965_v35  ;;  %4907 = vmatpush.bf16.msra.mxu2 %v7238_v34 }
   0xf   :  { %v7221_v40 = vld [vmem:[%s16570_s1 + $0x280] sm:$0xf]  ;;  %v10274_v41 = vld [vmem:[%s16570_s1 + $0x28c] sm:$0xf0]  ;;  %v7094_v45 = vor.u32 %v10242_v39, %v7093_v37  ;;  %4921 = vmatpush.bf16.msra.mxu3 %v7366_v38 }
  0x10   :  { %v7349_v42 = vld [vmem:[%s16570_s1 + $0x380] sm:$0xf]  ;;  %v10306_v43 = vld [vmem:[%s16570_s1 + $0x38c] sm:$0xf0]  ;;  %v7222_v46 = vor.u32 %v10274_v41, %v7221_v40  ;;  %4880 = vmatpush.bf16.msra.mxu0 %v6966_v44 }
  0x11   :  { %v6949_v47 = vld [vmem:[%s16570_s1 + $0x60] sm:$0xf]  ;;  %v10206_v48 = vld [vmem:[%s16570_s1 + $0x6c] sm:$0xf0]  ;;  %v7350_v50 = vor.u32 %v10306_v43, %v7349_v42  ;;  %4894 = vmatpush.bf16.msra.mxu1 %v7094_v45 }
  0x12   :  { %v7077_v49 = vld [vmem:[%s16570_s1 + $0x160] sm:$0xf]  ;;  %v10238_v51 = vld [vmem:[%s16570_s1 + $0x16c] sm:$0xf0]  ;;  %v6950_v56 = vor.u32 %v10206_v48, %v6949_v47  ;;  %4908 = vmatpush.bf16.msra.mxu2 %v7222_v46 }
  0x13   :  { %v7205_v52 = vld [vmem:[%s16570_s1 + $0x260] sm:$0xf]  ;;  %v10270_v53 = vld [vmem:[%s16570_s1 + $0x26c] sm:$0xf0]  ;;  %v7078_v57 = vor.u32 %v10238_v51, %v7077_v49  ;;  %4922 = vmatpush.bf16.msra.mxu3 %v7350_v50 }
  0x14   :  { %v7333_v54 = vld [vmem:[%s16570_s1 + $0x360] sm:$0xf]  ;;  %v10302_v55 = vld [vmem:[%s16570_s1 + $0x36c] sm:$0xf0]  ;;  %v7206_v58 = vor.u32 %v10270_v53, %v7205_v52  ;;  %4881 = vmatpush.bf16.msra.mxu0 %v6950_v56  ;;  %v10179_v53 = vld [vmem:[%s16571_s0 + $0x60] sm:$0xf0] }
  0x15   :  { %v6933_v59 = vld [vmem:[%s16570_s1 + $0x40] sm:$0xf]  ;;  %v10202_v60 = vld [vmem:[%s16570_s1 + $0x4c] sm:$0xf0]  ;;  %v7334_v62 = vor.u32 %v10302_v55, %v7333_v54  ;;  %4895 = vmatpush.bf16.msra.mxu1 %v7078_v57  ;;  %v6809_v54 = vld [vmem:[%s16571_s0 + $0x8] sm:$0xf] }
  0x16   :  { %v7061_v61 = vld [vmem:[%s16570_s1 + $0x140] sm:$0xf]  ;;  %v10234_v63 = vld [vmem:[%s16570_s1 + $0x14c] sm:$0xf0]  ;;  %v6934_v4 = vor.u32 %v10202_v60, %v6933_v59  ;;  %4909 = vmatpush.bf16.msra.mxu2 %v7206_v58  ;;  %v10180_v59 = vld [vmem:[%s16571_s0 + $0x68] sm:$0xf0] }
  0x17   :  { %v7189_v0 = vld [vmem:[%s16570_s1 + $0x240] sm:$0xf]  ;;  %v10266_v1 = vld [vmem:[%s16570_s1 + $0x24c] sm:$0xf0]  ;;  %v7062_v5 = vor.u32 %v10234_v63, %v7061_v61  ;;  %4923 = vmatpush.bf16.msra.mxu3 %v7334_v62 }
  0x18   :  { %v7317_v2 = vld [vmem:[%s16570_s1 + $0x340] sm:$0xf]  ;;  %v10298_v3 = vld [vmem:[%s16570_s1 + $0x34c] sm:$0xf0]  ;;  %v7190_v6 = vor.u32 %v10266_v1, %v7189_v0  ;;  %4882 = vmatpush.bf16.msra.mxu0 %v6934_v4  ;;  %v11319_v1 = vor.u32 %v10180_v59, %v6809_v54 }
  0x19   :  { %v6917_v7 = vld [vmem:[%s16570_s1 + $0x20] sm:$0xf]  ;;  %v10198_v8 = vld [vmem:[%s16570_s1 + $0x2c] sm:$0xf0]  ;;  %v7318_v10 = vor.u32 %v10298_v3, %v7317_v2  ;;  %4896 = vmatpush.bf16.msra.mxu1 %v7062_v5 }
  0x1a   :  { %v7045_v9 = vld [vmem:[%s16570_s1 + $0x120] sm:$0xf]  ;;  %v10230_v11 = vld [vmem:[%s16570_s1 + $0x12c] sm:$0xf0]  ;;  %v6918_v16 = vor.u32 %v10198_v8, %v6917_v7  ;;  %4910 = vmatpush.bf16.msra.mxu2 %v7190_v6  ;;  %v10167_v6 = vld [vmem:[%s16571_s0 + $0x4] sm:$0xf] }
  0x1b   :  { %v7173_v12 = vld [vmem:[%s16570_s1 + $0x220] sm:$0xf]  ;;  %v10262_v13 = vld [vmem:[%s16570_s1 + $0x22c] sm:$0xf0]  ;;  %v7046_v19 = vor.u32 %v10230_v11, %v7045_v9  ;;  %4924 = vmatpush.bf16.msra.mxu3 %v7318_v10  ;;  %v6803_v7 = vld [vmem:[%s16571_s0 + $0x64] sm:$0xf0] }
  0x1c   :  { %v7301_v14 = vld [vmem:[%s16570_s1 + $0x320] sm:$0xf]  ;;  %v10294_v15 = vld [vmem:[%s16570_s1 + $0x32c] sm:$0xf0]  ;;  %v7174_v20 = vor.u32 %v10262_v13, %v7173_v12  ;;  %4883 = vmatpush.bf16.msra.mxu0 %v6918_v16  ;;  %v10168_v8 = vld [vmem:[%s16571_s0 + $0xc] sm:$0xf]  ;;  %v11341_v10 = vor.u32 %v10167_v6, %v6803_v7 }
  0x1d   :  { %v6901_v17 = vld [vmem:[%s16570_s1] sm:$0xf]  ;;  %v10194_v18 = vld [vmem:[%s16570_s1 + $0xc] sm:$0xf0]  ;;  %v7302_v24 = vor.u32 %v10294_v15, %v7301_v14  ;;  %4897 = vmatpush.bf16.msra.mxu1 %v7046_v19 }
  0x1e   :  { %v7029_v21 = vld [vmem:[%s16570_s1 + $0x100] sm:$0xf]  ;;  %v10226_v22 = vld [vmem:[%s16570_s1 + $0x10c] sm:$0xf0]  ;;  %v6902_v31 = vor.u32 %v10194_v18, %v6901_v17  ;;  %4911 = vmatpush.bf16.msra.mxu2 %v7174_v20 }
  0x1f   :  { %v7157_v23 = vld [vmem:[%s16570_s1 + $0x200] sm:$0xf]  ;;  %v10258_v25 = vld [vmem:[%s16570_s1 + $0x20c] sm:$0xf0]  ;;  %v7030_v35 = vor.u32 %v10226_v22, %v7029_v21  ;;  %4925 = vmatpush.bf16.msra.mxu3 %v7302_v24 }
  0x20   :  { %v7285_v26 = vld [vmem:[%s16570_s1 + $0x300] sm:$0xf]  ;;  %v10290_v27 = vld [vmem:[%s16570_s1 + $0x30c] sm:$0xf0]  ;;  %v7158_v36 = vor.u32 %v10258_v25, %v7157_v23  ;;  %4884 = vmatpush.bf16.msra.mxu0 %v6902_v31 }
  0x21   :  { %v7525_v28 = vld [vmem:[%s16570_s1 + $0x4e0] sm:$0xf]  ;;  %v10350_v29 = vld [vmem:[%s16570_s1 + $0x4ec] sm:$0xf0]  ;;  %v7286_v39 = vor.u32 %v10290_v27, %v7285_v26  ;;  %4898 = vmatpush.bf16.msra.mxu1 %v7030_v35 }
  0x22   :  { %v7653_v30 = vld [vmem:[%s16570_s1 + $0x5e0] sm:$0xf]  ;;  %v10382_v32 = vld [vmem:[%s16570_s1 + $0x5ec] sm:$0xf0]  ;;  %v7526_v40 = vor.u32 %v10350_v29, %v7525_v28  ;;  %4912 = vmatpush.bf16.msra.mxu2 %v7158_v36 }
  0x23   :  { %v7781_v33 = vld [vmem:[%s16570_s1 + $0x6e0] sm:$0xf]  ;;  %v10414_v34 = vld [vmem:[%s16570_s1 + $0x6ec] sm:$0xf0]  ;;  %v7654_v43 = vor.u32 %v10382_v32, %v7653_v30  ;;  %4926 = vmatpush.bf16.msra.mxu3 %v7286_v39 }
  0x24   :  { %v7909_v37 = vld [vmem:[%s16570_s1 + $0x7e0] sm:$0xf]  ;;  %v10446_v38 = vld [vmem:[%s16570_s1 + $0x7ec] sm:$0xf0]  ;;  %v7782_v44 = vor.u32 %v10414_v34, %v7781_v33  ;;  %4933 = vmatpush.bf16.msrb.mxu0 %v7526_v40  ;;  %4899 = vmatmul.bf16.vlgmr.msra.gmra.mxu1 %v11341_v10 }
  0x25   :  { %v7509_v41 = vld [vmem:[%s16570_s1 + $0x4c0] sm:$0xf]  ;;  %v10346_v42 = vld [vmem:[%s16570_s1 + $0x4cc] sm:$0xf0]  ;;  %v7910_v48 = vor.u32 %v10446_v38, %v7909_v37  ;;  %4947 = vmatpush.bf16.msrb.mxu1 %v7654_v43  ;;  %4913 = vmatmul.bf16.vlgmr.msra.gmra.mxu2 %v11319_v1 }
  0x26   :  { %v7637_v45 = vld [vmem:[%s16570_s1 + $0x5c0] sm:$0xf]  ;;  %v10378_v46 = vld [vmem:[%s16570_s1 + $0x5cc] sm:$0xf0]  ;;  %v7510_v55 = vor.u32 %v10346_v42, %v7509_v41  ;;  %4961 = vmatpush.bf16.msrb.mxu2 %v7782_v44 }
  0x27   :  { %v7765_v47 = vld [vmem:[%s16570_s1 + $0x6c0] sm:$0xf]  ;;  %v10410_v49 = vld [vmem:[%s16570_s1 + $0x6cc] sm:$0xf0]  ;;  %v7638_v60 = vor.u32 %v10378_v46, %v7637_v45  ;;  %4975 = vmatpush.bf16.msrb.mxu3 %v7910_v48 }
  0x28   :  { %v7893_v50 = vld [vmem:[%s16570_s1 + $0x7c0] sm:$0xf]  ;;  %v10442_v51 = vld [vmem:[%s16570_s1 + $0x7cc] sm:$0xf0]  ;;  %v7766_v61 = vor.u32 %v10410_v49, %v7765_v47  ;;  %4934 = vmatpush.bf16.msrb.mxu0 %v7510_v55 }
  0x29   :  { %v6801_v52 = vld [vmem:[%s16571_s0] sm:$0xf]  ;;  %v10342_v57 = vld [vmem:[%s16570_s1 + $0x4ac] sm:$0xf0]  ;;  %v7894_v2 = vor.u32 %v10442_v51, %v7893_v50  ;;  %4948 = vmatpush.bf16.msrb.mxu1 %v7638_v60 }
  0x2a   :  { %v7493_v56 = vld [vmem:[%s16570_s1 + $0x4a0] sm:$0xf]  ;;  %v11305_v58 = vor.u32 %v10179_v53, %v6801_v52  ;;  %v10374_v63 = vld [vmem:[%s16570_s1 + $0x5ac] sm:$0xf0]  ;;  %4962 = vmatpush.bf16.msrb.mxu2 %v7766_v61 }
  0x2b   :  { %v7621_v62 = vld [vmem:[%s16570_s1 + $0x5a0] sm:$0xf]  ;;  %v10406_v3 = vld [vmem:[%s16570_s1 + $0x6ac] sm:$0xf0]  ;;  %v7494_v9 = vor.u32 %v10342_v57, %v7493_v56  ;;  %4976 = vmatpush.bf16.msrb.mxu3 %v7894_v2 }
  0x2c   :  { %v7749_v0 = vld [vmem:[%s16570_s1 + $0x6a0] sm:$0xf]  ;;  %v10438_v5 = vld [vmem:[%s16570_s1 + $0x7ac] sm:$0xf0]  ;;  %4885 = vmatmul.bf16.vlgmr.msra.gmra.mxu0 %v11305_v58  ;;  %v7622_v12 = vor.u32 %v10374_v63, %v7621_v62 }
  0x2d   :  { %v7877_v4 = vld [vmem:[%s16570_s1 + $0x7a0] sm:$0xf]  ;;  %v6811_v11 = vld [vmem:[%s16571_s0 + $0x6c] sm:$0xf0]  ;;  %v7750_v13 = vor.u32 %v10406_v3, %v7749_v0  ;;  %4935 = vmatpush.bf16.msrb.mxu0 %v7494_v9 }
  0x2e   :  { %v7477_v14 = vld [vmem:[%s16570_s1 + $0x480] sm:$0xf]  ;;  %v10338_v15 = vld [vmem:[%s16570_s1 + $0x48c] sm:$0xf0]  ;;  %v11355_v17 = vor.u32 %v10168_v8, %v6811_v11  ;;  %v7878_v18 = vor.u32 %v10438_v5, %v7877_v4  ;;  %4949 = vmatpush.bf16.msrb.mxu1 %v7622_v12 }
  0x2f   :  { %v7605_v16 = vld [vmem:[%s16570_s1 + $0x580] sm:$0xf]  ;;  %v10370_v19 = vld [vmem:[%s16570_s1 + $0x58c] sm:$0xf0]  ;;  %v7478_v24 = vor.u32 %v10338_v15, %v7477_v14  ;;  %4963 = vmatpush.bf16.msrb.mxu2 %v7750_v13 }
  0x30   :  { %v7733_v20 = vld [vmem:[%s16570_s1 + $0x680] sm:$0xf]  ;;  %v10402_v21 = vld [vmem:[%s16570_s1 + $0x68c] sm:$0xf0]  ;;  %4927 = vmatmul.bf16.vlgmr.msra.gmra.mxu3 %v11355_v17  ;;  %v7606_v25 = vor.u32 %v10370_v19, %v7605_v16 }
  0x31   :  { %v7861_v22 = vld [vmem:[%s16570_s1 + $0x780] sm:$0xf]  ;;  %v10434_v23 = vld [vmem:[%s16570_s1 + $0x78c] sm:$0xf0]  ;;  %v7734_v26 = vor.u32 %v10402_v21, %v7733_v20  ;;  %4977 = vmatpush.bf16.msrb.mxu3 %v7878_v18  ;;  %4936 = vmatpush.bf16.msrb.mxu0 %v7478_v24 }
  0x32   :  { %v7461_v27 = vld [vmem:[%s16570_s1 + $0x460] sm:$0xf]  ;;  %v10334_v28 = vld [vmem:[%s16570_s1 + $0x46c] sm:$0xf0]  ;;  %v7862_v30 = vor.u32 %v10434_v23, %v7861_v22  ;;  %4950 = vmatpush.bf16.msrb.mxu1 %v7606_v25  ;;  %v10181_v22 = vld [vmem:[%s16571_s0 + $0x70] sm:$0xf0] }
  0x33   :  { %v7589_v29 = vld [vmem:[%s16570_s1 + $0x560] sm:$0xf]  ;;  %v10366_v31 = vld [vmem:[%s16570_s1 + $0x56c] sm:$0xf0]  ;;  %v7462_v36 = vor.u32 %v10334_v28, %v7461_v27  ;;  %4964 = vmatpush.bf16.msrb.mxu2 %v7734_v26  ;;  %v6825_v25 = vld [vmem:[%s16571_s0 + $0x18] sm:$0xf] }
  0x34   :  { %v7717_v32 = vld [vmem:[%s16570_s1 + $0x660] sm:$0xf]  ;;  %v10398_v33 = vld [vmem:[%s16570_s1 + $0x66c] sm:$0xf0]  ;;  %v7590_v37 = vor.u32 %v10366_v31, %v7589_v29  ;;  %v10182_v26 = vld [vmem:[%s16571_s0 + $0x78] sm:$0xf0] }
  0x35   :  { %v7845_v34 = vld [vmem:[%s16570_s1 + $0x760] sm:$0xf]  ;;  %v10430_v35 = vld [vmem:[%s16570_s1 + $0x76c] sm:$0xf0]  ;;  %v7718_v38 = vor.u32 %v10398_v33, %v7717_v32  ;;  %4978 = vmatpush.bf16.msrb.mxu3 %v7862_v30  ;;  %4937 = vmatpush.bf16.msrb.mxu0 %v7462_v36  ;;  %v10169_v27 = vld [vmem:[%s16571_s0 + $0x14] sm:$0xf] }
  0x36   :  { %v7445_v39 = vld [vmem:[%s16570_s1 + $0x440] sm:$0xf]  ;;  %v10330_v40 = vld [vmem:[%s16570_s1 + $0x44c] sm:$0xf0]  ;;  %v7846_v42 = vor.u32 %v10430_v35, %v7845_v34  ;;  %4951 = vmatpush.bf16.msrb.mxu1 %v7590_v37  ;;  %v6819_v30 = vld [vmem:[%s16571_s0 + $0x74] sm:$0xf0] }
  0x37   :  { %v7573_v41 = vld [vmem:[%s16570_s1 + $0x540] sm:$0xf]  ;;  %v10362_v43 = vld [vmem:[%s16570_s1 + $0x54c] sm:$0xf0]  ;;  %v7446_v48 = vor.u32 %v10330_v40, %v7445_v39  ;;  %4965 = vmatpush.bf16.msrb.mxu2 %v7718_v38  ;;  %v10170_v31 = vld [vmem:[%s16571_s0 + $0x1c] sm:$0xf] }
  0x38   :  { %v7701_v44 = vld [vmem:[%s16570_s1 + $0x640] sm:$0xf]  ;;  %v10394_v45 = vld [vmem:[%s16570_s1 + $0x64c] sm:$0xf0]  ;;  %v7574_v50 = vor.u32 %v10362_v43, %v7573_v41  ;;  %v11538_v43 = vor.u32 %v10182_v26, %v6825_v25 }
  0x39   :  { %v7829_v46 = vld [vmem:[%s16570_s1 + $0x740] sm:$0xf]  ;;  %v10426_v47 = vld [vmem:[%s16570_s1 + $0x74c] sm:$0xf0]  ;;  %v7702_v51 = vor.u32 %v10394_v45, %v7701_v44  ;;  %4979 = vmatpush.bf16.msrb.mxu3 %v7846_v42  ;;  %4938 = vmatpush.bf16.msrb.mxu0 %v7446_v48  ;;  %v11540_v44 = vor.u32 %v10169_v27, %v6819_v30 }
  0x3a   :  { %v7429_v49 = vld [vmem:[%s16570_s1 + $0x420] sm:$0xf]  ;;  %v10326_v52 = vld [vmem:[%s16570_s1 + $0x42c] sm:$0xf0]  ;;  %v7830_v55 = vor.u32 %v10426_v47, %v7829_v46  ;;  %4952 = vmatpush.bf16.msrb.mxu1 %v7574_v50 }
  0x3b   :  { %v7557_v53 = vld [vmem:[%s16570_s1 + $0x520] sm:$0xf]  ;;  %v10358_v54 = vld [vmem:[%s16570_s1 + $0x52c] sm:$0xf0]  ;;  %v7430_v63 = vor.u32 %v10326_v52, %v7429_v49  ;;  %4966 = vmatpush.bf16.msrb.mxu2 %v7702_v51 }
  0x3c   :  { %v7685_v56 = vld [vmem:[%s16570_s1 + $0x620] sm:$0xf]  ;;  %v10390_v57 = vld [vmem:[%s16570_s1 + $0x62c] sm:$0xf0]  ;;  %v7558_v5 = vor.u32 %v10358_v54, %v7557_v53 }
  0x3d   :  { %v7813_v59 = vld [vmem:[%s16570_s1 + $0x720] sm:$0xf]  ;;  %v10422_v60 = vld [vmem:[%s16570_s1 + $0x72c] sm:$0xf0]  ;;  %v7686_v6 = vor.u32 %v10390_v57, %v7685_v56  ;;  %4980 = vmatpush.bf16.msrb.mxu3 %v7830_v55  ;;  %4939 = vmatpush.bf16.msrb.mxu0 %v7430_v63 }
  0x3e   :  { %v7413_v61 = vld [vmem:[%s16570_s1 + $0x400] sm:$0xf]  ;;  %v10322_v62 = vld [vmem:[%s16570_s1 + $0x40c] sm:$0xf0]  ;;  %v7814_v11 = vor.u32 %v10422_v60, %v7813_v59  ;;  %4953 = vmatpush.bf16.msrb.mxu1 %v7558_v5 }
  0x3f   :  { %v7541_v0 = vld [vmem:[%s16570_s1 + $0x500] sm:$0xf]  ;;  %v10354_v2 = vld [vmem:[%s16570_s1 + $0x50c] sm:$0xf0]  ;;  %v7414_v19 = vor.u32 %v10322_v62, %v7413_v61  ;;  %4967 = vmatpush.bf16.msrb.mxu2 %v7686_v6 }
  0x40   :  { %v7669_v3 = vld [vmem:[%s16570_s1 + $0x600] sm:$0xf]  ;;  %v10386_v4 = vld [vmem:[%s16570_s1 + $0x60c] sm:$0xf0]  ;;  %v7542_v23 = vor.u32 %v10354_v2, %v7541_v0 }
  0x41   :  { %v7797_v7 = vld [vmem:[%s16570_s1 + $0x700] sm:$0xf]  ;;  %v10418_v8 = vld [vmem:[%s16570_s1 + $0x70c] sm:$0xf0]  ;;  %v7670_v24 = vor.u32 %v10386_v4, %v7669_v3  ;;  %4981 = vmatpush.bf16.msrb.mxu3 %v7814_v11  ;;  %4940 = vmatpush.bf16.msrb.mxu0 %v7414_v19 }
  0x42   :  { %v8037_v9 = vld [vmem:[%s16570_s1 + $0x8e0] sm:$0xf]  ;;  %v10478_v12 = vld [vmem:[%s16570_s1 + $0x8ec] sm:$0xf0]  ;;  %v7798_v28 = vor.u32 %v10418_v8, %v7797_v7  ;;  %4954 = vmatpush.bf16.msrb.mxu1 %v7542_v23 }
  0x43   :  { %v8165_v13 = vld [vmem:[%s16570_s1 + $0x9e0] sm:$0xf]  ;;  %v10510_v14 = vld [vmem:[%s16570_s1 + $0x9ec] sm:$0xf0]  ;;  %v8038_v29 = vor.u32 %v10478_v12, %v8037_v9  ;;  %4968 = vmatpush.bf16.msrb.mxu2 %v7670_v24 }
  0x44   :  { %v8293_v15 = vld [vmem:[%s16570_s1 + $0xae0] sm:$0xf]  ;;  %v10542_v16 = vld [vmem:[%s16570_s1 + $0xaec] sm:$0xf0]  ;;  %v8166_v33 = vor.u32 %v10510_v14, %v8165_v13 }
  0x45   :  { %v8421_v18 = vld [vmem:[%s16570_s1 + $0xbe0] sm:$0xf]  ;;  %v10574_v20 = vld [vmem:[%s16570_s1 + $0xbec] sm:$0xf0]  ;;  %v8294_v34 = vor.u32 %v10542_v16, %v8293_v15  ;;  %4982 = vmatpush.bf16.msrb.mxu3 %v7798_v28  ;;  %4989 = vmatpush.bf16.msra.mxu0 %v8038_v29 }
  0x46   :  { %v6817_v21 = vld [vmem:[%s16571_s0 + $0x10] sm:$0xf]  ;;  %v6827_v32 = vld [vmem:[%s16571_s0 + $0x7c] sm:$0xf0]  ;;  %v8422_v38 = vor.u32 %v10574_v20, %v8421_v18  ;;  %5003 = vmatpush.bf16.msra.mxu1 %v8166_v33  ;;  %4969 = vmatmul.bf16.vlgmr.msrb.gmra.mxu2 %v11538_v43 }
  0x47   :  { %v8021_v35 = vld [vmem:[%s16570_s1 + $0x8c0] sm:$0xf]  ;;  %v10474_v36 = vld [vmem:[%s16570_s1 + $0x8cc] sm:$0xf0]  ;;  %v11527_v39 = vor.u32 %v10181_v22, %v6817_v21  ;;  %v11548_v47 = vor.u32 %v10170_v31, %v6827_v32  ;;  %5017 = vmatpush.bf16.msra.mxu2 %v8294_v34  ;;  %4955 = vmatmul.bf16.vlgmr.msrb.gmra.mxu1 %v11540_v44 }
  0x48   :  { %v8149_v37 = vld [vmem:[%s16570_s1 + $0x9c0] sm:$0xf]  ;;  %v10506_v40 = vld [vmem:[%s16570_s1 + $0x9cc] sm:$0xf0]  ;;  %v8022_v48 = vor.u32 %v10474_v36, %v8021_v35 }
  0x49   :  { %v8277_v41 = vld [vmem:[%s16570_s1 + $0xac0] sm:$0xf]  ;;  %v10538_v42 = vld [vmem:[%s16570_s1 + $0xacc] sm:$0xf0]  ;;  %v8150_v49 = vor.u32 %v10506_v40, %v8149_v37  ;;  %5031 = vmatpush.bf16.msra.mxu3 %v8422_v38  ;;  %4941 = vmatmul.bf16.vlgmr.msrb.gmra.mxu0 %v11527_v39 }
  0x4a   :  { %v8405_v45 = vld [vmem:[%s16570_s1 + $0xbc0] sm:$0xf]  ;;  %v10570_v46 = vld [vmem:[%s16570_s1 + $0xbcc] sm:$0xf0]  ;;  %v8278_v50 = vor.u32 %v10538_v42, %v8277_v41  ;;  %4983 = vmatmul.bf16.vlgmr.msrb.gmra.mxu3 %v11548_v47  ;;  %4990 = vmatpush.bf16.msra.mxu0 %v8022_v48 }
  0x4b   :  { %v8005_v51 = vld [vmem:[%s16570_s1 + $0x8a0] sm:$0xf]  ;;  %v10470_v52 = vld [vmem:[%s16570_s1 + $0x8ac] sm:$0xf0]  ;;  %v8406_v54 = vor.u32 %v10570_v46, %v8405_v45  ;;  %5004 = vmatpush.bf16.msra.mxu1 %v8150_v49 }
  0x4c   :  { %v8133_v53 = vld [vmem:[%s16570_s1 + $0x9a0] sm:$0xf]  ;;  %v10502_v55 = vld [vmem:[%s16570_s1 + $0x9ac] sm:$0xf0]  ;;  %v8006_v61 = vor.u32 %v10470_v52, %v8005_v51  ;;  %5018 = vmatpush.bf16.msra.mxu2 %v8278_v50 }
  0x4d   :  { %v8261_v56 = vld [vmem:[%s16570_s1 + $0xaa0] sm:$0xf]  ;;  %v10534_v57 = vld [vmem:[%s16570_s1 + $0xaac] sm:$0xf0]  ;;  %v8134_v62 = vor.u32 %v10502_v55, %v8133_v53  ;;  %5032 = vmatpush.bf16.msra.mxu3 %v8406_v54 }
  0x4e   :  { %v8389_v59 = vld [vmem:[%s16570_s1 + $0xba0] sm:$0xf]  ;;  %v10566_v60 = vld [vmem:[%s16570_s1 + $0xbac] sm:$0xf0]  ;;  %v8262_v63 = vor.u32 %v10534_v57, %v8261_v56  ;;  %4991 = vmatpush.bf16.msra.mxu0 %v8006_v61 }
  0x4f   :  { %v7989_v0 = vld [vmem:[%s16570_s1 + $0x880] sm:$0xf]  ;;  %v10466_v2 = vld [vmem:[%s16570_s1 + $0x88c] sm:$0xf0]  ;;  %v8390_v4 = vor.u32 %v10566_v60, %v8389_v59  ;;  %5005 = vmatpush.bf16.msra.mxu1 %v8134_v62 }
  0x50   :  { %v8117_v3 = vld [vmem:[%s16570_s1 + $0x980] sm:$0xf]  ;;  %v10498_v5 = vld [vmem:[%s16570_s1 + $0x98c] sm:$0xf0]  ;;  %v7990_v11 = vor.u32 %v10466_v2, %v7989_v0  ;;  %5019 = vmatpush.bf16.msra.mxu2 %v8262_v63 }
  0x51   :  { %v8245_v6 = vld [vmem:[%s16570_s1 + $0xa80] sm:$0xf]  ;;  %v10530_v7 = vld [vmem:[%s16570_s1 + $0xa8c] sm:$0xf0]  ;;  %v8118_v12 = vor.u32 %v10498_v5, %v8117_v3  ;;  %5033 = vmatpush.bf16.msra.mxu3 %v8390_v4 }
  0x52   :  { %v8373_v8 = vld [vmem:[%s16570_s1 + $0xb80] sm:$0xf]  ;;  %v10562_v9 = vld [vmem:[%s16570_s1 + $0xb8c] sm:$0xf0]  ;;  %v8246_v13 = vor.u32 %v10530_v7, %v8245_v6  ;;  %4992 = vmatpush.bf16.msra.mxu0 %v7990_v11 }
  0x53   :  { %v7973_v14 = vld [vmem:[%s16570_s1 + $0x860] sm:$0xf]  ;;  %v10462_v15 = vld [vmem:[%s16570_s1 + $0x86c] sm:$0xf0]  ;;  %v8374_v18 = vor.u32 %v10562_v9, %v8373_v8  ;;  %5006 = vmatpush.bf16.msra.mxu1 %v8118_v12 }
  0x54   :  { %v8101_v16 = vld [vmem:[%s16570_s1 + $0x960] sm:$0xf]  ;;  %v10494_v19 = vld [vmem:[%s16570_s1 + $0x96c] sm:$0xf0]  ;;  %v7974_v24 = vor.u32 %v10462_v15, %v7973_v14  ;;  %5020 = vmatpush.bf16.msra.mxu2 %v8246_v13  ;;  %v10183_v13 = vld [vmem:[%s16571_s0 + $0x80] sm:$0xf0] }
  0x55   :  { %v8229_v20 = vld [vmem:[%s16570_s1 + $0xa60] sm:$0xf]  ;;  %v10526_v21 = vld [vmem:[%s16570_s1 + $0xa6c] sm:$0xf0]  ;;  %v8102_v25 = vor.u32 %v10494_v19, %v8101_v16  ;;  %5034 = vmatpush.bf16.msra.mxu3 %v8374_v18  ;;  %v6841_v16 = vld [vmem:[%s16571_s0 + $0x28] sm:$0xf] }
  0x56   :  { %v8357_v22 = vld [vmem:[%s16570_s1 + $0xb60] sm:$0xf]  ;;  %v10558_v23 = vld [vmem:[%s16570_s1 + $0xb6c] sm:$0xf0]  ;;  %v8230_v26 = vor.u32 %v10526_v21, %v8229_v20  ;;  %4993 = vmatpush.bf16.msra.mxu0 %v7974_v24  ;;  %v10184_v18 = vld [vmem:[%s16571_s0 + $0x88] sm:$0xf0] }
  0x57   :  { %v7957_v27 = vld [vmem:[%s16570_s1 + $0x840] sm:$0xf]  ;;  %v10458_v28 = vld [vmem:[%s16570_s1 + $0x84c] sm:$0xf0]  ;;  %v8358_v30 = vor.u32 %v10558_v23, %v8357_v22  ;;  %5007 = vmatpush.bf16.msra.mxu1 %v8102_v25  ;;  %v10171_v19 = vld [vmem:[%s16571_s0 + $0x24] sm:$0xf] }
  0x58   :  { %v8085_v29 = vld [vmem:[%s16570_s1 + $0x940] sm:$0xf]  ;;  %v10490_v31 = vld [vmem:[%s16570_s1 + $0x94c] sm:$0xf0]  ;;  %v7958_v36 = vor.u32 %v10458_v28, %v7957_v27  ;;  %5021 = vmatpush.bf16.msra.mxu2 %v8230_v26  ;;  %v6835_v22 = vld [vmem:[%s16571_s0 + $0x84] sm:$0xf0] }
  0x59   :  { %v8213_v32 = vld [vmem:[%s16570_s1 + $0xa40] sm:$0xf]  ;;  %v10522_v33 = vld [vmem:[%s16570_s1 + $0xa4c] sm:$0xf0]  ;;  %v8086_v38 = vor.u32 %v10490_v31, %v8085_v29  ;;  %5035 = vmatpush.bf16.msra.mxu3 %v8358_v30  ;;  %v10172_v23 = vld [vmem:[%s16571_s0 + $0x2c] sm:$0xf] }
  0x5a   :  { %v8341_v34 = vld [vmem:[%s16570_s1 + $0xb40] sm:$0xf]  ;;  %v10554_v35 = vld [vmem:[%s16570_s1 + $0xb4c] sm:$0xf0]  ;;  %v8214_v40 = vor.u32 %v10522_v33, %v8213_v32  ;;  %4994 = vmatpush.bf16.msra.mxu0 %v7958_v36  ;;  %v11768_v36 = vor.u32 %v10171_v19, %v6835_v22 }
  0x5b   :  { %v7941_v37 = vld [vmem:[%s16570_s1 + $0x820] sm:$0xf]  ;;  %v10454_v41 = vld [vmem:[%s16570_s1 + $0x82c] sm:$0xf0]  ;;  %v8342_v46 = vor.u32 %v10554_v35, %v8341_v34  ;;  %5008 = vmatpush.bf16.msra.mxu1 %v8086_v38  ;;  %v11766_v35 = vor.u32 %v10184_v18, %v6841_v16 }
  0x5c   :  { %v8069_v42 = vld [vmem:[%s16570_s1 + $0x920] sm:$0xf]  ;;  %v10486_v45 = vld [vmem:[%s16570_s1 + $0x92c] sm:$0xf0]  ;;  %v7942_v54 = vor.u32 %v10454_v41, %v7941_v37  ;;  %5022 = vmatpush.bf16.msra.mxu2 %v8214_v40  ;;  %16587 = vst [vmem:[#allocation4_spill] sm:$0xff] %v11768_v36 }
  0x5d   :  { %v8197_v48 = vld [vmem:[%s16570_s1 + $0xa20] sm:$0xf]  ;;  %v10518_v49 = vld [vmem:[%s16570_s1 + $0xa2c] sm:$0xf0]  ;;  %v8070_v60 = vor.u32 %v10486_v45, %v8069_v42  ;;  %5036 = vmatpush.bf16.msra.mxu3 %v8342_v46  ;;  %16586 = vst [vmem:[#allocation3_spill] sm:$0xff] %v11766_v35 }
  0x5e   :  { %v8325_v50 = vld [vmem:[%s16570_s1 + $0xb20] sm:$0xf]  ;;  %v10550_v51 = vld [vmem:[%s16570_s1 + $0xb2c] sm:$0xf0]  ;;  %v8198_v61 = vor.u32 %v10518_v49, %v8197_v48  ;;  %4995 = vmatpush.bf16.msra.mxu0 %v7942_v54 }
  0x5f   :  { %v7925_v52 = vld [vmem:[%s16570_s1 + $0x800] sm:$0xf]  ;;  %v10450_v53 = vld [vmem:[%s16570_s1 + $0x80c] sm:$0xf0]  ;;  %v8326_v2 = vor.u32 %v10550_v51, %v8325_v50  ;;  %5009 = vmatpush.bf16.msra.mxu1 %v8070_v60 }
  0x60   :  { %v8053_v55 = vld [vmem:[%s16570_s1 + $0x900] sm:$0xf]  ;;  %v10482_v56 = vld [vmem:[%s16570_s1 + $0x90c] sm:$0xf0]  ;;  %v7926_v9 = vor.u32 %v10450_v53, %v7925_v52  ;;  %5023 = vmatpush.bf16.msra.mxu2 %v8198_v61 }
  0x61   :  { %v8181_v57 = vld [vmem:[%s16570_s1 + $0xa00] sm:$0xf]  ;;  %v10514_v59 = vld [vmem:[%s16570_s1 + $0xa0c] sm:$0xf0]  ;;  %v8054_v14 = vor.u32 %v10482_v56, %v8053_v55  ;;  %5037 = vmatpush.bf16.msra.mxu3 %v8326_v2 }
  0x62   :  { %v8309_v62 = vld [vmem:[%s16570_s1 + $0xb00] sm:$0xf]  ;;  %v10546_v63 = vld [vmem:[%s16570_s1 + $0xb0c] sm:$0xf0]  ;;  %v8182_v15 = vor.u32 %v10514_v59, %v8181_v57  ;;  %4996 = vmatpush.bf16.msra.mxu0 %v7926_v9 }
  0x63   :  { %v8549_v0 = vld [vmem:[%s16570_s1 + $0xce0] sm:$0xf]  ;;  %v10606_v3 = vld [vmem:[%s16570_s1 + $0xcec] sm:$0xf0]  ;;  %v8310_v20 = vor.u32 %v10546_v63, %v8309_v62  ;;  %5010 = vmatpush.bf16.msra.mxu1 %v8054_v14 }
  0x64   :  { %v8677_v4 = vld [vmem:[%s16570_s1 + $0xde0] sm:$0xf]  ;;  %v10638_v5 = vld [vmem:[%s16570_s1 + $0xdec] sm:$0xf0]  ;;  %v8550_v21 = vor.u32 %v10606_v3, %v8549_v0  ;;  %5024 = vmatpush.bf16.msra.mxu2 %v8182_v15 }
  0x65   :  { %v8805_v6 = vld [vmem:[%s16570_s1 + $0xee0] sm:$0xf]  ;;  %v10670_v7 = vld [vmem:[%s16570_s1 + $0xeec] sm:$0xf0]  ;;  %v8678_v25 = vor.u32 %v10638_v5, %v8677_v4  ;;  %5038 = vmatpush.bf16.msra.mxu3 %v8310_v20 }
  0x66   :  { %v8933_v8 = vld [vmem:[%s16570_s1 + $0xfe0] sm:$0xf]  ;;  %v10702_v11 = vld [vmem:[%s16570_s1 + $0xfec] sm:$0xf0]  ;;  %v8806_v26 = vor.u32 %v10670_v7, %v8805_v6  ;;  %5045 = vmatpush.bf16.msrb.mxu0 %v8550_v21  ;;  %5011 = vmatmul.bf16.vlgmr.msra.gmra.mxu1 %v11768_v36 }
  0x67   :  { %v6833_v12 = vld [vmem:[%s16571_s0 + $0x20] sm:$0xf]  ;;  %v6843_v24 = vld [vmem:[%s16571_s0 + $0x8c] sm:$0xf0]  ;;  %v8934_v30 = vor.u32 %v10702_v11, %v8933_v8  ;;  %5059 = vmatpush.bf16.msrb.mxu1 %v8678_v25  ;;  %5025 = vmatmul.bf16.vlgmr.msra.gmra.mxu2 %v11766_v35 }
  0x68   :  { %v8533_v27 = vld [vmem:[%s16570_s1 + $0xcc0] sm:$0xf]  ;;  %v10602_v28 = vld [vmem:[%s16570_s1 + $0xccc] sm:$0xf0]  ;;  %v11755_v31 = vor.u32 %v10183_v13, %v6833_v12  ;;  %v11776_v40 = vor.u32 %v10172_v23, %v6843_v24  ;;  %5073 = vmatpush.bf16.msrb.mxu2 %v8806_v26 }
  0x69   :  { %v8661_v29 = vld [vmem:[%s16570_s1 + $0xdc0] sm:$0xf]  ;;  %v10634_v32 = vld [vmem:[%s16570_s1 + $0xdcc] sm:$0xf0]  ;;  %v8534_v41 = vor.u32 %v10602_v28, %v8533_v27  ;;  %5087 = vmatpush.bf16.msrb.mxu3 %v8934_v30 }
  0x6a   :  { %16585 = vst [vmem:[#allocation2_spill] sm:$0xff] %v11755_v31  ;;  %v8789_v33 = vld [vmem:[%s16570_s1 + $0xec0] sm:$0xf]  ;;  %v10666_v34 = vld [vmem:[%s16570_s1 + $0xecc] sm:$0xf0]  ;;  %v8662_v42 = vor.u32 %v10634_v32, %v8661_v29  ;;  %4997 = vmatmul.bf16.vlgmr.msra.gmra.mxu0 %v11755_v31  ;;  %5039 = vmatmul.bf16.vlgmr.msra.gmra.mxu3 %v11776_v40 }
  0x6b   :  { %v8917_v37 = vld [vmem:[%s16570_s1 + $0xfc0] sm:$0xf]  ;;  %v10698_v38 = vld [vmem:[%s16570_s1 + $0xfcc] sm:$0xf0]  ;;  %v8790_v45 = vor.u32 %v10666_v34, %v8789_v33  ;;  %5046 = vmatpush.bf16.msrb.mxu0 %v8534_v41 }
  0x6c   :  { %v8517_v46 = vld [vmem:[%s16570_s1 + $0xca0] sm:$0xf]  ;;  %v10598_v48 = vld [vmem:[%s16570_s1 + $0xcac] sm:$0xf0]  ;;  %v8918_v50 = vor.u32 %v10698_v38, %v8917_v37  ;;  %5060 = vmatpush.bf16.msrb.mxu1 %v8662_v42 }
  0x6d   :  { %v8645_v49 = vld [vmem:[%s16570_s1 + $0xda0] sm:$0xf]  ;;  %v10630_v51 = vld [vmem:[%s16570_s1 + $0xdac] sm:$0xf0]  ;;  %v8518_v56 = vor.u32 %v10598_v48, %v8517_v46  ;;  %5074 = vmatpush.bf16.msrb.mxu2 %v8790_v45 }
  0x6e   :  { %v8773_v52 = vld [vmem:[%s16570_s1 + $0xea0] sm:$0xf]  ;;  %v10662_v53 = vld [vmem:[%s16570_s1 + $0xeac] sm:$0xf0]  ;;  %v8646_v57 = vor.u32 %v10630_v51, %v8645_v49  ;;  %5088 = vmatpush.bf16.msrb.mxu3 %v8918_v50 }
  0x6f   :  { %v8901_v54 = vld [vmem:[%s16570_s1 + $0xfa0] sm:$0xf]  ;;  %v10694_v55 = vld [vmem:[%s16570_s1 + $0xfac] sm:$0xf0]  ;;  %v8774_v59 = vor.u32 %v10662_v53, %v8773_v52  ;;  %5047 = vmatpush.bf16.msrb.mxu0 %v8518_v56 }
  0x70   :  { %v8501_v60 = vld [vmem:[%s16570_s1 + $0xc80] sm:$0xf]  ;;  %v10594_v61 = vld [vmem:[%s16570_s1 + $0xc8c] sm:$0xf0]  ;;  %v8902_v63 = vor.u32 %v10694_v55, %v8901_v54  ;;  %5061 = vmatpush.bf16.msrb.mxu1 %v8646_v57 }
  0x71   :  { %v8629_v62 = vld [vmem:[%s16570_s1 + $0xd80] sm:$0xf]  ;;  %v10626_v0 = vld [vmem:[%s16570_s1 + $0xd8c] sm:$0xf0]  ;;  %v8502_v6 = vor.u32 %v10594_v61, %v8501_v60  ;;  %5075 = vmatpush.bf16.msrb.mxu2 %v8774_v59 }
  0x72   :  { %v8757_v2 = vld [vmem:[%s16570_s1 + $0xe80] sm:$0xf]  ;;  %v10658_v3 = vld [vmem:[%s16570_s1 + $0xe8c] sm:$0xf0]  ;;  %v8630_v7 = vor.u32 %v10626_v0, %v8629_v62  ;;  %5089 = vmatpush.bf16.msrb.mxu3 %v8902_v63 }
  0x73   :  { %v8885_v4 = vld [vmem:[%s16570_s1 + $0xf80] sm:$0xf]  ;;  %v10690_v5 = vld [vmem:[%s16570_s1 + $0xf8c] sm:$0xf0]  ;;  %v8758_v8 = vor.u32 %v10658_v3, %v8757_v2  ;;  %5048 = vmatpush.bf16.msrb.mxu0 %v8502_v6 }
  0x74   :  { %v8485_v9 = vld [vmem:[%s16570_s1 + $0xc60] sm:$0xf]  ;;  %v10590_v11 = vld [vmem:[%s16570_s1 + $0xc6c] sm:$0xf0]  ;;  %v8886_v13 = vor.u32 %v10690_v5, %v8885_v4  ;;  %5062 = vmatpush.bf16.msrb.mxu1 %v8630_v7 }
  0x75   :  { %v8613_v12 = vld [vmem:[%s16570_s1 + $0xd60] sm:$0xf]  ;;  %v10622_v14 = vld [vmem:[%s16570_s1 + $0xd6c] sm:$0xf0]  ;;  %v8486_v20 = vor.u32 %v10590_v11, %v8485_v9  ;;  %5076 = vmatpush.bf16.msrb.mxu2 %v8758_v8 }
  0x76   :  { %v8741_v15 = vld [vmem:[%s16570_s1 + $0xe60] sm:$0xf]  ;;  %v10654_v16 = vld [vmem:[%s16570_s1 + $0xe6c] sm:$0xf0]  ;;  %v8614_v21 = vor.u32 %v10622_v14, %v8613_v12  ;;  %5090 = vmatpush.bf16.msrb.mxu3 %v8886_v13  ;;  %v10185_v13 = vld [vmem:[%s16571_s0 + $0x90] sm:$0xf0] }
  0x77   :  { %v8869_v18 = vld [vmem:[%s16570_s1 + $0xf60] sm:$0xf]  ;;  %v10686_v19 = vld [vmem:[%s16570_s1 + $0xf6c] sm:$0xf0]  ;;  %v8742_v22 = vor.u32 %v10654_v16, %v8741_v15  ;;  %5049 = vmatpush.bf16.msrb.mxu0 %v8486_v20  ;;  %v6857_v16 = vld [vmem:[%s16571_s0 + $0x38] sm:$0xf] }
  0x78   :  { %v8469_v23 = vld [vmem:[%s16570_s1 + $0xc40] sm:$0xf]  ;;  %v10586_v24 = vld [vmem:[%s16570_s1 + $0xc4c] sm:$0xf0]  ;;  %v8870_v26 = vor.u32 %v10686_v19, %v8869_v18  ;;  %5063 = vmatpush.bf16.msrb.mxu1 %v8614_v21  ;;  %v10186_v18 = vld [vmem:[%s16571_s0 + $0x98] sm:$0xf0] }
  0x79   :  { %v8597_v25 = vld [vmem:[%s16570_s1 + $0xd40] sm:$0xf]  ;;  %v10618_v27 = vld [vmem:[%s16570_s1 + $0xd4c] sm:$0xf0]  ;;  %v8470_v33 = vor.u32 %v10586_v24, %v8469_v23  ;;  %5077 = vmatpush.bf16.msrb.mxu2 %v8742_v22  ;;  %v10173_v19 = vld [vmem:[%s16571_s0 + $0x34] sm:$0xf] }
  0x7a   :  { %v8725_v28 = vld [vmem:[%s16570_s1 + $0xe40] sm:$0xf]  ;;  %v10650_v29 = vld [vmem:[%s16570_s1 + $0xe4c] sm:$0xf0]  ;;  %v8598_v37 = vor.u32 %v10618_v27, %v8597_v25  ;;  %5091 = vmatpush.bf16.msrb.mxu3 %v8870_v26  ;;  %v6851_v22 = vld [vmem:[%s16571_s0 + $0x94] sm:$0xf0] }
  0x7b   :  { %v8853_v30 = vld [vmem:[%s16570_s1 + $0xf40] sm:$0xf]  ;;  %v10682_v32 = vld [vmem:[%s16570_s1 + $0xf4c] sm:$0xf0]  ;;  %v8726_v38 = vor.u32 %v10650_v29, %v8725_v28  ;;  %5050 = vmatpush.bf16.msrb.mxu0 %v8470_v33  ;;  %v10174_v23 = vld [vmem:[%s16571_s0 + $0x3c] sm:$0xf] }
  0x7c   :  { %v8453_v34 = vld [vmem:[%s16570_s1 + $0xc20] sm:$0xf]  ;;  %v10582_v41 = vld [vmem:[%s16570_s1 + $0xc2c] sm:$0xf0]  ;;  %v8854_v46 = vor.u32 %v10682_v32, %v8853_v30  ;;  %5064 = vmatpush.bf16.msrb.mxu1 %v8598_v37 }
  0x7d   :  { %v8581_v42 = vld [vmem:[%s16570_s1 + $0xd20] sm:$0xf]  ;;  %v10614_v45 = vld [vmem:[%s16570_s1 + $0xd2c] sm:$0xf0]  ;;  %v8454_v54 = vor.u32 %v10582_v41, %v8453_v34  ;;  %5078 = vmatpush.bf16.msrb.mxu2 %v8726_v38  ;;  %v11994_v38 = vor.u32 %v10186_v18, %v6857_v16  ;;  %v11996_v41 = vor.u32 %v10173_v19, %v6851_v22 }
  0x7e   :  { %v8709_v48 = vld [vmem:[%s16570_s1 + $0xe20] sm:$0xf]  ;;  %v10646_v49 = vld [vmem:[%s16570_s1 + $0xe2c] sm:$0xf0]  ;;  %v8582_v60 = vor.u32 %v10614_v45, %v8581_v42  ;;  %5092 = vmatpush.bf16.msrb.mxu3 %v8854_v46 }
  0x7f   :  { %v8837_v50 = vld [vmem:[%s16570_s1 + $0xf20] sm:$0xf]  ;;  %v10678_v51 = vld [vmem:[%s16570_s1 + $0xf2c] sm:$0xf0]  ;;  %v8710_v61 = vor.u32 %v10646_v49, %v8709_v48  ;;  %5051 = vmatpush.bf16.msrb.mxu0 %v8454_v54  ;;  %16589 = vst [vmem:[#allocation6_spill] sm:$0xff] %v11994_v38 }
  0x80   :  { %v8437_v52 = vld [vmem:[%s16570_s1 + $0xc00] sm:$0xf]  ;;  %v10578_v53 = vld [vmem:[%s16570_s1 + $0xc0c] sm:$0xf0]  ;;  %v8838_v2 = vor.u32 %v10678_v51, %v8837_v50  ;;  %5065 = vmatpush.bf16.msrb.mxu1 %v8582_v60  ;;  %16590 = vst [vmem:[#allocation7_spill] sm:$0xff] %v11996_v41 }
  0x81   :  { %v8565_v55 = vld [vmem:[%s16570_s1 + $0xd00] sm:$0xf]  ;;  %v10610_v56 = vld [vmem:[%s16570_s1 + $0xd0c] sm:$0xf0]  ;;  %v8438_v9 = vor.u32 %v10578_v53, %v8437_v52  ;;  %5079 = vmatpush.bf16.msrb.mxu2 %v8710_v61 }
  0x82   :  { %v8693_v57 = vld [vmem:[%s16570_s1 + $0xe00] sm:$0xf]  ;;  %v10642_v59 = vld [vmem:[%s16570_s1 + $0xe0c] sm:$0xf0]  ;;  %v8566_v14 = vor.u32 %v10610_v56, %v8565_v55  ;;  %5093 = vmatpush.bf16.msrb.mxu3 %v8838_v2 }
  0x83   :  { %v8821_v62 = vld [vmem:[%s16570_s1 + $0xf00] sm:$0xf]  ;;  %v10674_v63 = vld [vmem:[%s16570_s1 + $0xf0c] sm:$0xf0]  ;;  %v8694_v15 = vor.u32 %v10642_v59, %v8693_v57  ;;  %5052 = vmatpush.bf16.msrb.mxu0 %v8438_v9 }
  0x84   :  { %v9061_v0 = vld [vmem:[%s16570_s1 + $0x10e0] sm:$0xf]  ;;  %v10734_v3 = vld [vmem:[%s16570_s1 + $0x10ec] sm:$0xf0]  ;;  %v8822_v20 = vor.u32 %v10674_v63, %v8821_v62  ;;  %5066 = vmatpush.bf16.msrb.mxu1 %v8566_v14 }
  0x85   :  { %v9189_v4 = vld [vmem:[%s16570_s1 + $0x11e0] sm:$0xf]  ;;  %v10766_v5 = vld [vmem:[%s16570_s1 + $0x11ec] sm:$0xf0]  ;;  %v9062_v21 = vor.u32 %v10734_v3, %v9061_v0  ;;  %5080 = vmatpush.bf16.msrb.mxu2 %v8694_v15 }
  0x86   :  { %v9317_v6 = vld [vmem:[%s16570_s1 + $0x12e0] sm:$0xf]  ;;  %v10798_v7 = vld [vmem:[%s16570_s1 + $0x12ec] sm:$0xf0]  ;;  %v9190_v25 = vor.u32 %v10766_v5, %v9189_v4  ;;  %5094 = vmatpush.bf16.msrb.mxu3 %v8822_v20 }
  0x87   :  { %v9445_v8 = vld [vmem:[%s16570_s1 + $0x13e0] sm:$0xf]  ;;  %v10830_v11 = vld [vmem:[%s16570_s1 + $0x13ec] sm:$0xf0]  ;;  %v9318_v26 = vor.u32 %v10798_v7, %v9317_v6  ;;  %5101 = vmatpush.bf16.msra.mxu0 %v9062_v21  ;;  %5067 = vmatmul.bf16.vlgmr.msrb.gmra.mxu1 %v11996_v41 }
  0x88   :  { %v6849_v12 = vld [vmem:[%s16571_s0 + $0x30] sm:$0xf]  ;;  %v6859_v24 = vld [vmem:[%s16571_s0 + $0x9c] sm:$0xf0]  ;;  %v9446_v30 = vor.u32 %v10830_v11, %v9445_v8  ;;  %5115 = vmatpush.bf16.msra.mxu1 %v9190_v25  ;;  %5081 = vmatmul.bf16.vlgmr.msrb.gmra.mxu2 %v11994_v38 }
  0x89   :  { %v9045_v27 = vld [vmem:[%s16570_s1 + $0x10c0] sm:$0xf]  ;;  %v10730_v28 = vld [vmem:[%s16570_s1 + $0x10cc] sm:$0xf0]  ;;  %v11983_v32 = vor.u32 %v10185_v13, %v6849_v12  ;;  %v12004_v46 = vor.u32 %v10174_v23, %v6859_v24  ;;  %5129 = vmatpush.bf16.msra.mxu2 %v9318_v26 }
  0x8a   :  { %v9173_v29 = vld [vmem:[%s16570_s1 + $0x11c0] sm:$0xf]  ;;  %v10762_v33 = vld [vmem:[%s16570_s1 + $0x11cc] sm:$0xf0]  ;;  %v9046_v48 = vor.u32 %v10730_v28, %v9045_v27  ;;  %5143 = vmatpush.bf16.msra.mxu3 %v9446_v30 }
  0x8b   :  { %16588 = vst [vmem:[#allocation5_spill] sm:$0xff] %v11983_v32  ;;  %v9301_v34 = vld [vmem:[%s16570_s1 + $0x12c0] sm:$0xf]  ;;  %v10794_v37 = vld [vmem:[%s16570_s1 + $0x12cc] sm:$0xf0]  ;;  %v9174_v49 = vor.u32 %v10762_v33, %v9173_v29  ;;  %5053 = vmatmul.bf16.vlgmr.msrb.gmra.mxu0 %v11983_v32  ;;  %5095 = vmatmul.bf16.vlgmr.msrb.gmra.mxu3 %v12004_v46 }
  0x8c   :  { %v9429_v42 = vld [vmem:[%s16570_s1 + $0x13c0] sm:$0xf]  ;;  %v10826_v45 = vld [vmem:[%s16570_s1 + $0x13cc] sm:$0xf0]  ;;  %16591 = vst [vmem:[#allocation8_spill] sm:$0xff] %v12004_v46  ;;  %v9302_v50 = vor.u32 %v10794_v37, %v9301_v34  ;;  %5102 = vmatpush.bf16.msra.mxu0 %v9046_v48 }
  0x8d   :  { %v9029_v51 = vld [vmem:[%s16570_s1 + $0x10a0] sm:$0xf]  ;;  %v10726_v52 = vld [vmem:[%s16570_s1 + $0x10ac] sm:$0xf0]  ;;  %v9430_v54 = vor.u32 %v10826_v45, %v9429_v42  ;;  %5116 = vmatpush.bf16.msra.mxu1 %v9174_v49 }
  0x8e   :  { %v9157_v53 = vld [vmem:[%s16570_s1 + $0x11a0] sm:$0xf]  ;;  %v10758_v55 = vld [vmem:[%s16570_s1 + $0x11ac] sm:$0xf0]  ;;  %v9030_v61 = vor.u32 %v10726_v52, %v9029_v51  ;;  %5130 = vmatpush.bf16.msra.mxu2 %v9302_v50 }
  0x8f   :  { %v9285_v56 = vld [vmem:[%s16570_s1 + $0x12a0] sm:$0xf]  ;;  %v10790_v57 = vld [vmem:[%s16570_s1 + $0x12ac] sm:$0xf0]  ;;  %v9158_v62 = vor.u32 %v10758_v55, %v9157_v53  ;;  %5144 = vmatpush.bf16.msra.mxu3 %v9430_v54 }
  0x90   :  { %v9413_v59 = vld [vmem:[%s16570_s1 + $0x13a0] sm:$0xf]  ;;  %v10822_v60 = vld [vmem:[%s16570_s1 + $0x13ac] sm:$0xf0]  ;;  %v9286_v63 = vor.u32 %v10790_v57, %v9285_v56  ;;  %5103 = vmatpush.bf16.msra.mxu0 %v9030_v61 }
  0x91   :  { %v9013_v0 = vld [vmem:[%s16570_s1 + $0x1080] sm:$0xf]  ;;  %v10722_v2 = vld [vmem:[%s16570_s1 + $0x108c] sm:$0xf0]  ;;  %v9414_v4 = vor.u32 %v10822_v60, %v9413_v59  ;;  %5117 = vmatpush.bf16.msra.mxu1 %v9158_v62 }
  0x92   :  { %v9141_v3 = vld [vmem:[%s16570_s1 + $0x1180] sm:$0xf]  ;;  %v10754_v5 = vld [vmem:[%s16570_s1 + $0x118c] sm:$0xf0]  ;;  %v9014_v11 = vor.u32 %v10722_v2, %v9013_v0  ;;  %5131 = vmatpush.bf16.msra.mxu2 %v9286_v63 }
  0x93   :  { %v9269_v6 = vld [vmem:[%s16570_s1 + $0x1280] sm:$0xf]  ;;  %v10786_v7 = vld [vmem:[%s16570_s1 + $0x128c] sm:$0xf0]  ;;  %v9142_v12 = vor.u32 %v10754_v5, %v9141_v3  ;;  %5145 = vmatpush.bf16.msra.mxu3 %v9414_v4 }
  0x94   :  { %v9397_v8 = vld [vmem:[%s16570_s1 + $0x1380] sm:$0xf]  ;;  %v10818_v9 = vld [vmem:[%s16570_s1 + $0x138c] sm:$0xf0]  ;;  %v9270_v13 = vor.u32 %v10786_v7, %v9269_v6  ;;  %5104 = vmatpush.bf16.msra.mxu0 %v9014_v11 }
  0x95   :  { %v8997_v14 = vld [vmem:[%s16570_s1 + $0x1060] sm:$0xf]  ;;  %v10718_v15 = vld [vmem:[%s16570_s1 + $0x106c] sm:$0xf0]  ;;  %v9398_v18 = vor.u32 %v10818_v9, %v9397_v8  ;;  %5118 = vmatpush.bf16.msra.mxu1 %v9142_v12 }
  0x96   :  { %v9125_v16 = vld [vmem:[%s16570_s1 + $0x1160] sm:$0xf]  ;;  %v10750_v19 = vld [vmem:[%s16570_s1 + $0x116c] sm:$0xf0]  ;;  %v8998_v24 = vor.u32 %v10718_v15, %v8997_v14  ;;  %5132 = vmatpush.bf16.msra.mxu2 %v9270_v13 }
  0x97   :  { %v9253_v20 = vld [vmem:[%s16570_s1 + $0x1260] sm:$0xf]  ;;  %v10782_v21 = vld [vmem:[%s16570_s1 + $0x126c] sm:$0xf0]  ;;  %v9126_v25 = vor.u32 %v10750_v19, %v9125_v16  ;;  %5146 = vmatpush.bf16.msra.mxu3 %v9398_v18 }
  0x98   :  { %v9381_v22 = vld [vmem:[%s16570_s1 + $0x1360] sm:$0xf]  ;;  %v10814_v23 = vld [vmem:[%s16570_s1 + $0x136c] sm:$0xf0]  ;;  %v9254_v26 = vor.u32 %v10782_v21, %v9253_v20  ;;  %5105 = vmatpush.bf16.msra.mxu0 %v8998_v24 }
  0x99   :  { %v8981_v27 = vld [vmem:[%s16570_s1 + $0x1040] sm:$0xf]  ;;  %v10714_v28 = vld [vmem:[%s16570_s1 + $0x104c] sm:$0xf0]  ;;  %v9382_v30 = vor.u32 %v10814_v23, %v9381_v22  ;;  %5119 = vmatpush.bf16.msra.mxu1 %v9126_v25  ;;  %v10187_v22 = vld [vmem:[%s16571_s0 + $0xa0] sm:$0xf0] }
  0x9a   :  { %v9109_v29 = vld [vmem:[%s16570_s1 + $0x1140] sm:$0xf]  ;;  %v10746_v33 = vld [vmem:[%s16570_s1 + $0x114c] sm:$0xf0]  ;;  %v8982_v48 = vor.u32 %v10714_v28, %v8981_v27  ;;  %5133 = vmatpush.bf16.msra.mxu2 %v9254_v26  ;;  %v6873_v25 = vld [vmem:[%s16571_s0 + $0x48] sm:$0xf] }
  0x9b   :  { %v9237_v34 = vld [vmem:[%s16570_s1 + $0x1240] sm:$0xf]  ;;  %v10778_v37 = vld [vmem:[%s16570_s1 + $0x124c] sm:$0xf0]  ;;  %v9110_v50 = vor.u32 %v10746_v33, %v9109_v29  ;;  %5147 = vmatpush.bf16.msra.mxu3 %v9382_v30  ;;  %v10188_v26 = vld [vmem:[%s16571_s0 + $0xa8] sm:$0xf0] }
  0x9c   :  { %v9365_v42 = vld [vmem:[%s16570_s1 + $0x1340] sm:$0xf]  ;;  %v10810_v45 = vld [vmem:[%s16570_s1 + $0x134c] sm:$0xf0]  ;;  %v9238_v51 = vor.u32 %v10778_v37, %v9237_v34  ;;  %5106 = vmatpush.bf16.msra.mxu0 %v8982_v48  ;;  %v10175_v27 = vld [vmem:[%s16571_s0 + $0x44] sm:$0xf] }
  0x9d   :  { %v8965_v49 = vld [vmem:[%s16570_s1 + $0x1020] sm:$0xf]  ;;  %v10710_v52 = vld [vmem:[%s16570_s1 + $0x102c] sm:$0xf0]  ;;  %v9366_v55 = vor.u32 %v10810_v45, %v9365_v42  ;;  %5120 = vmatpush.bf16.msra.mxu1 %v9110_v50  ;;  %v6867_v30 = vld [vmem:[%s16571_s0 + $0xa4] sm:$0xf0] }
  0x9e   :  { %v9093_v53 = vld [vmem:[%s16570_s1 + $0x1120] sm:$0xf]  ;;  %v10742_v54 = vld [vmem:[%s16570_s1 + $0x112c] sm:$0xf0]  ;;  %v8966_v63 = vor.u32 %v10710_v52, %v8965_v49  ;;  %5134 = vmatpush.bf16.msra.mxu2 %v9238_v51  ;;  %v10176_v33 = vld [vmem:[%s16571_s0 + $0x4c] sm:$0xf] }
  0x9f   :  { %v9221_v56 = vld [vmem:[%s16570_s1 + $0x1220] sm:$0xf]  ;;  %v10774_v57 = vld [vmem:[%s16570_s1 + $0x122c] sm:$0xf0]  ;;  %v9094_v5 = vor.u32 %v10742_v54, %v9093_v53  ;;  %5148 = vmatpush.bf16.msra.mxu3 %v9366_v55  ;;  %v12222_v55 = vor.u32 %v10188_v26, %v6873_v25 }
  0xa0   :  { %v9349_v59 = vld [vmem:[%s16570_s1 + $0x1320] sm:$0xf]  ;;  %v10806_v60 = vld [vmem:[%s16570_s1 + $0x132c] sm:$0xf0]  ;;  %v9222_v6 = vor.u32 %v10774_v57, %v9221_v56  ;;  %5107 = vmatpush.bf16.msra.mxu0 %v8966_v63  ;;  %v12224_v56 = vor.u32 %v10175_v27, %v6867_v30 }
  0xa1   :  { %v8949_v61 = vld [vmem:[%s16570_s1 + $0x1000] sm:$0xf]  ;;  %v10706_v62 = vld [vmem:[%s16570_s1 + $0x100c] sm:$0xf0]  ;;  %v9350_v11 = vor.u32 %v10806_v60, %v9349_v59  ;;  %5121 = vmatpush.bf16.msra.mxu1 %v9094_v5 }
  0xa2   :  { %v9077_v0 = vld [vmem:[%s16570_s1 + $0x1100] sm:$0xf]  ;;  %v10738_v2 = vld [vmem:[%s16570_s1 + $0x110c] sm:$0xf0]  ;;  %v8950_v19 = vor.u32 %v10706_v62, %v8949_v61  ;;  %5135 = vmatpush.bf16.msra.mxu2 %v9222_v6 }
  0xa3   :  { %v9205_v3 = vld [vmem:[%s16570_s1 + $0x1200] sm:$0xf]  ;;  %v10770_v4 = vld [vmem:[%s16570_s1 + $0x120c] sm:$0xf0]  ;;  %v9078_v23 = vor.u32 %v10738_v2, %v9077_v0  ;;  %5149 = vmatpush.bf16.msra.mxu3 %v9350_v11 }
  0xa4   :  { %v9333_v7 = vld [vmem:[%s16570_s1 + $0x1300] sm:$0xf]  ;;  %v10802_v8 = vld [vmem:[%s16570_s1 + $0x130c] sm:$0xf0]  ;;  %v9206_v24 = vor.u32 %v10770_v4, %v9205_v3  ;;  %5108 = vmatpush.bf16.msra.mxu0 %v8950_v19 }
  0xa5   :  { %v9573_v9 = vld [vmem:[%s16570_s1 + $0x14e0] sm:$0xf]  ;;  %v10862_v12 = vld [vmem:[%s16570_s1 + $0x14ec] sm:$0xf0]  ;;  %v9334_v28 = vor.u32 %v10802_v8, %v9333_v7  ;;  %5122 = vmatpush.bf16.msra.mxu1 %v9078_v23 }
  0xa6   :  { %v9701_v13 = vld [vmem:[%s16570_s1 + $0x15e0] sm:$0xf]  ;;  %v10894_v14 = vld [vmem:[%s16570_s1 + $0x15ec] sm:$0xf0]  ;;  %v9574_v29 = vor.u32 %v10862_v12, %v9573_v9  ;;  %5136 = vmatpush.bf16.msra.mxu2 %v9206_v24 }
  0xa7   :  { %v9829_v15 = vld [vmem:[%s16570_s1 + $0x16e0] sm:$0xf]  ;;  %v10926_v16 = vld [vmem:[%s16570_s1 + $0x16ec] sm:$0xf0]  ;;  %v9702_v37 = vor.u32 %v10894_v14, %v9701_v13  ;;  %5150 = vmatpush.bf16.msra.mxu3 %v9334_v28 }
  0xa8   :  { %v9957_v18 = vld [vmem:[%s16570_s1 + $0x17e0] sm:$0xf]  ;;  %v10958_v20 = vld [vmem:[%s16570_s1 + $0x17ec] sm:$0xf0]  ;;  %v9830_v42 = vor.u32 %v10926_v16, %v9829_v15  ;;  %5157 = vmatpush.bf16.msrb.mxu0 %v9574_v29  ;;  %5123 = vmatmul.bf16.vlgmr.msra.gmra.mxu1 %v12224_v56 }
  0xa9   :  { %v6865_v21 = vld [vmem:[%s16571_s0 + $0x40] sm:$0xf]  ;;  %v6875_v34 = vld [vmem:[%s16571_s0 + $0xac] sm:$0xf0]  ;;  %v9958_v50 = vor.u32 %v10958_v20, %v9957_v18  ;;  %5171 = vmatpush.bf16.msrb.mxu1 %v9702_v37  ;;  %5137 = vmatmul.bf16.vlgmr.msra.gmra.mxu2 %v12222_v55 }
  0xaa   :  { %v9557_v45 = vld [vmem:[%s16570_s1 + $0x14c0] sm:$0xf]  ;;  %v10858_v48 = vld [vmem:[%s16570_s1 + $0x14cc] sm:$0xf0]  ;;  %v12211_v51 = vor.u32 %v10187_v22, %v6865_v21  ;;  %v12232_v60 = vor.u32 %v10176_v33, %v6875_v34  ;;  %5185 = vmatpush.bf16.msrb.mxu2 %v9830_v42 }
  0xab   :  { %v9685_v49 = vld [vmem:[%s16570_s1 + $0x15c0] sm:$0xf]  ;;  %v10890_v52 = vld [vmem:[%s16570_s1 + $0x15cc] sm:$0xf0]  ;;  %v9558_v61 = vor.u32 %v10858_v48, %v9557_v45  ;;  %5199 = vmatpush.bf16.msrb.mxu3 %v9958_v50  ;;  %v4886_v48 = vpop.f32.mrf.mxu0 }
  0xac   :  { %v9813_v53 = vld [vmem:[%s16570_s1 + $0x16c0] sm:$0xf]  ;;  %v10922_v54 = vld [vmem:[%s16570_s1 + $0x16cc] sm:$0xf0]  ;;  %v9686_v62 = vor.u32 %v10890_v52, %v9685_v49  ;;  %5109 = vmatmul.bf16.vlgmr.msra.gmra.mxu0 %v12211_v51  ;;  %5151 = vmatmul.bf16.vlgmr.msra.gmra.mxu3 %v12232_v60  ;;  %v4900_v49 = vpop.f32.mrf.mxu1 }
  0xad   :  { %v9941_v57 = vld [vmem:[%s16570_s1 + $0x17c0] sm:$0xf]  ;;  %v10954_v59 = vld [vmem:[%s16570_s1 + $0x17cc] sm:$0xf0]  ;;  %v9814_v63 = vor.u32 %v10922_v54, %v9813_v53  ;;  %5158 = vmatpush.bf16.msrb.mxu0 %v9558_v61  ;;  %v4901_v52 = vadd.f32 %v4900_v49, %v4886_v48  ;;  %v10220_v49 = vld [vmem:[%s16570_s1 + $0xe4] sm:$0xf] }
  0xae   :  { %v9541_v0 = vld [vmem:[%s16570_s1 + $0x14a0] sm:$0xf]  ;;  %v10854_v2 = vld [vmem:[%s16570_s1 + $0x14ac] sm:$0xf0]  ;;  %v9942_v4 = vor.u32 %v10954_v59, %v9941_v57  ;;  %5172 = vmatpush.bf16.msrb.mxu1 %v9686_v62 }
  0xaf   :  { %v9669_v3 = vld [vmem:[%s16570_s1 + $0x15a0] sm:$0xf]  ;;  %v10886_v5 = vld [vmem:[%s16570_s1 + $0x15ac] sm:$0xf0]  ;;  %v9542_v11 = vor.u32 %v10854_v2, %v9541_v0  ;;  %5186 = vmatpush.bf16.msrb.mxu2 %v9814_v63 }
  0xb0   :  { %v9797_v6 = vld [vmem:[%s16570_s1 + $0x16a0] sm:$0xf]  ;;  %v10918_v7 = vld [vmem:[%s16570_s1 + $0x16ac] sm:$0xf0]  ;;  %v9670_v12 = vor.u32 %v10886_v5, %v9669_v3  ;;  %5200 = vmatpush.bf16.msrb.mxu3 %v9942_v4  ;;  %v4914_v3 = vpop.f32.mrf.mxu2 }
  0xb1   :  { %v9925_v8 = vld [vmem:[%s16570_s1 + $0x17a0] sm:$0xf]  ;;  %v10950_v9 = vld [vmem:[%s16570_s1 + $0x17ac] sm:$0xf0]  ;;  %v9798_v13 = vor.u32 %v10918_v7, %v9797_v6  ;;  %5159 = vmatpush.bf16.msrb.mxu0 %v9542_v11  ;;  %v4915_v6 = vadd.f32 %v4914_v3, %v4901_v52  ;;  %v10252_v52 = vld [vmem:[%s16570_s1 + $0x1e4] sm:$0xf] }
  0xb2   :  { %v9525_v14 = vld [vmem:[%s16570_s1 + $0x1480] sm:$0xf]  ;;  %v10850_v15 = vld [vmem:[%s16570_s1 + $0x148c] sm:$0xf0]  ;;  %v9926_v18 = vor.u32 %v10950_v9, %v9925_v8  ;;  %5173 = vmatpush.bf16.msrb.mxu1 %v9670_v12  ;;  %v10190_v3 = vld [vmem:[%s16571_s0 + $0xb8] sm:$0xf0] }
  0xb3   :  { %v9653_v16 = vld [vmem:[%s16570_s1 + $0x1580] sm:$0xf]  ;;  %v10882_v19 = vld [vmem:[%s16570_s1 + $0x158c] sm:$0xf0]  ;;  %v9526_v24 = vor.u32 %v10850_v15, %v9525_v14  ;;  %5187 = vmatpush.bf16.msrb.mxu2 %v9798_v13 }
  0xb4   :  { %v9781_v20 = vld [vmem:[%s16570_s1 + $0x1680] sm:$0xf]  ;;  %v10914_v21 = vld [vmem:[%s16570_s1 + $0x168c] sm:$0xf0]  ;;  %v9654_v25 = vor.u32 %v10882_v19, %v9653_v16  ;;  %5201 = vmatpush.bf16.msrb.mxu3 %v9926_v18 }
  0xb5   :  { %v9909_v22 = vld [vmem:[%s16570_s1 + $0x1780] sm:$0xf]  ;;  %v10946_v23 = vld [vmem:[%s16570_s1 + $0x178c] sm:$0xf0]  ;;  %v9782_v26 = vor.u32 %v10914_v21, %v9781_v20  ;;  %5160 = vmatpush.bf16.msrb.mxu0 %v9526_v24  ;;  %v4928_v20 = vpop.f32.mrf.mxu3 }
  0xb6   :  { %v9509_v27 = vld [vmem:[%s16570_s1 + $0x1460] sm:$0xf]  ;;  %v10846_v28 = vld [vmem:[%s16570_s1 + $0x146c] sm:$0xf0]  ;;  %v9910_v30 = vor.u32 %v10946_v23, %v9909_v22  ;;  %5174 = vmatpush.bf16.msrb.mxu1 %v9654_v25  ;;  %v12364_v24 = vadd.f32 %v4928_v20, %v4915_v6  ;;  %v6999_v20 = vld [vmem:[%s16570_s1 + $0xd0] sm:$0xf0] }
  0xb7   :  { %v9637_v29 = vld [vmem:[%s16570_s1 + $0x1560] sm:$0xf]  ;;  %v10878_v33 = vld [vmem:[%s16570_s1 + $0x156c] sm:$0xf0]  ;;  %v9510_v50 = vor.u32 %v10846_v28, %v9509_v27  ;;  %5188 = vmatpush.bf16.msrb.mxu2 %v9782_v26 }
  0xb8   :  { %v9765_v34 = vld [vmem:[%s16570_s1 + $0x1660] sm:$0xf]  ;;  %v10910_v37 = vld [vmem:[%s16570_s1 + $0x166c] sm:$0xf0]  ;;  %v9638_v53 = vor.u32 %v10878_v33, %v9637_v29  ;;  %5202 = vmatpush.bf16.msrb.mxu3 %v9910_v30 }
  0xb9   :  { %v9893_v42 = vld [vmem:[%s16570_s1 + $0x1760] sm:$0xf]  ;;  %v10942_v45 = vld [vmem:[%s16570_s1 + $0x176c] sm:$0xf0]  ;;  %v9766_v54 = vor.u32 %v10910_v37, %v9765_v34  ;;  %5161 = vmatpush.bf16.msrb.mxu0 %v9510_v50  ;;  %v7015_v50 = vld [vmem:[%s16570_s1 + $0xf0] sm:$0xf0] }
  0xba   :  { %v9493_v57 = vld [vmem:[%s16570_s1 + $0x1440] sm:$0xf]  ;;  %v10842_v59 = vld [vmem:[%s16570_s1 + $0x144c] sm:$0xf0]  ;;  %v9894_v62 = vor.u32 %v10942_v45, %v9893_v42  ;;  %5175 = vmatpush.bf16.msrb.mxu1 %v9638_v53  ;;  %v7143_v53 = vld [vmem:[%s16570_s1 + $0x1f0] sm:$0xf0] }
  0xbb   :  { %v9621_v61 = vld [vmem:[%s16570_s1 + $0x1540] sm:$0xf]  ;;  %v10874_v63 = vld [vmem:[%s16570_s1 + $0x154c] sm:$0xf0]  ;;  %v9494_v7 = vor.u32 %v10842_v59, %v9493_v57  ;;  %5189 = vmatpush.bf16.msrb.mxu2 %v9766_v54  ;;  %v10284_v54 = vld [vmem:[%s16570_s1 + $0x2e4] sm:$0xf] }
  0xbc   :  { %v9749_v0 = vld [vmem:[%s16570_s1 + $0x1640] sm:$0xf]  ;;  %v10906_v2 = vld [vmem:[%s16570_s1 + $0x164c] sm:$0xf0]  ;;  %v9622_v9 = vor.u32 %v10874_v63, %v9621_v61  ;;  %5203 = vmatpush.bf16.msrb.mxu3 %v9894_v62  ;;  %v7271_v59 = vld [vmem:[%s16570_s1 + $0x2f0] sm:$0xf0] }
  0xbd   :  { %v9877_v4 = vld [vmem:[%s16570_s1 + $0x1740] sm:$0xf]  ;;  %v10938_v5 = vld [vmem:[%s16570_s1 + $0x174c] sm:$0xf0]  ;;  %v9750_v11 = vor.u32 %v10906_v2, %v9749_v0  ;;  %5162 = vmatpush.bf16.msrb.mxu0 %v9494_v7  ;;  %v10189_v62 = vld [vmem:[%s16571_s0 + $0xb0] sm:$0xf0] }
  0xbe   :  { %v9477_v8 = vld [vmem:[%s16570_s1 + $0x1420] sm:$0xf]  ;;  %v10838_v12 = vld [vmem:[%s16570_s1 + $0x142c] sm:$0xf0]  ;;  %v9878_v15 = vor.u32 %v10938_v5, %v9877_v4  ;;  %5176 = vmatpush.bf16.msrb.mxu1 %v9622_v9  ;;  %v6889_v2 = vld [vmem:[%s16571_s0 + $0x58] sm:$0xf] }
  0xbf   :  { %v9605_v13 = vld [vmem:[%s16570_s1 + $0x1520] sm:$0xf]  ;;  %v10870_v14 = vld [vmem:[%s16570_s1 + $0x152c] sm:$0xf0]  ;;  %v9478_v25 = vor.u32 %v10838_v12, %v9477_v8  ;;  %5190 = vmatpush.bf16.msrb.mxu2 %v9750_v11  ;;  %v10177_v4 = vld [vmem:[%s16571_s0 + $0x54] sm:$0xf]  ;;  %v7018_v11 = vor.u32 %v10220_v49, %v7015_v50  ;;  %v7146_v12 = vor.u32 %v10252_v52, %v7143_v53 }
  0xc0   :  { %v9733_v16 = vld [vmem:[%s16570_s1 + $0x1620] sm:$0xf]  ;;  %v10902_v18 = vld [vmem:[%s16570_s1 + $0x162c] sm:$0xf0]  ;;  %v9606_v30 = vor.u32 %v10870_v14, %v9605_v13  ;;  %5204 = vmatpush.bf16.msrb.mxu3 %v9878_v15  ;;  %v6883_v7 = vld [vmem:[%s16571_s0 + $0xb4] sm:$0xf0]  ;;  %v12432_v13 = vpop.f32.mrf.mxu0 }
  0xc1   :  { %v9861_v19 = vld [vmem:[%s16570_s1 + $0x1720] sm:$0xf]  ;;  %v10934_v21 = vld [vmem:[%s16570_s1 + $0x172c] sm:$0xf0]  ;;  %v9734_v33 = vor.u32 %v10902_v18, %v9733_v16  ;;  %5163 = vmatpush.bf16.msrb.mxu0 %v9478_v25  ;;  %v10178_v8 = vld [vmem:[%s16571_s0 + $0x5c] sm:$0xf]  ;;  %v7274_v18 = vor.u32 %v10284_v54, %v7271_v59  ;;  %v12456_v25 = vor.u32 %v10177_v4, %v6883_v7  ;;  %v12496_v59 = vpop.f32.mrf.mxu2 }
  0xc2   :  { %v9461_v22 = vld [vmem:[%s16570_s1 + $0x1400] sm:$0xf]  ;;  %v10834_v23 = vld [vmem:[%s16570_s1 + $0x140c] sm:$0xf0]  ;;  %v9862_v45 = vor.u32 %v10934_v21, %v9861_v19  ;;  %5177 = vmatpush.bf16.msrb.mxu1 %v9606_v30  ;;  %v10216_v16 = vld [vmem:[%s16570_s1 + $0xc4] sm:$0xf] }
  0xc3   :  { %v9589_v26 = vld [vmem:[%s16570_s1 + $0x1500] sm:$0xf]  ;;  %v10866_v27 = vld [vmem:[%s16570_s1 + $0x150c] sm:$0xf0]  ;;  %v9462_v57 = vor.u32 %v10834_v23, %v9461_v22  ;;  %5191 = vmatpush.bf16.msrb.mxu2 %v9734_v33  ;;  %v10248_v21 = vld [vmem:[%s16570_s1 + $0x1c4] sm:$0xf]  ;;  %v12454_v23 = vor.u32 %v10190_v3, %v6889_v2  ;;  %v7002_v33 = vor.u32 %v10216_v16, %v6999_v20 }
  0xc4   :  { %v9717_v28 = vld [vmem:[%s16570_s1 + $0x1600] sm:$0xf]  ;;  %v10898_v29 = vld [vmem:[%s16570_s1 + $0x160c] sm:$0xf0]  ;;  %v9590_v63 = vor.u32 %v10866_v27, %v9589_v26  ;;  %5205 = vmatpush.bf16.msrb.mxu3 %v9862_v45  ;;  %v7127_v22 = vld [vmem:[%s16570_s1 + $0x1d0] sm:$0xf0] }
  0xc5   :  { %v9845_v34 = vld [vmem:[%s16570_s1 + $0x1700] sm:$0xf]  ;;  %v10930_v37 = vld [vmem:[%s16570_s1 + $0x170c] sm:$0xf0]  ;;  %v9718_v0 = vor.u32 %v10898_v29, %v9717_v28  ;;  %5164 = vmatpush.bf16.msrb.mxu0 %v9462_v57  ;;  %16592 = vst [vmem:[#allocation9_spill] sm:$0xff] %v12456_v25  ;;  %v12464_v28 = vpop.f32.mrf.mxu1 }
  0xc6   :  { %v10021_v42 = vld [vmem:[%s16570_s1 + $0x1860] sm:$0xf]  ;;  %v10974_v48 = vld [vmem:[%s16570_s1 + $0x186c] sm:$0xf0]  ;;  %v9846_v5 = vor.u32 %v10930_v37, %v9845_v34  ;;  %5178 = vmatpush.bf16.msrb.mxu1 %v9590_v63  ;;  %v10280_v26 = vld [vmem:[%s16570_s1 + $0x2c4] sm:$0xf]  ;;  %v7130_v34 = vor.u32 %v10248_v21, %v7127_v22 }
  0xc7   :  { %v6881_v61 = vld [vmem:[%s16571_s0 + $0x50] sm:$0xf]  ;;  %v10022_v6 = vor.u32 %v10974_v48, %v10021_v42  ;;  %v6891_v9 = vld [vmem:[%s16571_s0 + $0xbc] sm:$0xf0]  ;;  %5192 = vmatpush.bf16.msrb.mxu2 %v9718_v0  ;;  %v7255_v27 = vld [vmem:[%s16570_s1 + $0x2d0] sm:$0xf0] }
  0xc8   :  { %v10005_v14 = vld [vmem:[%s16570_s1 + $0x1840] sm:$0xf]  ;;  %v10970_v15 = vld [vmem:[%s16570_s1 + $0x184c] sm:$0xf0]  ;;  %v12443_v19 = vor.u32 %v10189_v62, %v6881_v61  ;;  %5206 = vmatpush.bf16.msrb.mxu3 %v9846_v5  ;;  %v12466_v29 = vor.u32 %v10178_v8, %v6891_v9  ;;  %v10212_v45 = vld [vmem:[%s16570_s1 + $0xa4] sm:$0xf]  ;;  %v7258_v48 = vor.u32 %v10280_v26, %v7255_v27  ;;  %v12510_v5 = vpop.f32.mrf.mxu3  ;;  %v4942_v9 = vpop.f32.mrf.mxu0 }
  0xc9   :  { %5217 = vmatpush.bf16.msra.mxu0 %v10022_v6  ;;  %v10006_v30 = vor.u32 %v10970_v15, %v10005_v14  ;;  %v9989_v37 = vld [vmem:[%s16570_s1 + $0x1820] sm:$0xf]  ;;  %v10966_v42 = vld [vmem:[%s16570_s1 + $0x182c] sm:$0xf0]  ;;  %v6983_v49 = vld [vmem:[%s16570_s1 + $0xb0] sm:$0xf0]  ;;  %5179 = vmatmul.bf16.vlgmr.msrb.gmra.mxu1 %v12456_v25  ;;  %v4943_v15 = vadd.f32 %v4942_v9, %v12364_v24 }
  0xca   :  { %5227 = vmatpush.bf16.msra.mxu1 %v7018_v11  ;;  %5165 = vmatmul.bf16.vlgmr.msrb.gmra.mxu0 %v12443_v19  ;;  %v10244_v50 = vld [vmem:[%s16570_s1 + $0x1a4] sm:$0xf]  ;;  %v7111_v52 = vld [vmem:[%s16570_s1 + $0x1b0] sm:$0xf0]  ;;  %v9990_v57 = vor.u32 %v10966_v42, %v9989_v37  ;;  %v9973_v61 = vld [vmem:[%s16570_s1 + $0x1800] sm:$0xf]  ;;  %v6986_v62 = vor.u32 %v10212_v45, %v6983_v49 }
  0xcb   :  { %5241 = vmatpush.bf16.msra.mxu2 %v7146_v12  ;;  %v10276_v53 = vld [vmem:[%s16570_s1 + $0x2a4] sm:$0xf]  ;;  %v7239_v54 = vld [vmem:[%s16570_s1 + $0x2b0] sm:$0xf0]  ;;  %5207 = vmatmul.bf16.vlgmr.msrb.gmra.mxu3 %v12466_v29  ;;  %v7114_v63 = vor.u32 %v10244_v50, %v7111_v52  ;;  %v10962_v0 = vld [vmem:[%s16570_s1 + $0x180c] sm:$0xf0] }
  0xcc   :  { %5255 = vmatpush.bf16.msra.mxu3 %v7274_v18  ;;  %5193 = vmatmul.bf16.vlgmr.msrb.gmra.mxu2 %v12454_v23  ;;  %v10208_v2 = vld [vmem:[%s16570_s1 + $0x84] sm:$0xf]  ;;  %v6967_v3 = vld [vmem:[%s16570_s1 + $0x90] sm:$0xf0]  ;;  %v7242_v4 = vor.u32 %v10276_v53, %v7239_v54  ;;  %v9974_v16 = vor.u32 %v10962_v0, %v9973_v61  ;;  %v6897_v49 = vld [vmem:[%s16571_s0 + $0x60] sm:$0xf] }
  0xcd   :  { %5218 = vmatpush.bf16.msra.mxu0 %v10006_v30  ;;  %v10240_v6 = vld [vmem:[%s16570_s1 + $0x184] sm:$0xf]  ;;  %v7095_v7 = vld [vmem:[%s16570_s1 + $0x190] sm:$0xf0]  ;;  %v6970_v18 = vor.u32 %v10208_v2, %v6967_v3  ;;  %v4956_v21 = vpop.f32.mrf.mxu1 }
  0xce   :  { %5228 = vmatpush.bf16.msra.mxu1 %v7002_v33  ;;  %v10272_v8 = vld [vmem:[%s16570_s1 + $0x284] sm:$0xf]  ;;  %v7223_v11 = vld [vmem:[%s16570_s1 + $0x290] sm:$0xf0]  ;;  %v7098_v20 = vor.u32 %v10240_v6, %v7095_v7  ;;  %v4957_v30 = vadd.f32 %v4956_v21, %v4943_v15 }
  0xcf   :  { %5242 = vmatpush.bf16.msra.mxu2 %v7130_v34  ;;  %v10316_v12 = vld [vmem:[%s16570_s1 + $0x3e4] sm:$0xf]  ;;  %v7399_v14 = vld [vmem:[%s16570_s1 + $0x3f0] sm:$0xf0]  ;;  %v7226_v27 = vor.u32 %v10272_v8, %v7223_v11 }
  0xd0   :  { %5256 = vmatpush.bf16.msra.mxu3 %v7258_v48  ;;  %v10204_v22 = vld [vmem:[%s16570_s1 + $0x64] sm:$0xf]  ;;  %v6951_v26 = vld [vmem:[%s16570_s1 + $0x70] sm:$0xf0]  ;;  %v7402_v33 = vor.u32 %v10316_v12, %v7399_v14  ;;  %v4984_v11 = vpop.f32.mrf.mxu3 }
  0xd1   :  { %5219 = vmatpush.bf16.msra.mxu0 %v9990_v57  ;;  %v10236_v24 = vld [vmem:[%s16570_s1 + $0x164] sm:$0xf]  ;;  %v7079_v34 = vld [vmem:[%s16570_s1 + $0x170] sm:$0xf0]  ;;  %v6954_v52 = vor.u32 %v10204_v22, %v6951_v26 }
  0xd2   :  { %5229 = vmatpush.bf16.msra.mxu1 %v6986_v62  ;;  %v10268_v37 = vld [vmem:[%s16570_s1 + $0x264] sm:$0xf]  ;;  %v7207_v42 = vld [vmem:[%s16570_s1 + $0x270] sm:$0xf0]  ;;  %v7082_v53 = vor.u32 %v10236_v24, %v7079_v34  ;;  %v4970_v62 = vpop.f32.mrf.mxu2 }
  0xd3   :  { %5243 = vmatpush.bf16.msra.mxu2 %v7114_v63  ;;  %v10312_v45 = vld [vmem:[%s16570_s1 + $0x3c4] sm:$0xf]  ;;  %v7383_v48 = vld [vmem:[%s16570_s1 + $0x3d0] sm:$0xf0]  ;;  %v7210_v61 = vor.u32 %v10268_v37, %v7207_v42 }
  0xd4   :  { %5257 = vmatpush.bf16.msra.mxu3 %v7242_v4  ;;  %v10191_v50 = vld [vmem:[%s16571_s0 + $0xc0] sm:$0xf0]  ;;  %v6935_v57 = vld [vmem:[%s16570_s1 + $0x50] sm:$0xf0]  ;;  %v7386_v63 = vor.u32 %v10312_v45, %v7383_v48  ;;  %v4971_v4 = vadd.f32 %v4970_v62, %v4957_v30 }
  0xd5   :  { %5220 = vmatpush.bf16.msra.mxu0 %v9974_v16  ;;  %v10200_v54 = vld [vmem:[%s16570_s1 + $0x44] sm:$0xf]  ;;  %v7063_v2 = vld [vmem:[%s16570_s1 + $0x150] sm:$0xf0]  ;;  %v12576_v6 = vor.u32 %v10191_v50, %v6897_v49 }
  0xd6   :  { %5230 = vmatpush.bf16.msra.mxu1 %v6970_v18  ;;  %v10232_v0 = vld [vmem:[%s16570_s1 + $0x144] sm:$0xf]  ;;  %v7191_v7 = vld [vmem:[%s16570_s1 + $0x250] sm:$0xf0]  ;;  %v12587_v12 = vadd.f32 %v4984_v11, %v4971_v4  ;;  %v6938_v14 = vor.u32 %v10200_v54, %v6935_v57 }
  0xd7   :  { %5244 = vmatpush.bf16.msra.mxu2 %v7098_v20  ;;  %v10264_v3 = vld [vmem:[%s16570_s1 + $0x244] sm:$0xf]  ;;  %16593 = vst [vmem:[#allocation10_spill] sm:$0xff] %v12576_v6  ;;  %v7367_v9 = vld [vmem:[%s16570_s1 + $0x3b0] sm:$0xf0]  ;;  %v7066_v15 = vor.u32 %v10232_v0, %v7063_v2 }
  0xd8   :  { %5258 = vmatpush.bf16.msra.mxu3 %v7226_v27  ;;  %v10308_v8 = vld [vmem:[%s16570_s1 + $0x3a4] sm:$0xf]  ;;  %v6919_v18 = vld [vmem:[%s16570_s1 + $0x30] sm:$0xf0]  ;;  %v7194_v20 = vor.u32 %v10264_v3, %v7191_v7 }
  0xd9   :  { %5269 = vmatpush.bf16.msrb.mxu0 %v7402_v33  ;;  %v10196_v16 = vld [vmem:[%s16570_s1 + $0x24] sm:$0xf]  ;;  %v7370_v21 = vor.u32 %v10308_v8, %v7367_v9  ;;  %v7047_v26 = vld [vmem:[%s16570_s1 + $0x130] sm:$0xf0] }
  0xda   :  { %5231 = vmatpush.bf16.msra.mxu1 %v6954_v52  ;;  %v10228_v22 = vld [vmem:[%s16570_s1 + $0x124] sm:$0xf]  ;;  %10035 = vmatmul.msk.bf16.vlgmr.msra.gmra.mxu0 %vm4873_vm0, %v12576_v6  ;;  %v7175_v30 = vld [vmem:[%s16570_s1 + $0x230] sm:$0xf0]  ;;  %v6922_v34 = vor.u32 %v10196_v16, %v6919_v18 }
  0xdb   :  { %5245 = vmatpush.bf16.msra.mxu2 %v7082_v53  ;;  %v10260_v27 = vld [vmem:[%s16570_s1 + $0x224] sm:$0xf]  ;;  %v7351_v24 = vld [vmem:[%s16570_s1 + $0x390] sm:$0xf0]  ;;  %v7050_v37 = vor.u32 %v10228_v22, %v7047_v26 }
  0xdc   :  { %5259 = vmatpush.bf16.msra.mxu3 %v7210_v61  ;;  %v10304_v33 = vld [vmem:[%s16570_s1 + $0x384] sm:$0xf]  ;;  %v6903_v45 = vld [vmem:[%s16570_s1 + $0x10] sm:$0xf0]  ;;  %v7178_v49 = vor.u32 %v10260_v27, %v7175_v30  ;;  %v12675_v30 = vpop.f32.mrf.mxu0 }
  0xdd   :  { %5270 = vmatpush.bf16.msrb.mxu0 %v7386_v63  ;;  %v10192_v42 = vld [vmem:[%s16570_s1 + $0x4] sm:$0xf]  ;;  %v7354_v50 = vor.u32 %v10304_v33, %v7351_v24  ;;  %v7031_v52 = vld [vmem:[%s16570_s1 + $0x110] sm:$0xf0] }
  0xde   :  { %5232 = vmatpush.bf16.msra.mxu1 %v6938_v14  ;;  %v10224_v48 = vld [vmem:[%s16570_s1 + $0x104] sm:$0xf]  ;;  %v7159_v54 = vld [vmem:[%s16570_s1 + $0x210] sm:$0xf0]  ;;  %v6906_v3 = vor.u32 %v10192_v42, %v6903_v45 }
  0xdf   :  { %5246 = vmatpush.bf16.msra.mxu2 %v7066_v15  ;;  %v10256_v53 = vld [vmem:[%s16570_s1 + $0x204] sm:$0xf]  ;;  %v7335_v61 = vld [vmem:[%s16570_s1 + $0x370] sm:$0xf0]  ;;  %v7034_v4 = vor.u32 %v10224_v48, %v7031_v52 }
  0xe0   :  { %5260 = vmatpush.bf16.msra.mxu3 %v7194_v20  ;;  %v10300_v57 = vld [vmem:[%s16570_s1 + $0x364] sm:$0xf]  ;;  %v7527_v63 = vld [vmem:[%s16570_s1 + $0x4f0] sm:$0xf0]  ;;  %v7162_v9 = vor.u32 %v10256_v53, %v7159_v54 }
  0xe1   :  { %5271 = vmatpush.bf16.msrb.mxu0 %v7370_v21  ;;  %v10348_v62 = vld [vmem:[%s16570_s1 + $0x4e4] sm:$0xf]  ;;  %v7655_v2 = vld [vmem:[%s16570_s1 + $0x5f0] sm:$0xf0]  ;;  %v7338_v11 = vor.u32 %v10300_v57, %v7335_v61 }
  0xe2   :  { %v10380_v0 = vld [vmem:[%s16570_s1 + $0x5e4] sm:$0xf]  ;;  %5233 = vmatpush.bf16.msra.mxu1 %v6922_v34  ;;  %v7783_v8 = vld [vmem:[%s16570_s1 + $0x6f0] sm:$0xf0]  ;;  %v7530_v14 = vor.u32 %v10348_v62, %v7527_v63  ;;  %v12683_v34 = vpop.f32.mrf.mxu1 }
  0xe3   :  { %5247 = vmatpush.bf16.msra.mxu2 %v7050_v37  ;;  %v10412_v7 = vld [vmem:[%s16570_s1 + $0x6e4] sm:$0xf]  ;;  %v7658_v15 = vor.u32 %v10380_v0, %v7655_v2  ;;  %v7319_v18 = vld [vmem:[%s16570_s1 + $0x350] sm:$0xf0] }
  0xe4   :  { %5261 = vmatpush.bf16.msra.mxu3 %v7178_v49  ;;  %v10296_v16 = vld [vmem:[%s16570_s1 + $0x344] sm:$0xf]  ;;  %v7786_v21 = vor.u32 %v10412_v7, %v7783_v8  ;;  %v7511_v22 = vld [vmem:[%s16570_s1 + $0x4d0] sm:$0xf0] }
  0xe5   :  { %5272 = vmatpush.bf16.msrb.mxu0 %v7354_v50  ;;  %v10344_v20 = vld [vmem:[%s16570_s1 + $0x4c4] sm:$0xf]  ;;  %v7639_v27 = vld [vmem:[%s16570_s1 + $0x5d0] sm:$0xf0]  ;;  %v7322_v37 = vor.u32 %v10296_v16, %v7319_v18  ;;  %v12735_v18 = vpop.f32.mrf.mxu3 }
  0xe6   :  { %v10376_v26 = vld [vmem:[%s16570_s1 + $0x5c4] sm:$0xf]  ;;  %5234 = vmatpush.bf16.msra.mxu1 %v6906_v3  ;;  %v7767_v24 = vld [vmem:[%s16570_s1 + $0x6d0] sm:$0xf0]  ;;  %v7514_v42 = vor.u32 %v10344_v20, %v7511_v22 }
  0xe7   :  { %5248 = vmatpush.bf16.msra.mxu2 %v7034_v4  ;;  %v10408_v33 = vld [vmem:[%s16570_s1 + $0x6c4] sm:$0xf]  ;;  %v7642_v45 = vor.u32 %v10376_v26, %v7639_v27  ;;  %v7303_v49 = vld [vmem:[%s16570_s1 + $0x330] sm:$0xf0]  ;;  %v4998_v20 = vpop.f32.mrf.mxu0 }
  0xe8   :  { %5262 = vmatpush.bf16.msra.mxu3 %v7162_v9  ;;  %v10292_v48 = vld [vmem:[%s16570_s1 + $0x324] sm:$0xf]  ;;  %v7770_v52 = vor.u32 %v10408_v33, %v7767_v24  ;;  %v7495_v53 = vld [vmem:[%s16570_s1 + $0x4b0] sm:$0xf0]  ;;  %v12724_v9 = vpop.f32.mrf.mxu2  ;;  %v4999_v27 = vadd.f32 %v4998_v20, %v12587_v12 }
  0xe9   :  { %5273 = vmatpush.bf16.msrb.mxu0 %v7338_v11  ;;  %v10340_v50 = vld [vmem:[%s16570_s1 + $0x4a4] sm:$0xf]  ;;  %v7623_v57 = vld [vmem:[%s16570_s1 + $0x5b0] sm:$0xf0]  ;;  %5235 = vmatmul.bf16.vlgmr.msra.gmra.mxu1 %v11305_v58  ;;  %v7306_v63 = vor.u32 %v10292_v48, %v7303_v49 }
  0xea   :  { %5283 = vmatpush.bf16.msrb.mxu1 %v7530_v14  ;;  %v10372_v54 = vld [vmem:[%s16570_s1 + $0x5a4] sm:$0xf]  ;;  %v7751_v62 = vld [vmem:[%s16570_s1 + $0x6b0] sm:$0xf0]  ;;  %5249 = vmatmul.bf16.vlgmr.msra.gmra.mxu2 %v11341_v10  ;;  %v7498_v2 = vor.u32 %v10340_v50, %v7495_v53  ;;  %v5012_v24 = vpop.f32.mrf.mxu1 }
  0xeb   :  { %5297 = vmatpush.bf16.msrb.mxu2 %v7658_v15  ;;  %v10404_v61 = vld [vmem:[%s16570_s1 + $0x6a4] sm:$0xf]  ;;  %5263 = vmatmul.bf16.vlgmr.msra.gmra.mxu3 %v11319_v1  ;;  %v7626_v3 = vor.u32 %v10372_v54, %v7623_v57  ;;  %v7287_v4 = vld [vmem:[%s16570_s1 + $0x310] sm:$0xf0]  ;;  %v5013_v50 = vadd.f32 %v5012_v24, %v4999_v27 }
  0xec   :  { %5311 = vmatpush.bf16.msrb.mxu3 %v7786_v21  ;;  %v10288_v0 = vld [vmem:[%s16570_s1 + $0x304] sm:$0xf]  ;;  %v7479_v8 = vld [vmem:[%s16570_s1 + $0x490] sm:$0xf0]  ;;  %v7754_v11 = vor.u32 %v10404_v61, %v7751_v62 }
  0xed   :  { %5274 = vmatpush.bf16.msrb.mxu0 %v7322_v37  ;;  %v10336_v7 = vld [vmem:[%s16570_s1 + $0x484] sm:$0xf]  ;;  %v7607_v15 = vld [vmem:[%s16570_s1 + $0x590] sm:$0xf0]  ;;  %v7290_v33 = vor.u32 %v10288_v0, %v7287_v4  ;;  %v5040_v20 = vpop.f32.mrf.mxu3 }
  0xee   :  { %5284 = vmatpush.bf16.msrb.mxu1 %v7514_v42  ;;  %v10368_v14 = vld [vmem:[%s16570_s1 + $0x584] sm:$0xf]  ;;  %v7735_v21 = vld [vmem:[%s16570_s1 + $0x690] sm:$0xf0]  ;;  %v7482_v37 = vor.u32 %v10336_v7, %v7479_v8 }
  0xef   :  { %5298 = vmatpush.bf16.msrb.mxu2 %v7642_v45  ;;  %v10400_v16 = vld [vmem:[%s16570_s1 + $0x684] sm:$0xf]  ;;  %v7911_v26 = vld [vmem:[%s16570_s1 + $0x7f0] sm:$0xf0]  ;;  %v7610_v42 = vor.u32 %v10368_v14, %v7607_v15 }
  0xf0   :  { %5312 = vmatpush.bf16.msrb.mxu3 %v7770_v52  ;;  %v10444_v22 = vld [vmem:[%s16570_s1 + $0x7e4] sm:$0xf]  ;;  %v7463_v48 = vld [vmem:[%s16570_s1 + $0x470] sm:$0xf0]  ;;  %v7738_v49 = vor.u32 %v10400_v16, %v7735_v21  ;;  %v5026_v7 = vpop.f32.mrf.mxu2 }
  0xf1   :  { %5275 = vmatpush.bf16.msrb.mxu0 %v7306_v63  ;;  %v10332_v45 = vld [vmem:[%s16570_s1 + $0x464] sm:$0xf]  ;;  %v7914_v52 = vor.u32 %v10444_v22, %v7911_v26  ;;  %v7591_v53 = vld [vmem:[%s16570_s1 + $0x570] sm:$0xf0]  ;;  %v5027_v16 = vadd.f32 %v5026_v7, %v5013_v50 }
  0xf2   :  { %5285 = vmatpush.bf16.msrb.mxu1 %v7498_v2  ;;  %v10364_v12 = vld [vmem:[%s16570_s1 + $0x564] sm:$0xf]  ;;  %v7719_v57 = vld [vmem:[%s16570_s1 + $0x670] sm:$0xf0]  ;;  %v7466_v63 = vor.u32 %v10332_v45, %v7463_v48 }
  0xf3   :  { %5299 = vmatpush.bf16.msrb.mxu2 %v7626_v3  ;;  %v10396_v54 = vld [vmem:[%s16570_s1 + $0x664] sm:$0xf]  ;;  %v7895_v62 = vld [vmem:[%s16570_s1 + $0x7d0] sm:$0xf0]  ;;  %v7594_v0 = vor.u32 %v10364_v12, %v7591_v53  ;;  %v12796_v27 = vadd.f32 %v5040_v20, %v5027_v16 }
  0xf4   :  { %5313 = vmatpush.bf16.msrb.mxu3 %v7754_v11  ;;  %v10440_v61 = vld [vmem:[%s16570_s1 + $0x7c4] sm:$0xf]  ;;  %v7447_v3 = vld [vmem:[%s16570_s1 + $0x450] sm:$0xf0]  ;;  %v7722_v4 = vor.u32 %v10396_v54, %v7719_v57 }
  0xf5   :  { %5276 = vmatpush.bf16.msrb.mxu0 %v7290_v33  ;;  %v10328_v2 = vld [vmem:[%s16570_s1 + $0x444] sm:$0xf]  ;;  %v7898_v8 = vor.u32 %v10440_v61, %v7895_v62  ;;  %v7575_v14 = vld [vmem:[%s16570_s1 + $0x550] sm:$0xf0] }
  0xf6   :  { %5286 = vmatpush.bf16.msrb.mxu1 %v7482_v37  ;;  %v10360_v11 = vld [vmem:[%s16570_s1 + $0x544] sm:$0xf]  ;;  %v7703_v21 = vld [vmem:[%s16570_s1 + $0x650] sm:$0xf0]  ;;  %v7450_v33 = vor.u32 %v10328_v2, %v7447_v3 }
  0xf7   :  { %5300 = vmatpush.bf16.msrb.mxu2 %v7610_v42  ;;  %v10392_v15 = vld [vmem:[%s16570_s1 + $0x644] sm:$0xf]  ;;  %v7879_v26 = vld [vmem:[%s16570_s1 + $0x7b0] sm:$0xf0]  ;;  %v7578_v24 = vor.u32 %v10360_v11, %v7575_v14 }
  0xf8   :  { %5314 = vmatpush.bf16.msrb.mxu3 %v7738_v49  ;;  %v10436_v22 = vld [vmem:[%s16570_s1 + $0x7a4] sm:$0xf]  ;;  %5277 = vmatmul.bf16.vlgmr.msrb.gmra.mxu0 %v11355_v17  ;;  %v7431_v42 = vld [vmem:[%s16570_s1 + $0x430] sm:$0xf0]  ;;  %v7706_v45 = vor.u32 %v10392_v15, %v7703_v21 }
  0xf9   :  { %5325 = vmatpush.bf16.msra.mxu0 %v7914_v52  ;;  %v10324_v37 = vld [vmem:[%s16570_s1 + $0x424] sm:$0xf]  ;;  %v7882_v48 = vor.u32 %v10436_v22, %v7879_v26  ;;  %v7559_v50 = vld [vmem:[%s16570_s1 + $0x530] sm:$0xf0] }
  0xfa   :  { %5287 = vmatpush.bf16.msrb.mxu1 %v7466_v63  ;;  %v10356_v49 = vld [vmem:[%s16570_s1 + $0x524] sm:$0xf]  ;;  %v7687_v12 = vld [vmem:[%s16570_s1 + $0x630] sm:$0xf0]  ;;  %v7434_v57 = vor.u32 %v10324_v37, %v7431_v42 }
  0xfb   :  { %5301 = vmatpush.bf16.msrb.mxu2 %v7594_v0  ;;  %v10388_v52 = vld [vmem:[%s16570_s1 + $0x624] sm:$0xf]  ;;  %v7863_v54 = vld [vmem:[%s16570_s1 + $0x790] sm:$0xf0]  ;;  %v7562_v61 = vor.u32 %v10356_v49, %v7559_v50 }
  0xfc   :  { %5315 = vmatpush.bf16.msrb.mxu3 %v7722_v4  ;;  %v10432_v53 = vld [vmem:[%s16570_s1 + $0x784] sm:$0xf]  ;;  %v7415_v63 = vld [vmem:[%s16570_s1 + $0x410] sm:$0xf0]  ;;  %v7690_v2 = vor.u32 %v10388_v52, %v7687_v12 }
  0xfd   :  { %5326 = vmatpush.bf16.msra.mxu0 %v7898_v8  ;;  %v10320_v62 = vld [vmem:[%s16570_s1 + $0x404] sm:$0xf]  ;;  %v7866_v3 = vor.u32 %v10432_v53, %v7863_v54  ;;  %v7543_v4 = vld [vmem:[%s16570_s1 + $0x510] sm:$0xf0] }
  0xfe   :  { %5288 = vmatpush.bf16.msrb.mxu1 %v7450_v33  ;;  %v10352_v0 = vld [vmem:[%s16570_s1 + $0x504] sm:$0xf]  ;;  %v7671_v8 = vld [vmem:[%s16570_s1 + $0x610] sm:$0xf0]  ;;  %v7418_v22 = vor.u32 %v10320_v62, %v7415_v63 }
  0xff   :  { %5302 = vmatpush.bf16.msrb.mxu2 %v7578_v24  ;;  %v10384_v7 = vld [vmem:[%s16570_s1 + $0x604] sm:$0xf]  ;;  %v7847_v14 = vld [vmem:[%s16570_s1 + $0x770] sm:$0xf0]  ;;  %v7546_v26 = vor.u32 %v10352_v0, %v7543_v4  ;;  %v12890_v0 = vpop.f32.mrf.mxu1 }
 0x100   :  { %5316 = vmatpush.bf16.msrb.mxu3 %v7706_v45  ;;  %v10428_v11 = vld [vmem:[%s16570_s1 + $0x764] sm:$0xf]  ;;  %v8039_v16 = vld [vmem:[%s16570_s1 + $0x8f0] sm:$0xf0]  ;;  %v7674_v37 = vor.u32 %v10384_v7, %v7671_v8 }
 0x101   :  { %5327 = vmatpush.bf16.msra.mxu0 %v7882_v48  ;;  %v10476_v15 = vld [vmem:[%s16570_s1 + $0x8e4] sm:$0xf]  ;;  %v8167_v21 = vld [vmem:[%s16570_s1 + $0x9f0] sm:$0xf0]  ;;  %v7850_v42 = vor.u32 %v10428_v11, %v7847_v14 }
 0x102   :  { %v10508_v20 = vld [vmem:[%s16570_s1 + $0x9e4] sm:$0xf]  ;;  %5289 = vmatpush.bf16.msrb.mxu1 %v7434_v57  ;;  %v8295_v24 = vld [vmem:[%s16570_s1 + $0xaf0] sm:$0xf0]  ;;  %v8042_v45 = vor.u32 %v10476_v15, %v8039_v16 }
 0x103   :  { %5303 = vmatpush.bf16.msrb.mxu2 %v7562_v61  ;;  %v10540_v33 = vld [vmem:[%s16570_s1 + $0xae4] sm:$0xf]  ;;  %v8170_v48 = vor.u32 %v10508_v20, %v8167_v21  ;;  %v7831_v50 = vld [vmem:[%s16570_s1 + $0x750] sm:$0xf0]  ;;  %v12882_v61 = vpop.f32.mrf.mxu0 }
 0x104   :  { %5317 = vmatpush.bf16.msrb.mxu3 %v7690_v2  ;;  %v10424_v49 = vld [vmem:[%s16570_s1 + $0x744] sm:$0xf]  ;;  %v8298_v12 = vor.u32 %v10540_v33, %v8295_v24  ;;  %v8023_v53 = vld [vmem:[%s16570_s1 + $0x8d0] sm:$0xf0] }
 0x105   :  { %5328 = vmatpush.bf16.msra.mxu0 %v7866_v3  ;;  %v10472_v52 = vld [vmem:[%s16570_s1 + $0x8c4] sm:$0xf]  ;;  %v8151_v57 = vld [vmem:[%s16570_s1 + $0x9d0] sm:$0xf0]  ;;  %v7834_v2 = vor.u32 %v10424_v49, %v7831_v50  ;;  %v12931_v49 = vpop.f32.mrf.mxu2 }
 0x106   :  { %v10504_v54 = vld [vmem:[%s16570_s1 + $0x9c4] sm:$0xf]  ;;  %5290 = vmatpush.bf16.msrb.mxu1 %v7418_v22  ;;  %v8279_v63 = vld [vmem:[%s16570_s1 + $0xad0] sm:$0xf0]  ;;  %v8026_v3 = vor.u32 %v10472_v52, %v8023_v53 }
 0x107   :  { %5304 = vmatpush.bf16.msrb.mxu2 %v7546_v26  ;;  %v10536_v62 = vld [vmem:[%s16570_s1 + $0xac4] sm:$0xf]  ;;  %v8154_v4 = vor.u32 %v10504_v54, %v8151_v57  ;;  %v7815_v8 = vld [vmem:[%s16570_s1 + $0x730] sm:$0xf0]  ;;  %v12942_v54 = vpop.f32.mrf.mxu3 }
 0x108   :  { %5318 = vmatpush.bf16.msrb.mxu3 %v7674_v37  ;;  %v10420_v7 = vld [vmem:[%s16570_s1 + $0x724] sm:$0xf]  ;;  %v8282_v14 = vor.u32 %v10536_v62, %v8279_v63  ;;  %v8007_v15 = vld [vmem:[%s16570_s1 + $0x8b0] sm:$0xf0]  ;;  %16594 = vst [vmem:[#allocation11_spill] sm:$0xff] %v12942_v54 }
 0x109   :  { %5329 = vmatpush.bf16.msra.mxu0 %v7850_v42  ;;  %v10468_v11 = vld [vmem:[%s16570_s1 + $0x8a4] sm:$0xf]  ;;  %5291 = vmatmul.bf16.vlgmr.msrb.gmra.mxu1 %v11527_v39  ;;  %v8135_v20 = vld [vmem:[%s16570_s1 + $0x9b0] sm:$0xf0]  ;;  %v7818_v26 = vor.u32 %v10420_v7, %v7815_v8  ;;  %v5068_v7 = vpop.f32.mrf.mxu1 }
 0x10a   :  { %5339 = vmatpush.bf16.msra.mxu1 %v8042_v45  ;;  %v10500_v16 = vld [vmem:[%s16570_s1 + $0x9a4] sm:$0xf]  ;;  %5305 = vmatmul.bf16.vlgmr.msrb.gmra.mxu2 %v11540_v44  ;;  %v8263_v22 = vld [vmem:[%s16570_s1 + $0xab0] sm:$0xf0]  ;;  %v8010_v24 = vor.u32 %v10468_v11, %v8007_v15 }
 0x10b   :  { %5353 = vmatpush.bf16.msra.mxu2 %v8170_v48  ;;  %5319 = vmatmul.bf16.vlgmr.msrb.gmra.mxu3 %v11538_v43  ;;  %v10532_v21 = vld [vmem:[%s16570_s1 + $0xaa4] sm:$0xf]  ;;  %v8138_v37 = vor.u32 %v10500_v16, %v8135_v20  ;;  %v7799_v42 = vld [vmem:[%s16570_s1 + $0x710] sm:$0xf0]  ;;  %v5054_v57 = vpop.f32.mrf.mxu0 }
 0x10c   :  { %5367 = vmatpush.bf16.msra.mxu3 %v8298_v12  ;;  %v10416_v33 = vld [vmem:[%s16570_s1 + $0x704] sm:$0xf]  ;;  %v7991_v48 = vld [vmem:[%s16570_s1 + $0x890] sm:$0xf0]  ;;  %v8266_v50 = vor.u32 %v10532_v21, %v8263_v22 }
 0x10d   :  { %5330 = vmatpush.bf16.msra.mxu0 %v7834_v2  ;;  %v10464_v45 = vld [vmem:[%s16570_s1 + $0x884] sm:$0xf]  ;;  %v8119_v12 = vld [vmem:[%s16570_s1 + $0x990] sm:$0xf0] }
 0x10e   :  { %5340 = vmatpush.bf16.msra.mxu1 %v8026_v3  ;;  %v10496_v52 = vld [vmem:[%s16570_s1 + $0x984] sm:$0xf]  ;;  %v8247_v62 = vld [vmem:[%s16570_s1 + $0xa90] sm:$0xf0]  ;;  %v5055_v3 = vadd.f32 %v5054_v57, %v12796_v27  ;;  %v7994_v8 = vor.u32 %v10464_v45, %v7991_v48 }
 0x10f   :  { %5354 = vmatpush.bf16.msra.mxu2 %v8154_v4  ;;  %v10528_v53 = vld [vmem:[%s16570_s1 + $0xa84] sm:$0xf]  ;;  %v8423_v2 = vld [vmem:[%s16570_s1 + $0xbf0] sm:$0xf0]  ;;  %v7802_v4 = vor.u32 %v10416_v33, %v7799_v42  ;;  %v8122_v11 = vor.u32 %v10496_v52, %v8119_v12  ;;  %v5082_v12 = vpop.f32.mrf.mxu2 }
 0x110   :  { %5368 = vmatpush.bf16.msra.mxu3 %v8282_v14  ;;  %v10572_v63 = vld [vmem:[%s16570_s1 + $0xbe4] sm:$0xf]  ;;  %v7975_v15 = vld [vmem:[%s16570_s1 + $0x870] sm:$0xf0]  ;;  %v8250_v16 = vor.u32 %v10528_v53, %v8247_v62  ;;  %v5069_v20 = vadd.f32 %v5068_v7, %v5055_v3  ;;  %v5096_v3 = vpop.f32.mrf.mxu3 }
 0x111   :  { %5331 = vmatpush.bf16.msra.mxu0 %v7818_v26  ;;  %v10460_v14 = vld [vmem:[%s16570_s1 + $0x864] sm:$0xf]  ;;  %v8426_v21 = vor.u32 %v10572_v63, %v8423_v2  ;;  %v8103_v22 = vld [vmem:[%s16570_s1 + $0x970] sm:$0xf0] }
 0x112   :  { %5341 = vmatpush.bf16.msra.mxu1 %v8010_v24  ;;  %v10492_v27 = vld [vmem:[%s16570_s1 + $0x964] sm:$0xf]  ;;  %v8231_v33 = vld [vmem:[%s16570_s1 + $0xa70] sm:$0xf0]  ;;  %v7978_v42 = vor.u32 %v10460_v14, %v7975_v15  ;;  %v5083_v2 = vadd.f32 %v5082_v12, %v5069_v20 }
 0x113   :  { %5355 = vmatpush.bf16.msra.mxu2 %v8138_v37  ;;  %v10524_v26 = vld [vmem:[%s16570_s1 + $0xa64] sm:$0xf]  ;;  %v8407_v37 = vld [vmem:[%s16570_s1 + $0xbd0] sm:$0xf0]  ;;  %v8106_v45 = vor.u32 %v10492_v27, %v8103_v22 }
 0x114   :  { %5369 = vmatpush.bf16.msra.mxu3 %v8266_v50  ;;  %v10568_v24 = vld [vmem:[%s16570_s1 + $0xbc4] sm:$0xf]  ;;  %v7959_v50 = vld [vmem:[%s16570_s1 + $0x850] sm:$0xf0]  ;;  %v8234_v52 = vor.u32 %v10524_v26, %v8231_v33 }
 0x115   :  { %5332 = vmatpush.bf16.msra.mxu0 %v7802_v4  ;;  %v10456_v48 = vld [vmem:[%s16570_s1 + $0x844] sm:$0xf]  ;;  %v8410_v53 = vor.u32 %v10568_v24, %v8407_v37  ;;  %v8087_v62 = vld [vmem:[%s16570_s1 + $0x950] sm:$0xf0] }
 0x116   :  { %5342 = vmatpush.bf16.msra.mxu1 %v7994_v8  ;;  %v10488_v57 = vld [vmem:[%s16570_s1 + $0x944] sm:$0xf]  ;;  %v8215_v4 = vld [vmem:[%s16570_s1 + $0xa50] sm:$0xf0]  ;;  %v7962_v14 = vor.u32 %v10456_v48, %v7959_v50 }
 0x117   :  { %5356 = vmatpush.bf16.msra.mxu2 %v8122_v11  ;;  %v10520_v63 = vld [vmem:[%s16570_s1 + $0xa44] sm:$0xf]  ;;  %v8391_v8 = vld [vmem:[%s16570_s1 + $0xbb0] sm:$0xf0]  ;;  %v13003_v11 = vadd.f32 %v5096_v3, %v5083_v2  ;;  %v8090_v15 = vor.u32 %v10488_v57, %v8087_v62 }
 0x118   :  { %5370 = vmatpush.bf16.msra.mxu3 %v8250_v16  ;;  %5333 = vmatmul.bf16.vlgmr.msra.gmra.mxu0 %v11548_v47  ;;  %v10564_v7 = vld [vmem:[%s16570_s1 + $0xba4] sm:$0xf]  ;;  %v7943_v20 = vld [vmem:[%s16570_s1 + $0x830] sm:$0xf0] }
 0x119   :  { %5381 = vmatpush.bf16.msrb.mxu0 %v8426_v21  ;;  %v10452_v16 = vld [vmem:[%s16570_s1 + $0x824] sm:$0xf]  ;;  %v8218_v21 = vor.u32 %v10520_v63, %v8215_v4  ;;  %v8394_v27 = vor.u32 %v10564_v7, %v8391_v8  ;;  %v8071_v26 = vld [vmem:[%s16570_s1 + $0x930] sm:$0xf0] }
 0x11a   :  { %5343 = vmatpush.bf16.msra.mxu1 %v7978_v42  ;;  %v10484_v22 = vld [vmem:[%s16570_s1 + $0x924] sm:$0xf]  ;;  %v8199_v24 = vld [vmem:[%s16570_s1 + $0xa30] sm:$0xf0] }
 0x11b   :  { %5357 = vmatpush.bf16.msra.mxu2 %v8106_v45  ;;  %v10516_v33 = vld [vmem:[%s16570_s1 + $0xa24] sm:$0xf]  ;;  %v8375_v42 = vld [vmem:[%s16570_s1 + $0xb90] sm:$0xf0]  ;;  %v7946_v45 = vor.u32 %v10452_v16, %v7943_v20  ;;  %v8074_v48 = vor.u32 %v10484_v22, %v8071_v26 }
 0x11c   :  { %5371 = vmatpush.bf16.msra.mxu3 %v8234_v52  ;;  %v10560_v37 = vld [vmem:[%s16570_s1 + $0xb84] sm:$0xf]  ;;  %v7927_v52 = vld [vmem:[%s16570_s1 + $0x810] sm:$0xf0] }
 0x11d   :  { %5382 = vmatpush.bf16.msrb.mxu0 %v8410_v53  ;;  %v10448_v50 = vld [vmem:[%s16570_s1 + $0x804] sm:$0xf]  ;;  %v8202_v53 = vor.u32 %v10516_v33, %v8199_v24  ;;  %v8378_v57 = vor.u32 %v10560_v37, %v8375_v42  ;;  %v8055_v62 = vld [vmem:[%s16570_s1 + $0x910] sm:$0xf0] }
 0x11e   :  { %5344 = vmatpush.bf16.msra.mxu1 %v7962_v14  ;;  %v10480_v12 = vld [vmem:[%s16570_s1 + $0x904] sm:$0xf]  ;;  %v8183_v2 = vld [vmem:[%s16570_s1 + $0xa10] sm:$0xf0]  ;;  %v7930_v16 = vor.u32 %v10448_v50, %v7927_v52 }
 0x11f   :  { %5358 = vmatpush.bf16.msra.mxu2 %v8090_v15  ;;  %v10512_v63 = vld [vmem:[%s16570_s1 + $0xa04] sm:$0xf]  ;;  %v8359_v4 = vld [vmem:[%s16570_s1 + $0xb70] sm:$0xf0]  ;;  %v8058_v20 = vor.u32 %v10480_v12, %v8055_v62 }
 0x120   :  { %5372 = vmatpush.bf16.msra.mxu3 %v8218_v21  ;;  %v10556_v3 = vld [vmem:[%s16570_s1 + $0xb64] sm:$0xf]  ;;  %v8551_v8 = vld [vmem:[%s16570_s1 + $0xcf0] sm:$0xf0]  ;;  %v8186_v22 = vor.u32 %v10512_v63, %v8183_v2  ;;  %v13097_v63 = vpop.f32.mrf.mxu1 }
 0x121   :  { %5383 = vmatpush.bf16.msrb.mxu0 %v8394_v27  ;;  %v10604_v7 = vld [vmem:[%s16570_s1 + $0xce4] sm:$0xf]  ;;  %v8679_v15 = vld [vmem:[%s16570_s1 + $0xdf0] sm:$0xf0]  ;;  %v8362_v26 = vor.u32 %v10556_v3, %v8359_v4  ;;  %16596 = vst [vmem:[#allocation13_spill] sm:$0xff] %v13097_v63 }
 0x122   :  { %v10636_v14 = vld [vmem:[%s16570_s1 + $0xde4] sm:$0xf]  ;;  %5345 = vmatpush.bf16.msra.mxu1 %v7946_v45  ;;  %v8807_v27 = vld [vmem:[%s16570_s1 + $0xef0] sm:$0xf0]  ;;  %v8554_v33 = vor.u32 %v10604_v7, %v8551_v8 }
 0x123   :  { %5359 = vmatpush.bf16.msra.mxu2 %v8074_v48  ;;  %v10668_v21 = vld [vmem:[%s16570_s1 + $0xee4] sm:$0xf]  ;;  %v8682_v24 = vor.u32 %v10636_v14, %v8679_v15  ;;  %v8343_v42 = vld [vmem:[%s16570_s1 + $0xb50] sm:$0xf0] }
 0x124   :  { %5373 = vmatpush.bf16.msra.mxu3 %v8202_v53  ;;  %v10552_v37 = vld [vmem:[%s16570_s1 + $0xb44] sm:$0xf]  ;;  %v8810_v48 = vor.u32 %v10668_v21, %v8807_v27  ;;  %v8535_v50 = vld [vmem:[%s16570_s1 + $0xcd0] sm:$0xf0]  ;;  %v13089_v53 = vpop.f32.mrf.mxu0 }
 0x125   :  { %5384 = vmatpush.bf16.msrb.mxu0 %v8378_v57  ;;  %v10600_v45 = vld [vmem:[%s16570_s1 + $0xcc4] sm:$0xf]  ;;  %v8663_v12 = vld [vmem:[%s16570_s1 + $0xdd0] sm:$0xf0]  ;;  %16595 = vst [vmem:[#allocation12_spill] sm:$0xff] %v13089_v53  ;;  %v8346_v2 = vor.u32 %v10552_v37, %v8343_v42 }
 0x126   :  { %v10632_v52 = vld [vmem:[%s16570_s1 + $0xdc4] sm:$0xf]  ;;  %5346 = vmatpush.bf16.msra.mxu1 %v7930_v16  ;;  %v8791_v62 = vld [vmem:[%s16570_s1 + $0xed0] sm:$0xf0]  ;;  %v8538_v3 = vor.u32 %v10600_v45, %v8535_v50  ;;  %v13138_v50 = vpop.f32.mrf.mxu2 }
 0x127   :  { %5360 = vmatpush.bf16.msra.mxu2 %v8058_v20  ;;  %v10664_v57 = vld [vmem:[%s16570_s1 + $0xec4] sm:$0xf]  ;;  %v8666_v4 = vor.u32 %v10632_v52, %v8663_v12  ;;  %v8327_v8 = vld [vmem:[%s16570_s1 + $0xb30] sm:$0xf0]  ;;  %16597 = vst [vmem:[#allocation14_spill] sm:$0xff] %v13138_v50 }
 0x128   :  { %5374 = vmatpush.bf16.msra.mxu3 %v8186_v22  ;;  %v10548_v7 = vld [vmem:[%s16570_s1 + $0xb24] sm:$0xf]  ;;  %v8794_v15 = vor.u32 %v10664_v57, %v8791_v62  ;;  %v8519_v16 = vld [vmem:[%s16570_s1 + $0xcb0] sm:$0xf0] }
 0x129   :  { %5385 = vmatpush.bf16.msrb.mxu0 %v8362_v26  ;;  %v10596_v14 = vld [vmem:[%s16570_s1 + $0xca4] sm:$0xf]  ;;  %5347 = vmatmul.bf16.vlgmr.msra.gmra.mxu1 %v11755_v31  ;;  %v8647_v21 = vld [vmem:[%s16570_s1 + $0xdb0] sm:$0xf0]  ;;  %v8330_v26 = vor.u32 %v10548_v7, %v8327_v8 }
 0x12a   :  { %5395 = vmatpush.bf16.msrb.mxu1 %v8554_v33  ;;  %v10628_v20 = vld [vmem:[%s16570_s1 + $0xda4] sm:$0xf]  ;;  %5361 = vmatmul.bf16.vlgmr.msra.gmra.mxu2 %v11768_v36  ;;  %v8775_v22 = vld [vmem:[%s16570_s1 + $0xeb0] sm:$0xf0] }
 0x12b   :  { %5409 = vmatpush.bf16.msrb.mxu2 %v8682_v24  ;;  %5375 = vmatmul.bf16.vlgmr.msra.gmra.mxu3 %v11766_v35  ;;  %v10660_v27 = vld [vmem:[%s16570_s1 + $0xea4] sm:$0xf]  ;;  %v8522_v24 = vor.u32 %v10596_v14, %v8519_v16  ;;  %v8650_v37 = vor.u32 %v10628_v20, %v8647_v21  ;;  %v8311_v42 = vld [vmem:[%s16570_s1 + $0xb10] sm:$0xf0]  ;;  %v5124_v16 = vpop.f32.mrf.mxu1 }
 0x12c   :  { %5423 = vmatpush.bf16.msrb.mxu3 %v8810_v48  ;;  %v10544_v33 = vld [vmem:[%s16570_s1 + $0xb04] sm:$0xf]  ;;  %v8503_v48 = vld [vmem:[%s16570_s1 + $0xc90] sm:$0xf0]  ;;  %v8778_v52 = vor.u32 %v10660_v27, %v8775_v22 }
 0x12d   :  { %5386 = vmatpush.bf16.msrb.mxu0 %v8346_v2  ;;  %v10592_v45 = vld [vmem:[%s16570_s1 + $0xc84] sm:$0xf]  ;;  %v8631_v57 = vld [vmem:[%s16570_s1 + $0xd90] sm:$0xf0]  ;;  %v13149_v2 = vpop.f32.mrf.mxu3 }
 0x12e   :  { %5396 = vmatpush.bf16.msrb.mxu1 %v8538_v3  ;;  %v10624_v12 = vld [vmem:[%s16570_s1 + $0xd84] sm:$0xf]  ;;  %16598 = vst [vmem:[#allocation15_spill] sm:$0xff] %v13149_v2  ;;  %v5110_v3 = vpop.f32.mrf.mxu0  ;;  %v8935_v8 = vld [vmem:[%s16570_s1 + $0xff0] sm:$0xf0]  ;;  %v8506_v20 = vor.u32 %v10592_v45, %v8503_v48 }
 0x12f   :  { %5410 = vmatpush.bf16.msrb.mxu2 %v8666_v4  ;;  %v10656_v62 = vld [vmem:[%s16570_s1 + $0xe84] sm:$0xf]  ;;  %v8759_v4 = vld [vmem:[%s16570_s1 + $0xe90] sm:$0xf0]  ;;  %v5111_v14 = vadd.f32 %v5110_v3, %v13003_v11  ;;  %v8634_v21 = vor.u32 %v10624_v12, %v8631_v57  ;;  %v5138_v3 = vpop.f32.mrf.mxu2 }
 0x130   :  { %5424 = vmatpush.bf16.msrb.mxu3 %v8794_v15  ;;  %v10700_v7 = vld [vmem:[%s16570_s1 + $0xfe4] sm:$0xf]  ;;  %v8314_v15 = vor.u32 %v10544_v33, %v8311_v42  ;;  %v8487_v22 = vld [vmem:[%s16570_s1 + $0xc70] sm:$0xf0]  ;;  %v8762_v2 = vor.u32 %v10656_v62, %v8759_v4 }
 0x131   :  { %5387 = vmatpush.bf16.msrb.mxu0 %v8330_v26  ;;  %v10588_v27 = vld [vmem:[%s16570_s1 + $0xc64] sm:$0xf]  ;;  %v5125_v50 = vadd.f32 %v5124_v16, %v5111_v14  ;;  %v8938_v26 = vor.u32 %v10700_v7, %v8935_v8  ;;  %v8615_v33 = vld [vmem:[%s16570_s1 + $0xd70] sm:$0xf0] }
 0x132   :  { %5397 = vmatpush.bf16.msrb.mxu1 %v8522_v24  ;;  %v10620_v11 = vld [vmem:[%s16570_s1 + $0xd64] sm:$0xf]  ;;  %v8919_v45 = vld [vmem:[%s16570_s1 + $0xfd0] sm:$0xf0]  ;;  %v8490_v48 = vor.u32 %v10588_v27, %v8487_v22 }
 0x133   :  { %5411 = vmatpush.bf16.msrb.mxu2 %v8650_v37  ;;  %v10652_v24 = vld [vmem:[%s16570_s1 + $0xe64] sm:$0xf]  ;;  %v8743_v37 = vld [vmem:[%s16570_s1 + $0xe70] sm:$0xf0] }
 0x134   :  { %5425 = vmatpush.bf16.msrb.mxu3 %v8778_v52  ;;  %v10696_v42 = vld [vmem:[%s16570_s1 + $0xfc4] sm:$0xf]  ;;  %v8618_v52 = vor.u32 %v10620_v11, %v8615_v33  ;;  %v8471_v57 = vld [vmem:[%s16570_s1 + $0xc50] sm:$0xf0]  ;;  %v8746_v62 = vor.u32 %v10652_v24, %v8743_v37 }
 0x135   :  { %5388 = vmatpush.bf16.msrb.mxu0 %v8314_v15  ;;  %v10584_v12 = vld [vmem:[%s16570_s1 + $0xc44] sm:$0xf]  ;;  %v8922_v4 = vor.u32 %v10696_v42, %v8919_v45  ;;  %v8599_v8 = vld [vmem:[%s16570_s1 + $0xd50] sm:$0xf0]  ;;  %v5139_v15 = vadd.f32 %v5138_v3, %v5125_v50 }
 0x136   :  { %5398 = vmatpush.bf16.msrb.mxu1 %v8506_v20  ;;  %v10616_v7 = vld [vmem:[%s16570_s1 + $0xd44] sm:$0xf]  ;;  %v8727_v16 = vld [vmem:[%s16570_s1 + $0xe50] sm:$0xf0]  ;;  %v8474_v22 = vor.u32 %v10584_v12, %v8471_v57 }
 0x137   :  { %5412 = vmatpush.bf16.msrb.mxu2 %v8634_v21  ;;  %v10648_v14 = vld [vmem:[%s16570_s1 + $0xe44] sm:$0xf]  ;;  %v8903_v21 = vld [vmem:[%s16570_s1 + $0xfb0] sm:$0xf0] }
 0x138   :  { %5426 = vmatpush.bf16.msrb.mxu3 %v8762_v2  ;;  %5389 = vmatmul.bf16.vlgmr.msrb.gmra.mxu0 %v11776_v40  ;;  %v5152_v2 = vpop.f32.mrf.mxu3  ;;  %v10692_v20 = vld [vmem:[%s16570_s1 + $0xfa4] sm:$0xf]  ;;  %v8455_v11 = vld [vmem:[%s16570_s1 + $0xc30] sm:$0xf0]  ;;  %v8730_v33 = vor.u32 %v10648_v14, %v8727_v16 }
 0x139   :  { %5437 = vmatpush.bf16.msra.mxu0 %v8938_v26  ;;  %v13210_v27 = vadd.f32 %v5152_v2, %v5139_v15  ;;  %v8602_v26 = vor.u32 %v10616_v7, %v8599_v8  ;;  %v10580_v50 = vld [vmem:[%s16570_s1 + $0xc24] sm:$0xf]  ;;  %v8906_v24 = vor.u32 %v10692_v20, %v8903_v21  ;;  %v8583_v42 = vld [vmem:[%s16570_s1 + $0xd30] sm:$0xf0] }
 0x13a   :  { %5399 = vmatpush.bf16.msrb.mxu1 %v8490_v48  ;;  %v10612_v37 = vld [vmem:[%s16570_s1 + $0xd24] sm:$0xf]  ;;  %v8711_v48 = vld [vmem:[%s16570_s1 + $0xe30] sm:$0xf0]  ;;  %v8458_v57 = vor.u32 %v10580_v50, %v8455_v11 }
 0x13b   :  { %5413 = vmatpush.bf16.msrb.mxu2 %v8618_v52  ;;  %v10644_v45 = vld [vmem:[%s16570_s1 + $0xe24] sm:$0xf]  ;;  %v8887_v12 = vld [vmem:[%s16570_s1 + $0xf90] sm:$0xf0] }
 0x13c   :  { %5427 = vmatpush.bf16.msrb.mxu3 %v8746_v62  ;;  %v10688_v52 = vld [vmem:[%s16570_s1 + $0xf84] sm:$0xf]  ;;  %v8586_v62 = vor.u32 %v10612_v37, %v8583_v42  ;;  %v8714_v8 = vor.u32 %v10644_v45, %v8711_v48  ;;  %v8567_v15 = vld [vmem:[%s16570_s1 + $0xd10] sm:$0xf0] }
 0x13d   :  { %5438 = vmatpush.bf16.msra.mxu0 %v8922_v4  ;;  %v10576_v3 = vld [vmem:[%s16570_s1 + $0xc04] sm:$0xf]  ;;  %v8439_v4 = vld [vmem:[%s16570_s1 + $0xc10] sm:$0xf0]  ;;  %v8890_v14 = vor.u32 %v10688_v52, %v8887_v12 }
 0x13e   :  { %5400 = vmatpush.bf16.msrb.mxu1 %v8474_v22  ;;  %v10608_v7 = vld [vmem:[%s16570_s1 + $0xd04] sm:$0xf]  ;;  %v8695_v16 = vld [vmem:[%s16570_s1 + $0xe10] sm:$0xf0] }
 0x13f   :  { %5414 = vmatpush.bf16.msrb.mxu2 %v8602_v26  ;;  %v10640_v2 = vld [vmem:[%s16570_s1 + $0xe04] sm:$0xf]  ;;  %v8871_v21 = vld [vmem:[%s16570_s1 + $0xf70] sm:$0xf0] }
 0x140   :  { %5428 = vmatpush.bf16.msrb.mxu3 %v8730_v33  ;;  %v10684_v20 = vld [vmem:[%s16570_s1 + $0xf64] sm:$0xf]  ;;  %v9063_v26 = vld [vmem:[%s16570_s1 + $0x10f0] sm:$0xf0]  ;;  %v8442_v33 = vor.u32 %v10576_v3, %v8439_v4  ;;  %v8698_v45 = vor.u32 %v10640_v2, %v8695_v16 }
 0x141   :  { %5439 = vmatpush.bf16.msra.mxu0 %v8906_v24  ;;  %v10732_v22 = vld [vmem:[%s16570_s1 + $0x10e4] sm:$0xf]  ;;  %v9191_v11 = vld [vmem:[%s16570_s1 + $0x11f0] sm:$0xf0]  ;;  %v8570_v24 = vor.u32 %v10608_v7, %v8567_v15  ;;  %v8874_v48 = vor.u32 %v10684_v20, %v8871_v21  ;;  %v13296_v15 = vpop.f32.mrf.mxu0  ;;  %v13304_v20 = vpop.f32.mrf.mxu1 }
 0x142   :  { %v10764_v50 = vld [vmem:[%s16570_s1 + $0x11e4] sm:$0xf]  ;;  %5401 = vmatpush.bf16.msrb.mxu1 %v8458_v57  ;;  %v9319_v42 = vld [vmem:[%s16570_s1 + $0x12f0] sm:$0xf0]  ;;  %v9066_v52 = vor.u32 %v10732_v22, %v9063_v26  ;;  %16599 = vst [vmem:[#allocation16_spill] sm:$0xff] %v13296_v15 }
 0x143   :  { %5415 = vmatpush.bf16.msrb.mxu2 %v8586_v62  ;;  %v10796_v37 = vld [vmem:[%s16570_s1 + $0x12e4] sm:$0xf]  ;;  %v9194_v12 = vor.u32 %v10764_v50, %v9191_v11  ;;  %v8855_v62 = vld [vmem:[%s16570_s1 + $0xf50] sm:$0xf0]  ;;  %16600 = vst [vmem:[#allocation17_spill] sm:$0xff] %v13304_v20 }
 0x144   :  { %5429 = vmatpush.bf16.msrb.mxu3 %v8714_v8  ;;  %v10680_v57 = vld [vmem:[%s16570_s1 + $0xf44] sm:$0xf]  ;;  %v9322_v4 = vor.u32 %v10796_v37, %v9319_v42  ;;  %v9047_v7 = vld [vmem:[%s16570_s1 + $0x10d0] sm:$0xf0] }
 0x145   :  { %5440 = vmatpush.bf16.msra.mxu0 %v8890_v14  ;;  %v10728_v3 = vld [vmem:[%s16570_s1 + $0x10c4] sm:$0xf]  ;;  %v9175_v14 = vld [vmem:[%s16570_s1 + $0x11d0] sm:$0xf0]  ;;  %v8858_v21 = vor.u32 %v10680_v57, %v8855_v62 }
 0x146   :  { %v10760_v8 = vld [vmem:[%s16570_s1 + $0x11c4] sm:$0xf]  ;;  %5402 = vmatpush.bf16.msrb.mxu1 %v8442_v33  ;;  %v9303_v16 = vld [vmem:[%s16570_s1 + $0x12d0] sm:$0xf0]  ;;  %v9050_v22 = vor.u32 %v10728_v3, %v9047_v7 }
 0x147   :  { %5416 = vmatpush.bf16.msrb.mxu2 %v8570_v24  ;;  %v10792_v2 = vld [vmem:[%s16570_s1 + $0x12c4] sm:$0xf]  ;;  %v9178_v26 = vor.u32 %v10760_v8, %v9175_v14  ;;  %v8839_v11 = vld [vmem:[%s16570_s1 + $0xf30] sm:$0xf0]  ;;  %v13345_v14 = vpop.f32.mrf.mxu2 }
 0x148   :  { %5430 = vmatpush.bf16.msrb.mxu3 %v8698_v45  ;;  %v10676_v50 = vld [vmem:[%s16570_s1 + $0xf24] sm:$0xf]  ;;  %v9306_v24 = vor.u32 %v10792_v2, %v9303_v16  ;;  %v9031_v37 = vld [vmem:[%s16570_s1 + $0x10b0] sm:$0xf0]  ;;  %16601 = vst [vmem:[#allocation18_spill] sm:$0xff] %v13345_v14 }
 0x149   :  { %5441 = vmatpush.bf16.msra.mxu0 %v8874_v48  ;;  %v10724_v33 = vld [vmem:[%s16570_s1 + $0x10a4] sm:$0xf]  ;;  %5403 = vmatmul.bf16.vlgmr.msrb.gmra.mxu1 %v11983_v32  ;;  %v9159_v45 = vld [vmem:[%s16570_s1 + $0x11b0] sm:$0xf0] }
 0x14a   :  { %5451 = vmatpush.bf16.msra.mxu1 %v9066_v52  ;;  %v10756_v42 = vld [vmem:[%s16570_s1 + $0x11a4] sm:$0xf]  ;;  %5417 = vmatmul.bf16.vlgmr.msrb.gmra.mxu2 %v11996_v41  ;;  %v9287_v52 = vld [vmem:[%s16570_s1 + $0x12b0] sm:$0xf0]  ;;  %v9034_v62 = vor.u32 %v10724_v33, %v9031_v37 }
 0x14b   :  { %5465 = vmatpush.bf16.msra.mxu2 %v9194_v12  ;;  %5431 = vmatmul.bf16.vlgmr.msrb.gmra.mxu3 %v11994_v38  ;;  %v10788_v48 = vld [vmem:[%s16570_s1 + $0x12a4] sm:$0xf]  ;;  %v8842_v12 = vor.u32 %v10676_v50, %v8839_v11  ;;  %v9162_v3 = vor.u32 %v10756_v42, %v9159_v45  ;;  %v9015_v8 = vld [vmem:[%s16570_s1 + $0x1090] sm:$0xf0]  ;;  %v5166_v50 = vpop.f32.mrf.mxu0  ;;  %v5180_v45 = vpop.f32.mrf.mxu1 }
 0x14c   :  { %5479 = vmatpush.bf16.msra.mxu3 %v9322_v4  ;;  %v10672_v57 = vld [vmem:[%s16570_s1 + $0xf04] sm:$0xf]  ;;  %v8823_v4 = vld [vmem:[%s16570_s1 + $0xf10] sm:$0xf0]  ;;  %v9290_v2 = vor.u32 %v10788_v48, %v9287_v52  ;;  %v5167_v37 = vadd.f32 %v5166_v50, %v13210_v27 }
 0x14d   :  { %5442 = vmatpush.bf16.msra.mxu0 %v8858_v21  ;;  %v10720_v7 = vld [vmem:[%s16570_s1 + $0x1084] sm:$0xf]  ;;  %v9143_v21 = vld [vmem:[%s16570_s1 + $0x1190] sm:$0xf0]  ;;  %v8826_v42 = vor.u32 %v10672_v57, %v8823_v4 }
 0x14e   :  { %5452 = vmatpush.bf16.msra.mxu1 %v9050_v22  ;;  %v10752_v16 = vld [vmem:[%s16570_s1 + $0x1184] sm:$0xf]  ;;  %v9271_v11 = vld [vmem:[%s16570_s1 + $0x1290] sm:$0xf0]  ;;  %v9018_v48 = vor.u32 %v10720_v7, %v9015_v8  ;;  %v5181_v15 = vadd.f32 %v5180_v45, %v5167_v37 }
 0x14f   :  { %5466 = vmatpush.bf16.msra.mxu2 %v9178_v26  ;;  %v10784_v22 = vld [vmem:[%s16570_s1 + $0x1284] sm:$0xf]  ;;  %v13356_v26 = vpop.f32.mrf.mxu3  ;;  %v9146_v52 = vor.u32 %v10752_v16, %v9143_v21  ;;  %v8999_v14 = vld [vmem:[%s16570_s1 + $0x1070] sm:$0xf0]  ;;  %v5194_v50 = vpop.f32.mrf.mxu2 }
 0x150   :  { %5480 = vmatpush.bf16.msra.mxu3 %v9306_v24  ;;  %16602 = vst [vmem:[#allocation19_spill] sm:$0xff] %v13356_v26  ;;  %v10828_v33 = vld [vmem:[%s16570_s1 + $0x13e4] sm:$0xf]  ;;  %v9447_v24 = vld [vmem:[%s16570_s1 + $0x13f0] sm:$0xf0]  ;;  %v9274_v20 = vor.u32 %v10784_v22, %v9271_v11 }
 0x151   :  { %5443 = vmatpush.bf16.msra.mxu0 %v8842_v12  ;;  %v10716_v26 = vld [vmem:[%s16570_s1 + $0x1064] sm:$0xf]  ;;  %v9450_v12 = vor.u32 %v10828_v33, %v9447_v24  ;;  %v9127_v57 = vld [vmem:[%s16570_s1 + $0x1170] sm:$0xf0]  ;;  %v5195_v24 = vadd.f32 %v5194_v50, %v5181_v15 }
 0x152   :  { %5453 = vmatpush.bf16.msra.mxu1 %v9034_v62  ;;  %v10748_v27 = vld [vmem:[%s16570_s1 + $0x1164] sm:$0xf]  ;;  %v9431_v7 = vld [vmem:[%s16570_s1 + $0x13d0] sm:$0xf0]  ;;  %v9002_v8 = vor.u32 %v10716_v26, %v8999_v14 }
 0x153   :  { %5467 = vmatpush.bf16.msra.mxu2 %v9162_v3  ;;  %v10780_v62 = vld [vmem:[%s16570_s1 + $0x1264] sm:$0xf]  ;;  %v9255_v3 = vld [vmem:[%s16570_s1 + $0x1270] sm:$0xf0] }
 0x154   :  { %5481 = vmatpush.bf16.msra.mxu3 %v9290_v2  ;;  %v10824_v4 = vld [vmem:[%s16570_s1 + $0x13c4] sm:$0xf]  ;;  %v9130_v2 = vor.u32 %v10748_v27, %v9127_v57  ;;  %v8983_v21 = vld [vmem:[%s16570_s1 + $0x1050] sm:$0xf0]  ;;  %v9258_v22 = vor.u32 %v10780_v62, %v9255_v3 }
 0x155   :  { %5444 = vmatpush.bf16.msra.mxu0 %v8826_v42  ;;  %v10712_v16 = vld [vmem:[%s16570_s1 + $0x1044] sm:$0xf]  ;;  %v9434_v11 = vor.u32 %v10824_v4, %v9431_v7  ;;  %v9111_v14 = vld [vmem:[%s16570_s1 + $0x1150] sm:$0xf0] }
 0x156   :  { %5454 = vmatpush.bf16.msra.mxu1 %v9018_v48  ;;  %v10744_v33 = vld [vmem:[%s16570_s1 + $0x1144] sm:$0xf]  ;;  %v9239_v42 = vld [vmem:[%s16570_s1 + $0x1250] sm:$0xf0] }
 0x157   :  { %5468 = vmatpush.bf16.msra.mxu2 %v9146_v52  ;;  %v10776_v26 = vld [vmem:[%s16570_s1 + $0x1244] sm:$0xf]  ;;  %v5208_v37 = vpop.f32.mrf.mxu3  ;;  %v9415_v48 = vld [vmem:[%s16570_s1 + $0x13b0] sm:$0xf0]  ;;  %v9114_v15 = vor.u32 %v10744_v33, %v9111_v14 }
 0x158   :  { %5482 = vmatpush.bf16.msra.mxu3 %v9274_v20  ;;  %5445 = vmatmul.bf16.vlgmr.msra.gmra.mxu0 %v12004_v46  ;;  %v13408_v20 = vpop.f32.mrf.mxu0  ;;  %v10820_v45 = vld [vmem:[%s16570_s1 + $0x13a4] sm:$0xf]  ;;  %v5209_v52 = vadd.f32 %v5208_v37, %v5195_v24  ;;  %v8967_v57 = vld [vmem:[%s16570_s1 + $0x1030] sm:$0xf0]  ;;  %v9242_v62 = vor.u32 %v10776_v26, %v9239_v42 }
 0x159   :  { %5493 = vmatpush.bf16.msrb.mxu0 %v9450_v12  ;;  %16603 = vst [vmem:[#allocation20_spill] sm:$0xff] %v13408_v20  ;;  %v8986_v12 = vor.u32 %v10712_v16, %v8983_v21  ;;  %v10708_v27 = vld [vmem:[%s16570_s1 + $0x1024] sm:$0xf]  ;;  %v9418_v3 = vor.u32 %v10820_v45, %v9415_v48  ;;  %v9095_v7 = vld [vmem:[%s16570_s1 + $0x1130] sm:$0xf0] }
 0x15a   :  { %5455 = vmatpush.bf16.msra.mxu1 %v9002_v8  ;;  %v10740_v4 = vld [vmem:[%s16570_s1 + $0x1124] sm:$0xf]  ;;  %v9399_v21 = vld [vmem:[%s16570_s1 + $0x1390] sm:$0xf0] }
 0x15b   :  { %5469 = vmatpush.bf16.msra.mxu2 %v9130_v2  ;;  %v10772_v8 = vld [vmem:[%s16570_s1 + $0x1224] sm:$0xf]  ;;  %v9223_v2 = vld [vmem:[%s16570_s1 + $0x1230] sm:$0xf0]  ;;  %v9098_v50 = vor.u32 %v10740_v4, %v9095_v7 }
 0x15c   :  { %5483 = vmatpush.bf16.msra.mxu3 %v9258_v22  ;;  %v10816_v16 = vld [vmem:[%s16570_s1 + $0x1384] sm:$0xf]  ;;  %v8970_v22 = vor.u32 %v10708_v27, %v8967_v57  ;;  %v8951_v33 = vld [vmem:[%s16570_s1 + $0x1010] sm:$0xf0]  ;;  %v9226_v26 = vor.u32 %v10772_v8, %v9223_v2 }
 0x15d   :  { %5494 = vmatpush.bf16.msrb.mxu0 %v9434_v11  ;;  %v10704_v11 = vld [vmem:[%s16570_s1 + $0x1004] sm:$0xf]  ;;  %v9402_v24 = vor.u32 %v10816_v16, %v9399_v21  ;;  %v9079_v37 = vld [vmem:[%s16570_s1 + $0x1110] sm:$0xf0] }
 0x15e   :  { %5456 = vmatpush.bf16.msra.mxu1 %v8986_v12  ;;  %v10736_v14 = vld [vmem:[%s16570_s1 + $0x1104] sm:$0xf]  ;;  %v9207_v45 = vld [vmem:[%s16570_s1 + $0x1210] sm:$0xf0]  ;;  %v8954_v7 = vor.u32 %v10704_v11, %v8951_v33 }
 0x15f   :  { %5470 = vmatpush.bf16.msra.mxu2 %v9114_v15  ;;  %v10768_v42 = vld [vmem:[%s16570_s1 + $0x1204] sm:$0xf]  ;;  %v9383_v12 = vld [vmem:[%s16570_s1 + $0x1370] sm:$0xf0]  ;;  %v9082_v8 = vor.u32 %v10736_v14, %v9079_v37 }
 0x160   :  { %5484 = vmatpush.bf16.msra.mxu3 %v9242_v62  ;;  %v10812_v48 = vld [vmem:[%s16570_s1 + $0x1364] sm:$0xf]  ;;  %v5222_v27 = vpop.f32.mrf.mxu0  ;;  %v9575_v57 = vld [vmem:[%s16570_s1 + $0x14f0] sm:$0xf0]  ;;  %v9210_v21 = vor.u32 %v10768_v42, %v9207_v45 }
 0x161   :  { %5495 = vmatpush.bf16.msrb.mxu0 %v9418_v3  ;;  %v10860_v15 = vld [vmem:[%s16570_s1 + $0x14e4] sm:$0xf]  ;;  %v9703_v3 = vld [vmem:[%s16570_s1 + $0x15f0] sm:$0xf0]  ;;  %v13479_v4 = vadd.f32 %v5222_v27, %v5209_v52  ;;  %v9386_v20 = vor.u32 %v10812_v48, %v9383_v12 }
 0x162   :  { %v10892_v62 = vld [vmem:[%s16570_s1 + $0x15e4] sm:$0xf]  ;;  %5457 = vmatpush.bf16.msra.mxu1 %v8970_v22  ;;  %v9831_v16 = vld [vmem:[%s16570_s1 + $0x16f0] sm:$0xf0]  ;;  %v9578_v63 = vor.u32 %v10860_v15, %v9575_v57 }
 0x163   :  { %5471 = vmatpush.bf16.msra.mxu2 %v9098_v50  ;;  %16604 = vst [vmem:[#allocation21_spill] sm:$0xff] %v13479_v4  ;;  %v10924_v2 = vld [vmem:[%s16570_s1 + $0x16e4] sm:$0xf]  ;;  %v9706_v53 = vor.u32 %v10892_v62, %v9703_v3  ;;  %v9367_v22 = vld [vmem:[%s16570_s1 + $0x1350] sm:$0xf0] }
 0x164   :  { %5485 = vmatpush.bf16.msra.mxu3 %v9226_v26  ;;  %v10808_v52 = vld [vmem:[%s16570_s1 + $0x1344] sm:$0xf]  ;;  %v9834_v11 = vor.u32 %v10924_v2, %v9831_v16  ;;  %v9559_v33 = vld [vmem:[%s16570_s1 + $0x14d0] sm:$0xf0] }
 0x165   :  { %5496 = vmatpush.bf16.msrb.mxu0 %v9402_v24  ;;  %v10856_v50 = vld [vmem:[%s16570_s1 + $0x14c4] sm:$0xf]  ;;  %v9687_v26 = vld [vmem:[%s16570_s1 + $0x15d0] sm:$0xf0]  ;;  %v9370_v42 = vor.u32 %v10808_v52, %v9367_v22 }
 0x166   :  { %v10888_v14 = vld [vmem:[%s16570_s1 + $0x15c4] sm:$0xf]  ;;  %5458 = vmatpush.bf16.msra.mxu1 %v8954_v7  ;;  %v9815_v37 = vld [vmem:[%s16570_s1 + $0x16d0] sm:$0xf0]  ;;  %v9562_v45 = vor.u32 %v10856_v50, %v9559_v33  ;;  %v13550_v50 = vpop.f32.mrf.mxu1 }
 0x167   :  { %5472 = vmatpush.bf16.msra.mxu2 %v9082_v8  ;;  %v10920_v24 = vld [vmem:[%s16570_s1 + $0x16c4] sm:$0xf]  ;;  %v9690_v48 = vor.u32 %v10888_v14, %v9687_v26  ;;  %v9351_v15 = vld [vmem:[%s16570_s1 + $0x1330] sm:$0xf0]  ;;  %16605 = vst [vmem:[#allocation22_spill] sm:$0xff] %v13550_v50 }
 0x168   :  { %5486 = vmatpush.bf16.msra.mxu3 %v9210_v21  ;;  %v10804_v12 = vld [vmem:[%s16570_s1 + $0x1324] sm:$0xf]  ;;  %v9671_v57 = vld [vmem:[%s16570_s1 + $0x15b0] sm:$0xf0] }
 0x169   :  { %5497 = vmatpush.bf16.msrb.mxu0 %v9386_v20  ;;  %v10852_v27 = vld [vmem:[%s16570_s1 + $0x14a4] sm:$0xf]  ;;  %5459 = vmatmul.bf16.vlgmr.msra.gmra.mxu1 %v12211_v51  ;;  %v9818_v20 = vor.u32 %v10920_v24, %v9815_v37  ;;  %v9799_v3 = vld [vmem:[%s16570_s1 + $0x16b0] sm:$0xf0]  ;;  %v9354_v7 = vor.u32 %v10804_v12, %v9351_v15 }
 0x16a   :  { %5507 = vmatpush.bf16.msrb.mxu1 %v9578_v63  ;;  %v10884_v63 = vld [vmem:[%s16570_s1 + $0x15a4] sm:$0xf]  ;;  %5473 = vmatmul.bf16.vlgmr.msra.gmra.mxu2 %v12224_v56  ;;  %v9335_v21 = vld [vmem:[%s16570_s1 + $0x1310] sm:$0xf0] }
 0x16b   :  { %5521 = vmatpush.bf16.msrb.mxu2 %v9706_v53  ;;  %v9543_v53 = vld [vmem:[%s16570_s1 + $0x14b0] sm:$0xf0]  ;;  %5487 = vmatmul.bf16.vlgmr.msra.gmra.mxu3 %v12222_v55  ;;  %v10916_v62 = vld [vmem:[%s16570_s1 + $0x16a4] sm:$0xf]  ;;  %v9674_v16 = vor.u32 %v10884_v63, %v9671_v57 }
 0x16c   :  { %5535 = vmatpush.bf16.msrb.mxu3 %v9834_v11  ;;  %v10800_v8 = vld [vmem:[%s16570_s1 + $0x1304] sm:$0xf]  ;;  %v9546_v2 = vor.u32 %v10852_v27, %v9543_v53  ;;  %v9527_v22 = vld [vmem:[%s16570_s1 + $0x1490] sm:$0xf0]  ;;  %v13552_v11 = vpop.f32.mrf.mxu2  ;;  %v9802_v33 = vor.u32 %v10916_v62, %v9799_v3 }
 0x16d   :  { %5498 = vmatpush.bf16.msrb.mxu0 %v9370_v42  ;;  %v10848_v52 = vld [vmem:[%s16570_s1 + $0x1484] sm:$0xf]  ;;  %16606 = vst [vmem:[#allocation23_spill] sm:$0xff] %v13552_v11  ;;  %v9655_v26 = vld [vmem:[%s16570_s1 + $0x1590] sm:$0xf0]  ;;  %v9338_v12 = vor.u32 %v10800_v8, %v9335_v21  ;;  %v13598_v21 = vpop.f32.mrf.mxu0 }
 0x16e   :  { %5508 = vmatpush.bf16.msrb.mxu1 %v9562_v45  ;;  %v10880_v14 = vld [vmem:[%s16570_s1 + $0x1584] sm:$0xf]  ;;  %v9783_v37 = vld [vmem:[%s16570_s1 + $0x1690] sm:$0xf0]  ;;  %v9530_v15 = vor.u32 %v10848_v52, %v9527_v22  ;;  %16608 = vst [vmem:[#allocation25_spill] sm:$0xff] %v13598_v21 }
 0x16f   :  { %5522 = vmatpush.bf16.msrb.mxu2 %v9690_v48  ;;  %v10912_v24 = vld [vmem:[%s16570_s1 + $0x1684] sm:$0xf]  ;;  %v9959_v45 = vld [vmem:[%s16570_s1 + $0x17f0] sm:$0xf0]  ;;  %v13572_v48 = vpop.f32.mrf.mxu3  ;;  %v9658_v27 = vor.u32 %v10880_v14, %v9655_v26 }
 0x170   :  { %5536 = vmatpush.bf16.msrb.mxu3 %v9818_v20  ;;  %v10956_v42 = vld [vmem:[%s16570_s1 + $0x17e4] sm:$0xf]  ;;  %16607 = vst [vmem:[#allocation24_spill] sm:$0xff] %v13572_v48  ;;  %v9511_v53 = vld [vmem:[%s16570_s1 + $0x1470] sm:$0xf0]  ;;  %v9786_v63 = vor.u32 %v10912_v24, %v9783_v37 }
 0x171   :  { %5499 = vmatpush.bf16.msrb.mxu0 %v9354_v7  ;;  %v10844_v20 = vld [vmem:[%s16570_s1 + $0x1464] sm:$0xf]  ;;  %v9962_v57 = vor.u32 %v10956_v42, %v9959_v45  ;;  %v9639_v3 = vld [vmem:[%s16570_s1 + $0x1570] sm:$0xf0] }
 0x172   :  { %5509 = vmatpush.bf16.msrb.mxu1 %v9546_v2  ;;  %v10876_v62 = vld [vmem:[%s16570_s1 + $0x1564] sm:$0xf]  ;;  %v9767_v8 = vld [vmem:[%s16570_s1 + $0x1670] sm:$0xf0]  ;;  %v9514_v52 = vor.u32 %v10844_v20, %v9511_v53 }
 0x173   :  { %5523 = vmatpush.bf16.msrb.mxu2 %v9674_v16  ;;  %v10908_v7 = vld [vmem:[%s16570_s1 + $0x1664] sm:$0xf]  ;;  %v9943_v16 = vld [vmem:[%s16570_s1 + $0x17d0] sm:$0xf0]  ;;  %v9642_v22 = vor.u32 %v10876_v62, %v9639_v3 }
 0x174   :  { %5537 = vmatpush.bf16.msrb.mxu3 %v9802_v33  ;;  %v10952_v2 = vld [vmem:[%s16570_s1 + $0x17c4] sm:$0xf]  ;;  %v9495_v14 = vld [vmem:[%s16570_s1 + $0x1450] sm:$0xf0]  ;;  %v9770_v26 = vor.u32 %v10908_v7, %v9767_v8 }
 0x175   :  { %5500 = vmatpush.bf16.msrb.mxu0 %v9338_v12  ;;  %v10840_v33 = vld [vmem:[%s16570_s1 + $0x1444] sm:$0xf]  ;;  %v9946_v24 = vor.u32 %v10952_v2, %v9943_v16  ;;  %v9623_v42 = vld [vmem:[%s16570_s1 + $0x1550] sm:$0xf0]  ;;  %v5236_v12 = vpop.f32.mrf.mxu1 }
 0x176   :  { %5510 = vmatpush.bf16.msrb.mxu1 %v9530_v15  ;;  %v10872_v37 = vld [vmem:[%s16570_s1 + $0x1544] sm:$0xf]  ;;  %v5250_v15 = vpop.f32.mrf.mxu2  ;;  %v9927_v53 = vld [vmem:[%s16570_s1 + $0x17b0] sm:$0xf0]  ;;  %v9498_v62 = vor.u32 %v10840_v33, %v9495_v14 }
 0x177   :  { %5524 = vmatpush.bf16.msrb.mxu2 %v9658_v27  ;;  %v10904_v45 = vld [vmem:[%s16570_s1 + $0x1644] sm:$0xf]  ;;  %v9751_v27 = vld [vmem:[%s16570_s1 + $0x1650] sm:$0xf0]  ;;  %v9626_v3 = vor.u32 %v10872_v37, %v9623_v42 }
 0x178   :  { %5538 = vmatpush.bf16.msrb.mxu3 %v9786_v63  ;;  %5501 = vmatmul.bf16.vlgmr.msrb.gmra.mxu0 %v12232_v60  ;;  %v10948_v20 = vld [vmem:[%s16570_s1 + $0x17a4] sm:$0xf]  ;;  %v5251_v63 = vadd.f32 %v5250_v15, %v5236_v12  ;;  %v9479_v8 = vld [vmem:[%s16570_s1 + $0x1430] sm:$0xf0]  ;;  %v9754_v16 = vor.u32 %v10904_v45, %v9751_v27  ;;  %v5278_v27 = vpop.f32.mrf.mxu0 }
 0x179   :  { %5549 = vmatpush.bf16.msra.mxu0 %v9962_v57  ;;  %v5264_v57 = vpop.f32.mrf.mxu3  ;;  %v10836_v7 = vld [vmem:[%s16570_s1 + $0x1424] sm:$0xf]  ;;  %v9930_v4 = vor.u32 %v10948_v20, %v9927_v53  ;;  %v9735_v14 = vld [vmem:[%s16570_s1 + $0x1630] sm:$0xf0] }
 0x17a   :  { %5511 = vmatpush.bf16.msrb.mxu1 %v9514_v52  ;;  %v5265_v2 = vadd.f32 %v5264_v57, %v5251_v63  ;;  %v10868_v52 = vld [vmem:[%s16570_s1 + $0x1524] sm:$0xf]  ;;  %v9482_v37 = vor.u32 %v10836_v7, %v9479_v8  ;;  %v9463_v12 = vld [vmem:[%s16570_s1 + $0x1410] sm:$0xf0] }
 0x17b   :  { %5525 = vmatpush.bf16.msrb.mxu2 %v9642_v22  ;;  %v9607_v22 = vld [vmem:[%s16570_s1 + $0x1530] sm:$0xf0]  ;;  %v10900_v33 = vld [vmem:[%s16570_s1 + $0x1624] sm:$0xf] }
 0x17c   :  { %5539 = vmatpush.bf16.msrb.mxu3 %v9770_v26  ;;  %v10944_v26 = vld [vmem:[%s16570_s1 + $0x1784] sm:$0xf]  ;;  %v9610_v42 = vor.u32 %v10868_v52, %v9607_v22  ;;  %v9738_v20 = vor.u32 %v10900_v33, %v9735_v14  ;;  %v9591_v63 = vld [vmem:[%s16570_s1 + $0x1510] sm:$0xf0]  ;;  %v10223_v52 = vld [vmem:[%s16570_s1 + $0xf4] sm:$0xf0] }
 0x17d   :  { %5550 = vmatpush.bf16.msra.mxu0 %v9946_v24  ;;  %v9911_v24 = vld [vmem:[%s16570_s1 + $0x1790] sm:$0xf0]  ;;  %v10832_v45 = vld [vmem:[%s16570_s1 + $0x1404] sm:$0xf]  ;;  %v7149_v14 = vld [vmem:[%s16570_s1 + $0x1e8] sm:$0xf]  ;;  %v13693_v11 = vpop.f32.mrf.mxu1 }
 0x17e   :  { %5512 = vmatpush.bf16.msrb.mxu1 %v9498_v62  ;;  %v10864_v15 = vld [vmem:[%s16570_s1 + $0x1504] sm:$0xf]  ;;  %v9914_v53 = vor.u32 %v10944_v26, %v9911_v24  ;;  %v9719_v62 = vld [vmem:[%s16570_s1 + $0x1610] sm:$0xf0]  ;;  %v9466_v22 = vor.u32 %v10832_v45, %v9463_v12  ;;  %v10255_v26 = vld [vmem:[%s16570_s1 + $0x1f4] sm:$0xf0] }
 0x17f   :  { %5526 = vmatpush.bf16.msrb.mxu2 %v9626_v3  ;;  %v10896_v57 = vld [vmem:[%s16570_s1 + $0x1604] sm:$0xf]  ;;  %v13667_v3 = vadd.f32 %v5278_v27, %v5265_v2  ;;  %v9895_v7 = vld [vmem:[%s16570_s1 + $0x1770] sm:$0xf0]  ;;  %v7021_v2 = vld [vmem:[%s16570_s1 + $0xe8] sm:$0xf]  ;;  %v9594_v33 = vor.u32 %v10864_v15, %v9591_v63  ;;  %v7150_v12 = vor.u32 %v10255_v26, %v7149_v14 }
 0x180   :  { %5540 = vmatpush.bf16.msrb.mxu3 %v9754_v16  ;;  %v10972_v8 = vld [vmem:[%s16570_s1 + $0x1864] sm:$0xf]  ;;  %v10023_v16 = vld [vmem:[%s16570_s1 + $0x1870] sm:$0xf0]  ;;  %v9722_v24 = vor.u32 %v10896_v57, %v9719_v62  ;;  %v7022_v48 = vor.u32 %v10223_v52, %v7021_v2  ;;  %v7133_v63 = vld [vmem:[%s16570_s1 + $0x1c8] sm:$0xf]  ;;  %v13787_v54 = vpop.f32.mrf.mxu0 }
 0x181   :  { %5551 = vmatpush.bf16.msra.mxu0 %v9930_v4  ;;  %v10940_v4 = vld [vmem:[%s16570_s1 + $0x1764] sm:$0xf]  ;;  %v10026_v21 = vor.u32 %v10972_v8, %v10023_v16  ;;  %v10007_v15 = vld [vmem:[%s16570_s1 + $0x1850] sm:$0xf0]  ;;  %v10251_v57 = vld [vmem:[%s16570_s1 + $0x1d4] sm:$0xf0] }
 0x182   :  { %5513 = vmatpush.bf16.msrb.mxu1 %v9482_v37  ;;  %v9898_v27 = vor.u32 %v10940_v4, %v9895_v7  ;;  %v10936_v37 = vld [vmem:[%s16570_s1 + $0x1744] sm:$0xf]  ;;  %v9863_v16 = vld [vmem:[%s16570_s1 + $0x1730] sm:$0xf0]  ;;  %v7134_v52 = vor.u32 %v10251_v57, %v7133_v63  ;;  %v10247_v14 = vld [vmem:[%s16570_s1 + $0x1b4] sm:$0xf0] }
 0x183   :  { %5527 = vmatpush.bf16.msrb.mxu2 %v9610_v42  ;;  %v9879_v42 = vld [vmem:[%s16570_s1 + $0x1750] sm:$0xf0]  ;;  %v10968_v45 = vld [vmem:[%s16570_s1 + $0x1844] sm:$0xf]  ;;  %v6973_v63 = vld [vmem:[%s16570_s1 + $0x88] sm:$0xf] }
 0x184   :  { %5541 = vmatpush.bf16.msrb.mxu3 %v9738_v20  ;;  %v7005_v20 = vld [vmem:[%s16570_s1 + $0xc8] sm:$0xf]  ;;  %v9882_v62 = vor.u32 %v10936_v37, %v9879_v42  ;;  %v10010_v4 = vor.u32 %v10968_v45, %v10007_v15  ;;  %v10932_v8 = vld [vmem:[%s16570_s1 + $0x1724] sm:$0xf]  ;;  %v9847_v45 = vld [vmem:[%s16570_s1 + $0x1710] sm:$0xf0] }
 0x185   :  { %5552 = vmatpush.bf16.msra.mxu0 %v9914_v53  ;;  %v10219_v53 = vld [vmem:[%s16570_s1 + $0xd4] sm:$0xf0]  ;;  %v10964_v2 = vld [vmem:[%s16570_s1 + $0x1824] sm:$0xf]  ;;  %v9866_v26 = vor.u32 %v10932_v8, %v9863_v16  ;;  %v9975_v15 = vld [vmem:[%s16570_s1 + $0x1810] sm:$0xf0] }
 0x186   :  { %5514 = vmatpush.bf16.msrb.mxu1 %v9466_v22  ;;  %v7006_v7 = vor.u32 %v10219_v53, %v7005_v20  ;;  %v10215_v22 = vld [vmem:[%s16570_s1 + $0xb4] sm:$0xf0]  ;;  %v13760_v53 = vpop.f32.mrf.mxu3  ;;  %v7277_v8 = vld [vmem:[%s16570_s1 + $0x2e8] sm:$0xf] }
 0x187   :  { %5528 = vmatpush.bf16.msrb.mxu2 %v9594_v33  ;;  %v7117_v33 = vld [vmem:[%s16570_s1 + $0x1a8] sm:$0xf]  ;;  %v10211_v57 = vld [vmem:[%s16570_s1 + $0x94] sm:$0xf0] }
 0x188   :  { %5542 = vmatpush.bf16.msrb.mxu3 %v9722_v24  ;;  %v13746_v24 = vpop.f32.mrf.mxu2  ;;  %v7118_v20 = vor.u32 %v10247_v14, %v7117_v33  ;;  %v10287_v16 = vld [vmem:[%s16570_s1 + $0x2f4] sm:$0xf0]  ;;  %v6974_v33 = vor.u32 %v10211_v57, %v6973_v63 }
 0x189   :  { %5553 = vmatpush.bf16.msra.mxu0 %v9898_v27  ;;  %5515 = vmatmul.bf16.vlgmr.msrb.gmra.mxu1 %v12443_v19  ;;  %v10928_v27 = vld [vmem:[%s16570_s1 + $0x1704] sm:$0xf]  ;;  %v7278_v50 = vor.u32 %v10287_v16, %v7277_v8  ;;  %v10203_v8 = vld [vmem:[%s16570_s1 + $0x54] sm:$0xf0]  ;;  %v7069_v16 = vld [vmem:[%s16570_s1 + $0x148] sm:$0xf] }
 0x18a   :  { %5567 = vmatpush.bf16.msra.mxu1 %v10026_v21  ;;  %v6989_v21 = vld [vmem:[%s16570_s1 + $0xa8] sm:$0xf]  ;;  %5529 = vmatmul.bf16.vlgmr.msrb.gmra.mxu2 %v12456_v25 }
 0x18b   :  { %5577 = vmatpush.bf16.msra.mxu2 %v7022_v48  ;;  %v9991_v48 = vld [vmem:[%s16570_s1 + $0x1830] sm:$0xf0]  ;;  %5543 = vmatmul.bf16.vlgmr.msrb.gmra.mxu3 %v12454_v23  ;;  %v6990_v42 = vor.u32 %v10215_v22, %v6989_v21  ;;  %v10319_v21 = vld [vmem:[%s16570_s1 + $0x3f4] sm:$0xf0] }
 0x18c   :  { %5591 = vmatpush.bf16.msra.mxu3 %v7150_v12  ;;  %v9994_v37 = vor.u32 %v10964_v2, %v9991_v48  ;;  %v10960_v12 = vld [vmem:[%s16570_s1 + $0x1804] sm:$0xf]  ;;  %v7405_v48 = vld [vmem:[%s16570_s1 + $0x3e8] sm:$0xf] }
 0x18d   :  { %5554 = vmatpush.bf16.msra.mxu0 %v9882_v62  ;;  %v7101_v62 = vld [vmem:[%s16570_s1 + $0x188] sm:$0xf]  ;;  %v9978_v22 = vor.u32 %v10960_v12, %v9975_v15  ;;  %v10283_v12 = vld [vmem:[%s16570_s1 + $0x2d4] sm:$0xf0] }
 0x18e   :  { %5568 = vmatpush.bf16.msra.mxu1 %v10010_v4  ;;  %v5292_v4 = vpop.f32.mrf.mxu1  ;;  %v7389_v15 = vld [vmem:[%s16570_s1 + $0x3c8] sm:$0xf] }
 0x18f   :  { %5578 = vmatpush.bf16.msra.mxu2 %v7006_v7  ;;  %v10243_v7 = vld [vmem:[%s16570_s1 + $0x194] sm:$0xf0]  ;;  %v5293_v2 = vadd.f32 %v5292_v4, %v13667_v3  ;;  %v6957_v3 = vld [vmem:[%s16570_s1 + $0x68] sm:$0xf] }
 0x190   :  { %5592 = vmatpush.bf16.msra.mxu3 %v7134_v52  ;;  %v9850_v52 = vor.u32 %v10928_v27, %v9847_v45  ;;  %v7102_v14 = vor.u32 %v10243_v7, %v7101_v62  ;;  %v7085_v27 = vld [vmem:[%s16570_s1 + $0x168] sm:$0xf]  ;;  %v5306_v62 = vpop.f32.mrf.mxu2 }
 0x191   :  { %5555 = vmatpush.bf16.msra.mxu0 %v9866_v26  ;;  %v10207_v26 = vld [vmem:[%s16570_s1 + $0x74] sm:$0xf0]  ;;  %v7261_v45 = vld [vmem:[%s16570_s1 + $0x2c8] sm:$0xf] }
 0x192   :  { %5569 = vmatpush.bf16.msra.mxu1 %v9994_v37  ;;  %v7406_v37 = vor.u32 %v10319_v21, %v7405_v48  ;;  %v6958_v63 = vor.u32 %v10207_v26, %v6957_v3  ;;  %v7262_v4 = vor.u32 %v10283_v12, %v7261_v45  ;;  %v6941_v7 = vld [vmem:[%s16570_s1 + $0x48] sm:$0xf]  ;;  %v10235_v48 = vld [vmem:[%s16570_s1 + $0x154] sm:$0xf0] }
 0x193   :  { %5579 = vmatpush.bf16.msra.mxu2 %v6990_v42  ;;  %v10239_v42 = vld [vmem:[%s16570_s1 + $0x174] sm:$0xf0]  ;;  %v7245_v21 = vld [vmem:[%s16570_s1 + $0x2a8] sm:$0xf]  ;;  %v6942_v26 = vor.u32 %v10203_v8, %v6941_v7 }
 0x194   :  { %5593 = vmatpush.bf16.msra.mxu3 %v7118_v20  ;;  %v10315_v20 = vld [vmem:[%s16570_s1 + $0x3d4] sm:$0xf0]  ;;  %v7086_v57 = vor.u32 %v10239_v42, %v7085_v27  ;;  %v7070_v27 = vor.u32 %v10235_v48, %v7069_v16  ;;  %v6925_v42 = vld [vmem:[%s16570_s1 + $0x28] sm:$0xf] }
 0x195   :  { %5556 = vmatpush.bf16.msra.mxu0 %v9850_v52  ;;  %v5307_v52 = vadd.f32 %v5306_v62, %v5293_v2  ;;  %v10311_v2 = vld [vmem:[%s16570_s1 + $0x3b4] sm:$0xf0]  ;;  %v7053_v12 = vld [vmem:[%s16570_s1 + $0x128] sm:$0xf]  ;;  %v5334_v62 = vpop.f32.mrf.mxu0 }
 0x196   :  { %5570 = vmatpush.bf16.msra.mxu1 %v9978_v22  ;;  %v10279_v22 = vld [vmem:[%s16570_s1 + $0x2b4] sm:$0xf0] }
 0x197   :  { %5580 = vmatpush.bf16.msra.mxu2 %v6974_v33  ;;  %v5320_v33 = vpop.f32.mrf.mxu3  ;;  %v10199_v45 = vld [vmem:[%s16570_s1 + $0x34] sm:$0xf0] }
 0x198   :  { %5594 = vmatpush.bf16.msra.mxu3 %v7102_v14  ;;  %5557 = vmatmul.bf16.vlgmr.msra.gmra.mxu0 %v12466_v29  ;;  %v7373_v14 = vld [vmem:[%s16570_s1 + $0x3a8] sm:$0xf]  ;;  %v5321_v3 = vadd.f32 %v5320_v33, %v5307_v52  ;;  %v10307_v7 = vld [vmem:[%s16570_s1 + $0x394] sm:$0xf0]  ;;  %v6926_v16 = vor.u32 %v10199_v45, %v6925_v42 }
 0x199   :  { %5605 = vmatpush.bf16.msrb.mxu0 %v7278_v50  ;;  %v7390_v50 = vor.u32 %v10315_v20, %v7389_v15  ;;  %v7374_v15 = vor.u32 %v10311_v2, %v7373_v14  ;;  %v10231_v20 = vld [vmem:[%s16570_s1 + $0x134] sm:$0xf0]  ;;  %10036 = vmatmul.msk.bf16.vlgmr.msra.gmra.mxu1 %vm4873_vm0, %v12576_v6  ;;  %v6909_v52 = vld [vmem:[%s16570_s1 + $0x8] sm:$0xf] }
 0x19a   :  { %5619 = vmatpush.bf16.msrb.mxu1 %v7406_v37  ;;  %v7246_v37 = vor.u32 %v10279_v22, %v7245_v21  ;;  %v13864_v8 = vadd.f32 %v5334_v62, %v5321_v3  ;;  %v10195_v21 = vld [vmem:[%s16570_s1 + $0x14] sm:$0xf0]  ;;  %v7037_v22 = vld [vmem:[%s16570_s1 + $0x108] sm:$0xf] }
 0x19b   :  { %5581 = vmatpush.bf16.msra.mxu2 %v6958_v63  ;;  %v7229_v63 = vld [vmem:[%s16570_s1 + $0x288] sm:$0xf]  ;;  %v10227_v33 = vld [vmem:[%s16570_s1 + $0x114] sm:$0xf0]  ;;  %v6910_v45 = vor.u32 %v10195_v21, %v6909_v52 }
 0x19c   :  { %5595 = vmatpush.bf16.msra.mxu3 %v7086_v57  ;;  %v10275_v57 = vld [vmem:[%s16570_s1 + $0x294] sm:$0xf0]  ;;  %v7213_v2 = vld [vmem:[%s16570_s1 + $0x268] sm:$0xf] }
 0x19d   :  { %5606 = vmatpush.bf16.msrb.mxu0 %v7262_v4  ;;  %v7357_v4 = vld [vmem:[%s16570_s1 + $0x388] sm:$0xf]  ;;  %v7230_v48 = vor.u32 %v10275_v57, %v7229_v63  ;;  %v10271_v3 = vld [vmem:[%s16570_s1 + $0x274] sm:$0xf0] }
 0x19e   :  { %5620 = vmatpush.bf16.msrb.mxu1 %v7390_v50  ;;  %v7054_v50 = vor.u32 %v10231_v20, %v7053_v12  ;;  %v7358_v14 = vor.u32 %v10307_v7, %v7357_v4  ;;  %v10351_v42 = vld [vmem:[%s16570_s1 + $0x4f4] sm:$0xf0]  ;;  %v7661_v12 = vld [vmem:[%s16570_s1 + $0x5e8] sm:$0xf]  ;;  %v7038_v20 = vor.u32 %v10227_v33, %v7037_v22  ;;  %v7214_v63 = vor.u32 %v10271_v3, %v7213_v2  ;;  %v13920_v22 = vpop.f32.mrf.mxu1 }
 0x19f   :  { %5582 = vmatpush.bf16.msra.mxu2 %v6942_v26  ;;  %v7341_v26 = vld [vmem:[%s16570_s1 + $0x368] sm:$0xf]  ;;  %v10267_v7 = vld [vmem:[%s16570_s1 + $0x254] sm:$0xf0]  ;;  %16609 = vst [vmem:[#allocation26_spill] sm:$0xff] %v13920_v22 }
 0x1a0   :  { %5596 = vmatpush.bf16.msra.mxu3 %v7070_v27  ;;  %v10303_v27 = vld [vmem:[%s16570_s1 + $0x374] sm:$0xf0]  ;;  %v7197_v4 = vld [vmem:[%s16570_s1 + $0x248] sm:$0xf] }
 0x1a1   :  { %5607 = vmatpush.bf16.msrb.mxu0 %v7246_v37  ;;  %v7533_v37 = vld [vmem:[%s16570_s1 + $0x4e8] sm:$0xf]  ;;  %v7342_v57 = vor.u32 %v10303_v27, %v7341_v26  ;;  %v10347_v21 = vld [vmem:[%s16570_s1 + $0x4d4] sm:$0xf0]  ;;  %v7198_v2 = vor.u32 %v10267_v7, %v7197_v4 }
 0x1a2   :  { %5621 = vmatpush.bf16.msrb.mxu1 %v7374_v15  ;;  %v10383_v15 = vld [vmem:[%s16570_s1 + $0x5f4] sm:$0xf0]  ;;  %v7534_v62 = vor.u32 %v10351_v42, %v7533_v37  ;;  %v7645_v33 = vld [vmem:[%s16570_s1 + $0x5c8] sm:$0xf] }
 0x1a3   :  { %5583 = vmatpush.bf16.msra.mxu2 %v6926_v16  ;;  %v7325_v16 = vld [vmem:[%s16570_s1 + $0x348] sm:$0xf]  ;;  %v7662_v52 = vor.u32 %v10383_v15, %v7661_v12  ;;  %v10263_v37 = vld [vmem:[%s16570_s1 + $0x234] sm:$0xf0] }
 0x1a4   :  { %5597 = vmatpush.bf16.msra.mxu3 %v7054_v50  ;;  %v10299_v50 = vld [vmem:[%s16570_s1 + $0x354] sm:$0xf0]  ;;  %v7181_v27 = vld [vmem:[%s16570_s1 + $0x228] sm:$0xf] }
 0x1a5   :  { %5608 = vmatpush.bf16.msrb.mxu0 %v7230_v48  ;;  %v7517_v48 = vld [vmem:[%s16570_s1 + $0x4c8] sm:$0xf]  ;;  %v7326_v3 = vor.u32 %v10299_v50, %v7325_v16  ;;  %v10295_v12 = vld [vmem:[%s16570_s1 + $0x334] sm:$0xf0] }
 0x1a6   :  { %5622 = vmatpush.bf16.msrb.mxu1 %v7358_v14  ;;  %v10379_v14 = vld [vmem:[%s16570_s1 + $0x5d4] sm:$0xf0]  ;;  %v7518_v26 = vor.u32 %v10347_v21, %v7517_v48  ;;  %v7309_v42 = vld [vmem:[%s16570_s1 + $0x328] sm:$0xf]  ;;  %v13966_v21 = vpop.f32.mrf.mxu2 }
 0x1a7   :  { %5584 = vmatpush.bf16.msra.mxu2 %v6910_v45  ;;  %v7646_v45 = vor.u32 %v10379_v14, %v7645_v33  ;;  %v7501_v15 = vld [vmem:[%s16570_s1 + $0x4a8] sm:$0xf]  ;;  %v7310_v7 = vor.u32 %v10295_v12, %v7309_v42  ;;  %v10291_v48 = vld [vmem:[%s16570_s1 + $0x314] sm:$0xf0]  ;;  %16610 = vst [vmem:[#allocation27_spill] sm:$0xff] %v13966_v21  ;;  %v13968_v33 = vpop.f32.mrf.mxu3 }
 0x1a8   :  { %5598 = vmatpush.bf16.msra.mxu3 %v7038_v20  ;;  %v10343_v20 = vld [vmem:[%s16570_s1 + $0x4b4] sm:$0xf0]  ;;  %v7165_v4 = vld [vmem:[%s16570_s1 + $0x208] sm:$0xf]  ;;  %16611 = vst [vmem:[#allocation28_spill] sm:$0xff] %v13968_v33 }
 0x1a9   :  { %5609 = vmatpush.bf16.msrb.mxu0 %v7214_v63  ;;  %v7629_v63 = vld [vmem:[%s16570_s1 + $0x5a8] sm:$0xf]  ;;  %v7502_v16 = vor.u32 %v10343_v20, %v7501_v15 }
 0x1aa   :  { %5623 = vmatpush.bf16.msrb.mxu1 %v7342_v57  ;;  %5585 = vmatmul.bf16.vlgmr.msra.gmra.mxu2 %v11305_v58  ;;  %v10375_v57 = vld [vmem:[%s16570_s1 + $0x5b4] sm:$0xf0]  ;;  %v7293_v50 = vld [vmem:[%s16570_s1 + $0x308] sm:$0xf] }
 0x1ab   :  { %5633 = vmatpush.bf16.msrb.mxu2 %v7534_v62  ;;  %5599 = vmatmul.bf16.vlgmr.msra.gmra.mxu3 %v11341_v10  ;;  %v7182_v62 = vor.u32 %v10263_v37, %v7181_v27  ;;  %v7630_v14 = vor.u32 %v10375_v57, %v7629_v63  ;;  %v5348_v27 = vpop.f32.mrf.mxu1  ;;  %v10371_v37 = vld [vmem:[%s16570_s1 + $0x594] sm:$0xf0]  ;;  %v7789_v42 = vld [vmem:[%s16570_s1 + $0x6e8] sm:$0xf]  ;;  %v7294_v57 = vor.u32 %v10291_v48, %v7293_v50  ;;  %v14013_v48 = vpop.f32.mrf.mxu0 }
 0x1ac   :  { %5647 = vmatpush.bf16.msrb.mxu3 %v7662_v52  ;;  %v10259_v52 = vld [vmem:[%s16570_s1 + $0x214] sm:$0xf0]  ;;  %v5349_v12 = vadd.f32 %v5348_v27, %v13864_v8  ;;  %v7917_v20 = vld [vmem:[%s16570_s1 + $0x7e8] sm:$0xf]  ;;  %16612 = vst [vmem:[#allocation29_spill] sm:$0xff] %v14013_v48 }
 0x1ad   :  { %5610 = vmatpush.bf16.msrb.mxu0 %v7198_v2  ;;  %v7485_v2 = vld [vmem:[%s16570_s1 + $0x488] sm:$0xf]  ;;  %v7166_v15 = vor.u32 %v10259_v52, %v7165_v4  ;;  %v10447_v63 = vld [vmem:[%s16570_s1 + $0x7f4] sm:$0xf0] }
 0x1ae   :  { %5624 = vmatpush.bf16.msrb.mxu1 %v7326_v3  ;;  %v10339_v3 = vld [vmem:[%s16570_s1 + $0x494] sm:$0xf0]  ;;  %v7469_v8 = vld [vmem:[%s16570_s1 + $0x468] sm:$0xf]  ;;  %v7918_v52 = vor.u32 %v10447_v63, %v7917_v20  ;;  %v5362_v27 = vpop.f32.mrf.mxu2 }
 0x1af   :  { %5634 = vmatpush.bf16.msrb.mxu2 %v7518_v26  ;;  %v7613_v26 = vld [vmem:[%s16570_s1 + $0x588] sm:$0xf]  ;;  %v7486_v33 = vor.u32 %v10339_v3, %v7485_v2  ;;  %v10411_v50 = vld [vmem:[%s16570_s1 + $0x6d4] sm:$0xf0] }
 0x1b0   :  { %5648 = vmatpush.bf16.msrb.mxu3 %v7646_v45  ;;  %v10415_v45 = vld [vmem:[%s16570_s1 + $0x6f4] sm:$0xf0]  ;;  %v7614_v21 = vor.u32 %v10371_v37, %v7613_v26  ;;  %v7597_v4 = vld [vmem:[%s16570_s1 + $0x568] sm:$0xf] }
 0x1b1   :  { %5611 = vmatpush.bf16.msrb.mxu0 %v7182_v62  ;;  %v7790_v22 = vor.u32 %v10415_v45, %v7789_v42  ;;  %v10335_v62 = vld [vmem:[%s16570_s1 + $0x474] sm:$0xf0]  ;;  %v5376_v42 = vpop.f32.mrf.mxu3  ;;  %v7453_v45 = vld [vmem:[%s16570_s1 + $0x448] sm:$0xf] }
 0x1b2   :  { %5625 = vmatpush.bf16.msrb.mxu1 %v7310_v7  ;;  %v10367_v7 = vld [vmem:[%s16570_s1 + $0x574] sm:$0xf0]  ;;  %v7470_v3 = vor.u32 %v10335_v62, %v7469_v8  ;;  %v7581_v20 = vld [vmem:[%s16570_s1 + $0x548] sm:$0xf] }
 0x1b3   :  { %5635 = vmatpush.bf16.msrb.mxu2 %v7502_v16  ;;  %v7773_v16 = vld [vmem:[%s16570_s1 + $0x6c8] sm:$0xf]  ;;  %v10443_v2 = vld [vmem:[%s16570_s1 + $0x7d4] sm:$0xf0]  ;;  %v7598_v26 = vor.u32 %v10367_v7, %v7597_v4 }
 0x1b4   :  { %5649 = vmatpush.bf16.msrb.mxu3 %v7630_v14  ;;  %v7901_v14 = vld [vmem:[%s16570_s1 + $0x7c8] sm:$0xf]  ;;  %v7774_v37 = vor.u32 %v10411_v50, %v7773_v16  ;;  %v10327_v50 = vld [vmem:[%s16570_s1 + $0x434] sm:$0xf0] }
 0x1b5   :  { %5612 = vmatpush.bf16.msrb.mxu0 %v7166_v15  ;;  %v10331_v15 = vld [vmem:[%s16570_s1 + $0x454] sm:$0xf0]  ;;  %v7757_v63 = vld [vmem:[%s16570_s1 + $0x6a8] sm:$0xf] }
 0x1b6   :  { %5626 = vmatpush.bf16.msrb.mxu1 %v7294_v57  ;;  %v10407_v57 = vld [vmem:[%s16570_s1 + $0x6b4] sm:$0xf0]  ;;  %v7885_v8 = vld [vmem:[%s16570_s1 + $0x7a8] sm:$0xf]  ;;  %v7454_v4 = vor.u32 %v10331_v15, %v7453_v45 }
 0x1b7   :  { %5636 = vmatpush.bf16.msrb.mxu2 %v7486_v33  ;;  %v5363_v33 = vadd.f32 %v5362_v27, %v5349_v12  ;;  %v10439_v12 = vld [vmem:[%s16570_s1 + $0x7b4] sm:$0xf0]  ;;  %v7758_v7 = vor.u32 %v10407_v57, %v7757_v63  ;;  %v7437_v16 = vld [vmem:[%s16570_s1 + $0x428] sm:$0xf] }
 0x1b8   :  { %5650 = vmatpush.bf16.msrb.mxu3 %v7614_v21  ;;  %v7902_v21 = vor.u32 %v10443_v2, %v7901_v14  ;;  %5613 = vmatmul.bf16.vlgmr.msrb.gmra.mxu0 %v11319_v1  ;;  %v7565_v14 = vld [vmem:[%s16570_s1 + $0x528] sm:$0xf]  ;;  %v7886_v2 = vor.u32 %v10439_v12, %v7885_v8  ;;  %v10403_v27 = vld [vmem:[%s16570_s1 + $0x694] sm:$0xf0] }
 0x1b9   :  { %5661 = vmatpush.bf16.msra.mxu0 %v7790_v22  ;;  %v10363_v22 = vld [vmem:[%s16570_s1 + $0x554] sm:$0xf0]  ;;  %5627 = vmatmul.bf16.vlgmr.msrb.gmra.mxu1 %v11355_v17  ;;  %v5377_v62 = vadd.f32 %v5376_v42, %v5363_v33  ;;  %v7869_v42 = vld [vmem:[%s16570_s1 + $0x788] sm:$0xf] }
 0x1ba   :  { %5675 = vmatpush.bf16.msra.mxu1 %v7918_v52  ;;  %v7582_v52 = vor.u32 %v10363_v22, %v7581_v20  ;;  %v10435_v45 = vld [vmem:[%s16570_s1 + $0x794] sm:$0xf0]  ;;  %v7438_v20 = vor.u32 %v10327_v50, %v7437_v16  ;;  %v7421_v33 = vld [vmem:[%s16570_s1 + $0x408] sm:$0xf] }
 0x1bb   :  { %5637 = vmatpush.bf16.msrb.mxu2 %v7470_v3  ;;  %v10359_v3 = vld [vmem:[%s16570_s1 + $0x534] sm:$0xf0]  ;;  %v7549_v57 = vld [vmem:[%s16570_s1 + $0x508] sm:$0xf]  ;;  %v7870_v12 = vor.u32 %v10435_v45, %v7869_v42 }
 0x1bc   :  { %5651 = vmatpush.bf16.msrb.mxu3 %v7598_v26  ;;  %v7741_v26 = vld [vmem:[%s16570_s1 + $0x688] sm:$0xf]  ;;  %v10323_v63 = vld [vmem:[%s16570_s1 + $0x414] sm:$0xf0] }
 0x1bd   :  { %5662 = vmatpush.bf16.msra.mxu0 %v7774_v37  ;;  %v5390_v37 = vpop.f32.mrf.mxu0  ;;  %v7742_v22 = vor.u32 %v10403_v27, %v7741_v26  ;;  %v10355_v8 = vld [vmem:[%s16570_s1 + $0x514] sm:$0xf0]  ;;  %v8045_v16 = vld [vmem:[%s16570_s1 + $0x8e8] sm:$0xf] }
 0x1be   :  { %5676 = vmatpush.bf16.msra.mxu1 %v7902_v21  ;;  %v14071_v15 = vadd.f32 %v5390_v37, %v5377_v62  ;;  %v7566_v21 = vor.u32 %v10359_v3, %v7565_v14  ;;  %v7725_v62 = vld [vmem:[%s16570_s1 + $0x668] sm:$0xf]  ;;  %v10479_v50 = vld [vmem:[%s16570_s1 + $0x8f4] sm:$0xf0]  ;;  %v7422_v14 = vor.u32 %v10323_v63, %v7421_v33  ;;  %v7550_v26 = vor.u32 %v10355_v8, %v7549_v57  ;;  %v14127_v8 = vpop.f32.mrf.mxu1 }
 0x1bf   :  { %5638 = vmatpush.bf16.msrb.mxu2 %v7454_v4  ;;  %v10399_v4 = vld [vmem:[%s16570_s1 + $0x674] sm:$0xf0]  ;;  %v8046_v42 = vor.u32 %v10479_v50, %v8045_v16  ;;  %v7709_v45 = vld [vmem:[%s16570_s1 + $0x648] sm:$0xf]  ;;  %16613 = vst [vmem:[#allocation30_spill] sm:$0xff] %v14127_v8 }
 0x1c0   :  { %5652 = vmatpush.bf16.msrb.mxu3 %v7582_v52  ;;  %v7853_v52 = vld [vmem:[%s16570_s1 + $0x768] sm:$0xf]  ;;  %v10511_v3 = vld [vmem:[%s16570_s1 + $0x9f4] sm:$0xf0]  ;;  %v7726_v27 = vor.u32 %v10399_v4, %v7725_v62 }
 0x1c1   :  { %5663 = vmatpush.bf16.msra.mxu0 %v7758_v7  ;;  %v10431_v7 = vld [vmem:[%s16570_s1 + $0x774] sm:$0xf0]  ;;  %v7837_v33 = vld [vmem:[%s16570_s1 + $0x748] sm:$0xf] }
 0x1c2   :  { %5677 = vmatpush.bf16.msra.mxu1 %v7886_v2  ;;  %v8173_v2 = vld [vmem:[%s16570_s1 + $0x9e8] sm:$0xf]  ;;  %v7854_v37 = vor.u32 %v10431_v7, %v7853_v52  ;;  %v10475_v57 = vld [vmem:[%s16570_s1 + $0x8d4] sm:$0xf0] }
 0x1c3   :  { %5639 = vmatpush.bf16.msrb.mxu2 %v7438_v20  ;;  %v10395_v20 = vld [vmem:[%s16570_s1 + $0x654] sm:$0xf0]  ;;  %v8174_v63 = vor.u32 %v10511_v3, %v8173_v2  ;;  %v7693_v16 = vld [vmem:[%s16570_s1 + $0x628] sm:$0xf] }
 0x1c4   :  { %5653 = vmatpush.bf16.msrb.mxu3 %v7566_v21  ;;  %v10427_v21 = vld [vmem:[%s16570_s1 + $0x754] sm:$0xf0]  ;;  %v7710_v4 = vor.u32 %v10395_v20, %v7709_v45  ;;  %v7677_v20 = vld [vmem:[%s16570_s1 + $0x608] sm:$0xf] }
 0x1c5   :  { %5664 = vmatpush.bf16.msra.mxu0 %v7742_v22  ;;  %v8029_v22 = vld [vmem:[%s16570_s1 + $0x8c8] sm:$0xf]  ;;  %v10507_v62 = vld [vmem:[%s16570_s1 + $0x9d4] sm:$0xf0]  ;;  %v7838_v52 = vor.u32 %v10427_v21, %v7837_v33 }
 0x1c6   :  { %5678 = vmatpush.bf16.msra.mxu1 %v7870_v12  ;;  %v8157_v12 = vld [vmem:[%s16570_s1 + $0x9c8] sm:$0xf]  ;;  %v8030_v7 = vor.u32 %v10475_v57, %v8029_v22  ;;  %v10391_v50 = vld [vmem:[%s16570_s1 + $0x634] sm:$0xf0] }
 0x1c7   :  { %5640 = vmatpush.bf16.msrb.mxu2 %v7422_v14  ;;  %v7821_v14 = vld [vmem:[%s16570_s1 + $0x728] sm:$0xf]  ;;  %v8158_v2 = vor.u32 %v10507_v62, %v8157_v12  ;;  %v10423_v3 = vld [vmem:[%s16570_s1 + $0x734] sm:$0xf0]  ;;  %v7694_v45 = vor.u32 %v10391_v50, %v7693_v16  ;;  %v14173_v12 = vpop.f32.mrf.mxu2  ;;  %v14175_v62 = vpop.f32.mrf.mxu3 }
 0x1c8   :  { %5654 = vmatpush.bf16.msrb.mxu3 %v7550_v26  ;;  %v8013_v26 = vld [vmem:[%s16570_s1 + $0x8a8] sm:$0xf]  ;;  %v7822_v33 = vor.u32 %v10423_v3, %v7821_v14  ;;  %v10387_v21 = vld [vmem:[%s16570_s1 + $0x614] sm:$0xf0]  ;;  %16614 = vst [vmem:[#allocation31_spill] sm:$0xff] %v14173_v12  ;;  %v5404_v50 = vpop.f32.mrf.mxu1 }
 0x1c9   :  { %5665 = vmatpush.bf16.msra.mxu0 %v7726_v27  ;;  %v10471_v27 = vld [vmem:[%s16570_s1 + $0x8b4] sm:$0xf0]  ;;  %v7805_v22 = vld [vmem:[%s16570_s1 + $0x708] sm:$0xf]  ;;  %16615 = vst [vmem:[#allocation32_spill] sm:$0xff] %v14175_v62 }
 0x1ca   :  { %5679 = vmatpush.bf16.msra.mxu1 %v7854_v37  ;;  %5641 = vmatmul.bf16.vlgmr.msrb.gmra.mxu2 %v11527_v39  ;;  %v8141_v37 = vld [vmem:[%s16570_s1 + $0x9a8] sm:$0xf]  ;;  %v10419_v57 = vld [vmem:[%s16570_s1 + $0x714] sm:$0xf0] }
 0x1cb   :  { %5689 = vmatpush.bf16.msra.mxu2 %v8046_v42  ;;  %5655 = vmatmul.bf16.vlgmr.msrb.gmra.mxu3 %v11540_v44  ;;  %v10503_v42 = vld [vmem:[%s16570_s1 + $0x9b4] sm:$0xf0]  ;;  %v8125_v16 = vld [vmem:[%s16570_s1 + $0x988] sm:$0xf]  ;;  %v7806_v62 = vor.u32 %v10419_v57, %v7805_v22  ;;  %v14220_v57 = vpop.f32.mrf.mxu0 }
 0x1cc   :  { %5703 = vmatpush.bf16.msra.mxu3 %v8174_v63  ;;  %v8014_v63 = vor.u32 %v10471_v27, %v8013_v26  ;;  %v10499_v14 = vld [vmem:[%s16570_s1 + $0x994] sm:$0xf0]  ;;  %v5405_v26 = vadd.f32 %v5404_v50, %v14071_v15  ;;  %v7678_v27 = vor.u32 %v10387_v21, %v7677_v20  ;;  %v7981_v15 = vld [vmem:[%s16570_s1 + $0x868] sm:$0xf] }
 0x1cd   :  { %5666 = vmatpush.bf16.msra.mxu0 %v7710_v4  ;;  %v8142_v4 = vor.u32 %v10503_v42, %v8141_v37  ;;  %v10543_v3 = vld [vmem:[%s16570_s1 + $0xaf4] sm:$0xf0]  ;;  %v8429_v37 = vld [vmem:[%s16570_s1 + $0xbe8] sm:$0xf]  ;;  %v8126_v8 = vor.u32 %v10499_v14, %v8125_v16 }
 0x1ce   :  { %5680 = vmatpush.bf16.msra.mxu1 %v7838_v52  ;;  %v7997_v52 = vld [vmem:[%s16570_s1 + $0x888] sm:$0xf]  ;;  %v10575_v42 = vld [vmem:[%s16570_s1 + $0xbf4] sm:$0xf0] }
 0x1cf   :  { %5690 = vmatpush.bf16.msra.mxu2 %v8030_v7  ;;  %v10467_v7 = vld [vmem:[%s16570_s1 + $0x894] sm:$0xf0]  ;;  %v8109_v20 = vld [vmem:[%s16570_s1 + $0x968] sm:$0xf]  ;;  %v8430_v21 = vor.u32 %v10575_v42, %v8429_v37  ;;  %v5418_v50 = vpop.f32.mrf.mxu2 }
 0x1d0   :  { %5704 = vmatpush.bf16.msra.mxu3 %v8158_v2  ;;  %v8301_v2 = vld [vmem:[%s16570_s1 + $0xae8] sm:$0xf]  ;;  %v7998_v12 = vor.u32 %v10467_v7, %v7997_v52  ;;  %v10539_v22 = vld [vmem:[%s16570_s1 + $0xad4] sm:$0xf0] }
 0x1d1   :  { %5667 = vmatpush.bf16.msra.mxu0 %v7694_v45  ;;  %v8302_v48 = vor.u32 %v10543_v3, %v8301_v2  ;;  %v10463_v45 = vld [vmem:[%s16570_s1 + $0x874] sm:$0xf0]  ;;  %v5432_v2 = vpop.f32.mrf.mxu3  ;;  %v7965_v3 = vld [vmem:[%s16570_s1 + $0x848] sm:$0xf] }
 0x1d2   :  { %5681 = vmatpush.bf16.msra.mxu1 %v7822_v33  ;;  %v10495_v33 = vld [vmem:[%s16570_s1 + $0x974] sm:$0xf0]  ;;  %v7982_v7 = vor.u32 %v10463_v45, %v7981_v15  ;;  %v8269_v37 = vld [vmem:[%s16570_s1 + $0xaa8] sm:$0xf] }
 0x1d3   :  { %5691 = vmatpush.bf16.msra.mxu2 %v8014_v63  ;;  %v8285_v63 = vld [vmem:[%s16570_s1 + $0xac8] sm:$0xf]  ;;  %v10571_v52 = vld [vmem:[%s16570_s1 + $0xbd4] sm:$0xf0]  ;;  %v8110_v16 = vor.u32 %v10495_v33, %v8109_v20 }
 0x1d4   :  { %5705 = vmatpush.bf16.msra.mxu3 %v8142_v4  ;;  %v8413_v4 = vld [vmem:[%s16570_s1 + $0xbc8] sm:$0xf]  ;;  %v8286_v14 = vor.u32 %v10539_v22, %v8285_v63  ;;  %v10535_v42 = vld [vmem:[%s16570_s1 + $0xab4] sm:$0xf0] }
 0x1d5   :  { %5668 = vmatpush.bf16.msra.mxu0 %v7678_v27  ;;  %v10459_v27 = vld [vmem:[%s16570_s1 + $0x854] sm:$0xf0]  ;;  %v8397_v15 = vld [vmem:[%s16570_s1 + $0xba8] sm:$0xf]  ;;  %v8270_v33 = vor.u32 %v10535_v42, %v8269_v37 }
 0x1d6   :  { %5682 = vmatpush.bf16.msra.mxu1 %v7806_v62  ;;  %v8093_v62 = vld [vmem:[%s16570_s1 + $0x948] sm:$0xf]  ;;  %v7966_v20 = vor.u32 %v10459_v27, %v7965_v3  ;;  %v10455_v22 = vld [vmem:[%s16570_s1 + $0x834] sm:$0xf0] }
 0x1d7   :  { %5692 = vmatpush.bf16.msra.mxu2 %v7998_v12  ;;  %v10491_v12 = vld [vmem:[%s16570_s1 + $0x954] sm:$0xf0]  ;;  %v7949_v63 = vld [vmem:[%s16570_s1 + $0x828] sm:$0xf] }
 0x1d8   :  { %5706 = vmatpush.bf16.msra.mxu3 %v8126_v8  ;;  %5669 = vmatmul.bf16.vlgmr.msra.gmra.mxu0 %v11538_v43  ;;  %v8414_v8 = vor.u32 %v10571_v52, %v8413_v4  ;;  %v8077_v4 = vld [vmem:[%s16570_s1 + $0x928] sm:$0xf]  ;;  %v10563_v3 = vld [vmem:[%s16570_s1 + $0xb94] sm:$0xf0] }
 0x1d9   :  { %5717 = vmatpush.bf16.msrb.mxu0 %v8302_v48  ;;  %v5419_v48 = vadd.f32 %v5418_v50, %v5405_v26  ;;  %5683 = vmatmul.bf16.vlgmr.msra.gmra.mxu1 %v11548_v47  ;;  %v10567_v26 = vld [vmem:[%s16570_s1 + $0xbb4] sm:$0xf0]  ;;  %v8061_v42 = vld [vmem:[%s16570_s1 + $0x908] sm:$0xf] }
 0x1da   :  { %5731 = vmatpush.bf16.msrb.mxu1 %v8430_v21  ;;  %v8094_v21 = vor.u32 %v10491_v12, %v8093_v62  ;;  %v8398_v52 = vor.u32 %v10567_v26, %v8397_v15  ;;  %v10531_v50 = vld [vmem:[%s16570_s1 + $0xa94] sm:$0xf0]  ;;  %v7950_v62 = vor.u32 %v10455_v22, %v7949_v63  ;;  %v8557_v63 = vld [vmem:[%s16570_s1 + $0xce8] sm:$0xf] }
 0x1db   :  { %5693 = vmatpush.bf16.msra.mxu2 %v7982_v7  ;;  %v5433_v45 = vadd.f32 %v5432_v2, %v5419_v48  ;;  %v10487_v7 = vld [vmem:[%s16570_s1 + $0x934] sm:$0xf0]  ;;  %v8381_v2 = vld [vmem:[%s16570_s1 + $0xb88] sm:$0xf] }
 0x1dc   :  { %5707 = vmatpush.bf16.msra.mxu3 %v8110_v16  ;;  %v8253_v16 = vld [vmem:[%s16570_s1 + $0xa88] sm:$0xf]  ;;  %v10451_v37 = vld [vmem:[%s16570_s1 + $0x814] sm:$0xf0]  ;;  %v8382_v26 = vor.u32 %v10563_v3, %v8381_v2 }
 0x1dd   :  { %5718 = vmatpush.bf16.msrb.mxu0 %v8286_v14  ;;  %v5446_v14 = vpop.f32.mrf.mxu0  ;;  %v7933_v48 = vld [vmem:[%s16570_s1 + $0x808] sm:$0xf]  ;;  %v8254_v12 = vor.u32 %v10531_v50, %v8253_v16  ;;  %v10483_v15 = vld [vmem:[%s16570_s1 + $0x914] sm:$0xf0] }
 0x1de   :  { %5732 = vmatpush.bf16.msrb.mxu1 %v8414_v8  ;;  %v14278_v27 = vadd.f32 %v5446_v14, %v5433_v45  ;;  %v8078_v8 = vor.u32 %v10487_v7, %v8077_v4  ;;  %v8237_v45 = vld [vmem:[%s16570_s1 + $0xa68] sm:$0xf]  ;;  %v10607_v22 = vld [vmem:[%s16570_s1 + $0xcf4] sm:$0xf0]  ;;  %v7934_v4 = vor.u32 %v10451_v37, %v7933_v48  ;;  %v8062_v16 = vor.u32 %v10483_v15, %v8061_v42  ;;  %v14334_v15 = vpop.f32.mrf.mxu1 }
 0x1df   :  { %5694 = vmatpush.bf16.msra.mxu2 %v7966_v20  ;;  %v10527_v20 = vld [vmem:[%s16570_s1 + $0xa74] sm:$0xf0]  ;;  %v8558_v2 = vor.u32 %v10607_v22, %v8557_v63  ;;  %v8221_v3 = vld [vmem:[%s16570_s1 + $0xa48] sm:$0xf] }
 0x1e0   :  { %5708 = vmatpush.bf16.msra.mxu3 %v8094_v21  ;;  %v8365_v21 = vld [vmem:[%s16570_s1 + $0xb68] sm:$0xf]  ;;  %v10639_v7 = vld [vmem:[%s16570_s1 + $0xdf4] sm:$0xf0]  ;;  %v8238_v50 = vor.u32 %v10527_v20, %v8237_v45 }
 0x1e1   :  { %5719 = vmatpush.bf16.msrb.mxu0 %v8270_v33  ;;  %v10559_v33 = vld [vmem:[%s16570_s1 + $0xb74] sm:$0xf0]  ;;  %v8349_v48 = vld [vmem:[%s16570_s1 + $0xb48] sm:$0xf] }
 0x1e2   :  { %5733 = vmatpush.bf16.msrb.mxu1 %v8398_v52  ;;  %v8685_v52 = vld [vmem:[%s16570_s1 + $0xde8] sm:$0xf]  ;;  %v8366_v14 = vor.u32 %v10559_v33, %v8365_v21  ;;  %v10603_v42 = vld [vmem:[%s16570_s1 + $0xcd4] sm:$0xf0] }
 0x1e3   :  { %5695 = vmatpush.bf16.msra.mxu2 %v7950_v62  ;;  %v10523_v62 = vld [vmem:[%s16570_s1 + $0xa54] sm:$0xf0]  ;;  %v8686_v37 = vor.u32 %v10639_v7, %v8685_v52  ;;  %v8205_v63 = vld [vmem:[%s16570_s1 + $0xa28] sm:$0xf] }
 0x1e4   :  { %5709 = vmatpush.bf16.msra.mxu3 %v8078_v8  ;;  %v10555_v8 = vld [vmem:[%s16570_s1 + $0xb54] sm:$0xf0]  ;;  %v8222_v20 = vor.u32 %v10523_v62, %v8221_v3  ;;  %v8189_v62 = vld [vmem:[%s16570_s1 + $0xa08] sm:$0xf] }
 0x1e5   :  { %5720 = vmatpush.bf16.msrb.mxu0 %v8254_v12  ;;  %v8541_v12 = vld [vmem:[%s16570_s1 + $0xcc8] sm:$0xf]  ;;  %v10635_v45 = vld [vmem:[%s16570_s1 + $0xdd4] sm:$0xf0]  ;;  %v8350_v21 = vor.u32 %v10555_v8, %v8349_v48 }
 0x1e6   :  { %5734 = vmatpush.bf16.msrb.mxu1 %v8382_v26  ;;  %v8669_v26 = vld [vmem:[%s16570_s1 + $0xdc8] sm:$0xf]  ;;  %v8542_v33 = vor.u32 %v10603_v42, %v8541_v12  ;;  %v10519_v22 = vld [vmem:[%s16570_s1 + $0xa34] sm:$0xf0] }
 0x1e7   :  { %5696 = vmatpush.bf16.msra.mxu2 %v7934_v4  ;;  %v8333_v4 = vld [vmem:[%s16570_s1 + $0xb28] sm:$0xf]  ;;  %v8670_v52 = vor.u32 %v10635_v45, %v8669_v26  ;;  %v10551_v7 = vld [vmem:[%s16570_s1 + $0xb34] sm:$0xf0]  ;;  %v8206_v3 = vor.u32 %v10519_v22, %v8205_v63  ;;  %v14380_v26 = vpop.f32.mrf.mxu2  ;;  %v14382_v45 = vpop.f32.mrf.mxu3 }
 0x1e8   :  { %5710 = vmatpush.bf16.msra.mxu3 %v8062_v16  ;;  %v8525_v16 = vld [vmem:[%s16570_s1 + $0xca8] sm:$0xf]  ;;  %v8334_v48 = vor.u32 %v10551_v7, %v8333_v4  ;;  %v10515_v8 = vld [vmem:[%s16570_s1 + $0xa14] sm:$0xf0]  ;;  %16616 = vst [vmem:[#allocation33_spill] sm:$0xff] %v14380_v26  ;;  %v5460_v22 = vpop.f32.mrf.mxu1 }
 0x1e9   :  { %5721 = vmatpush.bf16.msrb.mxu0 %v8238_v50  ;;  %v10599_v50 = vld [vmem:[%s16570_s1 + $0xcb4] sm:$0xf0]  ;;  %v8317_v12 = vld [vmem:[%s16570_s1 + $0xb08] sm:$0xf]  ;;  %16617 = vst [vmem:[#allocation34_spill] sm:$0xff] %v14382_v45 }
 0x1ea   :  { %5735 = vmatpush.bf16.msrb.mxu1 %v8366_v14  ;;  %5697 = vmatmul.bf16.vlgmr.msra.gmra.mxu2 %v11755_v31  ;;  %v8653_v14 = vld [vmem:[%s16570_s1 + $0xda8] sm:$0xf]  ;;  %v10547_v42 = vld [vmem:[%s16570_s1 + $0xb14] sm:$0xf0] }
 0x1eb   :  { %5745 = vmatpush.bf16.msrb.mxu2 %v8558_v2  ;;  %5711 = vmatmul.bf16.vlgmr.msra.gmra.mxu3 %v11768_v36  ;;  %v10631_v2 = vld [vmem:[%s16570_s1 + $0xdb4] sm:$0xf0]  ;;  %v8637_v63 = vld [vmem:[%s16570_s1 + $0xd88] sm:$0xf]  ;;  %v8318_v36 = vor.u32 %v10547_v42, %v8317_v12  ;;  %v14427_v42 = vpop.f32.mrf.mxu0 }
 0x1ec   :  { %5759 = vmatpush.bf16.msrb.mxu3 %v8686_v37  ;;  %v8526_v37 = vor.u32 %v10599_v50, %v8525_v16  ;;  %v10627_v4 = vld [vmem:[%s16570_s1 + $0xd94] sm:$0xf0]  ;;  %v5461_v16 = vadd.f32 %v5460_v22, %v14278_v27  ;;  %v8190_v50 = vor.u32 %v10515_v8, %v8189_v62  ;;  %v8493_v27 = vld [vmem:[%s16570_s1 + $0xc68] sm:$0xf] }
 0x1ed   :  { %5722 = vmatpush.bf16.msrb.mxu0 %v8222_v20  ;;  %v8654_v20 = vor.u32 %v10631_v2, %v8653_v14  ;;  %v10671_v7 = vld [vmem:[%s16570_s1 + $0xef4] sm:$0xf0]  ;;  %v8941_v14 = vld [vmem:[%s16570_s1 + $0xfe8] sm:$0xf]  ;;  %v8638_v26 = vor.u32 %v10627_v4, %v8637_v63 }
 0x1ee   :  { %5736 = vmatpush.bf16.msrb.mxu1 %v8350_v21  ;;  %v8509_v21 = vld [vmem:[%s16570_s1 + $0xc88] sm:$0xf]  ;;  %v10703_v2 = vld [vmem:[%s16570_s1 + $0xff4] sm:$0xf0] }
 0x1ef   :  { %5746 = vmatpush.bf16.msrb.mxu2 %v8542_v33  ;;  %v10595_v33 = vld [vmem:[%s16570_s1 + $0xc94] sm:$0xf0]  ;;  %v8621_v62 = vld [vmem:[%s16570_s1 + $0xd68] sm:$0xf]  ;;  %v8942_v8 = vor.u32 %v10703_v2, %v8941_v14  ;;  %v5474_v22 = vpop.f32.mrf.mxu2 }
 0x1f0   :  { %5760 = vmatpush.bf16.msrb.mxu3 %v8670_v52  ;;  %v8813_v52 = vld [vmem:[%s16570_s1 + $0xee8] sm:$0xf]  ;;  %v8510_v45 = vor.u32 %v10595_v33, %v8509_v21  ;;  %v10667_v12 = vld [vmem:[%s16570_s1 + $0xed4] sm:$0xf0] }
 0x1f1   :  { %5723 = vmatpush.bf16.msrb.mxu0 %v8206_v3  ;;  %v8814_v31 = vor.u32 %v10671_v7, %v8813_v52  ;;  %v10591_v3 = vld [vmem:[%s16570_s1 + $0xc74] sm:$0xf0]  ;;  %v5488_v52 = vpop.f32.mrf.mxu3  ;;  %v8477_v7 = vld [vmem:[%s16570_s1 + $0xc48] sm:$0xf] }
 0x1f2   :  { %5737 = vmatpush.bf16.msrb.mxu1 %v8334_v48  ;;  %v10623_v48 = vld [vmem:[%s16570_s1 + $0xd74] sm:$0xf0]  ;;  %v8494_v33 = vor.u32 %v10591_v3, %v8493_v27  ;;  %v8781_v14 = vld [vmem:[%s16570_s1 + $0xea8] sm:$0xf] }
 0x1f3   :  { %5747 = vmatpush.bf16.msrb.mxu2 %v8526_v37  ;;  %v8797_v37 = vld [vmem:[%s16570_s1 + $0xec8] sm:$0xf]  ;;  %v10699_v21 = vld [vmem:[%s16570_s1 + $0xfd4] sm:$0xf0]  ;;  %v8622_v63 = vor.u32 %v10623_v48, %v8621_v62 }
 0x1f4   :  { %5761 = vmatpush.bf16.msrb.mxu3 %v8654_v20  ;;  %v8925_v20 = vld [vmem:[%s16570_s1 + $0xfc8] sm:$0xf]  ;;  %v8798_v4 = vor.u32 %v10667_v12, %v8797_v37  ;;  %v10663_v2 = vld [vmem:[%s16570_s1 + $0xeb4] sm:$0xf0] }
 0x1f5   :  { %5724 = vmatpush.bf16.msrb.mxu0 %v8190_v50  ;;  %v10587_v50 = vld [vmem:[%s16570_s1 + $0xc54] sm:$0xf0]  ;;  %v8909_v27 = vld [vmem:[%s16570_s1 + $0xfa8] sm:$0xf]  ;;  %v8782_v48 = vor.u32 %v10663_v2, %v8781_v14 }
 0x1f6   :  { %5738 = vmatpush.bf16.msrb.mxu1 %v8318_v36  ;;  %v8605_v36 = vld [vmem:[%s16570_s1 + $0xd48] sm:$0xf]  ;;  %v8478_v62 = vor.u32 %v10587_v50, %v8477_v7  ;;  %v10583_v12 = vld [vmem:[%s16570_s1 + $0xc34] sm:$0xf0] }
 0x1f7   :  { %5748 = vmatpush.bf16.msrb.mxu2 %v8510_v45  ;;  %v10619_v45 = vld [vmem:[%s16570_s1 + $0xd54] sm:$0xf0]  ;;  %v8461_v37 = vld [vmem:[%s16570_s1 + $0xc28] sm:$0xf] }
 0x1f8   :  { %5762 = vmatpush.bf16.msrb.mxu3 %v8638_v26  ;;  %5725 = vmatmul.bf16.vlgmr.msrb.gmra.mxu0 %v11766_v35  ;;  %v8926_v26 = vor.u32 %v10699_v21, %v8925_v20  ;;  %v8589_v20 = vld [vmem:[%s16570_s1 + $0xd28] sm:$0xf]  ;;  %v10691_v7 = vld [vmem:[%s16570_s1 + $0xf94] sm:$0xf0] }
 0x1f9   :  { %5773 = vmatpush.bf16.msra.mxu0 %v8814_v31  ;;  %v5475_v31 = vadd.f32 %v5474_v22, %v5461_v16  ;;  %5739 = vmatmul.bf16.vlgmr.msrb.gmra.mxu1 %v11776_v40  ;;  %v10695_v16 = vld [vmem:[%s16570_s1 + $0xfb4] sm:$0xf0]  ;;  %v8573_v2 = vld [vmem:[%s16570_s1 + $0xd08] sm:$0xf] }
 0x1fa   :  { %5787 = vmatpush.bf16.msra.mxu1 %v8942_v8  ;;  %v8606_v8 = vor.u32 %v10619_v45, %v8605_v36  ;;  %v8910_v21 = vor.u32 %v10695_v16, %v8909_v27  ;;  %v10659_v22 = vld [vmem:[%s16570_s1 + $0xe94] sm:$0xf0]  ;;  %v8462_v36 = vor.u32 %v10583_v12, %v8461_v37  ;;  %v9069_v37 = vld [vmem:[%s16570_s1 + $0x10e8] sm:$0xf] }
 0x1fb   :  { %5749 = vmatpush.bf16.msrb.mxu2 %v8494_v33  ;;  %v5489_v3 = vadd.f32 %v5488_v52, %v5475_v31  ;;  %v10615_v33 = vld [vmem:[%s16570_s1 + $0xd34] sm:$0xf0]  ;;  %v8893_v52 = vld [vmem:[%s16570_s1 + $0xf88] sm:$0xf] }
 0x1fc   :  { %5763 = vmatpush.bf16.msrb.mxu3 %v8622_v63  ;;  %v8765_v63 = vld [vmem:[%s16570_s1 + $0xe88] sm:$0xf]  ;;  %v10579_v14 = vld [vmem:[%s16570_s1 + $0xc14] sm:$0xf0]  ;;  %v8894_v16 = vor.u32 %v10691_v7, %v8893_v52 }
 0x1fd   :  { %5774 = vmatpush.bf16.msra.mxu0 %v8798_v4  ;;  %v5502_v4 = vpop.f32.mrf.mxu0  ;;  %v8445_v31 = vld [vmem:[%s16570_s1 + $0xc08] sm:$0xf]  ;;  %v8766_v45 = vor.u32 %v10659_v22, %v8765_v63  ;;  %v10611_v27 = vld [vmem:[%s16570_s1 + $0xd14] sm:$0xf0] }
 0x1fe   :  { %5788 = vmatpush.bf16.msra.mxu1 %v8926_v26  ;;  %v14485_v50 = vadd.f32 %v5502_v4, %v5489_v3  ;;  %v8590_v26 = vor.u32 %v10615_v33, %v8589_v20  ;;  %v8749_v3 = vld [vmem:[%s16570_s1 + $0xe68] sm:$0xf]  ;;  %v10735_v12 = vld [vmem:[%s16570_s1 + $0x10f4] sm:$0xf0]  ;;  %v8446_v20 = vor.u32 %v10579_v14, %v8445_v31  ;;  %v8574_v63 = vor.u32 %v10611_v27, %v8573_v2  ;;  %v14541_v27 = vpop.f32.mrf.mxu1 }
 0x1ff   :  { %5750 = vmatpush.bf16.msrb.mxu2 %v8478_v62  ;;  %v10655_v62 = vld [vmem:[%s16570_s1 + $0xe74] sm:$0xf0]  ;;  %v9070_v52 = vor.u32 %v10735_v12, %v9069_v37  ;;  %v8733_v7 = vld [vmem:[%s16570_s1 + $0xe48] sm:$0xf] }
 0x200   :  { %5764 = vmatpush.bf16.msrb.mxu3 %v8606_v8  ;;  %v8877_v8 = vld [vmem:[%s16570_s1 + $0xf68] sm:$0xf]  ;;  %v10767_v33 = vld [vmem:[%s16570_s1 + $0x11f4] sm:$0xf0]  ;;  %v8750_v22 = vor.u32 %v10655_v62, %v8749_v3 }
 0x201   :  { %5775 = vmatpush.bf16.msra.mxu0 %v8782_v48  ;;  %v10687_v48 = vld [vmem:[%s16570_s1 + $0xf74] sm:$0xf0]  ;;  %v8861_v31 = vld [vmem:[%s16570_s1 + $0xf48] sm:$0xf] }
 0x202   :  { %5789 = vmatpush.bf16.msra.mxu1 %v8910_v21  ;;  %v9197_v21 = vld [vmem:[%s16570_s1 + $0x11e8] sm:$0xf]  ;;  %v8878_v4 = vor.u32 %v10687_v48, %v8877_v8  ;;  %v10731_v2 = vld [vmem:[%s16570_s1 + $0x10d4] sm:$0xf0] }
 0x203   :  { %5751 = vmatpush.bf16.msrb.mxu2 %v8462_v36  ;;  %v10651_v36 = vld [vmem:[%s16570_s1 + $0xe54] sm:$0xf0]  ;;  %v9198_v14 = vor.u32 %v10767_v33, %v9197_v21  ;;  %v8717_v37 = vld [vmem:[%s16570_s1 + $0xe28] sm:$0xf] }
 0x204   :  { %5765 = vmatpush.bf16.msrb.mxu3 %v8590_v26  ;;  %v10683_v26 = vld [vmem:[%s16570_s1 + $0xf54] sm:$0xf0]  ;;  %v8734_v62 = vor.u32 %v10651_v36, %v8733_v7  ;;  %v8701_v36 = vld [vmem:[%s16570_s1 + $0xe08] sm:$0xf] }
 0x205   :  { %5776 = vmatpush.bf16.msra.mxu0 %v8766_v45  ;;  %v9053_v45 = vld [vmem:[%s16570_s1 + $0x10c8] sm:$0xf]  ;;  %v10763_v3 = vld [vmem:[%s16570_s1 + $0x11d4] sm:$0xf0]  ;;  %v8862_v8 = vor.u32 %v10683_v26, %v8861_v31 }
 0x206   :  { %5790 = vmatpush.bf16.msra.mxu1 %v8894_v16  ;;  %v9181_v16 = vld [vmem:[%s16570_s1 + $0x11c8] sm:$0xf]  ;;  %v9054_v48 = vor.u32 %v10731_v2, %v9053_v45  ;;  %v10647_v12 = vld [vmem:[%s16570_s1 + $0xe34] sm:$0xf0] }
 0x207   :  { %5752 = vmatpush.bf16.msrb.mxu2 %v8446_v20  ;;  %v8845_v20 = vld [vmem:[%s16570_s1 + $0xf28] sm:$0xf]  ;;  %v9182_v21 = vor.u32 %v10763_v3, %v9181_v16  ;;  %v10679_v33 = vld [vmem:[%s16570_s1 + $0xf34] sm:$0xf0]  ;;  %v8718_v7 = vor.u32 %v10647_v12, %v8717_v37  ;;  %v14587_v16 = vpop.f32.mrf.mxu2  ;;  %v14589_v3 = vpop.f32.mrf.mxu3 }
 0x208   :  { %5766 = vmatpush.bf16.msrb.mxu3 %v8574_v63  ;;  %v9037_v63 = vld [vmem:[%s16570_s1 + $0x10a8] sm:$0xf]  ;;  %v8846_v31 = vor.u32 %v10679_v33, %v8845_v20  ;;  %v10643_v26 = vld [vmem:[%s16570_s1 + $0xe14] sm:$0xf0]  ;;  %16618 = vst [vmem:[#allocation35_spill] sm:$0xff] %v14589_v3  ;;  %v5516_v12 = vpop.f32.mrf.mxu1 }
 0x209   :  { %5777 = vmatpush.bf16.msra.mxu0 %v8750_v22  ;;  %v10727_v22 = vld [vmem:[%s16570_s1 + $0x10b4] sm:$0xf0]  ;;  %v8829_v45 = vld [vmem:[%s16570_s1 + $0xf08] sm:$0xf] }
 0x20a   :  { %5791 = vmatpush.bf16.msra.mxu1 %v8878_v4  ;;  %5753 = vmatmul.bf16.vlgmr.msrb.gmra.mxu2 %v11983_v32  ;;  %v9165_v4 = vld [vmem:[%s16570_s1 + $0x11a8] sm:$0xf]  ;;  %v10675_v2 = vld [vmem:[%s16570_s1 + $0xf14] sm:$0xf0] }
 0x20b   :  { %5801 = vmatpush.bf16.msra.mxu2 %v9070_v52  ;;  %5767 = vmatmul.bf16.vlgmr.msrb.gmra.mxu3 %v11996_v41  ;;  %v10759_v52 = vld [vmem:[%s16570_s1 + $0x11b4] sm:$0xf0]  ;;  %v9149_v37 = vld [vmem:[%s16570_s1 + $0x1188] sm:$0xf]  ;;  %v8830_v41 = vor.u32 %v10675_v2, %v8829_v45  ;;  %v14634_v2 = vpop.f32.mrf.mxu0 }
 0x20c   :  { %5815 = vmatpush.bf16.msra.mxu3 %v9198_v14  ;;  %v9038_v14 = vor.u32 %v10727_v22, %v9037_v63  ;;  %v10755_v20 = vld [vmem:[%s16570_s1 + $0x1194] sm:$0xf0]  ;;  %v5517_v63 = vadd.f32 %v5516_v12, %v14485_v50  ;;  %v8702_v22 = vor.u32 %v10643_v26, %v8701_v36  ;;  %v9005_v50 = vld [vmem:[%s16570_s1 + $0x1068] sm:$0xf] }
 0x20d   :  { %5778 = vmatpush.bf16.msra.mxu0 %v8734_v62  ;;  %v9166_v62 = vor.u32 %v10759_v52, %v9165_v4  ;;  %v10799_v33 = vld [vmem:[%s16570_s1 + $0x12f4] sm:$0xf0]  ;;  %v9453_v4 = vld [vmem:[%s16570_s1 + $0x13e8] sm:$0xf]  ;;  %v9150_v3 = vor.u32 %v10755_v20, %v9149_v37 }
 0x20e   :  { %5792 = vmatpush.bf16.msra.mxu1 %v8862_v8  ;;  %v9021_v8 = vld [vmem:[%s16570_s1 + $0x1088] sm:$0xf]  ;;  %v10831_v52 = vld [vmem:[%s16570_s1 + $0x13f4] sm:$0xf0] }
 0x20f   :  { %5802 = vmatpush.bf16.msra.mxu2 %v9054_v48  ;;  %v10723_v48 = vld [vmem:[%s16570_s1 + $0x1094] sm:$0xf0]  ;;  %v9133_v36 = vld [vmem:[%s16570_s1 + $0x1168] sm:$0xf]  ;;  %v9454_v26 = vor.u32 %v10831_v52, %v9453_v4  ;;  %v5530_v12 = vpop.f32.mrf.mxu2 }
 0x210   :  { %5816 = vmatpush.bf16.msra.mxu3 %v9182_v21  ;;  %v9325_v21 = vld [vmem:[%s16570_s1 + $0x12e8] sm:$0xf]  ;;  %v9022_v32 = vor.u32 %v10723_v48, %v9021_v8  ;;  %v10795_v45 = vld [vmem:[%s16570_s1 + $0x12d4] sm:$0xf0] }
 0x211   :  { %5779 = vmatpush.bf16.msra.mxu0 %v8718_v7  ;;  %v9326_v35 = vor.u32 %v10799_v33, %v9325_v21  ;;  %v10719_v7 = vld [vmem:[%s16570_s1 + $0x1074] sm:$0xf0]  ;;  %v5544_v21 = vpop.f32.mrf.mxu3  ;;  %v8989_v33 = vld [vmem:[%s16570_s1 + $0x1048] sm:$0xf] }
 0x212   :  { %5793 = vmatpush.bf16.msra.mxu1 %v8846_v31  ;;  %v10751_v31 = vld [vmem:[%s16570_s1 + $0x1174] sm:$0xf0]  ;;  %v9006_v48 = vor.u32 %v10719_v7, %v9005_v50  ;;  %v9293_v52 = vld [vmem:[%s16570_s1 + $0x12a8] sm:$0xf] }
 0x213   :  { %5803 = vmatpush.bf16.msra.mxu2 %v9038_v14  ;;  %v9309_v14 = vld [vmem:[%s16570_s1 + $0x12c8] sm:$0xf]  ;;  %v10827_v8 = vld [vmem:[%s16570_s1 + $0x13d4] sm:$0xf0]  ;;  %v9134_v37 = vor.u32 %v10751_v31, %v9133_v36 }
 0x214   :  { %5817 = vmatpush.bf16.msra.mxu3 %v9166_v62  ;;  %v9437_v62 = vld [vmem:[%s16570_s1 + $0x13c8] sm:$0xf]  ;;  %v9310_v20 = vor.u32 %v10795_v45, %v9309_v14  ;;  %v10747_v4 = vld [vmem:[%s16570_s1 + $0x1154] sm:$0xf0] }
 0x215   :  { %5780 = vmatpush.bf16.msra.mxu0 %v8702_v22  ;;  %v10715_v22 = vld [vmem:[%s16570_s1 + $0x1054] sm:$0xf0]  ;;  %v8973_v45 = vld [vmem:[%s16570_s1 + $0x1028] sm:$0xf] }
 0x216   :  { %5794 = vmatpush.bf16.msra.mxu1 %v8830_v41  ;;  %v9117_v41 = vld [vmem:[%s16570_s1 + $0x1148] sm:$0xf]  ;;  %v10791_v50 = vld [vmem:[%s16570_s1 + $0x12b4] sm:$0xf0] }
 0x217   :  { %5804 = vmatpush.bf16.msra.mxu2 %v9022_v32  ;;  %v9438_v32 = vor.u32 %v10827_v8, %v9437_v62  ;;  %v10823_v7 = vld [vmem:[%s16570_s1 + $0x13b4] sm:$0xf0]  ;;  %v9118_v31 = vor.u32 %v10747_v4, %v9117_v41  ;;  %v9294_v14 = vor.u32 %v10791_v50, %v9293_v52  ;;  %v9101_v8 = vld [vmem:[%s16570_s1 + $0x1128] sm:$0xf] }
 0x218   :  { %5818 = vmatpush.bf16.msra.mxu3 %v9150_v3  ;;  %5781 = vmatmul.bf16.vlgmr.msra.gmra.mxu0 %v11994_v38  ;;  %v14652_v3 = vpop.f32.mrf.mxu1  ;;  %v10711_v62 = vld [vmem:[%s16570_s1 + $0x1034] sm:$0xf0] }
 0x219   :  { %5829 = vmatpush.bf16.msrb.mxu0 %v9326_v35  ;;  %v5531_v35 = vadd.f32 %v5530_v12, %v5517_v63  ;;  %5795 = vmatmul.bf16.vlgmr.msra.gmra.mxu1 %v12004_v46  ;;  %v9421_v63 = vld [vmem:[%s16570_s1 + $0x13a8] sm:$0xf]  ;;  %v10707_v50 = vld [vmem:[%s16570_s1 + $0x1014] sm:$0xf0] }
 0x21a   :  { %5843 = vmatpush.bf16.msrb.mxu1 %v9454_v26  ;;  %v8990_v26 = vor.u32 %v10715_v22, %v8989_v33  ;;  %v9277_v12 = vld [vmem:[%s16570_s1 + $0x1288] sm:$0xf]  ;;  %v10819_v22 = vld [vmem:[%s16570_s1 + $0x1394] sm:$0xf0] }
 0x21b   :  { %5805 = vmatpush.bf16.msra.mxu2 %v9006_v48  ;;  %v5545_v36 = vadd.f32 %v5544_v21, %v5531_v35  ;;  %v9422_v48 = vor.u32 %v10823_v7, %v9421_v63  ;;  %v5558_v21 = vpop.f32.mrf.mxu0  ;;  %v9405_v33 = vld [vmem:[%s16570_s1 + $0x1388] sm:$0xf]  ;;  %v8974_v35 = vor.u32 %v10711_v62, %v8973_v45  ;;  %v10739_v7 = vld [vmem:[%s16570_s1 + $0x1114] sm:$0xf0] }
 0x21c   :  { %5819 = vmatpush.bf16.msra.mxu3 %v9134_v37  ;;  %v10743_v37 = vld [vmem:[%s16570_s1 + $0x1134] sm:$0xf0]  ;;  %v9085_v63 = vld [vmem:[%s16570_s1 + $0x1108] sm:$0xf] }
 0x21d   :  { %5830 = vmatpush.bf16.msrb.mxu0 %v9310_v20  ;;  %v10787_v20 = vld [vmem:[%s16570_s1 + $0x1294] sm:$0xf0]  ;;  %v5559_v41 = vadd.f32 %v5558_v21, %v5545_v36  ;;  %v9102_v4 = vor.u32 %v10743_v37, %v9101_v8  ;;  %v9406_v36 = vor.u32 %v10819_v22, %v9405_v33  ;;  %v9581_v62 = vld [vmem:[%s16570_s1 + $0x14e8] sm:$0xf]  ;;  %v9086_v33 = vor.u32 %v10739_v7, %v9085_v63 }
 0x21e   :  { %5844 = vmatpush.bf16.msrb.mxu1 %v9438_v32  ;;  %v8957_v32 = vld [vmem:[%s16570_s1 + $0x1008] sm:$0xf]  ;;  %v9278_v52 = vor.u32 %v10787_v20, %v9277_v12  ;;  %v10815_v45 = vld [vmem:[%s16570_s1 + $0x1374] sm:$0xf0] }
 0x21f   :  { %5806 = vmatpush.bf16.msra.mxu2 %v8990_v26  ;;  %v9261_v26 = vld [vmem:[%s16570_s1 + $0x1268] sm:$0xf]  ;;  %v10863_v8 = vld [vmem:[%s16570_s1 + $0x14f4] sm:$0xf0]  ;;  %v8958_v37 = vor.u32 %v10707_v50, %v8957_v32 }
 0x220   :  { %5820 = vmatpush.bf16.msra.mxu3 %v9118_v31  ;;  %v10783_v31 = vld [vmem:[%s16570_s1 + $0x1274] sm:$0xf0]  ;;  %v9709_v12 = vld [vmem:[%s16570_s1 + $0x15e8] sm:$0xf]  ;;  %v9582_v46 = vor.u32 %v10863_v8, %v9581_v62 }
 0x221   :  { %5831 = vmatpush.bf16.msrb.mxu0 %v9294_v14  ;;  %v9389_v14 = vld [vmem:[%s16570_s1 + $0x1368] sm:$0xf]  ;;  %v10895_v20 = vld [vmem:[%s16570_s1 + $0x15f4] sm:$0xf0]  ;;  %v9262_v22 = vor.u32 %v10783_v31, %v9261_v26 }
 0x222   :  { %5845 = vmatpush.bf16.msrb.mxu1 %v9422_v48  ;;  %v5572_v48 = vpop.f32.mrf.mxu1  ;;  %v9390_v38 = vor.u32 %v10815_v45, %v9389_v14  ;;  %v10779_v32 = vld [vmem:[%s16570_s1 + $0x1254] sm:$0xf0]  ;;  %v9565_v50 = vld [vmem:[%s16570_s1 + $0x14c8] sm:$0xf] }
 0x223   :  { %5807 = vmatpush.bf16.msra.mxu2 %v8974_v35  ;;  %v14730_v21 = vadd.f32 %v5572_v48, %v5559_v41  ;;  %v9245_v35 = vld [vmem:[%s16570_s1 + $0x1248] sm:$0xf]  ;;  %v10811_v41 = vld [vmem:[%s16570_s1 + $0x1354] sm:$0xf0] }
 0x224   :  { %5821 = vmatpush.bf16.msra.mxu3 %v9102_v4  ;;  %v9373_v4 = vld [vmem:[%s16570_s1 + $0x1348] sm:$0xf]  ;;  %v10859_v63 = vld [vmem:[%s16570_s1 + $0x14d4] sm:$0xf0]  ;;  %v9246_v26 = vor.u32 %v10779_v32, %v9245_v35 }
 0x225   :  { %5832 = vmatpush.bf16.msrb.mxu0 %v9278_v52  ;;  %v9710_v52 = vor.u32 %v10895_v20, %v9709_v12  ;;  %v9693_v7 = vld [vmem:[%s16570_s1 + $0x15c8] sm:$0xf]  ;;  %v9374_v31 = vor.u32 %v10811_v41, %v9373_v4  ;;  %v9566_v14 = vor.u32 %v10859_v63, %v9565_v50  ;;  %v10775_v62 = vld [vmem:[%s16570_s1 + $0x1234] sm:$0xf0] }
 0x226   :  { %5846 = vmatpush.bf16.msrb.mxu1 %v9406_v36  ;;  %v10891_v36 = vld [vmem:[%s16570_s1 + $0x15d4] sm:$0xf0]  ;;  %v9229_v45 = vld [vmem:[%s16570_s1 + $0x1228] sm:$0xf] }
 0x227   :  { %5808 = vmatpush.bf16.msra.mxu2 %v8958_v37  ;;  %v9357_v8 = vld [vmem:[%s16570_s1 + $0x1328] sm:$0xf]  ;;  %v9694_v48 = vor.u32 %v10891_v36, %v9693_v7  ;;  %v10855_v37 = vld [vmem:[%s16570_s1 + $0x14b4] sm:$0xf0] }
 0x228   :  { %5822 = vmatpush.bf16.msra.mxu3 %v9086_v33  ;;  %v9677_v12 = vld [vmem:[%s16570_s1 + $0x15a8] sm:$0xf]  ;;  %v10887_v20 = vld [vmem:[%s16570_s1 + $0x15b4] sm:$0xf0]  ;;  %v9230_v33 = vor.u32 %v10775_v62, %v9229_v45 }
 0x229   :  { %5833 = vmatpush.bf16.msrb.mxu0 %v9262_v22  ;;  %v9213_v22 = vld [vmem:[%s16570_s1 + $0x1208] sm:$0xf]  ;;  %v10771_v4 = vld [vmem:[%s16570_s1 + $0x1214] sm:$0xf0]  ;;  %v9678_v50 = vor.u32 %v10887_v20, %v9677_v12 }
 0x22a   :  { %5847 = vmatpush.bf16.msrb.mxu1 %v9390_v38  ;;  %5809 = vmatmul.bf16.vlgmr.msra.gmra.mxu2 %v12211_v51  ;;  %v10807_v38 = vld [vmem:[%s16570_s1 + $0x1334] sm:$0xf0]  ;;  %v9533_v63 = vld [vmem:[%s16570_s1 + $0x1488] sm:$0xf]  ;;  %v9214_v45 = vor.u32 %v10771_v4, %v9213_v22 }
 0x22b   :  { %5857 = vmatpush.bf16.msrb.mxu2 %v9582_v46  ;;  %v9549_v46 = vld [vmem:[%s16570_s1 + $0x14a8] sm:$0xf]  ;;  %5823 = vmatmul.bf16.vlgmr.msra.gmra.mxu3 %v12224_v56  ;;  %v9358_v35 = vor.u32 %v10807_v38, %v9357_v8  ;;  %v10803_v41 = vld [vmem:[%s16570_s1 + $0x1314] sm:$0xf0] }
 0x22c   :  { %5871 = vmatpush.bf16.msrb.mxu3 %v9710_v52  ;;  %v9550_v32 = vor.u32 %v10855_v37, %v9549_v46  ;;  %v9341_v52 = vld [vmem:[%s16570_s1 + $0x1308] sm:$0xf]  ;;  %v10851_v7 = vld [vmem:[%s16570_s1 + $0x1494] sm:$0xf0] }
 0x22d   :  { %5834 = vmatpush.bf16.msrb.mxu0 %v9246_v26  ;;  %v9661_v36 = vld [vmem:[%s16570_s1 + $0x1588] sm:$0xf]  ;;  %v10883_v26 = vld [vmem:[%s16570_s1 + $0x1594] sm:$0xf0]  ;;  %v9534_v38 = vor.u32 %v10851_v7, %v9533_v63 }
 0x22e   :  { %5848 = vmatpush.bf16.msrb.mxu1 %v9374_v31  ;;  %v9837_v31 = vld [vmem:[%s16570_s1 + $0x16e8] sm:$0xf]  ;;  %v10959_v8 = vld [vmem:[%s16570_s1 + $0x17f4] sm:$0xf0]  ;;  %v9662_v46 = vor.u32 %v10883_v26, %v9661_v36 }
 0x22f   :  { %5858 = vmatpush.bf16.msrb.mxu2 %v9566_v14  ;;  %v10927_v14 = vld [vmem:[%s16570_s1 + $0x16f4] sm:$0xf0]  ;;  %v9965_v62 = vld [vmem:[%s16570_s1 + $0x17e8] sm:$0xf] }
 0x230   :  { %5872 = vmatpush.bf16.msrb.mxu3 %v9694_v48  ;;  %v9342_v48 = vor.u32 %v10803_v41, %v9341_v52  ;;  %v9838_v37 = vor.u32 %v10927_v14, %v9837_v31  ;;  %v9517_v12 = vld [vmem:[%s16570_s1 + $0x1468] sm:$0xf]  ;;  %v10847_v20 = vld [vmem:[%s16570_s1 + $0x1474] sm:$0xf0]  ;;  %v9966_v22 = vor.u32 %v10959_v8, %v9965_v62 }
 0x231   :  { %5835 = vmatpush.bf16.msrb.mxu0 %v9230_v33  ;;  %v9645_v33 = vld [vmem:[%s16570_s1 + $0x1568] sm:$0xf]  ;;  %v10923_v4 = vld [vmem:[%s16570_s1 + $0x16d4] sm:$0xf0] }
 0x232   :  { %5849 = vmatpush.bf16.msrb.mxu1 %v9358_v35  ;;  %v10879_v35 = vld [vmem:[%s16570_s1 + $0x1574] sm:$0xf0]  ;;  %v9949_v52 = vld [vmem:[%s16570_s1 + $0x17c8] sm:$0xf] }
 0x233   :  { %5859 = vmatpush.bf16.msrb.mxu2 %v9550_v32  ;;  %v9821_v32 = vld [vmem:[%s16570_s1 + $0x16c8] sm:$0xf]  ;;  %v10955_v41 = vld [vmem:[%s16570_s1 + $0x17d4] sm:$0xf0]  ;;  %v9646_v63 = vor.u32 %v10879_v35, %v9645_v33 }
 0x234   :  { %5873 = vmatpush.bf16.msrb.mxu3 %v9678_v50  ;;  %v9518_v50 = vor.u32 %v10847_v20, %v9517_v12  ;;  %v9822_v7 = vor.u32 %v10923_v4, %v9821_v32  ;;  %v9501_v36 = vld [vmem:[%s16570_s1 + $0x1448] sm:$0xf]  ;;  %v10843_v26 = vld [vmem:[%s16570_s1 + $0x1454] sm:$0xf0]  ;;  %v9950_v14 = vor.u32 %v10955_v41, %v9949_v52 }
 0x235   :  { %5836 = vmatpush.bf16.msrb.mxu0 %v9214_v45  ;;  %v9629_v31 = vld [vmem:[%s16570_s1 + $0x1548] sm:$0xf]  ;;  %v10875_v45 = vld [vmem:[%s16570_s1 + $0x1554] sm:$0xf0] }
 0x236   :  { %5850 = vmatpush.bf16.msrb.mxu1 %v9342_v48  ;;  %v9805_v62 = vld [vmem:[%s16570_s1 + $0x16a8] sm:$0xf]  ;;  %v10919_v8 = vld [vmem:[%s16570_s1 + $0x16b4] sm:$0xf0] }
 0x237   :  { %5860 = vmatpush.bf16.msrb.mxu2 %v9534_v38  ;;  %v9933_v48 = vld [vmem:[%s16570_s1 + $0x17a8] sm:$0xf]  ;;  %v10951_v38 = vld [vmem:[%s16570_s1 + $0x17b4] sm:$0xf0]  ;;  %v9806_v12 = vor.u32 %v10919_v8, %v9805_v62 }
 0x238   :  { %5874 = vmatpush.bf16.msrb.mxu3 %v9662_v46  ;;  %5837 = vmatmul.bf16.vlgmr.msrb.gmra.mxu0 %v12222_v55  ;;  %v9502_v46 = vor.u32 %v10843_v26, %v9501_v36  ;;  %v9485_v20 = vld [vmem:[%s16570_s1 + $0x1428] sm:$0xf]  ;;  %v10839_v33 = vld [vmem:[%s16570_s1 + $0x1434] sm:$0xf0]  ;;  %v9934_v35 = vor.u32 %v10951_v38, %v9933_v48 }
 0x239   :  { %5885 = vmatpush.bf16.msra.mxu0 %v9838_v37  ;;  %5851 = vmatmul.bf16.vlgmr.msrb.gmra.mxu1 %v12232_v60  ;;  %v9630_v37 = vor.u32 %v10875_v45, %v9629_v31  ;;  %v10871_v32 = vld [vmem:[%s16570_s1 + $0x1534] sm:$0xf0]  ;;  %v9789_v4 = vld [vmem:[%s16570_s1 + $0x1688] sm:$0xf] }
 0x23a   :  { %5899 = vmatpush.bf16.msra.mxu1 %v9966_v22  ;;  %v9613_v22 = vld [vmem:[%s16570_s1 + $0x1528] sm:$0xf]  ;;  %v10915_v52 = vld [vmem:[%s16570_s1 + $0x1694] sm:$0xf0] }
 0x23b   :  { %5861 = vmatpush.bf16.msrb.mxu2 %v9518_v50  ;;  %v9917_v41 = vld [vmem:[%s16570_s1 + $0x1788] sm:$0xf]  ;;  %v10947_v50 = vld [vmem:[%s16570_s1 + $0x1794] sm:$0xf0]  ;;  %v9614_v36 = vor.u32 %v10871_v32, %v9613_v22  ;;  %v9790_v26 = vor.u32 %v10915_v52, %v9789_v4  ;;  %v7023_v22 = vld [vmem:[%s16570_s1 + $0xf8] sm:$0xf0] }
 0x23c   :  { %5875 = vmatpush.bf16.msrb.mxu3 %v9646_v63  ;;  %v9486_v63 = vor.u32 %v10839_v33, %v9485_v20  ;;  %v10835_v31 = vld [vmem:[%s16570_s1 + $0x1414] sm:$0xf0]  ;;  %v9918_v62 = vor.u32 %v10947_v50, %v9917_v41  ;;  %v9773_v8 = vld [vmem:[%s16570_s1 + $0x1668] sm:$0xf]  ;;  %v10221_v33 = vld [vmem:[%s16570_s1 + $0xec] sm:$0xf] }
 0x23d   :  { %5886 = vmatpush.bf16.msra.mxu0 %v9822_v7  ;;  %v9469_v7 = vld [vmem:[%s16570_s1 + $0x1408] sm:$0xf]  ;;  %v10867_v45 = vld [vmem:[%s16570_s1 + $0x1514] sm:$0xf0] }
 0x23e   :  { %5900 = vmatpush.bf16.msra.mxu1 %v9950_v14  ;;  %v9597_v14 = vld [vmem:[%s16570_s1 + $0x1508] sm:$0xf]  ;;  %v10911_v48 = vld [vmem:[%s16570_s1 + $0x1674] sm:$0xf0]  ;;  %v9470_v20 = vor.u32 %v10835_v31, %v9469_v7  ;;  %v7026_v7 = vor.u32 %v10221_v33, %v7023_v22 }
 0x23f   :  { %5862 = vmatpush.bf16.msrb.mxu2 %v9502_v46  ;;  %v9901_v38 = vld [vmem:[%s16570_s1 + $0x1768] sm:$0xf]  ;;  %v10943_v46 = vld [vmem:[%s16570_s1 + $0x1774] sm:$0xf0]  ;;  %v9774_v32 = vor.u32 %v10911_v48, %v9773_v8 }
 0x240   :  { %5876 = vmatpush.bf16.msrb.mxu3 %v9630_v37  ;;  %v10029_v37 = vld [vmem:[%s16570_s1 + $0x1868] sm:$0xf]  ;;  %v9902_v4 = vor.u32 %v10943_v46, %v9901_v38  ;;  %v10907_v50 = vld [vmem:[%s16570_s1 + $0x1654] sm:$0xf0] }
 0x241   :  { %5887 = vmatpush.bf16.msra.mxu0 %v9806_v12  ;;  %v10975_v12 = vld [vmem:[%s16570_s1 + $0x1874] sm:$0xf0]  ;;  %v9757_v41 = vld [vmem:[%s16570_s1 + $0x1648] sm:$0xf] }
 0x242   :  { %5901 = vmatpush.bf16.msra.mxu1 %v9934_v35  ;;  %v9598_v35 = vor.u32 %v10867_v45, %v9597_v14  ;;  %v10030_v52 = vor.u32 %v10975_v12, %v10029_v37  ;;  %v10971_v31 = vld [vmem:[%s16570_s1 + $0x1854] sm:$0xf0]  ;;  %v10217_v14 = vld [vmem:[%s16570_s1 + $0xcc] sm:$0xf]  ;;  %v7007_v45 = vld [vmem:[%s16570_s1 + $0xd8] sm:$0xf0] }
 0x243   :  { %5863 = vmatpush.bf16.msrb.mxu2 %v9486_v63  ;;  %v9885_v63 = vld [vmem:[%s16570_s1 + $0x1748] sm:$0xf]  ;;  %v10903_v46 = vld [vmem:[%s16570_s1 + $0x1634] sm:$0xf0]  ;;  %v7010_v12 = vor.u32 %v10217_v14, %v7007_v45  ;;  %v10209_v45 = vld [vmem:[%s16570_s1 + $0x8c] sm:$0xf] }
 0x244   :  { %5877 = vmatpush.bf16.msrb.mxu3 %v9614_v36  ;;  %v10939_v36 = vld [vmem:[%s16570_s1 + $0x1754] sm:$0xf0]  ;;  %v9741_v38 = vld [vmem:[%s16570_s1 + $0x1628] sm:$0xf] }
 0x245   :  { %5888 = vmatpush.bf16.msra.mxu0 %v9790_v26  ;;  %v10013_v26 = vld [vmem:[%s16570_s1 + $0x1848] sm:$0xf]  ;;  %v9886_v8 = vor.u32 %v10939_v36, %v9885_v63  ;;  %v10967_v22 = vld [vmem:[%s16570_s1 + $0x1834] sm:$0xf0] }
 0x246   :  { %5902 = vmatpush.bf16.msra.mxu1 %v9918_v62  ;;  %v9758_v62 = vor.u32 %v10907_v50, %v9757_v41  ;;  %v10014_v48 = vor.u32 %v10971_v31, %v10013_v26  ;;  %v9869_v37 = vld [vmem:[%s16570_s1 + $0x1728] sm:$0xf]  ;;  %v10899_v41 = vld [vmem:[%s16570_s1 + $0x1614] sm:$0xf0] }
 0x247   :  { %5864 = vmatpush.bf16.msrb.mxu2 %v9470_v20  ;;  %v10935_v20 = vld [vmem:[%s16570_s1 + $0x1734] sm:$0xf0]  ;;  %v9997_v33 = vld [vmem:[%s16570_s1 + $0x1828] sm:$0xf] }
 0x248   :  { %5878 = vmatpush.bf16.msrb.mxu3 %v9598_v35  ;;  %v10213_v35 = vld [vmem:[%s16570_s1 + $0xac] sm:$0xf]  ;;  %v9870_v50 = vor.u32 %v10935_v20, %v9869_v37  ;;  %v9998_v63 = vor.u32 %v10967_v22, %v9997_v33  ;;  %v10931_v36 = vld [vmem:[%s16570_s1 + $0x1714] sm:$0xf0]  ;;  %v9981_v26 = vld [vmem:[%s16570_s1 + $0x1808] sm:$0xf] }
 0x249   :  { %5889 = vmatpush.bf16.msra.mxu0 %v9774_v32  ;;  %v6991_v32 = vld [vmem:[%s16570_s1 + $0xb8] sm:$0xf0]  ;;  %v10963_v14 = vld [vmem:[%s16570_s1 + $0x1814] sm:$0xf0] }
 0x24a   :  { %5903 = vmatpush.bf16.msra.mxu1 %v9902_v4  ;;  %5865 = vmatmul.bf16.vlgmr.msrb.gmra.mxu2 %v12443_v19  ;;  %v9742_v4 = vor.u32 %v10903_v46, %v9741_v38  ;;  %v6994_v31 = vor.u32 %v10213_v35, %v6991_v32  ;;  %v10285_v38 = vld [vmem:[%s16570_s1 + $0x2ec] sm:$0xf]  ;;  %v7279_v37 = vld [vmem:[%s16570_s1 + $0x2f8] sm:$0xf0]  ;;  %v9982_v22 = vor.u32 %v10963_v14, %v9981_v26 }
 0x24b   :  { %5917 = vmatpush.bf16.msra.mxu2 %v10030_v52  ;;  %5879 = vmatmul.bf16.vlgmr.msrb.gmra.mxu3 %v12456_v25  ;;  %v9725_v52 = vld [vmem:[%s16570_s1 + $0x1608] sm:$0xf]  ;;  %v7407_v20 = vld [vmem:[%s16570_s1 + $0x3f8] sm:$0xf0]  ;;  %v10313_v26 = vld [vmem:[%s16570_s1 + $0x3cc] sm:$0xf] }
 0x24c   :  { %5927 = vmatpush.bf16.msra.mxu3 %v7026_v7  ;;  %v9853_v7 = vld [vmem:[%s16570_s1 + $0x1708] sm:$0xf]  ;;  %v9726_v46 = vor.u32 %v10899_v41, %v9725_v52  ;;  %v6959_v52 = vld [vmem:[%s16570_s1 + $0x78] sm:$0xf0]  ;;  %v7282_v41 = vor.u32 %v10285_v38, %v7279_v37 }
 0x24d   :  { %5890 = vmatpush.bf16.msra.mxu0 %v9758_v62  ;;  %v6975_v62 = vld [vmem:[%s16570_s1 + $0x98] sm:$0xf0]  ;;  %v9854_v33 = vor.u32 %v10931_v36, %v9853_v7  ;;  %v10281_v7 = vld [vmem:[%s16570_s1 + $0x2cc] sm:$0xf] }
 0x24e   :  { %5904 = vmatpush.bf16.msra.mxu1 %v9886_v8  ;;  %v10253_v8 = vld [vmem:[%s16570_s1 + $0x1ec] sm:$0xf]  ;;  %v6978_v35 = vor.u32 %v10209_v45, %v6975_v62  ;;  %v7263_v36 = vld [vmem:[%s16570_s1 + $0x2d8] sm:$0xf0] }
 0x24f   :  { %5918 = vmatpush.bf16.msra.mxu2 %v10014_v48  ;;  %v7151_v48 = vld [vmem:[%s16570_s1 + $0x1f8] sm:$0xf0]  ;;  %v10201_v62 = vld [vmem:[%s16570_s1 + $0x4c] sm:$0xf] }
 0x250   :  { %5928 = vmatpush.bf16.msra.mxu3 %v7010_v12  ;;  %v10317_v12 = vld [vmem:[%s16570_s1 + $0x3ec] sm:$0xf]  ;;  %v7154_v32 = vor.u32 %v10253_v8, %v7151_v48  ;;  %v6943_v8 = vld [vmem:[%s16570_s1 + $0x58] sm:$0xf0]  ;;  %v7266_v48 = vor.u32 %v10281_v7, %v7263_v36 }
 0x251   :  { %5891 = vmatpush.bf16.msra.mxu0 %v9742_v4  ;;  %v10205_v4 = vld [vmem:[%s16570_s1 + $0x6c] sm:$0xf]  ;;  %v7410_v25 = vor.u32 %v10317_v12, %v7407_v20  ;;  %v7119_v37 = vld [vmem:[%s16570_s1 + $0x1b8] sm:$0xf0] }
 0x252   :  { %5905 = vmatpush.bf16.msra.mxu1 %v9870_v50  ;;  %v10249_v50 = vld [vmem:[%s16570_s1 + $0x1cc] sm:$0xf]  ;;  %v6962_v14 = vor.u32 %v10205_v4, %v6959_v52  ;;  %v6927_v4 = vld [vmem:[%s16570_s1 + $0x38] sm:$0xf0] }
 0x253   :  { %5919 = vmatpush.bf16.msra.mxu2 %v9998_v63  ;;  %v7135_v63 = vld [vmem:[%s16570_s1 + $0x1d8] sm:$0xf0]  ;;  %v10277_v12 = vld [vmem:[%s16570_s1 + $0x2ac] sm:$0xf] }
 0x254   :  { %5929 = vmatpush.bf16.msra.mxu3 %v6994_v31  ;;  %v7391_v31 = vld [vmem:[%s16570_s1 + $0x3d8] sm:$0xf0]  ;;  %v7138_v45 = vor.u32 %v10249_v50, %v7135_v63  ;;  %v10309_v20 = vld [vmem:[%s16570_s1 + $0x3ac] sm:$0xf] }
 0x255   :  { %5892 = vmatpush.bf16.msra.mxu0 %v9726_v46  ;;  %v7394_v38 = vor.u32 %v10313_v26, %v7391_v31  ;;  %v10245_v46 = vld [vmem:[%s16570_s1 + $0x1ac] sm:$0xf]  ;;  %v7103_v63 = vld [vmem:[%s16570_s1 + $0x198] sm:$0xf0] }
 0x256   :  { %5906 = vmatpush.bf16.msra.mxu1 %v9854_v33  ;;  %v7375_v33 = vld [vmem:[%s16570_s1 + $0x3b8] sm:$0xf0]  ;;  %v10241_v50 = vld [vmem:[%s16570_s1 + $0x18c] sm:$0xf] }
 0x257   :  { %5920 = vmatpush.bf16.msra.mxu2 %v9982_v22  ;;  %v6946_v22 = vor.u32 %v10201_v62, %v6943_v8  ;;  %v10273_v7 = vld [vmem:[%s16570_s1 + $0x28c] sm:$0xf]  ;;  %v7231_v36 = vld [vmem:[%s16570_s1 + $0x298] sm:$0xf0] }
 0x258   :  { %5930 = vmatpush.bf16.msra.mxu3 %v6978_v35  ;;  %5893 = vmatmul.bf16.vlgmr.msra.gmra.mxu0 %v12454_v23  ;;  %v7122_v35 = vor.u32 %v10245_v46, %v7119_v37  ;;  %v10305_v26 = vld [vmem:[%s16570_s1 + $0x38c] sm:$0xf]  ;;  %v7359_v31 = vld [vmem:[%s16570_s1 + $0x398] sm:$0xf0] }
 0x259   :  { %5941 = vmatpush.bf16.msrb.mxu0 %v7154_v32  ;;  %5907 = vmatmul.bf16.vlgmr.msra.gmra.mxu1 %v12466_v29  ;;  %v10197_v32 = vld [vmem:[%s16570_s1 + $0x2c] sm:$0xf]  ;;  %v6911_v8 = vld [vmem:[%s16570_s1 + $0x18] sm:$0xf0] }
 0x25a   :  { %5955 = vmatpush.bf16.msrb.mxu1 %v7282_v41  ;;  %v7378_v41 = vor.u32 %v10309_v20, %v7375_v33  ;;  %10037 = vmatmul.msk.bf16.vlgmr.msra.gmra.mxu2 %vm4873_vm0, %v12576_v6  ;;  %v10193_v62 = vld [vmem:[%s16570_s1 + $0xc] sm:$0xf]  ;;  %v7087_v37 = vld [vmem:[%s16570_s1 + $0x178] sm:$0xf0]  ;;  %v15229_v6 = vpop.f32.mrf.mxu0 }
 0x25b   :  { %5969 = vmatpush.bf16.msrb.mxu2 %v7410_v25  ;;  %v7247_v25 = vld [vmem:[%s16570_s1 + $0x2b8] sm:$0xf0]  ;;  %v10237_v46 = vld [vmem:[%s16570_s1 + $0x16c] sm:$0xf] }
 0x25c   :  { %5931 = vmatpush.bf16.msra.mxu3 %v6962_v14  ;;  %v7250_v52 = vor.u32 %v10277_v12, %v7247_v25  ;;  %v6930_v14 = vor.u32 %v10197_v32, %v6927_v4  ;;  %v10269_v12 = vld [vmem:[%s16570_s1 + $0x26c] sm:$0xf]  ;;  %v7215_v25 = vld [vmem:[%s16570_s1 + $0x278] sm:$0xf0]  ;;  %v6914_v32 = vor.u32 %v10193_v62, %v6911_v8  ;;  %v7090_v4 = vor.u32 %v10237_v46, %v7087_v37 }
 0x25d   :  { %5942 = vmatpush.bf16.msrb.mxu0 %v7138_v45  ;;  %v7106_v45 = vor.u32 %v10241_v50, %v7103_v63  ;;  %v10301_v20 = vld [vmem:[%s16570_s1 + $0x36c] sm:$0xf]  ;;  %v7343_v33 = vld [vmem:[%s16570_s1 + $0x378] sm:$0xf0] }
 0x25e   :  { %5956 = vmatpush.bf16.msrb.mxu1 %v7266_v48  ;;  %v7234_v48 = vor.u32 %v10273_v7, %v7231_v36  ;;  %v10233_v50 = vld [vmem:[%s16570_s1 + $0x14c] sm:$0xf]  ;;  %v7071_v63 = vld [vmem:[%s16570_s1 + $0x158] sm:$0xf0] }
 0x25f   :  { %5970 = vmatpush.bf16.msrb.mxu2 %v7394_v38  ;;  %v7362_v38 = vor.u32 %v10305_v26, %v7359_v31  ;;  %v10265_v7 = vld [vmem:[%s16570_s1 + $0x24c] sm:$0xf]  ;;  %v7199_v26 = vld [vmem:[%s16570_s1 + $0x258] sm:$0xf0]  ;;  %v7074_v8 = vor.u32 %v10233_v50, %v7071_v63 }
 0x260   :  { %5932 = vmatpush.bf16.msra.mxu3 %v6946_v22  ;;  %v10349_v22 = vld [vmem:[%s16570_s1 + $0x4ec] sm:$0xf]  ;;  %v7519_v62 = vld [vmem:[%s16570_s1 + $0x4d8] sm:$0xf0] }
 0x261   :  { %5943 = vmatpush.bf16.msrb.mxu0 %v7122_v35  ;;  %v7535_v35 = vld [vmem:[%s16570_s1 + $0x4f8] sm:$0xf0]  ;;  %v10297_v31 = vld [vmem:[%s16570_s1 + $0x34c] sm:$0xf] }
 0x262   :  { %5957 = vmatpush.bf16.msrb.mxu1 %v7250_v52  ;;  %v7218_v52 = vor.u32 %v10269_v12, %v7215_v25  ;;  %v7538_v36 = vor.u32 %v10349_v22, %v7535_v35  ;;  %v10229_v46 = vld [vmem:[%s16570_s1 + $0x12c] sm:$0xf]  ;;  %v7055_v37 = vld [vmem:[%s16570_s1 + $0x138] sm:$0xf0]  ;;  %v15168_v35 = vpop.f32.mrf.mxu2 }
 0x263   :  { %5971 = vmatpush.bf16.msrb.mxu2 %v7378_v41  ;;  %v7346_v41 = vor.u32 %v10301_v20, %v7343_v33  ;;  %v10261_v12 = vld [vmem:[%s16570_s1 + $0x22c] sm:$0xf]  ;;  %v7183_v20 = vld [vmem:[%s16570_s1 + $0x238] sm:$0xf0] }
 0x264   :  { %5933 = vmatpush.bf16.msra.mxu3 %v6930_v14  ;;  %v7327_v14 = vld [vmem:[%s16570_s1 + $0x358] sm:$0xf0]  ;;  %v10293_v33 = vld [vmem:[%s16570_s1 + $0x32c] sm:$0xf]  ;;  %v7186_v63 = vor.u32 %v10261_v12, %v7183_v20  ;;  %v4903_v20 = vadd.f32 %v12464_v28, %v12432_v13 }
 0x265   :  { %5944 = vmatpush.bf16.msrb.mxu0 %v7106_v45  ;;  %v10345_v45 = vld [vmem:[%s16570_s1 + $0x4cc] sm:$0xf]  ;;  %v7311_v22 = vld [vmem:[%s16570_s1 + $0x338] sm:$0xf0] }
 0x266   :  { %5958 = vmatpush.bf16.msrb.mxu1 %v7234_v48  ;;  %v7202_v48 = vor.u32 %v10265_v7, %v7199_v26  ;;  %v7522_v25 = vor.u32 %v10345_v45, %v7519_v62  ;;  %v7039_v50 = vld [vmem:[%s16570_s1 + $0x118] sm:$0xf0]  ;;  %v7314_v7 = vor.u32 %v10293_v33, %v7311_v22  ;;  %v10289_v26 = vld [vmem:[%s16570_s1 + $0x30c] sm:$0xf]  ;;  %v15221_v33 = vpop.f32.mrf.mxu3 }
 0x267   :  { %5972 = vmatpush.bf16.msrb.mxu2 %v7362_v38  ;;  %v7330_v38 = vor.u32 %v10297_v31, %v7327_v14  ;;  %v7295_v14 = vld [vmem:[%s16570_s1 + $0x318] sm:$0xf0]  ;;  %v10337_v45 = vld [vmem:[%s16570_s1 + $0x48c] sm:$0xf] }
 0x268   :  { %5934 = vmatpush.bf16.msra.mxu3 %v6914_v32  ;;  %v10341_v32 = vld [vmem:[%s16570_s1 + $0x4ac] sm:$0xf]  ;;  %v7487_v62 = vld [vmem:[%s16570_s1 + $0x498] sm:$0xf0] }
 0x269   :  { %5945 = vmatpush.bf16.msrb.mxu0 %v7090_v4  ;;  %v7503_v4 = vld [vmem:[%s16570_s1 + $0x4b8] sm:$0xf0]  ;;  %v10445_v12 = vld [vmem:[%s16570_s1 + $0x7ec] sm:$0xf] }
 0x26a   :  { %5959 = vmatpush.bf16.msrb.mxu1 %v7218_v52  ;;  %v7058_v52 = vor.u32 %v10229_v46, %v7055_v37  ;;  %v7506_v31 = vor.u32 %v10341_v32, %v7503_v4  ;;  %v7791_v37 = vld [vmem:[%s16570_s1 + $0x6f8] sm:$0xf0]  ;;  %v7298_v32 = vor.u32 %v10289_v26, %v7295_v14  ;;  %v7490_v4 = vor.u32 %v10337_v45, %v7487_v62  ;;  %v15231_v13 = vpop.f32.mrf.mxu2 }
 0x26b   :  { %5973 = vmatpush.bf16.msrb.mxu2 %v7346_v41  ;;  %5935 = vmatmul.bf16.vlgmr.msra.gmra.mxu3 %v11305_v58  ;;  %v10225_v41 = vld [vmem:[%s16570_s1 + $0x10c] sm:$0xf]  ;;  %v7167_v58 = vld [vmem:[%s16570_s1 + $0x218] sm:$0xf0]  ;;  %v4917_v45 = vadd.f32 %v12496_v59, %v4903_v20 }
 0x26c   :  { %5983 = vmatpush.bf16.msrb.mxu3 %v7538_v36  ;;  %v10257_v36 = vld [vmem:[%s16570_s1 + $0x20c] sm:$0xf]  ;;  %v7042_v46 = vor.u32 %v10225_v41, %v7039_v50  ;;  %v7471_v50 = vld [vmem:[%s16570_s1 + $0x478] sm:$0xf0] }
 0x26d   :  { %5946 = vmatpush.bf16.msrb.mxu0 %v7074_v8  ;;  %v10381_v8 = vld [vmem:[%s16570_s1 + $0x5ec] sm:$0xf]  ;;  %v7170_v22 = vor.u32 %v10257_v36, %v7167_v58  ;;  %v7647_v36 = vld [vmem:[%s16570_s1 + $0x5d8] sm:$0xf0] }
 0x26e   :  { %5960 = vmatpush.bf16.msrb.mxu1 %v7202_v48  ;;  %v7663_v48 = vld [vmem:[%s16570_s1 + $0x5f8] sm:$0xf0]  ;;  %v10333_v41 = vld [vmem:[%s16570_s1 + $0x46c] sm:$0xf] }
 0x26f   :  { %5974 = vmatpush.bf16.msrb.mxu2 %v7330_v38  ;;  %v10413_v38 = vld [vmem:[%s16570_s1 + $0x6ec] sm:$0xf]  ;;  %v7775_v26 = vld [vmem:[%s16570_s1 + $0x6d8] sm:$0xf0]  ;;  %v7474_v62 = vor.u32 %v10333_v41, %v7471_v50  ;;  %v15281_v41 = vpop.f32.mrf.mxu3 }
 0x270   :  { %5984 = vmatpush.bf16.msrb.mxu3 %v7522_v25  ;;  %v7919_v25 = vld [vmem:[%s16570_s1 + $0x7f8] sm:$0xf0]  ;;  %v7794_v28 = vor.u32 %v10413_v38, %v7791_v37  ;;  %v10409_v58 = vld [vmem:[%s16570_s1 + $0x6cc] sm:$0xf] }
 0x271   :  { %5947 = vmatpush.bf16.msrb.mxu0 %v7058_v52  ;;  %v7666_v52 = vor.u32 %v10381_v8, %v7663_v48  ;;  %v7903_v14 = vld [vmem:[%s16570_s1 + $0x7d8] sm:$0xf0]  ;;  %v10329_v48 = vld [vmem:[%s16570_s1 + $0x44c] sm:$0xf]  ;;  %v7778_v37 = vor.u32 %v10409_v58, %v7775_v26 }
 0x272   :  { %5961 = vmatpush.bf16.msrb.mxu1 %v7186_v63  ;;  %v7922_v63 = vor.u32 %v10445_v12, %v7919_v25  ;;  %v7455_v38 = vld [vmem:[%s16570_s1 + $0x458] sm:$0xf0]  ;;  %v10373_v12 = vld [vmem:[%s16570_s1 + $0x5ac] sm:$0xf] }
 0x273   :  { %5975 = vmatpush.bf16.msrb.mxu2 %v7314_v7  ;;  %v10377_v7 = vld [vmem:[%s16570_s1 + $0x5cc] sm:$0xf]  ;;  %v7631_v25 = vld [vmem:[%s16570_s1 + $0x5b8] sm:$0xf0]  ;;  %v7458_v50 = vor.u32 %v10329_v48, %v7455_v38 }
 0x274   :  { %5985 = vmatpush.bf16.msrb.mxu3 %v7506_v31  ;;  %v10441_v31 = vld [vmem:[%s16570_s1 + $0x7cc] sm:$0xf]  ;;  %v7650_v8 = vor.u32 %v10377_v7, %v7647_v36  ;;  %v15291_v7 = vpop.f32.mrf.mxu0  ;;  %v7615_v58 = vld [vmem:[%s16570_s1 + $0x598] sm:$0xf0] }
 0x275   :  { %5948 = vmatpush.bf16.msrb.mxu0 %v7042_v46  ;;  %v15258_v46 = vpop.f32.mrf.mxu1  ;;  %v7906_v59 = vor.u32 %v10441_v31, %v7903_v14  ;;  %v10405_v20 = vld [vmem:[%s16570_s1 + $0x6ac] sm:$0xf]  ;;  %v7871_v14 = vld [vmem:[%s16570_s1 + $0x798] sm:$0xf0] }
 0x276   :  { %5962 = vmatpush.bf16.msrb.mxu1 %v7170_v22  ;;  %v7759_v22 = vld [vmem:[%s16570_s1 + $0x6b8] sm:$0xf0]  ;;  %v10369_v36 = vld [vmem:[%s16570_s1 + $0x58c] sm:$0xf] }
 0x277   :  { %5976 = vmatpush.bf16.msrb.mxu2 %v7298_v32  ;;  %v10437_v32 = vld [vmem:[%s16570_s1 + $0x7ac] sm:$0xf]  ;;  %v7423_v38 = vld [vmem:[%s16570_s1 + $0x418] sm:$0xf0] }
 0x278   :  { %5986 = vmatpush.bf16.msrb.mxu3 %v7490_v4  ;;  %v7887_v4 = vld [vmem:[%s16570_s1 + $0x7b8] sm:$0xf0]  ;;  %5949 = vmatmul.bf16.vlgmr.msrb.gmra.mxu0 %v11341_v10  ;;  %v10401_v26 = vld [vmem:[%s16570_s1 + $0x68c] sm:$0xf] }
 0x279   :  { %5997 = vmatpush.bf16.msra.mxu0 %v7666_v52  ;;  %v4931_v52 = vadd.f32 %v12510_v5, %v4917_v45  ;;  %5963 = vmatmul.bf16.vlgmr.msrb.gmra.mxu1 %v11319_v1  ;;  %v7762_v5 = vor.u32 %v10405_v20, %v7759_v22  ;;  %v7890_v1 = vor.u32 %v10437_v32, %v7887_v4  ;;  %v10433_v31 = vld [vmem:[%s16570_s1 + $0x78c] sm:$0xf]  ;;  %v15311_v45 = vpop.f32.mrf.mxu2  ;;  %v7599_v22 = vld [vmem:[%s16570_s1 + $0x578] sm:$0xf0] }
 0x27a   :  { %6011 = vmatpush.bf16.msra.mxu1 %v7794_v28  ;;  %5977 = vmatmul.bf16.vlgmr.msrb.gmra.mxu2 %v11355_v17  ;;  %v7634_v28 = vor.u32 %v10373_v12, %v7631_v25  ;;  %v7439_v17 = vld [vmem:[%s16570_s1 + $0x438] sm:$0xf0]  ;;  %v10321_v48 = vld [vmem:[%s16570_s1 + $0x40c] sm:$0xf]  ;;  %v7874_v25 = vor.u32 %v10433_v31, %v7871_v14 }
 0x27b   :  { %6025 = vmatpush.bf16.msra.mxu2 %v7922_v63  ;;  %v10325_v63 = vld [vmem:[%s16570_s1 + $0x42c] sm:$0xf]  ;;  %v4945_v10 = vadd.f32 %v12675_v30, %v4931_v52  ;;  %v7743_v30 = vld [vmem:[%s16570_s1 + $0x698] sm:$0xf0] }
 0x27c   :  { %5987 = vmatpush.bf16.msrb.mxu3 %v7474_v62  ;;  %v7442_v62 = vor.u32 %v10325_v63, %v7439_v17  ;;  %v7746_v12 = vor.u32 %v10401_v26, %v7743_v30  ;;  %v10365_v20 = vld [vmem:[%s16570_s1 + $0x56c] sm:$0xf]  ;;  %v7855_v52 = vld [vmem:[%s16570_s1 + $0x778] sm:$0xf0]  ;;  %v7426_v17 = vor.u32 %v10321_v48, %v7423_v38  ;;  %v15368_v48 = vpop.f32.mrf.mxu0 }
 0x27d   :  { %5998 = vmatpush.bf16.msra.mxu0 %v7650_v8  ;;  %v7618_v8 = vor.u32 %v10369_v36, %v7615_v58  ;;  %v10397_v32 = vld [vmem:[%s16570_s1 + $0x66c] sm:$0xf]  ;;  %v8047_v63 = vld [vmem:[%s16570_s1 + $0x8f8] sm:$0xf0] }
 0x27e   :  { %6012 = vmatpush.bf16.msra.mxu1 %v7778_v37  ;;  %v4959_v37 = vadd.f32 %v12683_v34, %v4945_v10  ;;  %v7727_v34 = vld [vmem:[%s16570_s1 + $0x678] sm:$0xf0]  ;;  %v10429_v4 = vld [vmem:[%s16570_s1 + $0x76c] sm:$0xf]  ;;  %v7602_v10 = vor.u32 %v10365_v20, %v7599_v22 }
 0x27f   :  { %6026 = vmatpush.bf16.msra.mxu2 %v7906_v59  ;;  %v15320_v59 = vpop.f32.mrf.mxu1  ;;  %v7858_v36 = vor.u32 %v10429_v4, %v7855_v52  ;;  %v7583_v58 = vld [vmem:[%s16570_s1 + $0x558] sm:$0xf0]  ;;  %v10393_v26 = vld [vmem:[%s16570_s1 + $0x64c] sm:$0xf] }
 0x280   :  { %5988 = vmatpush.bf16.msrb.mxu3 %v7458_v50  ;;  %v4973_v50 = vadd.f32 %v12724_v9, %v4959_v37  ;;  %v10361_v9 = vld [vmem:[%s16570_s1 + $0x54c] sm:$0xf]  ;;  %v7711_v31 = vld [vmem:[%s16570_s1 + $0x658] sm:$0xf0] }
 0x281   :  { %5999 = vmatpush.bf16.msra.mxu0 %v7634_v28  ;;  %v10477_v28 = vld [vmem:[%s16570_s1 + $0x8ec] sm:$0xf]  ;;  %v8031_v37 = vld [vmem:[%s16570_s1 + $0x8d8] sm:$0xf0]  ;;  %v15379_v22 = vpop.f32.mrf.mxu2 }
 0x282   :  { %6013 = vmatpush.bf16.msra.mxu1 %v7762_v5  ;;  %v15347_v5 = vpop.f32.mrf.mxu3  ;;  %v8050_v30 = vor.u32 %v10477_v28, %v8047_v63  ;;  %v10425_v14 = vld [vmem:[%s16570_s1 + $0x74c] sm:$0xf]  ;;  %v7567_v4 = vld [vmem:[%s16570_s1 + $0x538] sm:$0xf0] }
 0x283   :  { %6027 = vmatpush.bf16.msra.mxu2 %v7890_v1  ;;  %v7730_v1 = vor.u32 %v10397_v32, %v7727_v34  ;;  %v10473_v38 = vld [vmem:[%s16570_s1 + $0x8cc] sm:$0xf] }
 0x284   :  { %5989 = vmatpush.bf16.msrb.mxu3 %v7442_v62  ;;  %v7839_v62 = vld [vmem:[%s16570_s1 + $0x758] sm:$0xf0]  ;;  %v10357_v34 = vld [vmem:[%s16570_s1 + $0x52c] sm:$0xf] }
 0x285   :  { %6000 = vmatpush.bf16.msra.mxu0 %v7618_v8  ;;  %v4987_v8 = vadd.f32 %v12735_v18, %v4973_v50  ;;  %v7714_v18 = vor.u32 %v10393_v26, %v7711_v31  ;;  %v7842_v32 = vor.u32 %v10425_v14, %v7839_v62  ;;  %v10421_v52 = vld [vmem:[%s16570_s1 + $0x72c] sm:$0xf]  ;;  %v7823_v50 = vld [vmem:[%s16570_s1 + $0x738] sm:$0xf0] }
 0x286   :  { %6014 = vmatpush.bf16.msra.mxu1 %v7746_v12  ;;  %v5253_v12 = vadd.f32 %v13746_v24, %v13693_v11  ;;  %v10389_v11 = vld [vmem:[%s16570_s1 + $0x62c] sm:$0xf]  ;;  %v7695_v24 = vld [vmem:[%s16570_s1 + $0x638] sm:$0xf0]  ;;  %v7826_v26 = vor.u32 %v10421_v52, %v7823_v50 }
 0x287   :  { %6028 = vmatpush.bf16.msra.mxu2 %v7874_v25  ;;  %v7586_v25 = vor.u32 %v10361_v9, %v7583_v58  ;;  %v5001_v20 = vadd.f32 %v12882_v61, %v4987_v8  ;;  %v8034_v61 = vor.u32 %v10473_v38, %v8031_v37  ;;  %v15399_v28 = vpop.f32.mrf.mxu1  ;;  %v10469_v63 = vld [vmem:[%s16570_s1 + $0x8ac] sm:$0xf]  ;;  %v7698_v58 = vor.u32 %v10389_v11, %v7695_v24  ;;  %v7999_v8 = vld [vmem:[%s16570_s1 + $0x898] sm:$0xf0]  ;;  %v15456_v11 = vpop.f32.mrf.mxu0 }
 0x288   :  { %5990 = vmatpush.bf16.msrb.mxu3 %v7426_v17  ;;  %v8015_v17 = vld [vmem:[%s16570_s1 + $0x8b8] sm:$0xf0]  ;;  %v10417_v31 = vld [vmem:[%s16570_s1 + $0x70c] sm:$0xf] }
 0x289   :  { %6001 = vmatpush.bf16.msra.mxu0 %v7602_v10  ;;  %v5267_v10 = vadd.f32 %v13760_v53, %v5253_v12  ;;  %v5015_v9 = vadd.f32 %v12890_v0, %v5001_v20  ;;  %v10385_v53 = vld [vmem:[%s16570_s1 + $0x60c] sm:$0xf]  ;;  %v8018_v14 = vor.u32 %v10469_v63, %v8015_v17  ;;  %v7807_v0 = vld [vmem:[%s16570_s1 + $0x718] sm:$0xf0] }
 0x28a   :  { %6015 = vmatpush.bf16.msra.mxu1 %v7730_v1  ;;  %v7570_v1 = vor.u32 %v10357_v34, %v7567_v4  ;;  %v10465_v62 = vld [vmem:[%s16570_s1 + $0x88c] sm:$0xf]  ;;  %v15435_v37 = vpop.f32.mrf.mxu3  ;;  %v8431_v4 = vld [vmem:[%s16570_s1 + $0xbf8] sm:$0xf0] }
 0x28b   :  { %6029 = vmatpush.bf16.msra.mxu2 %v7858_v36  ;;  %5991 = vmatmul.bf16.vlgmr.msrb.gmra.mxu3 %v11527_v39  ;;  %v10353_v36 = vld [vmem:[%s16570_s1 + $0x50c] sm:$0xf]  ;;  %v7551_v39 = vld [vmem:[%s16570_s1 + $0x518] sm:$0xf0]  ;;  %v5029_v38 = vadd.f32 %v12931_v49, %v5015_v9  ;;  %v8002_v24 = vor.u32 %v10465_v62, %v7999_v8  ;;  %v16621_v62 = vld [vmem:[#allocation12_spill] sm:$0xff] }
 0x28c   :  { %6039 = vmatpush.bf16.msra.mxu3 %v8050_v30  ;;  %v7679_v30 = vld [vmem:[%s16570_s1 + $0x618] sm:$0xf0]  ;;  %v10509_v12 = vld [vmem:[%s16570_s1 + $0x9ec] sm:$0xf] }
 0x28d   :  { %6002 = vmatpush.bf16.msra.mxu0 %v7586_v25  ;;  %v8175_v25 = vld [vmem:[%s16570_s1 + $0x9f8] sm:$0xf0]  ;;  %v10541_v20 = vld [vmem:[%s16570_s1 + $0xaec] sm:$0xf] }
 0x28e   :  { %6016 = vmatpush.bf16.msra.mxu1 %v7714_v18  ;;  %v5281_v18 = vadd.f32 %v13787_v54, %v5267_v10  ;;  %v8303_v49 = vld [vmem:[%s16570_s1 + $0xaf8] sm:$0xf0]  ;;  %v10573_v34 = vld [vmem:[%s16570_s1 + $0xbec] sm:$0xf]  ;;  %v7810_v54 = vor.u32 %v10417_v31, %v7807_v0  ;;  %v8178_v52 = vor.u32 %v10509_v12, %v8175_v25 }
 0x28f   :  { %6030 = vmatpush.bf16.msra.mxu2 %v7842_v32  ;;  %v7554_v32 = vor.u32 %v10353_v36, %v7551_v39  ;;  %v10461_v50 = vld [vmem:[%s16570_s1 + $0x86c] sm:$0xf]  ;;  %v7983_v63 = vld [vmem:[%s16570_s1 + $0x878] sm:$0xf0]  ;;  %v8306_v36 = vor.u32 %v10541_v20, %v8303_v49  ;;  %v8434_v39 = vor.u32 %v10573_v34, %v8431_v4 }
 0x290   :  { %6040 = vmatpush.bf16.msra.mxu3 %v8034_v61  ;;  %v7682_v61 = vor.u32 %v10385_v53, %v7679_v30  ;;  %v16619_v17 = vld [vmem:[#allocation11_spill] sm:$0xff]  ;;  %v16620_v53 = vld [vmem:[#allocation26_spill] sm:$0xff]  ;;  %v8287_v31 = vld [vmem:[%s16570_s1 + $0xad8] sm:$0xf0]  ;;  %v7986_v20 = vor.u32 %v10461_v50, %v7983_v63 }
 0x291   :  { %6003 = vmatpush.bf16.msra.mxu0 %v7570_v1  ;;  %v5043_v10 = vadd.f32 %v16619_v17, %v5029_v38  ;;  %v15465_v1 = vpop.f32.mrf.mxu2  ;;  %v10505_v9 = vld [vmem:[%s16570_s1 + $0x9cc] sm:$0xf]  ;;  %v5295_v30 = vadd.f32 %v16620_v53, %v5281_v18  ;;  %v8415_v0 = vld [vmem:[%s16570_s1 + $0xbd8] sm:$0xf0]  ;;  %v15487_v38 = vpop.f32.mrf.mxu1  ;;  %v16625_v53 = vld [vmem:[#allocation14_spill] sm:$0xff] }
 0x292   :  { %6017 = vmatpush.bf16.msra.mxu1 %v7698_v58  ;;  %v8159_v58 = vld [vmem:[%s16570_s1 + $0x9d8] sm:$0xf0]  ;;  %v16622_v12 = vld [vmem:[#allocation27_spill] sm:$0xff] }
 0x293   :  { %6031 = vmatpush.bf16.msra.mxu2 %v7826_v26  ;;  %v10537_v26 = vld [vmem:[%s16570_s1 + $0xacc] sm:$0xf]  ;;  %v5057_v8 = vadd.f32 %v16621_v62, %v5043_v10  ;;  %v5309_v25 = vadd.f32 %v16622_v12, %v5295_v30  ;;  %v8162_v18 = vor.u32 %v10505_v9, %v8159_v58  ;;  %v7967_v49 = vld [vmem:[%s16570_s1 + $0x858] sm:$0xf0] }
 0x294   :  { %6041 = vmatpush.bf16.msra.mxu3 %v8018_v14  ;;  %v10569_v14 = vld [vmem:[%s16570_s1 + $0xbcc] sm:$0xf]  ;;  %v8290_v34 = vor.u32 %v10537_v26, %v8287_v31  ;;  %v8399_v63 = vld [vmem:[%s16570_s1 + $0xbb8] sm:$0xf0]  ;;  %v15528_v31 = vpop.f32.mrf.mxu0 }
 0x295   :  { %6004 = vmatpush.bf16.msra.mxu0 %v7554_v32  ;;  %v10457_v32 = vld [vmem:[%s16570_s1 + $0x84c] sm:$0xf]  ;;  %v8418_v4 = vor.u32 %v10569_v14, %v8415_v0  ;;  %v16623_v17 = vld [vmem:[#allocation13_spill] sm:$0xff] }
 0x296   :  { %6018 = vmatpush.bf16.msra.mxu1 %v7682_v61  ;;  %v10501_v61 = vld [vmem:[%s16570_s1 + $0x9ac] sm:$0xf]  ;;  %v5071_v10 = vadd.f32 %v16623_v17, %v5057_v8  ;;  %v7951_v26 = vld [vmem:[%s16570_s1 + $0x838] sm:$0xf0] }
 0x297   :  { %6032 = vmatpush.bf16.msra.mxu2 %v7810_v54  ;;  %v8143_v54 = vld [vmem:[%s16570_s1 + $0x9b8] sm:$0xf0]  ;;  %v10565_v50 = vld [vmem:[%s16570_s1 + $0xbac] sm:$0xf] }
 0x298   :  { %6042 = vmatpush.bf16.msra.mxu3 %v8002_v24  ;;  %v10533_v24 = vld [vmem:[%s16570_s1 + $0xaac] sm:$0xf]  ;;  %6005 = vmatmul.bf16.vlgmr.msra.gmra.mxu0 %v11540_v44  ;;  %v16624_v44 = vld [vmem:[#allocation28_spill] sm:$0xff]  ;;  %v8146_v9 = vor.u32 %v10501_v61, %v8143_v54  ;;  %v5085_v30 = vadd.f32 %v16625_v53, %v5071_v10  ;;  %v8402_v0 = vor.u32 %v10565_v50, %v8399_v63  ;;  %v8127_v8 = vld [vmem:[%s16570_s1 + $0x998] sm:$0xf0] }
 0x299   :  { %6053 = vmatpush.bf16.msrb.mxu0 %v8178_v52  ;;  %v8271_v52 = vld [vmem:[%s16570_s1 + $0xab8] sm:$0xf0]  ;;  %6019 = vmatmul.bf16.vlgmr.msra.gmra.mxu1 %v11538_v43  ;;  %v10453_v58 = vld [vmem:[%s16570_s1 + $0x82c] sm:$0xf]  ;;  %v15530_v14 = vpop.f32.mrf.mxu2  ;;  %v15559_v17 = vpop.f32.mrf.mxu1  ;;  %v5601_v53 = vadd.f32 %v15281_v41, %v15231_v13 }
 0x29a   :  { %6067 = vmatpush.bf16.msrb.mxu1 %v8306_v36  ;;  %6033 = vmatmul.bf16.vlgmr.msra.gmra.mxu2 %v11548_v47  ;;  %v15517_v36 = vpop.f32.mrf.mxu3  ;;  %v5323_v47 = vadd.f32 %v16624_v44, %v5309_v25  ;;  %v8274_v43 = vor.u32 %v10533_v24, %v8271_v52  ;;  %v10497_v62 = vld [vmem:[%s16570_s1 + $0x98c] sm:$0xf]  ;;  %v16626_v25 = vld [vmem:[#allocation29_spill] sm:$0xff]  ;;  %v7954_v61 = vor.u32 %v10453_v58, %v7951_v26 }
 0x29b   :  { %6081 = vmatpush.bf16.msrb.mxu2 %v8434_v39  ;;  %v7970_v39 = vor.u32 %v10457_v32, %v7967_v49  ;;  %v10529_v12 = vld [vmem:[%s16570_s1 + $0xa8c] sm:$0xf]  ;;  %v8383_v49 = vld [vmem:[%s16570_s1 + $0xb98] sm:$0xf0]  ;;  %v8130_v54 = vor.u32 %v10497_v62, %v8127_v8  ;;  %v16630_v62 = vld [vmem:[#allocation16_spill] sm:$0xff] }
 0x29c   :  { %6043 = vmatpush.bf16.msra.mxu3 %v7986_v20  ;;  %v5337_v20 = vadd.f32 %v16626_v25, %v5323_v47  ;;  %v10561_v32 = vld [vmem:[%s16570_s1 + $0xb8c] sm:$0xf]  ;;  %v7935_v52 = vld [vmem:[%s16570_s1 + $0x818] sm:$0xf0] }
 0x29d   :  { %6054 = vmatpush.bf16.msrb.mxu0 %v8162_v18  ;;  %v8255_v18 = vld [vmem:[%s16570_s1 + $0xa98] sm:$0xf0]  ;;  %v10449_v24 = vld [vmem:[%s16570_s1 + $0x80c] sm:$0xf]  ;;  %v8386_v44 = vor.u32 %v10561_v32, %v8383_v49 }
 0x29e   :  { %6068 = vmatpush.bf16.msrb.mxu1 %v8290_v34  ;;  %v16627_v34 = vld [vmem:[#allocation30_spill] sm:$0xff]  ;;  %v16628_v50 = vld [vmem:[#allocation15_spill] sm:$0xff]  ;;  %v8258_v10 = vor.u32 %v10529_v12, %v8255_v18  ;;  %v8559_v41 = vld [vmem:[%s16570_s1 + $0xcf8] sm:$0xf0]  ;;  %v7938_v25 = vor.u32 %v10449_v24, %v7935_v52  ;;  %v15591_v18 = vpop.f32.mrf.mxu0  ;;  %v5615_v52 = vadd.f32 %v15291_v7, %v5601_v53 }
 0x29f   :  { %6082 = vmatpush.bf16.msrb.mxu2 %v8418_v4  ;;  %v5351_v4 = vadd.f32 %v16627_v34, %v5337_v20  ;;  %v5099_v63 = vadd.f32 %v16628_v50, %v5085_v30  ;;  %v10493_v47 = vld [vmem:[%s16570_s1 + $0x96c] sm:$0xf]  ;;  %v8239_v30 = vld [vmem:[%s16570_s1 + $0xa78] sm:$0xf0] }
 0x2a0   :  { %6044 = vmatpush.bf16.msra.mxu3 %v7970_v39  ;;  %v8111_v39 = vld [vmem:[%s16570_s1 + $0x978] sm:$0xf0]  ;;  %v16629_v58 = vld [vmem:[#allocation31_spill] sm:$0xff] }
 0x2a1   :  { %6055 = vmatpush.bf16.msrb.mxu0 %v8146_v9  ;;  %v10525_v9 = vld [vmem:[%s16570_s1 + $0xa6c] sm:$0xf]  ;;  %v5365_v26 = vadd.f32 %v16629_v58, %v5351_v4  ;;  %v5113_v8 = vadd.f32 %v16630_v62, %v5099_v63  ;;  %v8114_v20 = vor.u32 %v10493_v47, %v8111_v39  ;;  %v8095_v4 = vld [vmem:[%s16570_s1 + $0x958] sm:$0xf0]  ;;  %v15616_v58 = vpop.f32.mrf.mxu2  ;;  %v15626_v62 = vpop.f32.mrf.mxu1 }
 0x2a2   :  { %6069 = vmatpush.bf16.msrb.mxu1 %v8274_v43  ;;  %v10557_v43 = vld [vmem:[%s16570_s1 + $0xb6c] sm:$0xf]  ;;  %v15583_v12 = vpop.f32.mrf.mxu3  ;;  %v8242_v32 = vor.u32 %v10525_v9, %v8239_v30  ;;  %v8223_v63 = vld [vmem:[%s16570_s1 + $0xa58] sm:$0xf0]  ;;  %v5603_v9 = vadd.f32 %v15347_v5, %v15311_v45 }
 0x2a3   :  { %6083 = vmatpush.bf16.msrb.mxu2 %v8402_v0  ;;  %v8367_v0 = vld [vmem:[%s16570_s1 + $0xb78] sm:$0xf0]  ;;  %v10605_v13 = vld [vmem:[%s16570_s1 + $0xcec] sm:$0xf] }
 0x2a4   :  { %6045 = vmatpush.bf16.msra.mxu3 %v7954_v61  ;;  %v8370_v49 = vor.u32 %v10557_v43, %v8367_v0  ;;  %v10489_v34 = vld [vmem:[%s16570_s1 + $0x94c] sm:$0xf]  ;;  %v8562_v50 = vor.u32 %v10605_v13, %v8559_v41  ;;  %v16632_v47 = vld [vmem:[#allocation17_spill] sm:$0xff]  ;;  %v16633_v43 = vld [vmem:[#allocation18_spill] sm:$0xff] }
 0x2a5   :  { %6056 = vmatpush.bf16.msrb.mxu0 %v8130_v54  ;;  %v10521_v61 = vld [vmem:[%s16570_s1 + $0xa4c] sm:$0xf]  ;;  %v16631_v54 = vld [vmem:[#allocation32_spill] sm:$0xff]  ;;  %v5127_v39 = vadd.f32 %v16632_v47, %v5113_v8  ;;  %v8098_v30 = vor.u32 %v10489_v34, %v8095_v4  ;;  %v8079_v13 = vld [vmem:[%s16570_s1 + $0x938] sm:$0xf0]  ;;  %v5617_v4 = vadd.f32 %v15368_v48, %v5603_v9 }
 0x2a6   :  { %6070 = vmatpush.bf16.msrb.mxu1 %v8258_v10  ;;  %v5379_v24 = vadd.f32 %v16631_v54, %v5365_v26  ;;  %v10553_v10 = vld [vmem:[%s16570_s1 + $0xb4c] sm:$0xf]  ;;  %v8543_v26 = vld [vmem:[%s16570_s1 + $0xcd8] sm:$0xf0]  ;;  %v8226_v45 = vor.u32 %v10521_v61, %v8223_v63  ;;  %v16634_v61 = vld [vmem:[#allocation2_spill] sm:$0xff] }
 0x2a7   :  { %6084 = vmatpush.bf16.msrb.mxu2 %v8386_v44  ;;  %v8351_v44 = vld [vmem:[%s16570_s1 + $0xb58] sm:$0xf0]  ;;  %v10601_v7 = vld [vmem:[%s16570_s1 + $0xccc] sm:$0xf]  ;;  %v5141_v0 = vadd.f32 %v16633_v43, %v5127_v39 }
 0x2a8   :  { %v5393_v53 = vadd.f32 %v14220_v57, %v5379_v24  ;;  %6046 = vmatpush.bf16.msra.mxu3 %v7938_v25  ;;  %v8354_v5 = vor.u32 %v10553_v10, %v8351_v44  ;;  %v10485_v8 = vld [vmem:[%s16570_s1 + $0x92c] sm:$0xf]  ;;  %v5629_v25 = vadd.f32 %v15320_v59, %v5615_v52  ;;  %v8335_v34 = vld [vmem:[%s16570_s1 + $0xb38] sm:$0xf0] }
 0x2a9   :  { %6057 = vmatpush.bf16.msrb.mxu0 %v8114_v20  ;;  %v10517_v57 = vld [vmem:[%s16570_s1 + $0xa2c] sm:$0xf]  ;;  %v8546_v20 = vor.u32 %v10601_v7, %v8543_v26  ;;  %v8527_v59 = vld [vmem:[%s16570_s1 + $0xcb8] sm:$0xf0]  ;;  %v8082_v52 = vor.u32 %v10485_v8, %v8079_v13  ;;  %v5631_v13 = vadd.f32 %v15399_v28, %v5617_v4 }
 0x2aa   :  { %6071 = vmatpush.bf16.msrb.mxu1 %v8242_v32  ;;  %v5407_v41 = vadd.f32 %v14334_v15, %v5393_v53  ;;  %v8207_v32 = vld [vmem:[%s16570_s1 + $0xa38] sm:$0xf0]  ;;  %v10597_v15 = vld [vmem:[%s16570_s1 + $0xcac] sm:$0xf]  ;;  %v15664_v44 = vpop.f32.mrf.mxu3  ;;  %v5643_v53 = vadd.f32 %v15379_v22, %v5629_v25  ;;  %v15689_v22 = vpop.f32.mrf.mxu2 }
 0x2ab   :  { %6085 = vmatpush.bf16.msrb.mxu2 %v8370_v49  ;;  %v10549_v49 = vld [vmem:[%s16570_s1 + $0xb2c] sm:$0xf]  ;;  %6047 = vmatmul.bf16.vlgmr.msra.gmra.mxu3 %v16634_v61  ;;  %v16635_v54 = vld [vmem:[#allocation33_spill] sm:$0xff]  ;;  %v8210_v47 = vor.u32 %v10517_v57, %v8207_v32  ;;  %v15687_v57 = vpop.f32.mrf.mxu0  ;;  %v16638_v32 = vld [vmem:[#allocation34_spill] sm:$0xff] }
 0x2ac   :  { %6095 = vmatpush.bf16.msrb.mxu3 %v8562_v50  ;;  %v5421_v24 = vadd.f32 %v16635_v54, %v5407_v41  ;;  %v10481_v50 = vld [vmem:[%s16570_s1 + $0x90c] sm:$0xf]  ;;  %v8063_v48 = vld [vmem:[%s16570_s1 + $0x918] sm:$0xf0]  ;;  %v8338_v39 = vor.u32 %v10549_v49, %v8335_v34 }
 0x2ad   :  { %6058 = vmatpush.bf16.msrb.mxu0 %v8098_v30  ;;  %v16636_v63 = vld [vmem:[#allocation19_spill] sm:$0xff]  ;;  %v8191_v7 = vld [vmem:[%s16570_s1 + $0xa18] sm:$0xf0]  ;;  %v8530_v30 = vor.u32 %v10597_v15, %v8527_v59  ;;  %v8066_v28 = vor.u32 %v10481_v50, %v8063_v48  ;;  %v5645_v15 = vadd.f32 %v15465_v1, %v5631_v13 }
 0x2ae   :  { %v5155_v10 = vadd.f32 %v16636_v63, %v5141_v0  ;;  %6072 = vmatpush.bf16.msrb.mxu1 %v8226_v45  ;;  %v10513_v9 = vld [vmem:[%s16570_s1 + $0xa0c] sm:$0xf]  ;;  %v8319_v43 = vld [vmem:[%s16570_s1 + $0xb18] sm:$0xf0]  ;;  %v5435_v49 = vadd.f32 %v16638_v32, %v5421_v24  ;;  %v5657_v24 = vadd.f32 %v15435_v37, %v5643_v53 }
 0x2af   :  { %6086 = vmatpush.bf16.msrb.mxu2 %v8354_v5  ;;  %v10545_v26 = vld [vmem:[%s16570_s1 + $0xb0c] sm:$0xf]  ;;  %v8511_v45 = vld [vmem:[%s16570_s1 + $0xc98] sm:$0xf0]  ;;  %v16637_v5 = vld [vmem:[#allocation20_spill] sm:$0xff]  ;;  %v8194_v59 = vor.u32 %v10513_v9, %v8191_v7 }
 0x2b0   :  { %6096 = vmatpush.bf16.msrb.mxu3 %v8546_v20  ;;  %v10593_v0 = vld [vmem:[%s16570_s1 + $0xc8c] sm:$0xf]  ;;  %v5169_v8 = vadd.f32 %v16637_v5, %v5155_v10  ;;  %v8687_v25 = vld [vmem:[%s16570_s1 + $0xdf8] sm:$0xf0]  ;;  %v8322_v54 = vor.u32 %v10545_v26, %v8319_v43  ;;  %v16639_v10 = vld [vmem:[#allocation22_spill] sm:$0xff]  ;;  %v5449_v1 = vadd.f32 %v14427_v42, %v5435_v49 }
 0x2b1   :  { %v10637_v41 = vld [vmem:[%s16570_s1 + $0xdec] sm:$0xf]  ;;  %6059 = vmatpush.bf16.msrb.mxu0 %v8082_v52  ;;  %v8815_v34 = vld [vmem:[%s16570_s1 + $0xef8] sm:$0xf0]  ;;  %v8514_v52 = vor.u32 %v10593_v0, %v8511_v45 }
 0x2b2   :  { %v10669_v20 = vld [vmem:[%s16570_s1 + $0xeec] sm:$0xf]  ;;  %v8943_v61 = vld [vmem:[%s16570_s1 + $0xff8] sm:$0xf0]  ;;  %6073 = vmatpush.bf16.msrb.mxu1 %v8210_v47  ;;  %v8690_v50 = vor.u32 %v10637_v41, %v8687_v25  ;;  %v5183_v5 = vadd.f32 %v16639_v10, %v5169_v8  ;;  %v15720_v47 = vpop.f32.mrf.mxu1  ;;  %v5463_v45 = vadd.f32 %v14541_v27, %v5449_v1  ;;  %v5659_v8 = vadd.f32 %v15517_v36, %v5645_v15  ;;  %v15743_v13 = vpop.f32.mrf.mxu3  ;;  %v16641_v15 = vld [vmem:[#allocation4_spill] sm:$0xff] }
 0x2b3   :  { %v10701_v4 = vld [vmem:[%s16570_s1 + $0xfec] sm:$0xf]  ;;  %6087 = vmatpush.bf16.msrb.mxu2 %v8338_v39  ;;  %v8495_v63 = vld [vmem:[%s16570_s1 + $0xc78] sm:$0xf0]  ;;  %v8818_v39 = vor.u32 %v10669_v20, %v8815_v34  ;;  %v5671_v41 = vadd.f32 %v15456_v11, %v5657_v24  ;;  %v15753_v49 = vpop.f32.mrf.mxu0  ;;  %v16642_v24 = vld [vmem:[#allocation24_spill] sm:$0xff] }
 0x2b4   :  { %6097 = vmatpush.bf16.msrb.mxu3 %v8530_v30  ;;  %v10589_v48 = vld [vmem:[%s16570_s1 + $0xc6c] sm:$0xf]  ;;  %v8946_v9 = vor.u32 %v10701_v4, %v8943_v61  ;;  %v8671_v7 = vld [vmem:[%s16570_s1 + $0xdd8] sm:$0xf0]  ;;  %v5673_v36 = vadd.f32 %v15528_v31, %v5659_v8 }
 0x2b5   :  { %v10633_v37 = vld [vmem:[%s16570_s1 + $0xdcc] sm:$0xf]  ;;  %6060 = vmatpush.bf16.msrb.mxu0 %v8066_v28  ;;  %v8799_v42 = vld [vmem:[%s16570_s1 + $0xed8] sm:$0xf0]  ;;  %v8498_v25 = vor.u32 %v10589_v48, %v8495_v63  ;;  %v15777_v48 = vpop.f32.mrf.mxu2 }
 0x2b6   :  { %v10665_v26 = vld [vmem:[%s16570_s1 + $0xecc] sm:$0xf]  ;;  %v8927_v30 = vld [vmem:[%s16570_s1 + $0xfd8] sm:$0xf0]  ;;  %6074 = vmatpush.bf16.msrb.mxu1 %v8194_v59  ;;  %v8674_v20 = vor.u32 %v10633_v37, %v8671_v7 }
 0x2b7   :  { %v10697_v53 = vld [vmem:[%s16570_s1 + $0xfcc] sm:$0xf]  ;;  %6088 = vmatpush.bf16.msrb.mxu2 %v8322_v54  ;;  %v8479_v27 = vld [vmem:[%s16570_s1 + $0xc58] sm:$0xf0]  ;;  %v8802_v28 = vor.u32 %v10665_v26, %v8799_v42 }
 0x2b8   :  { %v16640_v43 = vld [vmem:[#allocation23_spill] sm:$0xff]  ;;  %6098 = vmatpush.bf16.msrb.mxu3 %v8514_v52  ;;  %v8930_v11 = vor.u32 %v10697_v53, %v8927_v30  ;;  %v8655_v4 = vld [vmem:[%s16570_s1 + $0xdb8] sm:$0xf0]  ;;  %6061 = vmatmul.bf16.vlgmr.msrb.gmra.mxu0 %v16641_v15 }
 0x2b9   :  { %v5197_v0 = vadd.f32 %v16640_v43, %v5183_v5  ;;  %6109 = vmatpush.bf16.msra.mxu0 %v8690_v50  ;;  %v10585_v32 = vld [vmem:[%s16570_s1 + $0xc4c] sm:$0xf]  ;;  %v8783_v31 = vld [vmem:[%s16570_s1 + $0xeb8] sm:$0xf0]  ;;  %v5477_v50 = vadd.f32 %v14587_v16, %v5463_v45  ;;  %v5687_v16 = vadd.f32 %v15559_v17, %v5673_v36 }
 0x2ba   :  { %6123 = vmatpush.bf16.msra.mxu1 %v8818_v39  ;;  %v10629_v34 = vld [vmem:[%s16570_s1 + $0xdac] sm:$0xf]  ;;  %6089 = vmatmul.bf16.vlgmr.msrb.gmra.mxu2 %v11776_v40  ;;  %v8911_v54 = vld [vmem:[%s16570_s1 + $0xfb8] sm:$0xf0]  ;;  %v5685_v40 = vadd.f32 %v15487_v38, %v5671_v41  ;;  %v8482_v10 = vor.u32 %v10585_v32, %v8479_v27 }
 0x2bb   :  { %6137 = vmatpush.bf16.msra.mxu2 %v8946_v9  ;;  %v10661_v61 = vld [vmem:[%s16570_s1 + $0xeac] sm:$0xf]  ;;  %v5211_v52 = vadd.f32 %v16642_v24, %v5197_v0  ;;  %v8658_v5 = vor.u32 %v10629_v34, %v8655_v4  ;;  %v8463_v39 = vld [vmem:[%s16570_s1 + $0xc38] sm:$0xf0]  ;;  %v15788_v9 = vpop.f32.mrf.mxu1 }
 0x2bc   :  { %v10693_v59 = vld [vmem:[%s16570_s1 + $0xfac] sm:$0xf]  ;;  %6099 = vmatpush.bf16.msrb.mxu3 %v8498_v25  ;;  %v8786_v37 = vor.u32 %v10661_v61, %v8783_v31  ;;  %v8639_v26 = vld [vmem:[%s16570_s1 + $0xd98] sm:$0xf0]  ;;  %v5699_v17 = vadd.f32 %v15530_v14, %v5685_v40  ;;  %v5701_v25 = vadd.f32 %v15616_v58, %v5687_v16 }
 0x2bd   :  { %v16643_v63 = vld [vmem:[#allocation3_spill] sm:$0xff]  ;;  %6110 = vmatpush.bf16.msra.mxu0 %v8674_v20  ;;  %v8914_v38 = vor.u32 %v10693_v59, %v8911_v54  ;;  %v8767_v53 = vld [vmem:[%s16570_s1 + $0xe98] sm:$0xf0] }
 0x2be   :  { %6075 = vmatmul.bf16.vlgmr.msrb.gmra.mxu1 %v16643_v63  ;;  %v10581_v1 = vld [vmem:[%s16570_s1 + $0xc2c] sm:$0xf]  ;;  %v8895_v43 = vld [vmem:[%s16570_s1 + $0xf98] sm:$0xf0] }
 0x2bf   :  { %6124 = vmatpush.bf16.msra.mxu1 %v8802_v28  ;;  %6138 = vmatpush.bf16.msra.mxu2 %v8930_v11  ;;  %v10625_v7 = vld [vmem:[%s16570_s1 + $0xd8c] sm:$0xf]  ;;  %v16644_v0 = vld [vmem:[#allocation25_spill] sm:$0xff]  ;;  %v8466_v14 = vor.u32 %v10581_v1, %v8463_v39  ;;  %v15821_v28 = vpop.f32.mrf.mxu3 }
 0x2c0   :  { %v10657_v42 = vld [vmem:[%s16570_s1 + $0xe8c] sm:$0xf]  ;;  %v15810_v45 = vadd.f32 %v16644_v0, %v5211_v52  ;;  %6100 = vmatpush.bf16.msrb.mxu3 %v8482_v10  ;;  %v8642_v20 = vor.u32 %v10625_v7, %v8639_v26  ;;  %v8447_v27 = vld [vmem:[%s16570_s1 + $0xc18] sm:$0xf0]  ;;  %v5715_v52 = vadd.f32 %v15664_v44, %v5701_v25 }
 0x2c1   :  { %v10689_v30 = vld [vmem:[%s16570_s1 + $0xf8c] sm:$0xf]  ;;  %6111 = vmatpush.bf16.msra.mxu0 %v8658_v5  ;;  %v8770_v11 = vor.u32 %v10657_v42, %v8767_v53  ;;  %v8623_v4 = vld [vmem:[%s16570_s1 + $0xd78] sm:$0xf0] }
 0x2c2   :  { %v16645_v8 = vld [vmem:[#allocation35_spill] sm:$0xff]  ;;  %v8898_v58 = vor.u32 %v10689_v30, %v8895_v43  ;;  %v8751_v15 = vld [vmem:[%s16570_s1 + $0xe78] sm:$0xf0]  ;;  %v6309_v54 = vmul.f32 %v15810_v45, %v15810_v45  ;;  %v5729_v44 = vadd.f32 %v15687_v57, %v5715_v52 }
 0x2c3   :  { %v5491_v41 = vadd.f32 %v16645_v8, %v5477_v50  ;;  %v10577_v32 = vld [vmem:[%s16570_s1 + $0xc0c] sm:$0xf]  ;;  %6125 = vmatpush.bf16.msra.mxu1 %v8786_v37  ;;  %6139 = vmatpush.bf16.msra.mxu2 %v8914_v38  ;;  %v8879_v59 = vld [vmem:[%s16570_s1 + $0xf78] sm:$0xf0]  ;;  %v15848_v50 = vpop.f32.mrf.mxu2  ;;  %v15883_v43 = vpop.f32.mrf.mxu1 }
 0x2c4   :  { %v10621_v34 = vld [vmem:[%s16570_s1 + $0xd6c] sm:$0xf]  ;;  %v9071_v40 = vld [vmem:[%s16570_s1 + $0x10f8] sm:$0xf0]  ;;  %6101 = vmatpush.bf16.msrb.mxu3 %v8466_v14  ;;  %v8450_v5 = vor.u32 %v10577_v32, %v8447_v27  ;;  %v5743_v14 = vadd.f32 %v15720_v47, %v5729_v44 }
 0x2c5   :  { %v5505_v36 = vadd.f32 %v14634_v2, %v5491_v41  ;;  %v10653_v61 = vld [vmem:[%s16570_s1 + $0xe6c] sm:$0xf]  ;;  %v5713_v2 = vadd.f32 %v15583_v12, %v5699_v17  ;;  %v15846_v12 = vpop.f32.mrf.mxu0  ;;  %6112 = vmatpush.bf16.msra.mxu0 %v8642_v20  ;;  %v8607_v37 = vld [vmem:[%s16570_s1 + $0xd58] sm:$0xf0] }
 0x2c6   :  { %v10685_v31 = vld [vmem:[%s16570_s1 + $0xf6c] sm:$0xf]  ;;  %v8754_v1 = vor.u32 %v10653_v61, %v8751_v15  ;;  %v16646_v38 = vld [vmem:[#allocation21_spill] sm:$0xff]  ;;  %v5757_v15 = vadd.f32 %v15777_v48, %v5743_v14 }
 0x2c7   :  { %v5519_v24 = vadd.f32 %v14652_v3, %v5505_v36  ;;  %v10733_v63 = vld [vmem:[%s16570_s1 + $0x10ec] sm:$0xf]  ;;  %v5727_v10 = vadd.f32 %v15591_v18, %v5713_v2  ;;  %v8626_v3 = vor.u32 %v10621_v34, %v8623_v4  ;;  %6126 = vmatpush.bf16.msra.mxu1 %v8770_v11  ;;  %6140 = vmatpush.bf16.msra.mxu2 %v8898_v58  ;;  %v8735_v42 = vld [vmem:[%s16570_s1 + $0xe58] sm:$0xf0]  ;;  %v15895_v20 = vpop.f32.mrf.mxu3 }
 0x2c8   :  { %v8882_v39 = vor.u32 %v10685_v31, %v8879_v59  ;;  %v10617_v16 = vld [vmem:[%s16570_s1 + $0xd4c] sm:$0xf]  ;;  %v6305_v7 = vmul.f32 %v16646_v38, %v16646_v38  ;;  %v9074_v26 = vor.u32 %v10733_v63, %v9071_v40  ;;  %v8863_v53 = vld [vmem:[%s16570_s1 + $0xf58] sm:$0xf0]  ;;  %v15881_v30 = vadd.f32 %v15810_v45, %v16646_v38  ;;  %6102 = vmatpush.bf16.msrb.mxu3 %v8450_v5 }
 0x2c9   :  { %v10649_v18 = vld [vmem:[%s16570_s1 + $0xe4c] sm:$0xf]  ;;  %v5533_v57 = vadd.f32 %v15168_v35, %v5519_v24  ;;  %v9055_v0 = vld [vmem:[%s16570_s1 + $0x10d8] sm:$0xf0]  ;;  %v5741_v41 = vadd.f32 %v15626_v62, %v5727_v10  ;;  %6113 = vmatpush.bf16.msra.mxu0 %v8626_v3  ;;  %v8610_v25 = vor.u32 %v10617_v16, %v8607_v37 }
 0x2ca   :  { %v10681_v17 = vld [vmem:[%s16570_s1 + $0xf4c] sm:$0xf]  ;;  %v15891_v8 = vadd.f32 %v6309_v54, %v6305_v7  ;;  %v8738_v32 = vor.u32 %v10649_v18, %v8735_v42  ;;  %v8591_v11 = vld [vmem:[%s16570_s1 + $0xd38] sm:$0xf0]  ;;  %v6278_v54 = vrot.slane %v15881_v30, 4 }
 0x2cb   :  { %v10729_v35 = vld [vmem:[%s16570_s1 + $0x10cc] sm:$0xf]  ;;  %6127 = vmatpush.bf16.msra.mxu1 %v8754_v1  ;;  %6141 = vmatpush.bf16.msra.mxu2 %v8882_v39  ;;  %v8866_v27 = vor.u32 %v10681_v17, %v8863_v53  ;;  %v5547_v47 = vadd.f32 %v15221_v33, %v5533_v57  ;;  %v5755_v58 = vadd.f32 %v15689_v22, %v5741_v41  ;;  %v8719_v4 = vld [vmem:[%s16570_s1 + $0xe38] sm:$0xf0]  ;;  %v15936_v10 = vpop.f32.mrf.mxu2 }
 0x2cc   :  { %v10613_v36 = vld [vmem:[%s16570_s1 + $0xd2c] sm:$0xf]  ;;  %6151 = vmatpush.bf16.msra.mxu3 %v9074_v26  ;;  %v9058_v34 = vor.u32 %v10729_v35, %v9055_v0  ;;  %v8847_v2 = vld [vmem:[%s16570_s1 + $0xf38] sm:$0xf0]  ;;  %v6314_v24 = vrot.slane %v15891_v8, 4  ;;  %v5771_v57 = vadd.f32 %v15821_v28, %v5757_v15  ;;  %v15958_v26 = vpop.f32.mrf.mxu1 }
 0x2cd   :  { %v10645_v62 = vld [vmem:[%s16570_s1 + $0xe2c] sm:$0xf]  ;;  %v15918_v31 = vpop.f32.mrf.mxu0  ;;  %v16647_v33 = vld [vmem:[#allocation5_spill] sm:$0xff]  ;;  %v5561_v52 = vadd.f32 %v15229_v6, %v5547_v47  ;;  %6114 = vmatpush.bf16.msra.mxu0 %v8610_v25  ;;  %v8594_v48 = vor.u32 %v10613_v36, %v8591_v11  ;;  %v5769_v39 = vadd.f32 %v15743_v13, %v5755_v58 }
 0x2ce   :  { %v10677_v61 = vld [vmem:[%s16570_s1 + $0xf2c] sm:$0xf]  ;;  %6103 = vmatmul.bf16.vlgmr.msrb.gmra.mxu3 %v16647_v33  ;;  %v9039_v59 = vld [vmem:[%s16570_s1 + $0x10b8] sm:$0xf0]  ;;  %v8722_v5 = vor.u32 %v10645_v62, %v8719_v4  ;;  %v5785_v14 = vadd.f32 %v15846_v12, %v5771_v57 }
 0x2cf   :  { %v10725_v22 = vld [vmem:[%s16570_s1 + $0x10ac] sm:$0xf]  ;;  %v8575_v40 = vld [vmem:[%s16570_s1 + $0xd18] sm:$0xf0]  ;;  %6128 = vmatpush.bf16.msra.mxu1 %v8738_v32  ;;  %6142 = vmatpush.bf16.msra.mxu2 %v8866_v27  ;;  %v8850_v3 = vor.u32 %v10677_v61, %v8847_v2  ;;  %v15970_v53 = vadd.f32 %v15258_v46, %v5561_v52  ;;  %v5783_v35 = vadd.f32 %v15753_v49, %v5769_v39  ;;  %v15989_v62 = vpop.f32.mrf.mxu3 }
 0x2d0   :  { %v10609_v63 = vld [vmem:[%s16570_s1 + $0xd0c] sm:$0xf]  ;;  %v8703_v44 = vld [vmem:[%s16570_s1 + $0xe18] sm:$0xf0]  ;;  %6152 = vmatpush.bf16.msra.mxu3 %v9058_v34  ;;  %v9042_v16 = vor.u32 %v10725_v22, %v9039_v59  ;;  %v6279_v61 = vadd.f32 %v6278_v54, %v15881_v30  ;;  %v6315_v2 = vadd.f32 %v6314_v24, %v15891_v8 }
 0x2d1   :  { %v10641_v6 = vld [vmem:[%s16570_s1 + $0xe0c] sm:$0xf]  ;;  %v8831_v37 = vld [vmem:[%s16570_s1 + $0xf18] sm:$0xf0]  ;;  %6115 = vmatpush.bf16.msra.mxu0 %v8594_v48  ;;  %v8578_v28 = vor.u32 %v10609_v63, %v8575_v40  ;;  %v5797_v15 = vadd.f32 %v15788_v9, %v5783_v35  ;;  %v6284_v30 = vadd.f32 %v15970_v53, %v14730_v21  ;;  %v6310_v8 = vmul.f32 %v15970_v53, %v15970_v53 }
 0x2d2   :  { %v10673_v1 = vld [vmem:[%s16570_s1 + $0xf0c] sm:$0xf]  ;;  %v9023_v7 = vld [vmem:[%s16570_s1 + $0x1098] sm:$0xf0]  ;;  %v8706_v46 = vor.u32 %v10641_v6, %v8703_v44  ;;  %v5799_v9 = vadd.f32 %v15883_v43, %v5785_v14  ;;  %v6306_v43 = vmul.f32 %v14730_v21, %v14730_v21 }
 0x2d3   :  { %v10721_v18 = vld [vmem:[%s16570_s1 + $0x108c] sm:$0xf]  ;;  %v9199_v42 = vld [vmem:[%s16570_s1 + $0x11f8] sm:$0xf0]  ;;  %6129 = vmatpush.bf16.msra.mxu1 %v8722_v5  ;;  %6143 = vmatpush.bf16.msra.mxu2 %v8850_v3  ;;  %v8834_v49 = vor.u32 %v10673_v1, %v8831_v37  ;;  %v16017_v24 = vpop.f32.mrf.mxu2  ;;  %v5811_v52 = vadd.f32 %v15848_v50, %v5797_v15  ;;  %v16649_v37 = vld [vmem:[#allocation8_spill] sm:$0xff] }
 0x2d4   :  { %v10765_v13 = vld [vmem:[%s16570_s1 + $0x11ec] sm:$0xf]  ;;  %v9327_v0 = vld [vmem:[%s16570_s1 + $0x12f8] sm:$0xf0]  ;;  %6153 = vmatpush.bf16.msra.mxu3 %v9042_v16  ;;  %v9026_v32 = vor.u32 %v10721_v18, %v9023_v7  ;;  %v5813_v39 = vadd.f32 %v15936_v10, %v5799_v9  ;;  %v6320_v10 = vadd.f32 %v6310_v8, %v6306_v43  ;;  %v5854_v35 = vpop.f32.mrf.mxu1 }
 0x2d5   :  { %v10797_v17 = vld [vmem:[%s16570_s1 + $0x12ec] sm:$0xf]  ;;  %v9455_v25 = vld [vmem:[%s16570_s1 + $0x13f8] sm:$0xf0]  ;;  %v9202_v27 = vor.u32 %v10765_v13, %v9199_v42  ;;  %6116 = vmatpush.bf16.msra.mxu0 %v8578_v28  ;;  %v5840_v54 = vpop.f32.mrf.mxu0  ;;  %v6280_v13 = vrot.slane %v6279_v61, 2  ;;  %v6316_v42 = vrot.slane %v6315_v2, 2 }
 0x2d6   :  { %v10829_v41 = vld [vmem:[%s16570_s1 + $0x13ec] sm:$0xf]  ;;  %v9007_v11 = vld [vmem:[%s16570_s1 + $0x1078] sm:$0xf0]  ;;  %v9330_v47 = vor.u32 %v10797_v17, %v9327_v0  ;;  %v6285_v17 = vrot.slane %v6284_v30, 4  ;;  %v16650_v28 = vld [vmem:[#allocation6_spill] sm:$0xff]  ;;  %v5825_v0 = vadd.f32 %v15895_v20, %v5811_v52 }
 0x2d7   :  { %v10717_v36 = vld [vmem:[%s16570_s1 + $0x106c] sm:$0xf]  ;;  %v9458_v58 = vor.u32 %v10829_v41, %v9455_v25  ;;  %v9183_v34 = vld [vmem:[%s16570_s1 + $0x11d8] sm:$0xf0]  ;;  %6130 = vmatpush.bf16.msra.mxu1 %v8706_v46  ;;  %6144 = vmatpush.bf16.msra.mxu2 %v8834_v49  ;;  %v16057_v49 = vpop.f32.mrf.mxu3  ;;  %v6281_v15 = vadd.f32 %v6280_v13, %v6279_v61 }
 0x2d8   :  { %v10761_v12 = vld [vmem:[%s16570_s1 + $0x11cc] sm:$0xf]  ;;  %v9311_v33 = vld [vmem:[%s16570_s1 + $0x12d8] sm:$0xf0]  ;;  %6154 = vmatpush.bf16.msra.mxu3 %v9026_v32  ;;  %v9010_v48 = vor.u32 %v10717_v36, %v9007_v11 }
 0x2d9   :  { %v10793_v4 = vld [vmem:[%s16570_s1 + $0x12cc] sm:$0xf]  ;;  %v9439_v59 = vld [vmem:[%s16570_s1 + $0x13d8] sm:$0xf0]  ;;  %6165 = vmatpush.bf16.msrb.mxu0 %v9202_v27  ;;  %v9186_v63 = vor.u32 %v10761_v12, %v9183_v34 }
 0x2da   :  { %v10825_v22 = vld [vmem:[%s16570_s1 + $0x13cc] sm:$0xf]  ;;  %v8991_v5 = vld [vmem:[%s16570_s1 + $0x1058] sm:$0xf0]  ;;  %v9314_v3 = vor.u32 %v10793_v4, %v9311_v33  ;;  %6145 = vmatmul.bf16.vlgmr.msra.gmra.mxu2 %v16649_v37  ;;  %6131 = vmatmul.bf16.vlgmr.msra.gmra.mxu1 %v16650_v28  ;;  %v6317_v33 = vadd.f32 %v6316_v42, %v6315_v2 }
 0x2db   :  { %v10713_v40 = vld [vmem:[%s16570_s1 + $0x104c] sm:$0xf]  ;;  %6179 = vmatpush.bf16.msrb.mxu1 %v9330_v47  ;;  %6193 = vmatpush.bf16.msrb.mxu2 %v9458_v58  ;;  %v9442_v6 = vor.u32 %v10825_v22, %v9439_v59  ;;  %v9167_v44 = vld [vmem:[%s16570_s1 + $0x11b8] sm:$0xf0]  ;;  %v5839_v47 = vadd.f32 %v15918_v31, %v5825_v0  ;;  %v5827_v58 = vadd.f32 %v15989_v62, %v5813_v39  ;;  %v6321_v59 = vrot.slane %v6320_v10, 4  ;;  %v5868_v31 = vpop.f32.mrf.mxu2 }
 0x2dc   :  { %v10757_v50 = vld [vmem:[%s16570_s1 + $0x11ac] sm:$0xf]  ;;  %v9295_v18 = vld [vmem:[%s16570_s1 + $0x12b8] sm:$0xf0]  ;;  %6155 = vmatpush.bf16.msra.mxu3 %v9010_v48  ;;  %v8994_v41 = vor.u32 %v10713_v40, %v8991_v5  ;;  %v6286_v22 = vadd.f32 %v6285_v17, %v6284_v30  ;;  %v16106_v39 = vpop.f32.mrf.mxu1 }
 0x2dd   :  { %v10789_v1 = vld [vmem:[%s16570_s1 + $0x12ac] sm:$0xf]  ;;  %v9423_v57 = vld [vmem:[%s16570_s1 + $0x13b8] sm:$0xf0]  ;;  %6166 = vmatpush.bf16.msrb.mxu0 %v9186_v63  ;;  %v9170_v25 = vor.u32 %v10757_v50, %v9167_v44  ;;  %v16079_v8 = vpop.f32.mrf.mxu0  ;;  %v5841_v62 = vadd.f32 %v5840_v54, %v5827_v58  ;;  %v5853_v5 = vadd.f32 %v15958_v26, %v5839_v47  ;;  %v6282_v50 = vrot.slane %v6281_v15, 1 }
 0x2de   :  { %v16648_v16 = vld [vmem:[#allocation7_spill] sm:$0xff]  ;;  %v8975_v46 = vld [vmem:[%s16570_s1 + $0x1038] sm:$0xf0]  ;;  %v9298_v32 = vor.u32 %v10789_v1, %v9295_v18  ;;  %v6318_v44 = vrot.slane %v6317_v33, 1  ;;  %v6322_v1 = vadd.f32 %v6321_v59, %v6320_v10  ;;  %v6287_v18 = vrot.slane %v6286_v22, 2 }
 0x2df   :  { %6117 = vmatmul.bf16.vlgmr.msra.gmra.mxu0 %v16648_v16  ;;  %v10821_v7 = vld [vmem:[%s16570_s1 + $0x13ac] sm:$0xf]  ;;  %6180 = vmatpush.bf16.msrb.mxu1 %v9314_v3  ;;  %v9151_v36 = vld [vmem:[%s16570_s1 + $0x1198] sm:$0xf0] }
 0x2e0   :  { %v10709_v14 = vld [vmem:[%s16570_s1 + $0x102c] sm:$0xf]  ;;  %6194 = vmatpush.bf16.msrb.mxu2 %v9442_v6  ;;  %v9426_v27 = vor.u32 %v10821_v7, %v9423_v57  ;;  %v9279_v12 = vld [vmem:[%s16570_s1 + $0x1298] sm:$0xf0]  ;;  %6156 = vmatpush.bf16.msra.mxu3 %v8994_v41  ;;  %v5855_v7 = vadd.f32 %v5854_v35, %v5841_v62  ;;  %v5867_v57 = vadd.f32 %v16017_v24, %v5853_v5  ;;  %v6323_v47 = vrot.slane %v6322_v1, 2 }
 0x2e1   :  { %v10753_v20 = vld [vmem:[%s16570_s1 + $0x118c] sm:$0xf]  ;;  %v9407_v4 = vld [vmem:[%s16570_s1 + $0x1398] sm:$0xf0]  ;;  %6167 = vmatpush.bf16.msrb.mxu0 %v9170_v25  ;;  %v8978_v9 = vor.u32 %v10709_v14, %v8975_v46  ;;  %v6283_v46 = vadd.f32 %v6282_v50, %v6281_v15 }
 0x2e2   :  { %v10785_v11 = vld [vmem:[%s16570_s1 + $0x128c] sm:$0xf]  ;;  %v9154_v52 = vor.u32 %v10753_v20, %v9151_v36  ;;  %v8959_v63 = vld [vmem:[%s16570_s1 + $0x1018] sm:$0xf0]  ;;  %v5869_v24 = vadd.f32 %v5868_v31, %v5855_v7  ;;  %v5881_v58 = vadd.f32 %v16057_v49, %v5867_v57 }
 0x2e3   :  { %v10817_v34 = vld [vmem:[%s16570_s1 + $0x138c] sm:$0xf]  ;;  %6181 = vmatpush.bf16.msrb.mxu1 %v9298_v32  ;;  %v9282_v61 = vor.u32 %v10785_v11, %v9279_v12  ;;  %v9135_v54 = vld [vmem:[%s16570_s1 + $0x1178] sm:$0xf0]  ;;  %v6319_v32 = vadd.f32 %v6318_v44, %v6317_v33  ;;  %v6288_v11 = vadd.f32 %v6287_v18, %v6286_v22 }
 0x2e4   :  { %v10705_v48 = vld [vmem:[%s16570_s1 + $0x100c] sm:$0xf]  ;;  %6195 = vmatpush.bf16.msrb.mxu2 %v9426_v27  ;;  %v9410_v2 = vor.u32 %v10817_v34, %v9407_v4  ;;  %v9263_v43 = vld [vmem:[%s16570_s1 + $0x1278] sm:$0xf0]  ;;  %6157 = vmatpush.bf16.msra.mxu3 %v8978_v9  ;;  %v5882_v27 = vpop.f32.mrf.mxu3  ;;  %v5922_v4 = vpop.f32.mrf.mxu2  ;;  %v5895_v31 = vadd.f32 %v16079_v8, %v5881_v58 }
 0x2e5   :  { %v10749_v30 = vld [vmem:[%s16570_s1 + $0x116c] sm:$0xf]  ;;  %v9391_v6 = vld [vmem:[%s16570_s1 + $0x1378] sm:$0xf0]  ;;  %v8962_v16 = vor.u32 %v10705_v48, %v8959_v63  ;;  %6168 = vmatpush.bf16.msrb.mxu0 %v9154_v52  ;;  %v5896_v34 = vpop.f32.mrf.mxu0  ;;  %v5883_v62 = vadd.f32 %v5882_v27, %v5869_v24 }
 0x2e6   :  { %v10781_v40 = vld [vmem:[%s16570_s1 + $0x126c] sm:$0xf]  ;;  %v9583_v37 = vld [vmem:[%s16570_s1 + $0x14f8] sm:$0xf0]  ;;  %v9138_v13 = vor.u32 %v10749_v30, %v9135_v54  ;;  %v16168_v30 = vmul.f32 0.5, %v6319_v32  ;;  %v6289_v54 = vrot.slane %v6288_v11, 1  ;;  %v5909_v18 = vadd.f32 %v16106_v39, %v5895_v31 }
 0x2e7   :  { %v10813_v3 = vld [vmem:[%s16570_s1 + $0x136c] sm:$0xf]  ;;  %6182 = vmatpush.bf16.msrb.mxu1 %v9282_v61  ;;  %v9266_v42 = vor.u32 %v10781_v40, %v9263_v43  ;;  %v9119_v28 = vld [vmem:[%s16570_s1 + $0x1158] sm:$0xf0]  ;;  %v16159_v61 = vmul.f32 0.5, %v6283_v46  ;;  %v5897_v40 = vadd.f32 %v5896_v34, %v5883_v62 }
 0x2e8   :  { %v10861_v26 = vld [vmem:[%s16570_s1 + $0x14ec] sm:$0xf]  ;;  %6196 = vmatpush.bf16.msrb.mxu2 %v9410_v2  ;;  %v9394_v17 = vor.u32 %v10813_v3, %v9391_v6  ;;  %v9247_v41 = vld [vmem:[%s16570_s1 + $0x1258] sm:$0xf0]  ;;  %6158 = vmatpush.bf16.msra.mxu3 %v8962_v16  ;;  %v6324_v3 = vadd.f32 %v6323_v47, %v6322_v1  ;;  %v5910_v6 = vpop.f32.mrf.mxu1 }
 0x2e9   :  { %v10745_v10 = vld [vmem:[%s16570_s1 + $0x114c] sm:$0xf]  ;;  %v9586_v0 = vor.u32 %v10861_v26, %v9583_v37  ;;  %v9375_v14 = vld [vmem:[%s16570_s1 + $0x1358] sm:$0xf0]  ;;  %6169 = vmatpush.bf16.msrb.mxu0 %v9138_v13 }
 0x2ea   :  { %v10777_v35 = vld [vmem:[%s16570_s1 + $0x124c] sm:$0xf]  ;;  %v9567_v36 = vld [vmem:[%s16570_s1 + $0x14d8] sm:$0xf0]  ;;  %v9122_v12 = vor.u32 %v10745_v10, %v9119_v28  ;;  %v6349_v10 = vmul.f32 %v16159_v61, %v16159_v61  ;;  %v16206_v28 = vadd.f32 %v5922_v4, %v5909_v18  ;;  %v6325_v46 = vrot.slane %v6324_v3, 1 }
 0x2eb   :  { %v10809_v25 = vld [vmem:[%s16570_s1 + $0x134c] sm:$0xf]  ;;  %6183 = vmatpush.bf16.msrb.mxu1 %v9266_v42  ;;  %v9250_v15 = vor.u32 %v10777_v35, %v9247_v41  ;;  %v9103_v22 = vld [vmem:[%s16570_s1 + $0x1138] sm:$0xf0]  ;;  %6159 = vmatmul.bf16.vlgmr.msra.gmra.mxu3 %v12211_v51  ;;  %v5911_v35 = vadd.f32 %v5910_v6, %v5897_v40 }
 0x2ec   :  { %v10857_v20 = vld [vmem:[%s16570_s1 + $0x14cc] sm:$0xf]  ;;  %6197 = vmatpush.bf16.msrb.mxu2 %v9394_v17  ;;  %v9378_v33 = vor.u32 %v10809_v25, %v9375_v14  ;;  %6207 = vmatpush.bf16.msrb.mxu3 %v9586_v0  ;;  %v9231_v52 = vld [vmem:[%s16570_s1 + $0x1238] sm:$0xf0]  ;;  %v6290_v14 = vadd.f32 %v6289_v54, %v6288_v11  ;;  %v5924_v32 = vpop.f32.mrf.mxu2 }
 0x2ed   :  { %v10741_v59 = vld [vmem:[%s16570_s1 + $0x112c] sm:$0xf]  ;;  %v9570_v9 = vor.u32 %v10857_v20, %v9567_v36  ;;  %v9359_v63 = vld [vmem:[%s16570_s1 + $0x1338] sm:$0xf0]  ;;  %6170 = vmatpush.bf16.msrb.mxu0 %v9122_v12  ;;  %v16217_v36 = vadd.f32 %v5924_v32, %v5911_v35 }
 0x2ee   :  { %v10773_v49 = vld [vmem:[%s16570_s1 + $0x122c] sm:$0xf]  ;;  %v9551_v2 = vld [vmem:[%s16570_s1 + $0x14b8] sm:$0xf0]  ;;  %v9106_v5 = vor.u32 %v10741_v59, %v9103_v22  ;;  %v6307_v22 = vmul.f32 %v16206_v28, %v16206_v28 }
 0x2ef   :  { %v10805_v48 = vld [vmem:[%s16570_s1 + $0x132c] sm:$0xf]  ;;  %v9087_v51 = vld [vmem:[%s16570_s1 + $0x1118] sm:$0xf0]  ;;  %6184 = vmatpush.bf16.msrb.mxu1 %v9250_v15  ;;  %v9234_v50 = vor.u32 %v10773_v49, %v9231_v52  ;;  %v6291_v49 = vadd.f32 %v16217_v36, %v16206_v28  ;;  %v6311_v31 = vmul.f32 %v16217_v36, %v16217_v36 }
 0x2f0   :  { %v10853_v8 = vld [vmem:[%s16570_s1 + $0x14ac] sm:$0xf]  ;;  %6198 = vmatpush.bf16.msrb.mxu2 %v9378_v33  ;;  %v9362_v44 = vor.u32 %v10805_v48, %v9359_v63  ;;  %v9215_v26 = vld [vmem:[%s16570_s1 + $0x1218] sm:$0xf0]  ;;  %6208 = vmatpush.bf16.msrb.mxu3 %v9570_v9  ;;  %v6353_v48 = vsub.f32 %v16168_v30, %v6349_v10  ;;  %v6326_v63 = vadd.f32 %v6325_v46, %v6324_v3 }
 0x2f1   :  { %v10737_v43 = vld [vmem:[%s16570_s1 + $0x110c] sm:$0xf]  ;;  %v9554_v1 = vor.u32 %v10853_v8, %v9551_v2  ;;  %v9343_v7 = vld [vmem:[%s16570_s1 + $0x1318] sm:$0xf0]  ;;  %6171 = vmatpush.bf16.msrb.mxu0 %v9106_v5  ;;  %v16250_v8 = vmul.f32 0.5, %v6290_v14  ;;  %v6292_v54 = vrot.slane %v6291_v49, 4  ;;  %v6327_v40 = vadd.f32 %v6311_v31, %v6307_v22 }
 0x2f2   :  { %v10769_v16 = vld [vmem:[%s16570_s1 + $0x120c] sm:$0xf]  ;;  %v9535_v13 = vld [vmem:[%s16570_s1 + $0x1498] sm:$0xf0]  ;;  %v9090_v24 = vor.u32 %v10737_v43, %v9087_v51 }
 0x2f3   :  { %v10801_v37 = vld [vmem:[%s16570_s1 + $0x130c] sm:$0xf]  ;;  %v9711_v39 = vld [vmem:[%s16570_s1 + $0x15f8] sm:$0xf0]  ;;  %6185 = vmatpush.bf16.msrb.mxu1 %v9234_v50  ;;  %v9218_v27 = vor.u32 %v10769_v16, %v9215_v26  ;;  %v6293_v26 = vadd.f32 %v6292_v54, %v6291_v49 }
 0x2f4   :  { %v10849_v57 = vld [vmem:[%s16570_s1 + $0x148c] sm:$0xf]  ;;  %v9839_v0 = vld [vmem:[%s16570_s1 + $0x16f8] sm:$0xf0]  ;;  %6199 = vmatpush.bf16.msrb.mxu2 %v9362_v44  ;;  %v9346_v20 = vor.u32 %v10801_v37, %v9343_v7  ;;  %6209 = vmatpush.bf16.msrb.mxu3 %v9554_v1  ;;  %v6328_v37 = vrot.slane %v6327_v40, 4  ;;  %v6357_v7 = vmax.f32 %v6353_v48, 0.0 }
 0x2f5   :  { %v10893_v42 = vld [vmem:[%s16570_s1 + $0x15ec] sm:$0xf]  ;;  %v9967_v25 = vld [vmem:[%s16570_s1 + $0x17f8] sm:$0xf0]  ;;  %v9538_v47 = vor.u32 %v10849_v57, %v9535_v13  ;;  %6172 = vmatpush.bf16.msrb.mxu0 %v9090_v24  ;;  %v6346_v57 = vmul.f32 0.5, %v6326_v63  ;;  %v6350_v13 = vmul.f32 %v16250_v8, %v16250_v8 }
 0x2f6   :  { %v10925_v17 = vld [vmem:[%s16570_s1 + $0x16ec] sm:$0xf]  ;;  %v9714_v58 = vor.u32 %v10893_v42, %v9711_v39  ;;  %v9519_v34 = vld [vmem:[%s16570_s1 + $0x1478] sm:$0xf0]  ;;  %v6329_v42 = vadd.f32 %v6328_v37, %v6327_v40 }
 0x2f7   :  { %v10957_v41 = vld [vmem:[%s16570_s1 + $0x17ec] sm:$0xf]  ;;  %v9842_v11 = vor.u32 %v10925_v17, %v9839_v0  ;;  %v9695_v33 = vld [vmem:[%s16570_s1 + $0x15d8] sm:$0xf0]  ;;  %6186 = vmatpush.bf16.msrb.mxu1 %v9218_v27 }
 0x2f8   :  { %v10845_v12 = vld [vmem:[%s16570_s1 + $0x146c] sm:$0xf]  ;;  %v9970_v4 = vor.u32 %v10957_v41, %v9967_v25  ;;  %v9823_v62 = vld [vmem:[%s16570_s1 + $0x16d8] sm:$0xf0]  ;;  %6200 = vmatpush.bf16.msrb.mxu2 %v9346_v20  ;;  %6210 = vmatpush.bf16.msrb.mxu3 %v9538_v47  ;;  %v6330_v46 = vrot.slane %v6329_v42, 2  ;;  %v6354_v47 = vsub.f32 %v6346_v57, %v6350_v13 }
 0x2f9   :  { %v10889_v15 = vld [vmem:[%s16570_s1 + $0x15cc] sm:$0xf]  ;;  %v9951_v52 = vld [vmem:[%s16570_s1 + $0x17d8] sm:$0xf0]  ;;  %6221 = vmatpush.bf16.msra.mxu0 %v9714_v58  ;;  %v9522_v5 = vor.u32 %v10845_v12, %v9519_v34  ;;  %v16305_v20 = vadd.f32 1e-05, %v6357_v7 }
 0x2fa   :  { %v10921_v59 = vld [vmem:[%s16570_s1 + $0x16cc] sm:$0xf]  ;;  %v9698_v43 = vor.u32 %v10889_v15, %v9695_v33  ;;  %v9503_v51 = vld [vmem:[%s16570_s1 + $0x1458] sm:$0xf0]  ;;  %6173 = vmatmul.bf16.vlgmr.msrb.gmra.mxu0 %v12224_v56  ;;  %6187 = vmatmul.bf16.vlgmr.msrb.gmra.mxu1 %v12222_v55  ;;  %v6331_v34 = vadd.f32 %v6330_v46, %v6329_v42 }
 0x2fb   :  { %v10953_v9 = vld [vmem:[%s16570_s1 + $0x17cc] sm:$0xf]  ;;  %6235 = vmatpush.bf16.msra.mxu1 %v9842_v11  ;;  %v9826_v3 = vor.u32 %v10921_v59, %v9823_v62  ;;  %v9679_v50 = vld [vmem:[%s16570_s1 + $0x15b8] sm:$0xf0]  ;;  %6201 = vmatmul.bf16.vlgmr.msrb.gmra.mxu2 %v12232_v60  ;;  %v6294_v60 = vrot.slane %v6293_v26, 2  ;;  %11009 = vrsqrt.f32 %v16305_v20  ;;  %vm6371_vm3 = vweird.f32 %v16305_v20 }
 0x2fc   :  { %v10841_v2 = vld [vmem:[%s16570_s1 + $0x144c] sm:$0xf]  ;;  %6249 = vmatpush.bf16.msra.mxu2 %v9970_v4  ;;  %v9954_v6 = vor.u32 %v10953_v9, %v9951_v52  ;;  %v9807_v16 = vld [vmem:[%s16570_s1 + $0x16b8] sm:$0xf0]  ;;  %6211 = vmatpush.bf16.msrb.mxu3 %v9522_v5  ;;  %v6332_v52 = vrot.slane %v6331_v34, 1 }
 0x2fd   :  { %v10885_v30 = vld [vmem:[%s16570_s1 + $0x15ac] sm:$0xf]  ;;  %v9935_v1 = vld [vmem:[%s16570_s1 + $0x17b8] sm:$0xf0]  ;;  %6222 = vmatpush.bf16.msra.mxu0 %v9698_v43  ;;  %v9506_v39 = vor.u32 %v10841_v2, %v9503_v51  ;;  %v6295_v14 = vadd.f32 %v6294_v60, %v6293_v26  ;;  %v6358_v2 = vmax.f32 %v6354_v47, 0.0 }
 0x2fe   :  { %v10917_v44 = vld [vmem:[%s16570_s1 + $0x16ac] sm:$0xf]  ;;  %v9682_v17 = vor.u32 %v10885_v30, %v9679_v50  ;;  %v9487_v10 = vld [vmem:[%s16570_s1 + $0x1438] sm:$0xf0]  ;;  %v6333_v5 = vadd.f32 %v6332_v52, %v6331_v34 }
 0x2ff   :  { %v10949_v18 = vld [vmem:[%s16570_s1 + $0x17ac] sm:$0xf]  ;;  %6236 = vmatpush.bf16.msra.mxu1 %v9826_v3  ;;  %v9810_v55 = vor.u32 %v10917_v44, %v9807_v16  ;;  %v9663_v0 = vld [vmem:[%s16570_s1 + $0x1598] sm:$0xf0]  ;;  %v6296_v12 = vrot.slane %v6295_v14, 1 }
 0x300   :  { %v10837_v56 = vld [vmem:[%s16570_s1 + $0x142c] sm:$0xf]  ;;  %6250 = vmatpush.bf16.msra.mxu2 %v9954_v6  ;;  %v9938_v24 = vor.u32 %v10949_v18, %v9935_v1  ;;  %v9791_v25 = vld [vmem:[%s16570_s1 + $0x1698] sm:$0xf0]  ;;  %6212 = vmatpush.bf16.msrb.mxu3 %v9506_v39  ;;  %v6347_v37 = vmul.f32 0.5, %v6333_v5 }
 0x301   :  { %v10881_v35 = vld [vmem:[%s16570_s1 + $0x158c] sm:$0xf]  ;;  %v9919_v27 = vld [vmem:[%s16570_s1 + $0x1798] sm:$0xf0]  ;;  %6223 = vmatpush.bf16.msra.mxu0 %v9682_v17  ;;  %v9490_v11 = vor.u32 %v10837_v56, %v9487_v10  ;;  %v6297_v9 = vadd.f32 %v6296_v12, %v6295_v14  ;;  %v16359_v13 = vadd.f32 1e-05, %v6358_v2 }
 0x302   :  { %v10913_v41 = vld [vmem:[%s16570_s1 + $0x168c] sm:$0xf]  ;;  %v9666_v4 = vor.u32 %v10881_v35, %v9663_v0  ;;  %v9471_v15 = vld [vmem:[%s16570_s1 + $0x1418] sm:$0xf0] }
 0x303   :  { %v10945_v32 = vld [vmem:[%s16570_s1 + $0x178c] sm:$0xf]  ;;  %6237 = vmatpush.bf16.msra.mxu1 %v9810_v55  ;;  %v9794_v59 = vor.u32 %v10913_v41, %v9791_v25  ;;  %v9647_v49 = vld [vmem:[%s16570_s1 + $0x1578] sm:$0xf0]  ;;  %v16337_v43 = vmul.f32 0.5, %v6297_v9  ;;  %11011 = vrsqrt.f32 %v16359_v13  ;;  %vm6381_vm6 = vweird.f32 %v16359_v13 }
 0x304   :  { %v10833_v58 = vld [vmem:[%s16570_s1 + $0x140c] sm:$0xf]  ;;  %6251 = vmatpush.bf16.msra.mxu2 %v9938_v24  ;;  %v9922_v22 = vor.u32 %v10945_v32, %v9919_v27  ;;  %v9775_v62 = vld [vmem:[%s16570_s1 + $0x1678] sm:$0xf0]  ;;  %6213 = vmatpush.bf16.msrb.mxu3 %v9490_v11 }
 0x305   :  { %v10877_v33 = vld [vmem:[%s16570_s1 + $0x156c] sm:$0xf]  ;;  %v9903_v63 = vld [vmem:[%s16570_s1 + $0x1778] sm:$0xf0]  ;;  %6224 = vmatpush.bf16.msra.mxu0 %v9666_v4  ;;  %v9474_v51 = vor.u32 %v10833_v58, %v9471_v15  ;;  %v6351_v18 = vmul.f32 %v16337_v43, %v16337_v43 }
 0x306   :  { %v10909_v31 = vld [vmem:[%s16570_s1 + $0x166c] sm:$0xf]  ;;  %v10031_v40 = vld [vmem:[%s16570_s1 + $0x1878] sm:$0xf0]  ;;  %v9650_v30 = vor.u32 %v10877_v33, %v9647_v49  ;;  %v16415_v49 = vpop.eup %11009 }
 0x307   :  { %v10941_v48 = vld [vmem:[%s16570_s1 + $0x176c] sm:$0xf]  ;;  %6238 = vmatpush.bf16.msra.mxu1 %v9794_v59  ;;  %v9778_v6 = vor.u32 %v10909_v31, %v9775_v62  ;;  %v9631_v44 = vld [vmem:[%s16570_s1 + $0x1558] sm:$0xf0]  ;;  %v6355_v42 = vsub.f32 %v6347_v37, %v6351_v18  ;;  %vm6372_vm1 = vweird.f32 %v16415_v49 }
 0x308   :  { %v10973_v54 = vld [vmem:[%s16570_s1 + $0x186c] sm:$0xf]  ;;  %6252 = vmatpush.bf16.msra.mxu2 %v9922_v22  ;;  %v9906_v50 = vor.u32 %v10941_v48, %v9903_v63  ;;  %v9759_v26 = vld [vmem:[%s16570_s1 + $0x1658] sm:$0xf0]  ;;  %6214 = vmatpush.bf16.msrb.mxu3 %v9474_v51  ;;  %vm6373_vm5 = vmor %vm6371_vm3, %vm6372_vm1 }
 0x309   :  { %v10873_v3 = vld [vmem:[%s16570_s1 + $0x154c] sm:$0xf]  ;;  %v10034_v1 = vor.u32 %v10973_v54, %v10031_v40  ;;  %v9887_v57 = vld [vmem:[%s16570_s1 + $0x1758] sm:$0xf0]  ;;  %6225 = vmatpush.bf16.msra.mxu0 %v9650_v30  ;;  %v6359_v41 = vmax.f32 %v6355_v42, 0.0  ;;  %v16423_v52 = vpop.eup %11011  ;;  %v6366_v30 = vmul.f32 %v16415_v49, %v16305_v20  ;;  %v10994_v20 = vld [vmem:[%s16572_s2 + $0x90] sm:$0xff] }
 0x30a   :  { %v10905_v16 = vld [vmem:[%s16570_s1 + $0x164c] sm:$0xf]  ;;  %v10015_v60 = vld [vmem:[%s16570_s1 + $0x1858] sm:$0xf0]  ;;  %v9634_v39 = vor.u32 %v10873_v3, %v9631_v44  ;;  %v6376_v3 = vmul.f32 %v16423_v52, %v16359_v13  ;;  %v10990_v44 = vld [vmem:[%s16572_s2 + $0x70] sm:$0xff]  ;;  %vm6382_vm2 = vweird.f32 %v16423_v52 }
 0x30b   :  { %v10937_v7 = vld [vmem:[%s16570_s1 + $0x174c] sm:$0xf]  ;;  %6239 = vmatpush.bf16.msra.mxu1 %v9778_v6  ;;  %v9762_v10 = vor.u32 %v10905_v16, %v9759_v26  ;;  %v9615_v55 = vld [vmem:[%s16570_s1 + $0x1538] sm:$0xf0]  ;;  %6215 = vmatmul.bf16.vlgmr.msrb.gmra.mxu3 %v12443_v19  ;;  %v16394_v47 = vadd.f32 1e-05, %v6359_v41  ;;  %v6367_v26 = vmul.f32 %v16415_v49, %v6366_v30  ;;  %vm6383_vm7 = vmor %vm6381_vm6, %vm6382_vm2 }
 0x30c   :  { %v10969_v56 = vld [vmem:[%s16570_s1 + $0x184c] sm:$0xf]  ;;  %6253 = vmatpush.bf16.msra.mxu2 %v9906_v50  ;;  %v9890_v35 = vor.u32 %v10937_v7, %v9887_v57  ;;  %v9743_v0 = vld [vmem:[%s16570_s1 + $0x1638] sm:$0xf0]  ;;  %6267 = vmatpush.bf16.msra.mxu3 %v10034_v1  ;;  %v10982_v50 = vld [vmem:[%s16572_s2 + $0x30] sm:$0xff]  ;;  %v6377_v37 = vmul.f32 %v16423_v52, %v6376_v3  ;;  %v5964_v3 = vpop.f32.mrf.mxu1 }
 0x30d   :  { %v10869_v17 = vld [vmem:[%s16570_s1 + $0x152c] sm:$0xf]  ;;  %v10018_v25 = vor.u32 %v10969_v56, %v10015_v60  ;;  %v9871_v46 = vld [vmem:[%s16570_s1 + $0x1738] sm:$0xf0]  ;;  %6226 = vmatpush.bf16.msra.mxu0 %v9634_v39  ;;  %11013 = vrsqrt.f32 %v16394_v47  ;;  %v10998_v16 = vld [vmem:[%s16572_s2 + $0xb0] sm:$0xff]  ;;  %v6368_v60 = vmul.f32 0.5, %v6367_v26  ;;  %vm6391_vm8 = vweird.f32 %v16394_v47 }
 0x30e   :  { %v10901_v24 = vld [vmem:[%s16570_s1 + $0x162c] sm:$0xf]  ;;  %v9999_v27 = vld [vmem:[%s16570_s1 + $0x1838] sm:$0xf0]  ;;  %v9618_v58 = vor.u32 %v10869_v17, %v9615_v55  ;;  %v16652_v56 = vld [vmem:[#allocation10_spill] sm:$0xff] }
 0x30f   :  { %v10933_v14 = vld [vmem:[%s16570_s1 + $0x172c] sm:$0xf]  ;;  %6240 = vmatpush.bf16.msra.mxu1 %v9762_v10  ;;  %v9746_v12 = vor.u32 %v10901_v24, %v9743_v0  ;;  %v9599_v11 = vld [vmem:[%s16570_s1 + $0x1518] sm:$0xf0]  ;;  %v10980_v39 = vld [vmem:[%s16572_s2 + $0x20] sm:$0xff] }
 0x310   :  { %v10965_v32 = vld [vmem:[%s16570_s1 + $0x182c] sm:$0xf]  ;;  %6254 = vmatpush.bf16.msra.mxu2 %v9890_v35  ;;  %v9874_v34 = vor.u32 %v10933_v14, %v9871_v46  ;;  %6268 = vmatpush.bf16.msra.mxu3 %v10018_v25  ;;  %v9727_v33 = vld [vmem:[%s16570_s1 + $0x1618] sm:$0xf0]  ;;  %v10988_v17 = vld [vmem:[%s16572_s2 + $0x60] sm:$0xff]  ;;  %v6369_v35 = vsub.f32 1.5, %v6368_v60 }
 0x311   :  { %v10865_v19 = vld [vmem:[%s16570_s1 + $0x150c] sm:$0xf]  ;;  %v10002_v15 = vor.u32 %v10965_v32, %v9999_v27  ;;  %v9855_v22 = vld [vmem:[%s16570_s1 + $0x1718] sm:$0xf0]  ;;  %6227 = vmatpush.bf16.msra.mxu0 %v9618_v58  ;;  %v10996_v10 = vld [vmem:[%s16572_s2 + $0xa0] sm:$0xff] }
 0x312   :  { %v10897_v4 = vld [vmem:[%s16570_s1 + $0x160c] sm:$0xf]  ;;  %v9602_v31 = vor.u32 %v10865_v19, %v9599_v11  ;;  %v9983_v9 = vld [vmem:[%s16570_s1 + $0x1818] sm:$0xf0]  ;;  %v6370_v14 = vmul.f32 %v16415_v49, %v6369_v35  ;;  %v10978_v27 = vld [vmem:[%s16572_s2 + $0x10] sm:$0xff]  ;;  %v6409_v19 = vsub.f32 %v15810_v45, %v16159_v61  ;;  %v6406_v11 = vsub.f32 %v14730_v21, %v16250_v8 }
 0x313   :  { %v10929_v59 = vld [vmem:[%s16570_s1 + $0x170c] sm:$0xf]  ;;  %6241 = vmatpush.bf16.msra.mxu1 %v9746_v12  ;;  %v9730_v48 = vor.u32 %v10897_v4, %v9727_v33  ;;  %v10983_v2 = vld [vmem:[%s16572_s2 + $0x38] sm:$0xff]  ;;  %v16434_v51 = vpop.eup %11013  ;;  %v10986_v58 = vld [vmem:[%s16572_s2 + $0x50] sm:$0xff]  ;;  %v6405_v12 = vsub.f32 %v16646_v38, %v16159_v61  ;;  %v6411_v38 = vsub.f32 %v16217_v36, %v16337_v43 }
 0x314   :  { %v10961_v62 = vld [vmem:[%s16570_s1 + $0x180c] sm:$0xf]  ;;  %6255 = vmatpush.bf16.msra.mxu2 %v9874_v34  ;;  %v9858_v63 = vor.u32 %v10929_v59, %v9855_v22  ;;  %6269 = vmatpush.bf16.msra.mxu3 %v10002_v15  ;;  %v10991_v54 = vld [vmem:[%s16572_s2 + $0x78] sm:$0xff]  ;;  %v6386_v6 = vmul.f32 %v16434_v51, %v16394_v47  ;;  %vm6392_vm4 = vweird.f32 %v16434_v51  ;;  %v6374_v13 = vsel %vm6373_vm5, %v16415_v49, %v6370_v14  ;;  %v10976_v59 = vld [vmem:[%s16572_s2] sm:$0xff] }
 0x315   :  { %v10999_v40 = vld [vmem:[%s16572_s2 + $0xb8] sm:$0xff]  ;;  %v9986_v5 = vor.u32 %v10961_v62, %v9983_v9  ;;  %6228 = vmatpush.bf16.msra.mxu0 %v9602_v31  ;;  %v10981_v7 = vld [vmem:[%s16572_s2 + $0x28] sm:$0xff]  ;;  %vm6393_vm9 = vmor %vm6391_vm8, %vm6392_vm4  ;;  %v6410_v47 = vsub.f32 %v15970_v53, %v16250_v8  ;;  %v6407_v15 = vsub.f32 %v16206_v28, %v16337_v43  ;;  %v6413_v61 = vmul.f32 %v6405_v12, %v6374_v13 }
 0x316   :  { %v16651_v18 = vld [vmem:[#allocation9_spill] sm:$0xff]  ;;  %v6387_v1 = vmul.f32 %v16434_v51, %v6386_v6  ;;  %v10989_v57 = vld [vmem:[%s16572_s2 + $0x68] sm:$0xff]  ;;  %v6417_v53 = vmul.f32 %v6409_v19, %v6374_v13  ;;  %v10984_v22 = vld [vmem:[%s16572_s2 + $0x40] sm:$0xff]  ;;  %v5978_v6 = vpop.f32.mrf.mxu2 }
 0x317   :  { %6242 = vmatpush.bf16.msra.mxu1 %v9730_v48  ;;  %v10979_v0 = vld [vmem:[%s16572_s2 + $0x18] sm:$0xff]  ;;  %v10977_v45 = vld [vmem:[%s16572_s2 + $0x8] sm:$0xff]  ;;  %v6421_v49 = vmax.f32 %v6413_v61, 0.0 }
 0x318   :  { %6256 = vmatpush.bf16.msra.mxu2 %v9858_v63  ;;  %6270 = vmatpush.bf16.msra.mxu3 %v9986_v5  ;;  %v6388_v42 = vmul.f32 0.5, %v6387_v1  ;;  %v10987_v41 = vld [vmem:[%s16572_s2 + $0x58] sm:$0xff]  ;;  %v10985_v21 = vld [vmem:[%s16572_s2 + $0x48] sm:$0xff]  ;;  %v6425_v31 = vmax.f32 %v6417_v53, 0.0 }
 0x319   :  { %6693 = vmatpush.bf16.msrb.mxu0 %v10983_v2  ;;  %v10995_v25 = vld [vmem:[%s16572_s2 + $0x98] sm:$0xff]  ;;  %v10993_v28 = vld [vmem:[%s16572_s2 + $0x88] sm:$0xff]  ;;  %v5936_v2 = vpop.f32.mrf.mxu3 }
 0x31a   :  { %6229 = vmatmul.bf16.vlgmr.msra.gmra.mxu0 %v16651_v18  ;;  %6243 = vmatmul.bf16.vlgmr.msra.gmra.mxu1 %v12454_v23  ;;  %v10997_v23 = vld [vmem:[%s16572_s2 + $0xa8] sm:$0xff]  ;;  %v6389_v24 = vsub.f32 1.5, %v6388_v42 }
 0x31b   :  { %6707 = vmatpush.bf16.msrb.mxu1 %v10991_v54  ;;  %6257 = vmatmul.bf16.vlgmr.msra.gmra.mxu2 %v12466_v29  ;;  %v6378_v29 = vmul.f32 0.5, %v6377_v37  ;;  %v6429_v54 = vpack.c.bf16 %v6425_v31, %v6421_v49 }
 0x31c   :  { %6721 = vmatpush.bf16.msrb.mxu2 %v10999_v40  ;;  %10038 = vmatmul.msk.bf16.vlgmr.msra.gmra.mxu3 %vm4873_vm0, %v16652_v56  ;;  %v6390_v32 = vmul.f32 %v16434_v51, %v6389_v24 }
 0x31d   :  { %6694 = vmatpush.bf16.msrb.mxu0 %v10982_v50  ;;  %v6379_v55 = vsub.f32 1.5, %v6378_v29 }
 0x31e   :  { %v6394_v4 = vsel %vm6393_vm9, %v16434_v51, %v6390_v32  ;;  %v5950_v51 = vpop.f32.mrf.mxu0  ;;  %v5980_v26 = vpop.f32.mrf.mxu2 }
 0x31f   :  { %6708 = vmatpush.bf16.msrb.mxu1 %v10990_v44  ;;  %v6380_v46 = vmul.f32 %v16423_v52, %v6379_v55  ;;  %v6415_v36 = vmul.f32 %v6407_v15, %v6394_v4  ;;  %v6419_v43 = vmul.f32 %v6411_v38, %v6394_v4  ;;  %v5966_v44 = vpop.f32.mrf.mxu1 }
 0x320   :  { %6722 = vmatpush.bf16.msrb.mxu2 %v10998_v16 }
 0x321   :  { %6695 = vmatpush.bf16.msrb.mxu0 %v10981_v7  ;;  %v6384_v34 = vsel %vm6383_vm7, %v16423_v52, %v6380_v46  ;;  %v10992_v52 = vld [vmem:[%s16572_s2 + $0x80] sm:$0xff]  ;;  %v6423_v48 = vmax.f32 %v6415_v36, 0.0  ;;  %v6427_v63 = vmax.f32 %v6419_v43, 0.0  ;;  %v5938_v30 = vpop.f32.mrf.mxu3 }
 0x322   :  { %v6414_v8 = vmul.f32 %v6406_v11, %v6384_v34  ;;  %v6418_v33 = vmul.f32 %v6410_v47, %v6384_v34 }
 0x323   :  { %6709 = vmatpush.bf16.msrb.mxu1 %v10989_v57  ;;  %v6431_v5 = vpack.c.bf16 %v6427_v63, %v6423_v48 }
 0x324   :  { %6723 = vmatpush.bf16.msrb.mxu2 %v10997_v23  ;;  %v6422_v62 = vmax.f32 %v6414_v8, 0.0  ;;  %v6426_v9 = vmax.f32 %v6418_v33, 0.0 }
 0x325   :  { %6696 = vmatpush.bf16.msrb.mxu0 %v10980_v39 }
 0x326   :  { %v6430_v40 = vpack.c.bf16 %v6426_v9, %v6422_v62  ;;  %v5952_v50 = vpop.f32.mrf.mxu0  ;;  %v6034_v7 = vpop.f32.mrf.mxu2 }
 0x327   :  { %6710 = vmatpush.bf16.msrb.mxu1 %v10988_v17  ;;  %v6020_v1 = vpop.f32.mrf.mxu1  ;;  %v5951_v17 = vadd.f32 %v5950_v51, %v5936_v2 }
 0x328   :  { %6724 = vmatpush.bf16.msrb.mxu2 %v10996_v10 }
 0x329   :  { %6697 = vmatpush.bf16.msrb.mxu0 %v10979_v0  ;;  %v5992_v16 = vpop.f32.mrf.mxu3  ;;  %v5965_v35 = vadd.f32 %v5964_v3, %v5951_v17 }
 0x32b   :  { %6711 = vmatpush.bf16.msrb.mxu1 %v10987_v41  ;;  %v5979_v0 = vadd.f32 %v5978_v6, %v5965_v35  ;;  %v5953_v41 = vadd.f32 %v5952_v50, %v5938_v30 }
 0x32c   :  { %6725 = vmatpush.bf16.msrb.mxu2 %v10995_v25 }
 0x32d   :  { %6698 = vmatpush.bf16.msrb.mxu0 %v10978_v27  ;;  %v5967_v14 = vadd.f32 %v5966_v44, %v5953_v41  ;;  %v5993_v46 = vadd.f32 %v5992_v16, %v5979_v0 }
 0x32e   :  { %v6006_v37 = vpop.f32.mrf.mxu0  ;;  %v6036_v60 = vpop.f32.mrf.mxu2 }
 0x32f   :  { %6712 = vmatpush.bf16.msrb.mxu1 %v10986_v58  ;;  %v6022_v23 = vpop.f32.mrf.mxu1  ;;  %v5981_v58 = vadd.f32 %v5980_v26, %v5967_v14 }
 0x330   :  { %6726 = vmatpush.bf16.msrb.mxu2 %v10994_v20  ;;  %v6007_v20 = vadd.f32 %v6006_v37, %v5993_v46  ;;  %v11005_v46 = vld [vmem:[%s16572_s2 + $0xe8] sm:$0xff] }
 0x331   :  { %6699 = vmatpush.bf16.msrb.mxu0 %v10977_v45  ;;  %v5994_v18 = vpop.f32.mrf.mxu3 }
 0x332   :  { %v5995_v34 = vadd.f32 %v5994_v18, %v5981_v58  ;;  %v6021_v19 = vadd.f32 %v6020_v1, %v6007_v20 }
 0x333   :  { %6713 = vmatpush.bf16.msrb.mxu1 %v10985_v21 }
 0x334   :  { %6727 = vmatpush.bf16.msrb.mxu2 %v10993_v28  ;;  %v6035_v4 = vadd.f32 %v6034_v7, %v6021_v19 }
 0x335   :  { %6700 = vmatpush.bf16.msrb.mxu0 %v10976_v59 }
 0x336   :  { %v6008_v57 = vpop.f32.mrf.mxu0 }
 0x337   :  { %6714 = vmatpush.bf16.msrb.mxu1 %v10984_v22  ;;  %v6009_v11 = vadd.f32 %v6008_v57, %v5995_v34 }
 0x338   :  { %6728 = vmatpush.bf16.msrb.mxu2 %v10992_v52  ;;  %6701 = vmatmul.bf16.vlgmr.msrb.gmra.mxu0 %v6429_v54 }
 0x339   :  { %v6048_v56 = vpop.f32.mrf.mxu3  ;;  %v6023_v15 = vadd.f32 %v6022_v23, %v6009_v11 }
 0x33a   :  { %6715 = vmatmul.bf16.vlgmr.msrb.gmra.mxu1 %v6430_v40  ;;  %v6049_v38 = vadd.f32 %v6048_v56, %v6035_v4 }
 0x33b   :  { %6729 = vmatmul.bf16.vlgmr.msrb.gmra.mxu2 %v6431_v5  ;;  %v6076_v39 = vpop.f32.mrf.mxu1  ;;  %v6037_v61 = vadd.f32 %v6036_v60, %v6023_v15  ;;  %v11003_v15 = vld [vmem:[%s16572_s2 + $0xd8] sm:$0xff] }
 0x33d   :  { %v6090_v10 = vpop.f32.mrf.mxu2 }
 0x33e   :  { %v6062_v29 = vpop.f32.mrf.mxu0 }
 0x33f   :  { %v6063_v53 = vadd.f32 %v6062_v29, %v6049_v38 }
 0x341   :  { %v6050_v42 = vpop.f32.mrf.mxu3  ;;  %v6077_v28 = vadd.f32 %v6076_v39, %v6063_v53  ;;  %v11002_v53 = vld [vmem:[%s16572_s2 + $0xd0] sm:$0xff] }
 0x342   :  { %v6051_v33 = vadd.f32 %v6050_v42, %v6037_v61  ;;  %v11007_v42 = vld [vmem:[%s16572_s2 + $0xf8] sm:$0xff] }
 0x343   :  { %v6078_v25 = vpop.f32.mrf.mxu1  ;;  %v6091_v59 = vadd.f32 %v6090_v10, %v6077_v28  ;;  %6735 = vmatpush.bf16.msrb.mxu3 %v11007_v42 }
 0x345   :  { %v6092_v32 = vpop.f32.mrf.mxu2 }
 0x346   :  { %v6064_v55 = vpop.f32.mrf.mxu0 }
 0x347   :  { %v6065_v36 = vadd.f32 %v6064_v55, %v6051_v33 }
 0x349   :  { %v6079_v49 = vadd.f32 %v6078_v25, %v6065_v36 }
 0x34b   :  { %v6093_v52 = vadd.f32 %v6092_v32, %v6079_v49 }
 0x351   :  { %v6104_v24 = vpop.f32.mrf.mxu3 }
 0x352   :  { %v6105_v31 = vadd.f32 %v6104_v24, %v6091_v59  ;;  %v11006_v24 = vld [vmem:[%s16572_s2 + $0xf0] sm:$0xff] }
 0x353   :  { %6736 = vmatpush.bf16.msrb.mxu3 %v11006_v24 }
 0x357   :  { %v6132_v12 = vpop.f32.mrf.mxu1  ;;  %6737 = vmatpush.bf16.msrb.mxu3 %v11005_v46 }
 0x359   :  { %v6106_v13 = vpop.f32.mrf.mxu3 }
 0x35a   :  { %v6107_v63 = vadd.f32 %v6106_v13, %v6093_v52 }
 0x35c   :  { %v6118_v27 = vpop.f32.mrf.mxu0 }
 0x35d   :  { %v6146_v47 = vpop.f32.mrf.mxu2  ;;  %v6119_v48 = vadd.f32 %v6118_v27, %v6105_v31 }
 0x35f   :  { %v6134_v8 = vpop.f32.mrf.mxu1  ;;  %v6133_v54 = vadd.f32 %v6132_v12, %v6119_v48  ;;  %v11004_v12 = vld [vmem:[%s16572_s2 + $0xe0] sm:$0xff] }
 0x360   :  { %6738 = vmatpush.bf16.msrb.mxu3 %v11004_v12 }
 0x361   :  { %v6147_v5 = vadd.f32 %v6146_v47, %v6133_v54 }
 0x364   :  { %v6120_v45 = vpop.f32.mrf.mxu0  ;;  %6739 = vmatpush.bf16.msrb.mxu3 %v11003_v15 }
 0x365   :  { %v6148_v43 = vpop.f32.mrf.mxu2  ;;  %v6121_v40 = vadd.f32 %v6120_v45, %v6107_v63 }
 0x367   :  { %v6135_v3 = vadd.f32 %v6134_v8, %v6121_v40 }
 0x368   :  { %6740 = vmatpush.bf16.msrb.mxu3 %v11002_v53 }
 0x369   :  { %v6149_v44 = vadd.f32 %v6148_v43, %v6135_v3  ;;  %v11001_v43 = vld [vmem:[%s16572_s2 + $0xc8] sm:$0xff] }
 0x36c   :  { %6741 = vmatpush.bf16.msrb.mxu3 %v11001_v43 }
 0x36e   :  { %v6160_v21 = vpop.f32.mrf.mxu3 }
 0x36f   :  { %v6161_v6 = vadd.f32 %v6160_v21, %v6147_v5 }
 0x376   :  { %v6162_v62 = vpop.f32.mrf.mxu3 }
 0x377   :  { %v6174_v22 = vpop.f32.mrf.mxu0  ;;  %v6188_v9 = vpop.f32.mrf.mxu1  ;;  %v6163_v26 = vadd.f32 %v6162_v62, %v6149_v44  ;;  %v11000_v62 = vld [vmem:[%s16572_s2 + $0xc0] sm:$0xff] }
 0x378   :  { %v6175_v16 = vadd.f32 %v6174_v22, %v6161_v6  ;;  %6742 = vmatpush.bf16.msrb.mxu3 %v11000_v62 }
 0x37a   :  { %v6189_v18 = vadd.f32 %v6188_v9, %v6175_v16 }
 0x37e   :  { %v6202_v2 = vpop.f32.mrf.mxu2 }
 0x37f   :  { %v6176_v51 = vpop.f32.mrf.mxu0  ;;  %v6190_v50 = vpop.f32.mrf.mxu1  ;;  %v6203_v56 = vadd.f32 %v6202_v2, %v6189_v18 }
 0x380   :  { %v6177_v1 = vadd.f32 %v6176_v51, %v6163_v26 }
 0x382   :  { %v6191_v60 = vadd.f32 %v6190_v50, %v6177_v1 }
 0x386   :  { %v6204_v37 = vpop.f32.mrf.mxu2 }
 0x387   :  { %v6205_v39 = vadd.f32 %v6204_v37, %v6191_v60 }
 0x38e   :  { %v6216_v30 = vpop.f32.mrf.mxu3 }
 0x38f   :  { %v6217_v29 = vadd.f32 %v6216_v30, %v6203_v56 }
 0x396   :  { %v6218_v57 = vpop.f32.mrf.mxu3 }
 0x397   :  { %v6230_v7 = vpop.f32.mrf.mxu0  ;;  %v6244_v23 = vpop.f32.mrf.mxu1  ;;  %v6219_v35 = vadd.f32 %v6218_v57, %v6205_v39 }
 0x398   :  { %v6231_v17 = vadd.f32 %v6230_v7, %v6217_v29 }
 0x39a   :  { %v6245_v41 = vadd.f32 %v6244_v23, %v6231_v17  ;;  %v11008_v23 = vld [vmem:[%s16573_s3] ss:$0 sm:$0xff] }
 0x39e   :  { %v6258_v10 = vpop.f32.mrf.mxu2 }
 0x39f   :  { %v6232_v55 = vpop.f32.mrf.mxu0  ;;  %v6272_v0 = vpop.f32.mrf.mxu3  ;;  %v6259_v14 = vadd.f32 %v6258_v10, %v6245_v41 }
 0x3a0   :  { %v6233_v25 = vadd.f32 %v6232_v55, %v6219_v35  ;;  %v6246_v32 = vpop.f32.mrf.mxu1 }
 0x3a1   :  { %v6273_v20 = vadd.f32 %v6272_v0, %v6259_v14 }
 0x3a2   :  { %v6247_v27 = vadd.f32 %v6246_v32, %v6233_v25 }
 0x3a3   :  { %v6308_v11 = vmul.f32 %v6273_v20, %v6273_v20 }
 0x3a6   :  { %v6260_v58 = vpop.f32.mrf.mxu2 }
 0x3a7   :  { %v6261_v13 = vadd.f32 %v6260_v58, %v6247_v27  ;;  %v6274_v34 = vpop.f32.mrf.mxu3 }
 0x3a9   :  { %v6275_v19 = vadd.f32 %v6274_v34, %v6261_v13 }
 0x3ab   :  { %v6298_v47 = vadd.f32 %v6275_v19, %v6273_v20  ;;  %v6312_v4 = vmul.f32 %v6275_v19, %v6275_v19 }
 0x3ad   :  { %v6299_v38 = vrot.slane %v6298_v47, 4  ;;  %v6334_v45 = vadd.f32 %v6312_v4, %v6308_v11 }
 0x3af   :  { %v6300_v21 = vadd.f32 %v6299_v38, %v6298_v47  ;;  %v6335_v61 = vrot.slane %v6334_v45, 4 }
 0x3b1   :  { %v6301_v8 = vrot.slane %v6300_v21, 2  ;;  %v6336_v33 = vadd.f32 %v6335_v61, %v6334_v45 }
 0x3b3   :  { %v6302_v28 = vadd.f32 %v6301_v8, %v6300_v21  ;;  %v6337_v36 = vrot.slane %v6336_v33, 2 }
 0x3b5   :  { %v6303_v59 = vrot.slane %v6302_v28, 1  ;;  %v6338_v22 = vadd.f32 %v6337_v36, %v6336_v33  ;;  %v6702_v56 = vpop.f32.mrf.mxu0 }
 0x3b6   :  { %v6703_v60 = vadd.f32 %v11008_v23, %v6702_v56 }
 0x3b7   :  { %v6304_v49 = vadd.f32 %v6303_v59, %v6302_v28  ;;  %v6339_v31 = vrot.slane %v6338_v22, 1  ;;  %v6716_v29 = vpop.f32.mrf.mxu1 }
 0x3b8   :  { %v6717_v39 = vadd.f32 %v6716_v29, %v6703_v60 }
 0x3b9   :  { %v6340_v9 = vadd.f32 %v6339_v31, %v6338_v22  ;;  %v6344_v52 = vmul.f32 0.5, %v6304_v49 }
 0x3bb   :  { %v6348_v48 = vmul.f32 0.5, %v6340_v9  ;;  %v6352_v63 = vmul.f32 %v6344_v52, %v6344_v52  ;;  %v6408_v44 = vsub.f32 %v6273_v20, %v6344_v52  ;;  %v6412_v16 = vsub.f32 %v6275_v19, %v6344_v52 }
 0x3bd   :  { %v6356_v2 = vsub.f32 %v6348_v48, %v6352_v63  ;;  %v6704_v17 = vpop.f32.mrf.mxu0 }
 0x3be   :  { %v6730_v42 = vpop.f32.mrf.mxu2  ;;  %v6705_v55 = vadd.f32 %v11008_v23, %v6704_v17 }
 0x3bf   :  { %v6360_v54 = vmax.f32 %v6356_v2, 0.0  ;;  %v6731_v10 = vadd.f32 %v6730_v42, %v6717_v39  ;;  %v6718_v0 = vpop.f32.mrf.mxu1 }
 0x3c0   :  { %v6719_v25 = vadd.f32 %v6718_v0, %v6705_v55 }
 0x3c1   :  { %v6364_v40 = vadd.f32 1e-05, %v6360_v54 }
 0x3c3   :  { %11015 = vrsqrt.f32 %v6364_v40  ;;  %vm6401_vm11 = vweird.f32 %v6364_v40 }
 0x3c6   :  { %v6732_v41 = vpop.f32.mrf.mxu2 }
 0x3c7   :  { %v6733_v14 = vadd.f32 %v6732_v41, %v6719_v25 }
 0x3c9   :  { %v11016_v5 = vpop.eup %11015 }
 0x3ca   :  { %v6396_v51 = vmul.f32 %v11016_v5, %v6364_v40  ;;  %vm6402_vm10 = vweird.f32 %v11016_v5 }
 0x3cb   :  { %vm6403_vm12 = vmor %vm6401_vm11, %vm6402_vm10 }
 0x3cc   :  { %v6397_v30 = vmul.f32 %v11016_v5, %v6396_v51 }
 0x3ce   :  { %v6398_v3 = vmul.f32 0.5, %v6397_v30 }
 0x3d0   :  { %v6399_v6 = vsub.f32 1.5, %v6398_v3 }
 0x3d2   :  { %v6400_v50 = vmul.f32 %v11016_v5, %v6399_v6 }
 0x3d4   :  { %v6404_v26 = vsel %vm6403_vm12, %v11016_v5, %v6400_v50 }
 0x3d5   :  { %v6416_v37 = vmul.f32 %v6408_v44, %v6404_v26  ;;  %v6420_v18 = vmul.f32 %v6412_v16, %v6404_v26 }
 0x3d7   :  { %v6424_v1 = vmax.f32 %v6416_v37, 0.0  ;;  %v6428_v7 = vmax.f32 %v6420_v18, 0.0 }
 0x3d9   :  { %v6432_v57 = vpack.c.bf16 %v6428_v7, %v6424_v1 }
 0x3db   :  { %6743 = vmatmul.bf16.vlgmr.msrb.gmra.mxu3 %v6432_v57 }
 0x45e   :  { %v6744_v35 = vpop.f32.mrf.mxu3 }
 0x45f   :  { %v6745_v24 = vadd.f32 %v6744_v35, %v6731_v10 }
 0x461   :  { %6749 = vmax.xlane.f32.xlu0 %v6745_v24 }
 0x466   :  { %v6746_v46 = vpop.f32.mrf.mxu3 }
 0x467   :  { %v6747_v32 = vadd.f32 %v6746_v46, %v6733_v14 }
 0x469   :  { %6751 = vmax.xlane.f32.xlu0 %v6747_v32 }
 0x4d4   :  { %v6750_v27 = vpop.xlane.xlu0 %6749 }
 0x4d5   :  { %v6753_v58 = vsub.f32 %v6745_v24, %v6750_v27 }
 0x4d7   :  { %v6755_v20 = vmul.f32 1.442695, %v6753_v58 }
 0x4d9   :  { %11017 = vpow2.f32 %v6755_v20 }
 0x4dc   :  { %v6752_v13 = vpop.xlane.xlu0 %6751 }
 0x4dd   :  { %v6754_v12 = vsub.f32 %v6747_v32, %v6752_v13 }
 0x4df   :  { %v11018_v34 = vpop.eup %11017  ;;  %v6757_v19 = vmul.f32 1.442695, %v6754_v12 }
 0x4e0   :  { %6759 = vadd.xlane.f32.xlu1 %v11018_v34 }
 0x4e1   :  { %11019 = vpow2.f32 %v6757_v19 }
 0x4e7   :  { %v11020_v11 = vpop.eup %11019 }
 0x4e8   :  { %6761 = vadd.xlane.f32.xlu1 %v11020_v11 }
 0x553   :  { %v6760_v47 = vpop.xlane.xlu1 %6759 }
 0x554   :  { %11021 = vrcp.f32 %v6760_v47  ;;  %v6774_v21 = vand.u32 2147483648, %v6760_v47  ;;  %v6772_v53 = vand.u32 2147483647, %v6760_v47  ;;  %vm6768_vm14 = vweird.f32 %v6760_v47 }
 0x556   :  { %v6775_v28 = vor.u32 1.1754944e-38, %v6774_v21  ;;  %vm6773_vm0 = vcmp.eq.f32.partialorder %v6772_v53, 8.507059e+37 }
 0x55a   :  { %v11022_v4 = vpop.eup %11021 }
 0x55b   :  { %v6764_v15 = vmul.f32 %v11022_v4, %v6760_v47  ;;  %v6762_v38 = vpop.xlane.xlu1 %6761  ;;  %vm6769_vm13 = vweird.f32 %v11022_v4 }
 0x55c   :  { %11023 = vrcp.f32 %v6762_v38  ;;  %vm6770_vm15 = vmor %vm6768_vm14, %vm6769_vm13  ;;  %v6789_v31 = vand.u32 2147483648, %v6762_v38  ;;  %v6787_v9 = vand.u32 2147483647, %v6762_v38  ;;  %vm6783_vm2 = vweird.f32 %v6762_v38 }
 0x55d   :  { %v6765_v45 = vsub.f32 1.0, %v6764_v15 }
 0x55e   :  { %v6790_v48 = vor.u32 1.1754944e-38, %v6789_v31  ;;  %vm6788_vm4 = vcmp.eq.f32.partialorder %v6787_v9, 8.507059e+37 }
 0x55f   :  { %v6766_v61 = vmul.f32 %v11022_v4, %v6765_v45 }
 0x561   :  { %v6767_v8 = vadd.f32 %v11022_v4, %v6766_v61 }
 0x562   :  { %v11024_v33 = vpop.eup %11023 }
 0x563   :  { %v6771_v36 = vsel %vm6770_vm15, %v11022_v4, %v6767_v8  ;;  %v6779_v43 = vmul.f32 %v11024_v33, %v6762_v38  ;;  %vm6784_vm1 = vweird.f32 %v11024_v33 }
 0x564   :  { %v6776_v59 = vsel %vm6773_vm0, %v6775_v28, %v6771_v36  ;;  %vm6785_vm3 = vmor %vm6783_vm2, %vm6784_vm1 }
 0x565   :  { %v6777_v22 = vmul.f32 %v11018_v34, %v6776_v59  ;;  %v6780_v49 = vsub.f32 1.0, %v6779_v43 }
 0x567   :  { %6793 = vst [vmem:[%s16574_s4] sm:$0xff] %v6777_v22  ;;  %v6781_v62 = vmul.f32 %v11024_v33, %v6780_v49 }
 0x569   :  { %v6782_v52 = vadd.f32 %v11024_v33, %v6781_v62 }
 0x56b   :  { %v6786_v63 = vsel %vm6785_vm3, %v11024_v33, %v6782_v52 }
 0x56c   :  { %v6791_v2 = vsel %vm6788_vm4, %v6790_v48, %v6786_v63 }
 0x56d   :  { %v6792_v54 = vmul.f32 %v11020_v11, %v6791_v2 }
 0x56f   :  { %6794 = vst [vmem:[%s16574_s4 + $0x8] sm:$0xff] %v6792_v54 }

</bundles_post_ra>
